<compile_context>
chip_gen: v7x
topology: tpu7x:2x2x1
jax: 0.10.0
libtpu: 0.0.40
codegen_flags: <defaults>
</compile_context>

<pallas_src>
import functools

import jax
import jax.numpy as jnp
from jax import lax
from jax.experimental import pallas as pl
from jax.experimental.pallas import tpu as pltpu

# Fixed DQLearnModel hyper-parameters.
_C1_OUT, _C2_OUT, _C3_OUT, _HID = 32, 64, 64, 512
_K1, _S1 = 8, 4
_K2, _S2 = 4, 2
_K3, _S3 = 3, 1


def _out_hw(i, k, s):
    return (i - k) // s + 1


def _block_batch(n, cap):
    """Largest divisor of n that is <= cap (batch block size per grid step)."""
    b = max(1, min(n, cap))
    while n % b:
        b -= 1
    return b


# ----------------------------------------------------------------------------
# Kernel 1: conv1 as one implicit-GEMM dot per grid step (batch block).
# LHS (nb*OH*OW, KH*KW*C) is built in VMEM from contiguous window slices of the
# W-phase-folded input; single bf16 MXU dot with fp32 accumulation.
# ----------------------------------------------------------------------------
def _conv1_kernel(x_ref, w_ref, b_ref, o_ref, *, nb, ksz, kws, stride, oh_sz, ow_sz):
    rows = []
    for n in range(nb):                               # static unroll
        for oh in range(oh_sz):
            pieces = []
            for kh in range(ksz):
                for pw in range(kws):
                    # (OW, stride*C) contiguous slice of the folded input row
                    pieces.append(x_ref[n, oh * stride + kh, pw:pw + ow_sz, :])
            rows.append(jnp.concatenate(pieces, axis=-1))      # (OW, KH*KW*C)
    lhs = jnp.concatenate(rows, axis=0).astype(jnp.bfloat16)   # (nb*OH*OW, K)
    acc = jnp.dot(lhs, w_ref[...], preferred_element_type=jnp.float32)
    acc = jnp.maximum(acc + b_ref[...], 0.0)                   # fp32 epilogue
    # Store stays O(=32)-lane wide: relayouting to a 128-lane-dense row would
    # cost more XLU work than the masked store saves at this size.
    o_ref[...] = acc.astype(o_ref.dtype)


def conv1_pallas(x_nhwc, w_blk, b_row, *, ksize, stride, block_n):
    N, H, W, C = x_nhwc.shape
    assert ksize % stride == 0
    OH, OW = _out_hw(H, ksize, stride), _out_hw(W, ksize, stride)
    O = w_blk.shape[-1]
    # Free row-major reshape: fold the W stride-phase into lanes so every
    # (kh, w-phase) window read in the kernel is a contiguous (OW, s*C) slice.
    Wp = -(-W // stride) * stride
    if Wp != W:
        x_nhwc = jnp.pad(x_nhwc, ((0, 0), (0, 0), (0, Wp - W), (0, 0)))
    xr = x_nhwc.reshape(N, H, Wp // stride, stride * C)

    nb = block_n
    kern = functools.partial(_conv1_kernel, nb=nb, ksz=ksize, kws=ksize // stride,
                             stride=stride, oh_sz=OH, ow_sz=OW)
    out = pl.pallas_call(
        kern,
        out_shape=jax.ShapeDtypeStruct((N * OH * OW, O), jnp.float32),
        grid=(N // nb,),
        in_specs=[
            pl.BlockSpec((nb, H, Wp // stride, stride * C), lambda i: (i, 0, 0, 0)),
            pl.BlockSpec(w_blk.shape, lambda i: (0, 0)),
            pl.BlockSpec((1, O), lambda i: (0, 0)),
        ],
        out_specs=pl.BlockSpec((nb * OH * OW, O), lambda i: (i, 0)),
        compiler_params=pltpu.CompilerParams(dimension_semantics=("parallel",)),
    )(xr, w_blk, b_row)
    return out.reshape(N, OH, OW, O)                  # free row-major reshape


# ----------------------------------------------------------------------------
# Kernel 2: conv2 + conv3 + fc1(+ReLU) + fc2 fused in one pallas_call.
# conv2/conv3 are implicit GEMMs whose activations never leave VMEM; the
# conv3 -> fc1 flatten is a lane-concat (NCHW permutation baked into wfc1).
# ----------------------------------------------------------------------------
def _head_kernel(x_ref, w2_ref, b2_ref, w3_ref, b3_ref, wf1_ref, bf1_ref,
                 wf2_ref, bf2_ref, o_ref, *, nb, k2, s2, oh2, ow2, k3, oh3, ow3):
    # ---- conv2: one bf16 dot, fp32 accumulation ----------------------------
    rows = []
    for n in range(nb):
        for oh in range(oh2):
            pieces = []
            for kh in range(k2):
                for pw in range(k2 // s2):
                    pieces.append(x_ref[n, oh * s2 + kh, pw:pw + ow2, :])
            rows.append(jnp.concatenate(pieces, axis=-1))
    lhs2 = jnp.concatenate(rows, axis=0).astype(jnp.bfloat16)   # (nb*oh2*ow2, 512)
    a2 = jnp.dot(lhs2, w2_ref[...], preferred_element_type=jnp.float32)
    a2 = jnp.maximum(a2 + b2_ref[...], 0.0)                     # (nb*oh2*ow2, 64)

    # ---- conv3: windows gathered from a2 rows (stays in VMEM) --------------
    rows = []
    for p in range(oh3 * ow3):                 # pixel-major so the fc1 flatten
        r0, c0 = divmod(p, ow3)                # below is a pure lane-concat
        for n in range(nb):
            pieces = []
            for kh in range(k3):
                for kw in range(k3):
                    r = (n * oh2 + r0 + kh) * ow2 + (c0 + kw)
                    pieces.append(a2[r:r + 1, :])
            rows.append(jnp.concatenate(pieces, axis=-1))       # (1, 576)
    lhs3 = jnp.concatenate(rows, axis=0).astype(jnp.bfloat16)   # (P3*nb, 576)
    a3 = jnp.dot(lhs3, w3_ref[...], preferred_element_type=jnp.float32)
    a3 = jnp.maximum(a3 + b3_ref[...], 0.0)                     # (P3*nb, 64)

    # ---- fc1(+ReLU) + fc2 ---------------------------------------------------
    p3 = oh3 * ow3
    feat = jnp.concatenate([a3[p * nb:(p + 1) * nb, :] for p in range(p3)],
                           axis=-1).astype(jnp.bfloat16)        # (nb, P3*64)
    h = jnp.dot(feat, wf1_ref[...], preferred_element_type=jnp.float32)
    h = jnp.maximum(h + bf1_ref[...], 0.0).astype(jnp.bfloat16)  # (nb, 512)
    q = jnp.dot(h, wf2_ref[...], preferred_element_type=jnp.float32) + bf2_ref[...]
    o_ref[0] = q.astype(o_ref.dtype)


def head_pallas(a1, w2, b2, w3, b3, wf1, bf1, wf2, bf2, *, block_n):
    # a1: (N, H1, W1, C1) fp32 conv1 activations (NHWC).
    N, H1, W1, C1 = a1.shape
    OH2, OW2 = _out_hw(H1, _K2, _S2), _out_hw(W1, _K2, _S2)
    OH3, OW3 = _out_hw(OH2, _K3, _S3), _out_hw(OW2, _K3, _S3)
    A = wf2.shape[-1]
    W1p = -(-W1 // _S2) * _S2
    if W1p != W1:
        a1 = jnp.pad(a1, ((0, 0), (0, 0), (0, W1p - W1), (0, 0)))
    a1f = a1.reshape(N, H1, W1p // _S2, _S2 * C1)     # free W-phase fold for conv2

    nb = block_n
    kern = functools.partial(_head_kernel, nb=nb, k2=_K2, s2=_S2, oh2=OH2, ow2=OW2,
                             k3=_K3, oh3=OH3, ow3=OW3)
    out = pl.pallas_call(
        kern,
        out_shape=jax.ShapeDtypeStruct((N // nb, nb, A), jnp.float32),
        grid=(N // nb,),
        in_specs=[
            pl.BlockSpec((nb, H1, W1p // _S2, _S2 * C1), lambda i: (i, 0, 0, 0)),
            pl.BlockSpec(w2.shape, lambda i: (0, 0)),
            pl.BlockSpec(b2.shape, lambda i: (0, 0)),
            pl.BlockSpec(w3.shape, lambda i: (0, 0)),
            pl.BlockSpec(b3.shape, lambda i: (0, 0)),
            pl.BlockSpec(wf1.shape, lambda i: (0, 0)),
            pl.BlockSpec(bf1.shape, lambda i: (0, 0)),
            pl.BlockSpec(wf2.shape, lambda i: (0, 0)),
            pl.BlockSpec(bf2.shape, lambda i: (0, 0)),
        ],
        out_specs=pl.BlockSpec((1, nb, A), lambda i: (i, 0, 0)),
        compiler_params=pltpu.CompilerParams(dimension_semantics=("parallel",)),
    )(a1f, w2, b2, w3, b3, wf1, bf1, wf2, bf2)
    return out.reshape(N, A)


# ----------------------------------------------------------------------------
# Parameters: raw PyTorch layout + one-time re-layout / bf16 cast.
# ----------------------------------------------------------------------------
def init_params(key, ip_sz, tot_num_acts):
    """Raw parameters in PyTorch layout (Conv2d OIHW, Linear (out, in))."""
    C, H, W = ip_sz
    h1, w1 = _out_hw(H, _K1, _S1), _out_hw(W, _K1, _S1)
    h2, w2 = _out_hw(h1, _K2, _S2), _out_hw(w1, _K2, _S2)
    h3, w3 = _out_hw(h2, _K3, _S3), _out_hw(w2, _K3, _S3)
    feat = _C3_OUT * h3 * w3
    ks = jax.random.split(key, 10)
    s = 0.05
    return {
        "w1": jax.random.normal(ks[0], (_C1_OUT, C, _K1, _K1), jnp.float32) * s,
        "b1": jax.random.normal(ks[1], (_C1_OUT,), jnp.float32) * s,
        "w2": jax.random.normal(ks[2], (_C2_OUT, _C1_OUT, _K2, _K2), jnp.float32) * s,
        "b2": jax.random.normal(ks[3], (_C2_OUT,), jnp.float32) * s,
        "w3": jax.random.normal(ks[4], (_C3_OUT, _C2_OUT, _K3, _K3), jnp.float32) * s,
        "b3": jax.random.normal(ks[5], (_C3_OUT,), jnp.float32) * s,
        "wfc1": jax.random.normal(ks[6], (_HID, feat), jnp.float32) * s,
        "bfc1": jax.random.normal(ks[7], (_HID,), jnp.float32) * s,
        "wfc2": jax.random.normal(ks[8], (tot_num_acts, _HID), jnp.float32) * s,
        "bfc2": jax.random.normal(ks[9], (tot_num_acts,), jnp.float32) * s,
    }


def prepare_params(p, ip_sz):
    """One-time weight re-layout + bf16 cast (hoisted out of the hot path)."""
    C, H, W = ip_sz
    h1, w1 = _out_hw(H, _K1, _S1), _out_hw(W, _K1, _S1)
    h2, w2 = _out_hw(h1, _K2, _S2), _out_hw(w1, _K2, _S2)
    h3, w3 = _out_hw(h2, _K3, _S3), _out_hw(w2, _K3, _S3)

    def conv_w(w_oihw):
        # OIHW -> (KH*KW*Cin, O): row order (kh, kw, cin) matches the in-kernel
        # (kh, w-phase) lane-concat that builds the implicit-GEMM LHS.
        O, Cin, KH, KW = w_oihw.shape
        return (jnp.transpose(w_oihw, (2, 3, 1, 0))
                .reshape(KH * KW * Cin, O).astype(jnp.bfloat16))

    feat = _C3_OUT * h3 * w3
    assert p["wfc1"].shape[1] == feat
    # Fold PyTorch's NCHW .view(batch, -1) into fc1's row order so the NHWC,
    # pixel-major conv3 output feeds fc1 with no runtime transpose.
    wf1 = (jnp.transpose(p["wfc1"].reshape(_HID, _C3_OUT, h3, w3), (2, 3, 1, 0))
           .reshape(feat, _HID).astype(jnp.bfloat16))
    return {
        "w1": conv_w(p["w1"]), "b1": p["b1"].reshape(1, -1),        # biases stay fp32
        "w2": conv_w(p["w2"]), "b2": p["b2"].reshape(1, -1),
        "w3": conv_w(p["w3"]), "b3": p["b3"].reshape(1, -1),
        "wfc1": wf1, "bfc1": p["bfc1"].reshape(1, -1),
        "wfc2": p["wfc2"].T.astype(jnp.bfloat16), "bfc2": p["bfc2"].reshape(1, -1),
    }


# ----------------------------------------------------------------------------
# Forward pass (Pallas).  Input is NCHW float32, like the PyTorch module.
# ----------------------------------------------------------------------------
def dqlearn_forward(x_nchw, pp):
    N = x_nchw.shape[0]
    x = jnp.transpose(x_nchw, (0, 2, 3, 1))           # NCHW -> NHWC (one pass)
    nb1 = _block_batch(N, 2)                          # M = nb1*OH*OW >= 128, grid >= 2
    a1 = conv1_pallas(x, pp["w1"], pp["b1"], ksize=_K1, stride=_S1, block_n=nb1)
    nb2 = _block_batch(N, 4)                          # keep >= 2 grid steps for v7x
    return head_pallas(a1, pp["w2"], pp["b2"], pp["w3"], pp["b3"],
                       pp["wfc1"], pp["bfc1"], pp["wfc2"], pp["bfc2"],
                       block_n=nb2)


# ----------------------------------------------------------------------------
# Pure-JAX fp32 reference (same math via lax.conv, raw PyTorch-layout params).
# ----------------------------------------------------------------------------
def reference_forward(x_nchw, p):
    dn = ("NCHW", "OIHW", "NCHW")
    y = lax.conv_general_dilated(x_nchw, p["w1"], (_S1, _S1), "VALID",
                                 dimension_numbers=dn) + p["b1"][None, :, None, None]
    y = jnp.maximum(y, 0.0)
    y = lax.conv_general_dilated(y, p["w2"], (_S2, _S2), "VALID",
                                 dimension_numbers=dn) + p["b2"][None, :, None, None]
    y = jnp.maximum(y, 0.0)
    y = lax.conv_general_dilated(y, p["w3"], (_S3, _S3), "VALID",
                                 dimension_numbers=dn) + p["b3"][None, :, None, None]
    y = jnp.maximum(y, 0.0)
    flat = y.reshape(x_nchw.shape[0], -1)
    y = jnp.maximum(flat @ p["wfc1"].T + p["bfc1"], 0.0)
    return y @ p["wfc2"].T + p["bfc2"]


if __name__ == "__main__":
    # Smallest input compatible with the conv stack: ip_sz = (4, 44, 44)
    #   conv1 (k8,s4): 44 -> 10 ; conv2 (k4,s2): 10 -> 4 ; conv3 (k3,s1): 4 -> 2
    #   feat_sv = 64 * 2 * 2 = 256
    ip_sz = (4, 44, 44)
    tot_num_acts = 6
    batch = 8

    key = jax.random.PRNGKey(0)
    k_params, k_x = jax.random.split(key)
    raw_params = init_params(k_params, ip_sz, tot_num_acts)
    prepped = prepare_params(raw_params, ip_sz)
    x = jax.random.normal(k_x, (batch,) + ip_sz, jnp.float32)   # NCHW input

    fwd = jax.jit(dqlearn_forward)
    out = jax.block_until_ready(fwd(x, prepped))
    assert out.shape == (batch, tot_num_acts), out.shape

    ref = jax.block_until_ready(reference_forward(x, raw_params))
    # bf16 MXU operands (fp32 accumulation) vs fp32 reference -> loosened tolerance.
    assert jnp.allclose(out, ref, rtol=5e-2, atol=1e-2), (
        float(jnp.max(jnp.abs(out - ref))))

    print("KERNEL_OK")
</pallas_src>

<mosaic_0001>
module attributes {stable_mosaic.version = 11 : i64} {
  func.func @_conv1_kernel(%arg0: i32, %arg1: memref<2x44x11x16xf32, #tpu.memory_space<vmem>>, %arg2: memref<256x32xbf16, #tpu.memory_space<vmem>>, %arg3: memref<1x32xf32, #tpu.memory_space<vmem>>, %arg4: memref<200x32xf32, #tpu.memory_space<vmem>>) attributes {dimension_semantics = [#tpu.dimension_semantics<parallel>], iteration_bounds = array<i64: 4>, scalar_prefetch = 0 : i64, scratch_operands = 0 : i64, tpu.core_type = #tpu.core_type<tc>, window_params = [{transform_indices = @transform_0, window_bounds = array<i64: 2, 44, 11, 16>}, {pipeline_mode = #tpu.pipeline_mode<synchronous>, transform_indices = @transform_1, window_bounds = array<i64: 256, 32>}, {pipeline_mode = #tpu.pipeline_mode<synchronous>, transform_indices = @transform_2, window_bounds = array<i64: 1, 32>}, {transform_indices = @transform_3, window_bounds = array<i64: 200, 32>}]} {
    %c0 = arith.constant 0 : index
    %c0_0 = arith.constant 0 : index
    %c0_1 = arith.constant 0 : index
    %c0_2 = arith.constant 0 : index
    %0 = vector.load %arg1[%c0, %c0_0, %c0_1, %c0_2] : memref<2x44x11x16xf32, #tpu.memory_space<vmem>>, vector<1x1x10x16xf32>
    %1 = vector.shape_cast %0 : vector<1x1x10x16xf32> to vector<10x16xf32>
    %c0_3 = arith.constant 0 : index
    %c0_4 = arith.constant 0 : index
    %c1 = arith.constant 1 : index
    %c0_5 = arith.constant 0 : index
    %2 = vector.load %arg1[%c0_3, %c0_4, %c1, %c0_5] : memref<2x44x11x16xf32, #tpu.memory_space<vmem>>, vector<1x1x10x16xf32>
    %3 = vector.shape_cast %2 : vector<1x1x10x16xf32> to vector<10x16xf32>
    %c0_6 = arith.constant 0 : index
    %c1_7 = arith.constant 1 : index
    %c0_8 = arith.constant 0 : index
    %c0_9 = arith.constant 0 : index
    %4 = vector.load %arg1[%c0_6, %c1_7, %c0_8, %c0_9] : memref<2x44x11x16xf32, #tpu.memory_space<vmem>>, vector<1x1x10x16xf32>
    %5 = vector.shape_cast %4 : vector<1x1x10x16xf32> to vector<10x16xf32>
    %c0_10 = arith.constant 0 : index
    %c1_11 = arith.constant 1 : index
    %c1_12 = arith.constant 1 : index
    %c0_13 = arith.constant 0 : index
    %6 = vector.load %arg1[%c0_10, %c1_11, %c1_12, %c0_13] : memref<2x44x11x16xf32, #tpu.memory_space<vmem>>, vector<1x1x10x16xf32>
    %7 = vector.shape_cast %6 : vector<1x1x10x16xf32> to vector<10x16xf32>
    %c0_14 = arith.constant 0 : index
    %c2 = arith.constant 2 : index
    %c0_15 = arith.constant 0 : index
    %c0_16 = arith.constant 0 : index
    %8 = vector.load %arg1[%c0_14, %c2, %c0_15, %c0_16] : memref<2x44x11x16xf32, #tpu.memory_space<vmem>>, vector<1x1x10x16xf32>
    %9 = vector.shape_cast %8 : vector<1x1x10x16xf32> to vector<10x16xf32>
    %c0_17 = arith.constant 0 : index
    %c2_18 = arith.constant 2 : index
    %c1_19 = arith.constant 1 : index
    %c0_20 = arith.constant 0 : index
    %10 = vector.load %arg1[%c0_17, %c2_18, %c1_19, %c0_20] : memref<2x44x11x16xf32, #tpu.memory_space<vmem>>, vector<1x1x10x16xf32>
    %11 = vector.shape_cast %10 : vector<1x1x10x16xf32> to vector<10x16xf32>
    %c0_21 = arith.constant 0 : index
    %c3 = arith.constant 3 : index
    %c0_22 = arith.constant 0 : index
    %c0_23 = arith.constant 0 : index
    %12 = vector.load %arg1[%c0_21, %c3, %c0_22, %c0_23] : memref<2x44x11x16xf32, #tpu.memory_space<vmem>>, vector<1x1x10x16xf32>
    %13 = vector.shape_cast %12 : vector<1x1x10x16xf32> to vector<10x16xf32>
    %c0_24 = arith.constant 0 : index
    %c3_25 = arith.constant 3 : index
    %c1_26 = arith.constant 1 : index
    %c0_27 = arith.constant 0 : index
    %14 = vector.load %arg1[%c0_24, %c3_25, %c1_26, %c0_27] : memref<2x44x11x16xf32, #tpu.memory_space<vmem>>, vector<1x1x10x16xf32>
    %15 = vector.shape_cast %14 : vector<1x1x10x16xf32> to vector<10x16xf32>
    %c0_28 = arith.constant 0 : index
    %c4 = arith.constant 4 : index
    %c0_29 = arith.constant 0 : index
    %c0_30 = arith.constant 0 : index
    %16 = vector.load %arg1[%c0_28, %c4, %c0_29, %c0_30] : memref<2x44x11x16xf32, #tpu.memory_space<vmem>>, vector<1x1x10x16xf32>
    %17 = vector.shape_cast %16 : vector<1x1x10x16xf32> to vector<10x16xf32>
    %c0_31 = arith.constant 0 : index
    %c4_32 = arith.constant 4 : index
    %c1_33 = arith.constant 1 : index
    %c0_34 = arith.constant 0 : index
    %18 = vector.load %arg1[%c0_31, %c4_32, %c1_33, %c0_34] : memref<2x44x11x16xf32, #tpu.memory_space<vmem>>, vector<1x1x10x16xf32>
    %19 = vector.shape_cast %18 : vector<1x1x10x16xf32> to vector<10x16xf32>
    %c0_35 = arith.constant 0 : index
    %c5 = arith.constant 5 : index
    %c0_36 = arith.constant 0 : index
    %c0_37 = arith.constant 0 : index
    %20 = vector.load %arg1[%c0_35, %c5, %c0_36, %c0_37] : memref<2x44x11x16xf32, #tpu.memory_space<vmem>>, vector<1x1x10x16xf32>
    %21 = vector.shape_cast %20 : vector<1x1x10x16xf32> to vector<10x16xf32>
    %c0_38 = arith.constant 0 : index
    %c5_39 = arith.constant 5 : index
    %c1_40 = arith.constant 1 : index
    %c0_41 = arith.constant 0 : index
    %22 = vector.load %arg1[%c0_38, %c5_39, %c1_40, %c0_41] : memref<2x44x11x16xf32, #tpu.memory_space<vmem>>, vector<1x1x10x16xf32>
    %23 = vector.shape_cast %22 : vector<1x1x10x16xf32> to vector<10x16xf32>
    %c0_42 = arith.constant 0 : index
    %c6 = arith.constant 6 : index
    %c0_43 = arith.constant 0 : index
    %c0_44 = arith.constant 0 : index
    %24 = vector.load %arg1[%c0_42, %c6, %c0_43, %c0_44] : memref<2x44x11x16xf32, #tpu.memory_space<vmem>>, vector<1x1x10x16xf32>
    %25 = vector.shape_cast %24 : vector<1x1x10x16xf32> to vector<10x16xf32>
    %c0_45 = arith.constant 0 : index
    %c6_46 = arith.constant 6 : index
    %c1_47 = arith.constant 1 : index
    %c0_48 = arith.constant 0 : index
    %26 = vector.load %arg1[%c0_45, %c6_46, %c1_47, %c0_48] : memref<2x44x11x16xf32, #tpu.memory_space<vmem>>, vector<1x1x10x16xf32>
    %27 = vector.shape_cast %26 : vector<1x1x10x16xf32> to vector<10x16xf32>
    %c0_49 = arith.constant 0 : index
    %c7 = arith.constant 7 : index
    %c0_50 = arith.constant 0 : index
    %c0_51 = arith.constant 0 : index
    %28 = vector.load %arg1[%c0_49, %c7, %c0_50, %c0_51] : memref<2x44x11x16xf32, #tpu.memory_space<vmem>>, vector<1x1x10x16xf32>
    %29 = vector.shape_cast %28 : vector<1x1x10x16xf32> to vector<10x16xf32>
    %c0_52 = arith.constant 0 : index
    %c7_53 = arith.constant 7 : index
    %c1_54 = arith.constant 1 : index
    %c0_55 = arith.constant 0 : index
    %30 = vector.load %arg1[%c0_52, %c7_53, %c1_54, %c0_55] : memref<2x44x11x16xf32, #tpu.memory_space<vmem>>, vector<1x1x10x16xf32>
    %31 = vector.shape_cast %30 : vector<1x1x10x16xf32> to vector<10x16xf32>
    %32 = tpu.concatenate %1, %3, %5, %7, %9, %11, %13, %15, %17, %19, %21, %23, %25, %27, %29, %31 in 1 : vector<10x16xf32>, vector<10x16xf32>, vector<10x16xf32>, vector<10x16xf32>, vector<10x16xf32>, vector<10x16xf32>, vector<10x16xf32>, vector<10x16xf32>, vector<10x16xf32>, vector<10x16xf32>, vector<10x16xf32>, vector<10x16xf32>, vector<10x16xf32>, vector<10x16xf32>, vector<10x16xf32>, vector<10x16xf32> -> vector<10x256xf32>
    %c0_56 = arith.constant 0 : index
    %c4_57 = arith.constant 4 : index
    %c0_58 = arith.constant 0 : index
    %c0_59 = arith.constant 0 : index
    %33 = vector.load %arg1[%c0_56, %c4_57, %c0_58, %c0_59] : memref<2x44x11x16xf32, #tpu.memory_space<vmem>>, vector<1x1x10x16xf32>
    %34 = vector.shape_cast %33 : vector<1x1x10x16xf32> to vector<10x16xf32>
    %c0_60 = arith.constant 0 : index
    %c4_61 = arith.constant 4 : index
    %c1_62 = arith.constant 1 : index
    %c0_63 = arith.constant 0 : index
    %35 = vector.load %arg1[%c0_60, %c4_61, %c1_62, %c0_63] : memref<2x44x11x16xf32, #tpu.memory_space<vmem>>, vector<1x1x10x16xf32>
    %36 = vector.shape_cast %35 : vector<1x1x10x16xf32> to vector<10x16xf32>
    %c0_64 = arith.constant 0 : index
    %c5_65 = arith.constant 5 : index
    %c0_66 = arith.constant 0 : index
    %c0_67 = arith.constant 0 : index
    %37 = vector.load %arg1[%c0_64, %c5_65, %c0_66, %c0_67] : memref<2x44x11x16xf32, #tpu.memory_space<vmem>>, vector<1x1x10x16xf32>
    %38 = vector.shape_cast %37 : vector<1x1x10x16xf32> to vector<10x16xf32>
    %c0_68 = arith.constant 0 : index
    %c5_69 = arith.constant 5 : index
    %c1_70 = arith.constant 1 : index
    %c0_71 = arith.constant 0 : index
    %39 = vector.load %arg1[%c0_68, %c5_69, %c1_70, %c0_71] : memref<2x44x11x16xf32, #tpu.memory_space<vmem>>, vector<1x1x10x16xf32>
    %40 = vector.shape_cast %39 : vector<1x1x10x16xf32> to vector<10x16xf32>
    %c0_72 = arith.constant 0 : index
    %c6_73 = arith.constant 6 : index
    %c0_74 = arith.constant 0 : index
    %c0_75 = arith.constant 0 : index
    %41 = vector.load %arg1[%c0_72, %c6_73, %c0_74, %c0_75] : memref<2x44x11x16xf32, #tpu.memory_space<vmem>>, vector<1x1x10x16xf32>
    %42 = vector.shape_cast %41 : vector<1x1x10x16xf32> to vector<10x16xf32>
    %c0_76 = arith.constant 0 : index
    %c6_77 = arith.constant 6 : index
    %c1_78 = arith.constant 1 : index
    %c0_79 = arith.constant 0 : index
    %43 = vector.load %arg1[%c0_76, %c6_77, %c1_78, %c0_79] : memref<2x44x11x16xf32, #tpu.memory_space<vmem>>, vector<1x1x10x16xf32>
    %44 = vector.shape_cast %43 : vector<1x1x10x16xf32> to vector<10x16xf32>
    %c0_80 = arith.constant 0 : index
    %c7_81 = arith.constant 7 : index
    %c0_82 = arith.constant 0 : index
    %c0_83 = arith.constant 0 : index
    %45 = vector.load %arg1[%c0_80, %c7_81, %c0_82, %c0_83] : memref<2x44x11x16xf32, #tpu.memory_space<vmem>>, vector<1x1x10x16xf32>
    %46 = vector.shape_cast %45 : vector<1x1x10x16xf32> to vector<10x16xf32>
    %c0_84 = arith.constant 0 : index
    %c7_85 = arith.constant 7 : index
    %c1_86 = arith.constant 1 : index
    %c0_87 = arith.constant 0 : index
    %47 = vector.load %arg1[%c0_84, %c7_85, %c1_86, %c0_87] : memref<2x44x11x16xf32, #tpu.memory_space<vmem>>, vector<1x1x10x16xf32>
    %48 = vector.shape_cast %47 : vector<1x1x10x16xf32> to vector<10x16xf32>
    %c0_88 = arith.constant 0 : index
    %c8 = arith.constant 8 : index
    %c0_89 = arith.constant 0 : index
    %c0_90 = arith.constant 0 : index
    %49 = vector.load %arg1[%c0_88, %c8, %c0_89, %c0_90] : memref<2x44x11x16xf32, #tpu.memory_space<vmem>>, vector<1x1x10x16xf32>
    %50 = vector.shape_cast %49 : vector<1x1x10x16xf32> to vector<10x16xf32>
    %c0_91 = arith.constant 0 : index
    %c8_92 = arith.constant 8 : index
    %c1_93 = arith.constant 1 : index
    %c0_94 = arith.constant 0 : index
    %51 = vector.load %arg1[%c0_91, %c8_92, %c1_93, %c0_94] : memref<2x44x11x16xf32, #tpu.memory_space<vmem>>, vector<1x1x10x16xf32>
    %52 = vector.shape_cast %51 : vector<1x1x10x16xf32> to vector<10x16xf32>
    %c0_95 = arith.constant 0 : index
    %c9 = arith.constant 9 : index
    %c0_96 = arith.constant 0 : index
    %c0_97 = arith.constant 0 : index
    %53 = vector.load %arg1[%c0_95, %c9, %c0_96, %c0_97] : memref<2x44x11x16xf32, #tpu.memory_space<vmem>>, vector<1x1x10x16xf32>
    %54 = vector.shape_cast %53 : vector<1x1x10x16xf32> to vector<10x16xf32>
    %c0_98 = arith.constant 0 : index
    %c9_99 = arith.constant 9 : index
    %c1_100 = arith.constant 1 : index
    %c0_101 = arith.constant 0 : index
    %55 = vector.load %arg1[%c0_98, %c9_99, %c1_100, %c0_101] : memref<2x44x11x16xf32, #tpu.memory_space<vmem>>, vector<1x1x10x16xf32>
    %56 = vector.shape_cast %55 : vector<1x1x10x16xf32> to vector<10x16xf32>
    %c0_102 = arith.constant 0 : index
    %c10 = arith.constant 10 : index
    %c0_103 = arith.constant 0 : index
    %c0_104 = arith.constant 0 : index
    %57 = vector.load %arg1[%c0_102, %c10, %c0_103, %c0_104] : memref<2x44x11x16xf32, #tpu.memory_space<vmem>>, vector<1x1x10x16xf32>
    %58 = vector.shape_cast %57 : vector<1x1x10x16xf32> to vector<10x16xf32>
    %c0_105 = arith.constant 0 : index
    %c10_106 = arith.constant 10 : index
    %c1_107 = arith.constant 1 : index
    %c0_108 = arith.constant 0 : index
    %59 = vector.load %arg1[%c0_105, %c10_106, %c1_107, %c0_108] : memref<2x44x11x16xf32, #tpu.memory_space<vmem>>, vector<1x1x10x16xf32>
    %60 = vector.shape_cast %59 : vector<1x1x10x16xf32> to vector<10x16xf32>
    %c0_109 = arith.constant 0 : index
    %c11 = arith.constant 11 : index
    %c0_110 = arith.constant 0 : index
    %c0_111 = arith.constant 0 : index
    %61 = vector.load %arg1[%c0_109, %c11, %c0_110, %c0_111] : memref<2x44x11x16xf32, #tpu.memory_space<vmem>>, vector<1x1x10x16xf32>
    %62 = vector.shape_cast %61 : vector<1x1x10x16xf32> to vector<10x16xf32>
    %c0_112 = arith.constant 0 : index
    %c11_113 = arith.constant 11 : index
    %c1_114 = arith.constant 1 : index
    %c0_115 = arith.constant 0 : index
    %63 = vector.load %arg1[%c0_112, %c11_113, %c1_114, %c0_115] : memref<2x44x11x16xf32, #tpu.memory_space<vmem>>, vector<1x1x10x16xf32>
    %64 = vector.shape_cast %63 : vector<1x1x10x16xf32> to vector<10x16xf32>
    %65 = tpu.concatenate %34, %36, %38, %40, %42, %44, %46, %48, %50, %52, %54, %56, %58, %60, %62, %64 in 1 : vector<10x16xf32>, vector<10x16xf32>, vector<10x16xf32>, vector<10x16xf32>, vector<10x16xf32>, vector<10x16xf32>, vector<10x16xf32>, vector<10x16xf32>, vector<10x16xf32>, vector<10x16xf32>, vector<10x16xf32>, vector<10x16xf32>, vector<10x16xf32>, vector<10x16xf32>, vector<10x16xf32>, vector<10x16xf32> -> vector<10x256xf32>
    %c0_116 = arith.constant 0 : index
    %c8_117 = arith.constant 8 : index
    %c0_118 = arith.constant 0 : index
    %c0_119 = arith.constant 0 : index
    %66 = vector.load %arg1[%c0_116, %c8_117, %c0_118, %c0_119] : memref<2x44x11x16xf32, #tpu.memory_space<vmem>>, vector<1x1x10x16xf32>
    %67 = vector.shape_cast %66 : vector<1x1x10x16xf32> to vector<10x16xf32>
    %c0_120 = arith.constant 0 : index
    %c8_121 = arith.constant 8 : index
    %c1_122 = arith.constant 1 : index
    %c0_123 = arith.constant 0 : index
    %68 = vector.load %arg1[%c0_120, %c8_121, %c1_122, %c0_123] : memref<2x44x11x16xf32, #tpu.memory_space<vmem>>, vector<1x1x10x16xf32>
    %69 = vector.shape_cast %68 : vector<1x1x10x16xf32> to vector<10x16xf32>
    %c0_124 = arith.constant 0 : index
    %c9_125 = arith.constant 9 : index
    %c0_126 = arith.constant 0 : index
    %c0_127 = arith.constant 0 : index
    %70 = vector.load %arg1[%c0_124, %c9_125, %c0_126, %c0_127] : memref<2x44x11x16xf32, #tpu.memory_space<vmem>>, vector<1x1x10x16xf32>
    %71 = vector.shape_cast %70 : vector<1x1x10x16xf32> to vector<10x16xf32>
    %c0_128 = arith.constant 0 : index
    %c9_129 = arith.constant 9 : index
    %c1_130 = arith.constant 1 : index
    %c0_131 = arith.constant 0 : index
    %72 = vector.load %arg1[%c0_128, %c9_129, %c1_130, %c0_131] : memref<2x44x11x16xf32, #tpu.memory_space<vmem>>, vector<1x1x10x16xf32>
    %73 = vector.shape_cast %72 : vector<1x1x10x16xf32> to vector<10x16xf32>
    %c0_132 = arith.constant 0 : index
    %c10_133 = arith.constant 10 : index
    %c0_134 = arith.constant 0 : index
    %c0_135 = arith.constant 0 : index
    %74 = vector.load %arg1[%c0_132, %c10_133, %c0_134, %c0_135] : memref<2x44x11x16xf32, #tpu.memory_space<vmem>>, vector<1x1x10x16xf32>
    %75 = vector.shape_cast %74 : vector<1x1x10x16xf32> to vector<10x16xf32>
    %c0_136 = arith.constant 0 : index
    %c10_137 = arith.constant 10 : index
    %c1_138 = arith.constant 1 : index
    %c0_139 = arith.constant 0 : index
    %76 = vector.load %arg1[%c0_136, %c10_137, %c1_138, %c0_139] : memref<2x44x11x16xf32, #tpu.memory_space<vmem>>, vector<1x1x10x16xf32>
    %77 = vector.shape_cast %76 : vector<1x1x10x16xf32> to vector<10x16xf32>
    %c0_140 = arith.constant 0 : index
    %c11_141 = arith.constant 11 : index
    %c0_142 = arith.constant 0 : index
    %c0_143 = arith.constant 0 : index
    %78 = vector.load %arg1[%c0_140, %c11_141, %c0_142, %c0_143] : memref<2x44x11x16xf32, #tpu.memory_space<vmem>>, vector<1x1x10x16xf32>
    %79 = vector.shape_cast %78 : vector<1x1x10x16xf32> to vector<10x16xf32>
    %c0_144 = arith.constant 0 : index
    %c11_145 = arith.constant 11 : index
    %c1_146 = arith.constant 1 : index
    %c0_147 = arith.constant 0 : index
    %80 = vector.load %arg1[%c0_144, %c11_145, %c1_146, %c0_147] : memref<2x44x11x16xf32, #tpu.memory_space<vmem>>, vector<1x1x10x16xf32>
    %81 = vector.shape_cast %80 : vector<1x1x10x16xf32> to vector<10x16xf32>
    %c0_148 = arith.constant 0 : index
    %c12 = arith.constant 12 : index
    %c0_149 = arith.constant 0 : index
    %c0_150 = arith.constant 0 : index
    %82 = vector.load %arg1[%c0_148, %c12, %c0_149, %c0_150] : memref<2x44x11x16xf32, #tpu.memory_space<vmem>>, vector<1x1x10x16xf32>
    %83 = vector.shape_cast %82 : vector<1x1x10x16xf32> to vector<10x16xf32>
    %c0_151 = arith.constant 0 : index
    %c12_152 = arith.constant 12 : index
    %c1_153 = arith.constant 1 : index
    %c0_154 = arith.constant 0 : index
    %84 = vector.load %arg1[%c0_151, %c12_152, %c1_153, %c0_154] : memref<2x44x11x16xf32, #tpu.memory_space<vmem>>, vector<1x1x10x16xf32>
    %85 = vector.shape_cast %84 : vector<1x1x10x16xf32> to vector<10x16xf32>
    %c0_155 = arith.constant 0 : index
    %c13 = arith.constant 13 : index
    %c0_156 = arith.constant 0 : index
    %c0_157 = arith.constant 0 : index
    %86 = vector.load %arg1[%c0_155, %c13, %c0_156, %c0_157] : memref<2x44x11x16xf32, #tpu.memory_space<vmem>>, vector<1x1x10x16xf32>
    %87 = vector.shape_cast %86 : vector<1x1x10x16xf32> to vector<10x16xf32>
    %c0_158 = arith.constant 0 : index
    %c13_159 = arith.constant 13 : index
    %c1_160 = arith.constant 1 : index
    %c0_161 = arith.constant 0 : index
    %88 = vector.load %arg1[%c0_158, %c13_159, %c1_160, %c0_161] : memref<2x44x11x16xf32, #tpu.memory_space<vmem>>, vector<1x1x10x16xf32>
    %89 = vector.shape_cast %88 : vector<1x1x10x16xf32> to vector<10x16xf32>
    %c0_162 = arith.constant 0 : index
    %c14 = arith.constant 14 : index
    %c0_163 = arith.constant 0 : index
    %c0_164 = arith.constant 0 : index
    %90 = vector.load %arg1[%c0_162, %c14, %c0_163, %c0_164] : memref<2x44x11x16xf32, #tpu.memory_space<vmem>>, vector<1x1x10x16xf32>
    %91 = vector.shape_cast %90 : vector<1x1x10x16xf32> to vector<10x16xf32>
    %c0_165 = arith.constant 0 : index
    %c14_166 = arith.constant 14 : index
    %c1_167 = arith.constant 1 : index
    %c0_168 = arith.constant 0 : index
    %92 = vector.load %arg1[%c0_165, %c14_166, %c1_167, %c0_168] : memref<2x44x11x16xf32, #tpu.memory_space<vmem>>, vector<1x1x10x16xf32>
    %93 = vector.shape_cast %92 : vector<1x1x10x16xf32> to vector<10x16xf32>
    %c0_169 = arith.constant 0 : index
    %c15 = arith.constant 15 : index
    %c0_170 = arith.constant 0 : index
    %c0_171 = arith.constant 0 : index
    %94 = vector.load %arg1[%c0_169, %c15, %c0_170, %c0_171] : memref<2x44x11x16xf32, #tpu.memory_space<vmem>>, vector<1x1x10x16xf32>
    %95 = vector.shape_cast %94 : vector<1x1x10x16xf32> to vector<10x16xf32>
    %c0_172 = arith.constant 0 : index
    %c15_173 = arith.constant 15 : index
    %c1_174 = arith.constant 1 : index
    %c0_175 = arith.constant 0 : index
    %96 = vector.load %arg1[%c0_172, %c15_173, %c1_174, %c0_175] : memref<2x44x11x16xf32, #tpu.memory_space<vmem>>, vector<1x1x10x16xf32>
    %97 = vector.shape_cast %96 : vector<1x1x10x16xf32> to vector<10x16xf32>
    %98 = tpu.concatenate %67, %69, %71, %73, %75, %77, %79, %81, %83, %85, %87, %89, %91, %93, %95, %97 in 1 : vector<10x16xf32>, vector<10x16xf32>, vector<10x16xf32>, vector<10x16xf32>, vector<10x16xf32>, vector<10x16xf32>, vector<10x16xf32>, vector<10x16xf32>, vector<10x16xf32>, vector<10x16xf32>, vector<10x16xf32>, vector<10x16xf32>, vector<10x16xf32>, vector<10x16xf32>, vector<10x16xf32>, vector<10x16xf32> -> vector<10x256xf32>
    %c0_176 = arith.constant 0 : index
    %c12_177 = arith.constant 12 : index
    %c0_178 = arith.constant 0 : index
    %c0_179 = arith.constant 0 : index
    %99 = vector.load %arg1[%c0_176, %c12_177, %c0_178, %c0_179] : memref<2x44x11x16xf32, #tpu.memory_space<vmem>>, vector<1x1x10x16xf32>
    %100 = vector.shape_cast %99 : vector<1x1x10x16xf32> to vector<10x16xf32>
    %c0_180 = arith.constant 0 : index
    %c12_181 = arith.constant 12 : index
    %c1_182 = arith.constant 1 : index
    %c0_183 = arith.constant 0 : index
    %101 = vector.load %arg1[%c0_180, %c12_181, %c1_182, %c0_183] : memref<2x44x11x16xf32, #tpu.memory_space<vmem>>, vector<1x1x10x16xf32>
    %102 = vector.shape_cast %101 : vector<1x1x10x16xf32> to vector<10x16xf32>
    %c0_184 = arith.constant 0 : index
    %c13_185 = arith.constant 13 : index
    %c0_186 = arith.constant 0 : index
    %c0_187 = arith.constant 0 : index
    %103 = vector.load %arg1[%c0_184, %c13_185, %c0_186, %c0_187] : memref<2x44x11x16xf32, #tpu.memory_space<vmem>>, vector<1x1x10x16xf32>
    %104 = vector.shape_cast %103 : vector<1x1x10x16xf32> to vector<10x16xf32>
    %c0_188 = arith.constant 0 : index
    %c13_189 = arith.constant 13 : index
    %c1_190 = arith.constant 1 : index
    %c0_191 = arith.constant 0 : index
    %105 = vector.load %arg1[%c0_188, %c13_189, %c1_190, %c0_191] : memref<2x44x11x16xf32, #tpu.memory_space<vmem>>, vector<1x1x10x16xf32>
    %106 = vector.shape_cast %105 : vector<1x1x10x16xf32> to vector<10x16xf32>
    %c0_192 = arith.constant 0 : index
    %c14_193 = arith.constant 14 : index
    %c0_194 = arith.constant 0 : index
    %c0_195 = arith.constant 0 : index
    %107 = vector.load %arg1[%c0_192, %c14_193, %c0_194, %c0_195] : memref<2x44x11x16xf32, #tpu.memory_space<vmem>>, vector<1x1x10x16xf32>
    %108 = vector.shape_cast %107 : vector<1x1x10x16xf32> to vector<10x16xf32>
    %c0_196 = arith.constant 0 : index
    %c14_197 = arith.constant 14 : index
    %c1_198 = arith.constant 1 : index
    %c0_199 = arith.constant 0 : index
    %109 = vector.load %arg1[%c0_196, %c14_197, %c1_198, %c0_199] : memref<2x44x11x16xf32, #tpu.memory_space<vmem>>, vector<1x1x10x16xf32>
    %110 = vector.shape_cast %109 : vector<1x1x10x16xf32> to vector<10x16xf32>
    %c0_200 = arith.constant 0 : index
    %c15_201 = arith.constant 15 : index
    %c0_202 = arith.constant 0 : index
    %c0_203 = arith.constant 0 : index
    %111 = vector.load %arg1[%c0_200, %c15_201, %c0_202, %c0_203] : memref<2x44x11x16xf32, #tpu.memory_space<vmem>>, vector<1x1x10x16xf32>
    %112 = vector.shape_cast %111 : vector<1x1x10x16xf32> to vector<10x16xf32>
    %c0_204 = arith.constant 0 : index
    %c15_205 = arith.constant 15 : index
    %c1_206 = arith.constant 1 : index
    %c0_207 = arith.constant 0 : index
    %113 = vector.load %arg1[%c0_204, %c15_205, %c1_206, %c0_207] : memref<2x44x11x16xf32, #tpu.memory_space<vmem>>, vector<1x1x10x16xf32>
    %114 = vector.shape_cast %113 : vector<1x1x10x16xf32> to vector<10x16xf32>
    %c0_208 = arith.constant 0 : index
    %c16 = arith.constant 16 : index
    %c0_209 = arith.constant 0 : index
    %c0_210 = arith.constant 0 : index
    %115 = vector.load %arg1[%c0_208, %c16, %c0_209, %c0_210] : memref<2x44x11x16xf32, #tpu.memory_space<vmem>>, vector<1x1x10x16xf32>
    %116 = vector.shape_cast %115 : vector<1x1x10x16xf32> to vector<10x16xf32>
    %c0_211 = arith.constant 0 : index
    %c16_212 = arith.constant 16 : index
    %c1_213 = arith.constant 1 : index
    %c0_214 = arith.constant 0 : index
    %117 = vector.load %arg1[%c0_211, %c16_212, %c1_213, %c0_214] : memref<2x44x11x16xf32, #tpu.memory_space<vmem>>, vector<1x1x10x16xf32>
    %118 = vector.shape_cast %117 : vector<1x1x10x16xf32> to vector<10x16xf32>
    %c0_215 = arith.constant 0 : index
    %c17 = arith.constant 17 : index
    %c0_216 = arith.constant 0 : index
    %c0_217 = arith.constant 0 : index
    %119 = vector.load %arg1[%c0_215, %c17, %c0_216, %c0_217] : memref<2x44x11x16xf32, #tpu.memory_space<vmem>>, vector<1x1x10x16xf32>
    %120 = vector.shape_cast %119 : vector<1x1x10x16xf32> to vector<10x16xf32>
    %c0_218 = arith.constant 0 : index
    %c17_219 = arith.constant 17 : index
    %c1_220 = arith.constant 1 : index
    %c0_221 = arith.constant 0 : index
    %121 = vector.load %arg1[%c0_218, %c17_219, %c1_220, %c0_221] : memref<2x44x11x16xf32, #tpu.memory_space<vmem>>, vector<1x1x10x16xf32>
    %122 = vector.shape_cast %121 : vector<1x1x10x16xf32> to vector<10x16xf32>
    %c0_222 = arith.constant 0 : index
    %c18 = arith.constant 18 : index
    %c0_223 = arith.constant 0 : index
    %c0_224 = arith.constant 0 : index
    %123 = vector.load %arg1[%c0_222, %c18, %c0_223, %c0_224] : memref<2x44x11x16xf32, #tpu.memory_space<vmem>>, vector<1x1x10x16xf32>
    %124 = vector.shape_cast %123 : vector<1x1x10x16xf32> to vector<10x16xf32>
    %c0_225 = arith.constant 0 : index
    %c18_226 = arith.constant 18 : index
    %c1_227 = arith.constant 1 : index
    %c0_228 = arith.constant 0 : index
    %125 = vector.load %arg1[%c0_225, %c18_226, %c1_227, %c0_228] : memref<2x44x11x16xf32, #tpu.memory_space<vmem>>, vector<1x1x10x16xf32>
    %126 = vector.shape_cast %125 : vector<1x1x10x16xf32> to vector<10x16xf32>
    %c0_229 = arith.constant 0 : index
    %c19 = arith.constant 19 : index
    %c0_230 = arith.constant 0 : index
    %c0_231 = arith.constant 0 : index
    %127 = vector.load %arg1[%c0_229, %c19, %c0_230, %c0_231] : memref<2x44x11x16xf32, #tpu.memory_space<vmem>>, vector<1x1x10x16xf32>
    %128 = vector.shape_cast %127 : vector<1x1x10x16xf32> to vector<10x16xf32>
    %c0_232 = arith.constant 0 : index
    %c19_233 = arith.constant 19 : index
    %c1_234 = arith.constant 1 : index
    %c0_235 = arith.constant 0 : index
    %129 = vector.load %arg1[%c0_232, %c19_233, %c1_234, %c0_235] : memref<2x44x11x16xf32, #tpu.memory_space<vmem>>, vector<1x1x10x16xf32>
    %130 = vector.shape_cast %129 : vector<1x1x10x16xf32> to vector<10x16xf32>
    %131 = tpu.concatenate %100, %102, %104, %106, %108, %110, %112, %114, %116, %118, %120, %122, %124, %126, %128, %130 in 1 : vector<10x16xf32>, vector<10x16xf32>, vector<10x16xf32>, vector<10x16xf32>, vector<10x16xf32>, vector<10x16xf32>, vector<10x16xf32>, vector<10x16xf32>, vector<10x16xf32>, vector<10x16xf32>, vector<10x16xf32>, vector<10x16xf32>, vector<10x16xf32>, vector<10x16xf32>, vector<10x16xf32>, vector<10x16xf32> -> vector<10x256xf32>
    %c0_236 = arith.constant 0 : index
    %c16_237 = arith.constant 16 : index
    %c0_238 = arith.constant 0 : index
    %c0_239 = arith.constant 0 : index
    %132 = vector.load %arg1[%c0_236, %c16_237, %c0_238, %c0_239] : memref<2x44x11x16xf32, #tpu.memory_space<vmem>>, vector<1x1x10x16xf32>
    %133 = vector.shape_cast %132 : vector<1x1x10x16xf32> to vector<10x16xf32>
    %c0_240 = arith.constant 0 : index
    %c16_241 = arith.constant 16 : index
    %c1_242 = arith.constant 1 : index
    %c0_243 = arith.constant 0 : index
    %134 = vector.load %arg1[%c0_240, %c16_241, %c1_242, %c0_243] : memref<2x44x11x16xf32, #tpu.memory_space<vmem>>, vector<1x1x10x16xf32>
    %135 = vector.shape_cast %134 : vector<1x1x10x16xf32> to vector<10x16xf32>
    %c0_244 = arith.constant 0 : index
    %c17_245 = arith.constant 17 : index
    %c0_246 = arith.constant 0 : index
    %c0_247 = arith.constant 0 : index
    %136 = vector.load %arg1[%c0_244, %c17_245, %c0_246, %c0_247] : memref<2x44x11x16xf32, #tpu.memory_space<vmem>>, vector<1x1x10x16xf32>
    %137 = vector.shape_cast %136 : vector<1x1x10x16xf32> to vector<10x16xf32>
    %c0_248 = arith.constant 0 : index
    %c17_249 = arith.constant 17 : index
    %c1_250 = arith.constant 1 : index
    %c0_251 = arith.constant 0 : index
    %138 = vector.load %arg1[%c0_248, %c17_249, %c1_250, %c0_251] : memref<2x44x11x16xf32, #tpu.memory_space<vmem>>, vector<1x1x10x16xf32>
    %139 = vector.shape_cast %138 : vector<1x1x10x16xf32> to vector<10x16xf32>
    %c0_252 = arith.constant 0 : index
    %c18_253 = arith.constant 18 : index
    %c0_254 = arith.constant 0 : index
    %c0_255 = arith.constant 0 : index
    %140 = vector.load %arg1[%c0_252, %c18_253, %c0_254, %c0_255] : memref<2x44x11x16xf32, #tpu.memory_space<vmem>>, vector<1x1x10x16xf32>
    %141 = vector.shape_cast %140 : vector<1x1x10x16xf32> to vector<10x16xf32>
    %c0_256 = arith.constant 0 : index
    %c18_257 = arith.constant 18 : index
    %c1_258 = arith.constant 1 : index
    %c0_259 = arith.constant 0 : index
    %142 = vector.load %arg1[%c0_256, %c18_257, %c1_258, %c0_259] : memref<2x44x11x16xf32, #tpu.memory_space<vmem>>, vector<1x1x10x16xf32>
    %143 = vector.shape_cast %142 : vector<1x1x10x16xf32> to vector<10x16xf32>
    %c0_260 = arith.constant 0 : index
    %c19_261 = arith.constant 19 : index
    %c0_262 = arith.constant 0 : index
    %c0_263 = arith.constant 0 : index
    %144 = vector.load %arg1[%c0_260, %c19_261, %c0_262, %c0_263] : memref<2x44x11x16xf32, #tpu.memory_space<vmem>>, vector<1x1x10x16xf32>
    %145 = vector.shape_cast %144 : vector<1x1x10x16xf32> to vector<10x16xf32>
    %c0_264 = arith.constant 0 : index
    %c19_265 = arith.constant 19 : index
    %c1_266 = arith.constant 1 : index
    %c0_267 = arith.constant 0 : index
    %146 = vector.load %arg1[%c0_264, %c19_265, %c1_266, %c0_267] : memref<2x44x11x16xf32, #tpu.memory_space<vmem>>, vector<1x1x10x16xf32>
    %147 = vector.shape_cast %146 : vector<1x1x10x16xf32> to vector<10x16xf32>
    %c0_268 = arith.constant 0 : index
    %c20 = arith.constant 20 : index
    %c0_269 = arith.constant 0 : index
    %c0_270 = arith.constant 0 : index
    %148 = vector.load %arg1[%c0_268, %c20, %c0_269, %c0_270] : memref<2x44x11x16xf32, #tpu.memory_space<vmem>>, vector<1x1x10x16xf32>
    %149 = vector.shape_cast %148 : vector<1x1x10x16xf32> to vector<10x16xf32>
    %c0_271 = arith.constant 0 : index
    %c20_272 = arith.constant 20 : index
    %c1_273 = arith.constant 1 : index
    %c0_274 = arith.constant 0 : index
    %150 = vector.load %arg1[%c0_271, %c20_272, %c1_273, %c0_274] : memref<2x44x11x16xf32, #tpu.memory_space<vmem>>, vector<1x1x10x16xf32>
    %151 = vector.shape_cast %150 : vector<1x1x10x16xf32> to vector<10x16xf32>
    %c0_275 = arith.constant 0 : index
    %c21 = arith.constant 21 : index
    %c0_276 = arith.constant 0 : index
    %c0_277 = arith.constant 0 : index
    %152 = vector.load %arg1[%c0_275, %c21, %c0_276, %c0_277] : memref<2x44x11x16xf32, #tpu.memory_space<vmem>>, vector<1x1x10x16xf32>
    %153 = vector.shape_cast %152 : vector<1x1x10x16xf32> to vector<10x16xf32>
    %c0_278 = arith.constant 0 : index
    %c21_279 = arith.constant 21 : index
    %c1_280 = arith.constant 1 : index
    %c0_281 = arith.constant 0 : index
    %154 = vector.load %arg1[%c0_278, %c21_279, %c1_280, %c0_281] : memref<2x44x11x16xf32, #tpu.memory_space<vmem>>, vector<1x1x10x16xf32>
    %155 = vector.shape_cast %154 : vector<1x1x10x16xf32> to vector<10x16xf32>
    %c0_282 = arith.constant 0 : index
    %c22 = arith.constant 22 : index
    %c0_283 = arith.constant 0 : index
    %c0_284 = arith.constant 0 : index
    %156 = vector.load %arg1[%c0_282, %c22, %c0_283, %c0_284] : memref<2x44x11x16xf32, #tpu.memory_space<vmem>>, vector<1x1x10x16xf32>
    %157 = vector.shape_cast %156 : vector<1x1x10x16xf32> to vector<10x16xf32>
    %c0_285 = arith.constant 0 : index
    %c22_286 = arith.constant 22 : index
    %c1_287 = arith.constant 1 : index
    %c0_288 = arith.constant 0 : index
    %158 = vector.load %arg1[%c0_285, %c22_286, %c1_287, %c0_288] : memref<2x44x11x16xf32, #tpu.memory_space<vmem>>, vector<1x1x10x16xf32>
    %159 = vector.shape_cast %158 : vector<1x1x10x16xf32> to vector<10x16xf32>
    %c0_289 = arith.constant 0 : index
    %c23 = arith.constant 23 : index
    %c0_290 = arith.constant 0 : index
    %c0_291 = arith.constant 0 : index
    %160 = vector.load %arg1[%c0_289, %c23, %c0_290, %c0_291] : memref<2x44x11x16xf32, #tpu.memory_space<vmem>>, vector<1x1x10x16xf32>
    %161 = vector.shape_cast %160 : vector<1x1x10x16xf32> to vector<10x16xf32>
    %c0_292 = arith.constant 0 : index
    %c23_293 = arith.constant 23 : index
    %c1_294 = arith.constant 1 : index
    %c0_295 = arith.constant 0 : index
    %162 = vector.load %arg1[%c0_292, %c23_293, %c1_294, %c0_295] : memref<2x44x11x16xf32, #tpu.memory_space<vmem>>, vector<1x1x10x16xf32>
    %163 = vector.shape_cast %162 : vector<1x1x10x16xf32> to vector<10x16xf32>
    %164 = tpu.concatenate %133, %135, %137, %139, %141, %143, %145, %147, %149, %151, %153, %155, %157, %159, %161, %163 in 1 : vector<10x16xf32>, vector<10x16xf32>, vector<10x16xf32>, vector<10x16xf32>, vector<10x16xf32>, vector<10x16xf32>, vector<10x16xf32>, vector<10x16xf32>, vector<10x16xf32>, vector<10x16xf32>, vector<10x16xf32>, vector<10x16xf32>, vector<10x16xf32>, vector<10x16xf32>, vector<10x16xf32>, vector<10x16xf32> -> vector<10x256xf32>
    %c0_296 = arith.constant 0 : index
    %c20_297 = arith.constant 20 : index
    %c0_298 = arith.constant 0 : index
    %c0_299 = arith.constant 0 : index
    %165 = vector.load %arg1[%c0_296, %c20_297, %c0_298, %c0_299] : memref<2x44x11x16xf32, #tpu.memory_space<vmem>>, vector<1x1x10x16xf32>
    %166 = vector.shape_cast %165 : vector<1x1x10x16xf32> to vector<10x16xf32>
    %c0_300 = arith.constant 0 : index
    %c20_301 = arith.constant 20 : index
    %c1_302 = arith.constant 1 : index
    %c0_303 = arith.constant 0 : index
    %167 = vector.load %arg1[%c0_300, %c20_301, %c1_302, %c0_303] : memref<2x44x11x16xf32, #tpu.memory_space<vmem>>, vector<1x1x10x16xf32>
    %168 = vector.shape_cast %167 : vector<1x1x10x16xf32> to vector<10x16xf32>
    %c0_304 = arith.constant 0 : index
    %c21_305 = arith.constant 21 : index
    %c0_306 = arith.constant 0 : index
    %c0_307 = arith.constant 0 : index
    %169 = vector.load %arg1[%c0_304, %c21_305, %c0_306, %c0_307] : memref<2x44x11x16xf32, #tpu.memory_space<vmem>>, vector<1x1x10x16xf32>
    %170 = vector.shape_cast %169 : vector<1x1x10x16xf32> to vector<10x16xf32>
    %c0_308 = arith.constant 0 : index
    %c21_309 = arith.constant 21 : index
    %c1_310 = arith.constant 1 : index
    %c0_311 = arith.constant 0 : index
    %171 = vector.load %arg1[%c0_308, %c21_309, %c1_310, %c0_311] : memref<2x44x11x16xf32, #tpu.memory_space<vmem>>, vector<1x1x10x16xf32>
    %172 = vector.shape_cast %171 : vector<1x1x10x16xf32> to vector<10x16xf32>
    %c0_312 = arith.constant 0 : index
    %c22_313 = arith.constant 22 : index
    %c0_314 = arith.constant 0 : index
    %c0_315 = arith.constant 0 : index
    %173 = vector.load %arg1[%c0_312, %c22_313, %c0_314, %c0_315] : memref<2x44x11x16xf32, #tpu.memory_space<vmem>>, vector<1x1x10x16xf32>
    %174 = vector.shape_cast %173 : vector<1x1x10x16xf32> to vector<10x16xf32>
    %c0_316 = arith.constant 0 : index
    %c22_317 = arith.constant 22 : index
    %c1_318 = arith.constant 1 : index
    %c0_319 = arith.constant 0 : index
    %175 = vector.load %arg1[%c0_316, %c22_317, %c1_318, %c0_319] : memref<2x44x11x16xf32, #tpu.memory_space<vmem>>, vector<1x1x10x16xf32>
    %176 = vector.shape_cast %175 : vector<1x1x10x16xf32> to vector<10x16xf32>
    %c0_320 = arith.constant 0 : index
    %c23_321 = arith.constant 23 : index
    %c0_322 = arith.constant 0 : index
    %c0_323 = arith.constant 0 : index
    %177 = vector.load %arg1[%c0_320, %c23_321, %c0_322, %c0_323] : memref<2x44x11x16xf32, #tpu.memory_space<vmem>>, vector<1x1x10x16xf32>
    %178 = vector.shape_cast %177 : vector<1x1x10x16xf32> to vector<10x16xf32>
    %c0_324 = arith.constant 0 : index
    %c23_325 = arith.constant 23 : index
    %c1_326 = arith.constant 1 : index
    %c0_327 = arith.constant 0 : index
    %179 = vector.load %arg1[%c0_324, %c23_325, %c1_326, %c0_327] : memref<2x44x11x16xf32, #tpu.memory_space<vmem>>, vector<1x1x10x16xf32>
    %180 = vector.shape_cast %179 : vector<1x1x10x16xf32> to vector<10x16xf32>
    %c0_328 = arith.constant 0 : index
    %c24 = arith.constant 24 : index
    %c0_329 = arith.constant 0 : index
    %c0_330 = arith.constant 0 : index
    %181 = vector.load %arg1[%c0_328, %c24, %c0_329, %c0_330] : memref<2x44x11x16xf32, #tpu.memory_space<vmem>>, vector<1x1x10x16xf32>
    %182 = vector.shape_cast %181 : vector<1x1x10x16xf32> to vector<10x16xf32>
    %c0_331 = arith.constant 0 : index
    %c24_332 = arith.constant 24 : index
    %c1_333 = arith.constant 1 : index
    %c0_334 = arith.constant 0 : index
    %183 = vector.load %arg1[%c0_331, %c24_332, %c1_333, %c0_334] : memref<2x44x11x16xf32, #tpu.memory_space<vmem>>, vector<1x1x10x16xf32>
    %184 = vector.shape_cast %183 : vector<1x1x10x16xf32> to vector<10x16xf32>
    %c0_335 = arith.constant 0 : index
    %c25 = arith.constant 25 : index
    %c0_336 = arith.constant 0 : index
    %c0_337 = arith.constant 0 : index
    %185 = vector.load %arg1[%c0_335, %c25, %c0_336, %c0_337] : memref<2x44x11x16xf32, #tpu.memory_space<vmem>>, vector<1x1x10x16xf32>
    %186 = vector.shape_cast %185 : vector<1x1x10x16xf32> to vector<10x16xf32>
    %c0_338 = arith.constant 0 : index
    %c25_339 = arith.constant 25 : index
    %c1_340 = arith.constant 1 : index
    %c0_341 = arith.constant 0 : index
    %187 = vector.load %arg1[%c0_338, %c25_339, %c1_340, %c0_341] : memref<2x44x11x16xf32, #tpu.memory_space<vmem>>, vector<1x1x10x16xf32>
    %188 = vector.shape_cast %187 : vector<1x1x10x16xf32> to vector<10x16xf32>
    %c0_342 = arith.constant 0 : index
    %c26 = arith.constant 26 : index
    %c0_343 = arith.constant 0 : index
    %c0_344 = arith.constant 0 : index
    %189 = vector.load %arg1[%c0_342, %c26, %c0_343, %c0_344] : memref<2x44x11x16xf32, #tpu.memory_space<vmem>>, vector<1x1x10x16xf32>
    %190 = vector.shape_cast %189 : vector<1x1x10x16xf32> to vector<10x16xf32>
    %c0_345 = arith.constant 0 : index
    %c26_346 = arith.constant 26 : index
    %c1_347 = arith.constant 1 : index
    %c0_348 = arith.constant 0 : index
    %191 = vector.load %arg1[%c0_345, %c26_346, %c1_347, %c0_348] : memref<2x44x11x16xf32, #tpu.memory_space<vmem>>, vector<1x1x10x16xf32>
    %192 = vector.shape_cast %191 : vector<1x1x10x16xf32> to vector<10x16xf32>
    %c0_349 = arith.constant 0 : index
    %c27 = arith.constant 27 : index
    %c0_350 = arith.constant 0 : index
    %c0_351 = arith.constant 0 : index
    %193 = vector.load %arg1[%c0_349, %c27, %c0_350, %c0_351] : memref<2x44x11x16xf32, #tpu.memory_space<vmem>>, vector<1x1x10x16xf32>
    %194 = vector.shape_cast %193 : vector<1x1x10x16xf32> to vector<10x16xf32>
    %c0_352 = arith.constant 0 : index
    %c27_353 = arith.constant 27 : index
    %c1_354 = arith.constant 1 : index
    %c0_355 = arith.constant 0 : index
    %195 = vector.load %arg1[%c0_352, %c27_353, %c1_354, %c0_355] : memref<2x44x11x16xf32, #tpu.memory_space<vmem>>, vector<1x1x10x16xf32>
    %196 = vector.shape_cast %195 : vector<1x1x10x16xf32> to vector<10x16xf32>
    %197 = tpu.concatenate %166, %168, %170, %172, %174, %176, %178, %180, %182, %184, %186, %188, %190, %192, %194, %196 in 1 : vector<10x16xf32>, vector<10x16xf32>, vector<10x16xf32>, vector<10x16xf32>, vector<10x16xf32>, vector<10x16xf32>, vector<10x16xf32>, vector<10x16xf32>, vector<10x16xf32>, vector<10x16xf32>, vector<10x16xf32>, vector<10x16xf32>, vector<10x16xf32>, vector<10x16xf32>, vector<10x16xf32>, vector<10x16xf32> -> vector<10x256xf32>
    %c0_356 = arith.constant 0 : index
    %c24_357 = arith.constant 24 : index
    %c0_358 = arith.constant 0 : index
    %c0_359 = arith.constant 0 : index
    %198 = vector.load %arg1[%c0_356, %c24_357, %c0_358, %c0_359] : memref<2x44x11x16xf32, #tpu.memory_space<vmem>>, vector<1x1x10x16xf32>
    %199 = vector.shape_cast %198 : vector<1x1x10x16xf32> to vector<10x16xf32>
    %c0_360 = arith.constant 0 : index
    %c24_361 = arith.constant 24 : index
    %c1_362 = arith.constant 1 : index
    %c0_363 = arith.constant 0 : index
    %200 = vector.load %arg1[%c0_360, %c24_361, %c1_362, %c0_363] : memref<2x44x11x16xf32, #tpu.memory_space<vmem>>, vector<1x1x10x16xf32>
    %201 = vector.shape_cast %200 : vector<1x1x10x16xf32> to vector<10x16xf32>
    %c0_364 = arith.constant 0 : index
    %c25_365 = arith.constant 25 : index
    %c0_366 = arith.constant 0 : index
    %c0_367 = arith.constant 0 : index
    %202 = vector.load %arg1[%c0_364, %c25_365, %c0_366, %c0_367] : memref<2x44x11x16xf32, #tpu.memory_space<vmem>>, vector<1x1x10x16xf32>
    %203 = vector.shape_cast %202 : vector<1x1x10x16xf32> to vector<10x16xf32>
    %c0_368 = arith.constant 0 : index
    %c25_369 = arith.constant 25 : index
    %c1_370 = arith.constant 1 : index
    %c0_371 = arith.constant 0 : index
    %204 = vector.load %arg1[%c0_368, %c25_369, %c1_370, %c0_371] : memref<2x44x11x16xf32, #tpu.memory_space<vmem>>, vector<1x1x10x16xf32>
    %205 = vector.shape_cast %204 : vector<1x1x10x16xf32> to vector<10x16xf32>
    %c0_372 = arith.constant 0 : index
    %c26_373 = arith.constant 26 : index
    %c0_374 = arith.constant 0 : index
    %c0_375 = arith.constant 0 : index
    %206 = vector.load %arg1[%c0_372, %c26_373, %c0_374, %c0_375] : memref<2x44x11x16xf32, #tpu.memory_space<vmem>>, vector<1x1x10x16xf32>
    %207 = vector.shape_cast %206 : vector<1x1x10x16xf32> to vector<10x16xf32>
    %c0_376 = arith.constant 0 : index
    %c26_377 = arith.constant 26 : index
    %c1_378 = arith.constant 1 : index
    %c0_379 = arith.constant 0 : index
    %208 = vector.load %arg1[%c0_376, %c26_377, %c1_378, %c0_379] : memref<2x44x11x16xf32, #tpu.memory_space<vmem>>, vector<1x1x10x16xf32>
    %209 = vector.shape_cast %208 : vector<1x1x10x16xf32> to vector<10x16xf32>
    %c0_380 = arith.constant 0 : index
    %c27_381 = arith.constant 27 : index
    %c0_382 = arith.constant 0 : index
    %c0_383 = arith.constant 0 : index
    %210 = vector.load %arg1[%c0_380, %c27_381, %c0_382, %c0_383] : memref<2x44x11x16xf32, #tpu.memory_space<vmem>>, vector<1x1x10x16xf32>
    %211 = vector.shape_cast %210 : vector<1x1x10x16xf32> to vector<10x16xf32>
    %c0_384 = arith.constant 0 : index
    %c27_385 = arith.constant 27 : index
    %c1_386 = arith.constant 1 : index
    %c0_387 = arith.constant 0 : index
    %212 = vector.load %arg1[%c0_384, %c27_385, %c1_386, %c0_387] : memref<2x44x11x16xf32, #tpu.memory_space<vmem>>, vector<1x1x10x16xf32>
    %213 = vector.shape_cast %212 : vector<1x1x10x16xf32> to vector<10x16xf32>
    %c0_388 = arith.constant 0 : index
    %c28 = arith.constant 28 : index
    %c0_389 = arith.constant 0 : index
    %c0_390 = arith.constant 0 : index
    %214 = vector.load %arg1[%c0_388, %c28, %c0_389, %c0_390] : memref<2x44x11x16xf32, #tpu.memory_space<vmem>>, vector<1x1x10x16xf32>
    %215 = vector.shape_cast %214 : vector<1x1x10x16xf32> to vector<10x16xf32>
    %c0_391 = arith.constant 0 : index
    %c28_392 = arith.constant 28 : index
    %c1_393 = arith.constant 1 : index
    %c0_394 = arith.constant 0 : index
    %216 = vector.load %arg1[%c0_391, %c28_392, %c1_393, %c0_394] : memref<2x44x11x16xf32, #tpu.memory_space<vmem>>, vector<1x1x10x16xf32>
    %217 = vector.shape_cast %216 : vector<1x1x10x16xf32> to vector<10x16xf32>
    %c0_395 = arith.constant 0 : index
    %c29 = arith.constant 29 : index
    %c0_396 = arith.constant 0 : index
    %c0_397 = arith.constant 0 : index
    %218 = vector.load %arg1[%c0_395, %c29, %c0_396, %c0_397] : memref<2x44x11x16xf32, #tpu.memory_space<vmem>>, vector<1x1x10x16xf32>
    %219 = vector.shape_cast %218 : vector<1x1x10x16xf32> to vector<10x16xf32>
    %c0_398 = arith.constant 0 : index
    %c29_399 = arith.constant 29 : index
    %c1_400 = arith.constant 1 : index
    %c0_401 = arith.constant 0 : index
    %220 = vector.load %arg1[%c0_398, %c29_399, %c1_400, %c0_401] : memref<2x44x11x16xf32, #tpu.memory_space<vmem>>, vector<1x1x10x16xf32>
    %221 = vector.shape_cast %220 : vector<1x1x10x16xf32> to vector<10x16xf32>
    %c0_402 = arith.constant 0 : index
    %c30 = arith.constant 30 : index
    %c0_403 = arith.constant 0 : index
    %c0_404 = arith.constant 0 : index
    %222 = vector.load %arg1[%c0_402, %c30, %c0_403, %c0_404] : memref<2x44x11x16xf32, #tpu.memory_space<vmem>>, vector<1x1x10x16xf32>
    %223 = vector.shape_cast %222 : vector<1x1x10x16xf32> to vector<10x16xf32>
    %c0_405 = arith.constant 0 : index
    %c30_406 = arith.constant 30 : index
    %c1_407 = arith.constant 1 : index
    %c0_408 = arith.constant 0 : index
    %224 = vector.load %arg1[%c0_405, %c30_406, %c1_407, %c0_408] : memref<2x44x11x16xf32, #tpu.memory_space<vmem>>, vector<1x1x10x16xf32>
    %225 = vector.shape_cast %224 : vector<1x1x10x16xf32> to vector<10x16xf32>
    %c0_409 = arith.constant 0 : index
    %c31 = arith.constant 31 : index
    %c0_410 = arith.constant 0 : index
    %c0_411 = arith.constant 0 : index
    %226 = vector.load %arg1[%c0_409, %c31, %c0_410, %c0_411] : memref<2x44x11x16xf32, #tpu.memory_space<vmem>>, vector<1x1x10x16xf32>
    %227 = vector.shape_cast %226 : vector<1x1x10x16xf32> to vector<10x16xf32>
    %c0_412 = arith.constant 0 : index
    %c31_413 = arith.constant 31 : index
    %c1_414 = arith.constant 1 : index
    %c0_415 = arith.constant 0 : index
    %228 = vector.load %arg1[%c0_412, %c31_413, %c1_414, %c0_415] : memref<2x44x11x16xf32, #tpu.memory_space<vmem>>, vector<1x1x10x16xf32>
    %229 = vector.shape_cast %228 : vector<1x1x10x16xf32> to vector<10x16xf32>
    %230 = tpu.concatenate %199, %201, %203, %205, %207, %209, %211, %213, %215, %217, %219, %221, %223, %225, %227, %229 in 1 : vector<10x16xf32>, vector<10x16xf32>, vector<10x16xf32>, vector<10x16xf32>, vector<10x16xf32>, vector<10x16xf32>, vector<10x16xf32>, vector<10x16xf32>, vector<10x16xf32>, vector<10x16xf32>, vector<10x16xf32>, vector<10x16xf32>, vector<10x16xf32>, vector<10x16xf32>, vector<10x16xf32>, vector<10x16xf32> -> vector<10x256xf32>
    %c0_416 = arith.constant 0 : index
    %c28_417 = arith.constant 28 : index
    %c0_418 = arith.constant 0 : index
    %c0_419 = arith.constant 0 : index
    %231 = vector.load %arg1[%c0_416, %c28_417, %c0_418, %c0_419] : memref<2x44x11x16xf32, #tpu.memory_space<vmem>>, vector<1x1x10x16xf32>
    %232 = vector.shape_cast %231 : vector<1x1x10x16xf32> to vector<10x16xf32>
    %c0_420 = arith.constant 0 : index
    %c28_421 = arith.constant 28 : index
    %c1_422 = arith.constant 1 : index
    %c0_423 = arith.constant 0 : index
    %233 = vector.load %arg1[%c0_420, %c28_421, %c1_422, %c0_423] : memref<2x44x11x16xf32, #tpu.memory_space<vmem>>, vector<1x1x10x16xf32>
    %234 = vector.shape_cast %233 : vector<1x1x10x16xf32> to vector<10x16xf32>
    %c0_424 = arith.constant 0 : index
    %c29_425 = arith.constant 29 : index
    %c0_426 = arith.constant 0 : index
    %c0_427 = arith.constant 0 : index
    %235 = vector.load %arg1[%c0_424, %c29_425, %c0_426, %c0_427] : memref<2x44x11x16xf32, #tpu.memory_space<vmem>>, vector<1x1x10x16xf32>
    %236 = vector.shape_cast %235 : vector<1x1x10x16xf32> to vector<10x16xf32>
    %c0_428 = arith.constant 0 : index
    %c29_429 = arith.constant 29 : index
    %c1_430 = arith.constant 1 : index
    %c0_431 = arith.constant 0 : index
    %237 = vector.load %arg1[%c0_428, %c29_429, %c1_430, %c0_431] : memref<2x44x11x16xf32, #tpu.memory_space<vmem>>, vector<1x1x10x16xf32>
    %238 = vector.shape_cast %237 : vector<1x1x10x16xf32> to vector<10x16xf32>
    %c0_432 = arith.constant 0 : index
    %c30_433 = arith.constant 30 : index
    %c0_434 = arith.constant 0 : index
    %c0_435 = arith.constant 0 : index
    %239 = vector.load %arg1[%c0_432, %c30_433, %c0_434, %c0_435] : memref<2x44x11x16xf32, #tpu.memory_space<vmem>>, vector<1x1x10x16xf32>
    %240 = vector.shape_cast %239 : vector<1x1x10x16xf32> to vector<10x16xf32>
    %c0_436 = arith.constant 0 : index
    %c30_437 = arith.constant 30 : index
    %c1_438 = arith.constant 1 : index
    %c0_439 = arith.constant 0 : index
    %241 = vector.load %arg1[%c0_436, %c30_437, %c1_438, %c0_439] : memref<2x44x11x16xf32, #tpu.memory_space<vmem>>, vector<1x1x10x16xf32>
    %242 = vector.shape_cast %241 : vector<1x1x10x16xf32> to vector<10x16xf32>
    %c0_440 = arith.constant 0 : index
    %c31_441 = arith.constant 31 : index
    %c0_442 = arith.constant 0 : index
    %c0_443 = arith.constant 0 : index
    %243 = vector.load %arg1[%c0_440, %c31_441, %c0_442, %c0_443] : memref<2x44x11x16xf32, #tpu.memory_space<vmem>>, vector<1x1x10x16xf32>
    %244 = vector.shape_cast %243 : vector<1x1x10x16xf32> to vector<10x16xf32>
    %c0_444 = arith.constant 0 : index
    %c31_445 = arith.constant 31 : index
    %c1_446 = arith.constant 1 : index
    %c0_447 = arith.constant 0 : index
    %245 = vector.load %arg1[%c0_444, %c31_445, %c1_446, %c0_447] : memref<2x44x11x16xf32, #tpu.memory_space<vmem>>, vector<1x1x10x16xf32>
    %246 = vector.shape_cast %245 : vector<1x1x10x16xf32> to vector<10x16xf32>
    %c0_448 = arith.constant 0 : index
    %c32 = arith.constant 32 : index
    %c0_449 = arith.constant 0 : index
    %c0_450 = arith.constant 0 : index
    %247 = vector.load %arg1[%c0_448, %c32, %c0_449, %c0_450] : memref<2x44x11x16xf32, #tpu.memory_space<vmem>>, vector<1x1x10x16xf32>
    %248 = vector.shape_cast %247 : vector<1x1x10x16xf32> to vector<10x16xf32>
    %c0_451 = arith.constant 0 : index
    %c32_452 = arith.constant 32 : index
    %c1_453 = arith.constant 1 : index
    %c0_454 = arith.constant 0 : index
    %249 = vector.load %arg1[%c0_451, %c32_452, %c1_453, %c0_454] : memref<2x44x11x16xf32, #tpu.memory_space<vmem>>, vector<1x1x10x16xf32>
    %250 = vector.shape_cast %249 : vector<1x1x10x16xf32> to vector<10x16xf32>
    %c0_455 = arith.constant 0 : index
    %c33 = arith.constant 33 : index
    %c0_456 = arith.constant 0 : index
    %c0_457 = arith.constant 0 : index
    %251 = vector.load %arg1[%c0_455, %c33, %c0_456, %c0_457] : memref<2x44x11x16xf32, #tpu.memory_space<vmem>>, vector<1x1x10x16xf32>
    %252 = vector.shape_cast %251 : vector<1x1x10x16xf32> to vector<10x16xf32>
    %c0_458 = arith.constant 0 : index
    %c33_459 = arith.constant 33 : index
    %c1_460 = arith.constant 1 : index
    %c0_461 = arith.constant 0 : index
    %253 = vector.load %arg1[%c0_458, %c33_459, %c1_460, %c0_461] : memref<2x44x11x16xf32, #tpu.memory_space<vmem>>, vector<1x1x10x16xf32>
    %254 = vector.shape_cast %253 : vector<1x1x10x16xf32> to vector<10x16xf32>
    %c0_462 = arith.constant 0 : index
    %c34 = arith.constant 34 : index
    %c0_463 = arith.constant 0 : index
    %c0_464 = arith.constant 0 : index
    %255 = vector.load %arg1[%c0_462, %c34, %c0_463, %c0_464] : memref<2x44x11x16xf32, #tpu.memory_space<vmem>>, vector<1x1x10x16xf32>
    %256 = vector.shape_cast %255 : vector<1x1x10x16xf32> to vector<10x16xf32>
    %c0_465 = arith.constant 0 : index
    %c34_466 = arith.constant 34 : index
    %c1_467 = arith.constant 1 : index
    %c0_468 = arith.constant 0 : index
    %257 = vector.load %arg1[%c0_465, %c34_466, %c1_467, %c0_468] : memref<2x44x11x16xf32, #tpu.memory_space<vmem>>, vector<1x1x10x16xf32>
    %258 = vector.shape_cast %257 : vector<1x1x10x16xf32> to vector<10x16xf32>
    %c0_469 = arith.constant 0 : index
    %c35 = arith.constant 35 : index
    %c0_470 = arith.constant 0 : index
    %c0_471 = arith.constant 0 : index
    %259 = vector.load %arg1[%c0_469, %c35, %c0_470, %c0_471] : memref<2x44x11x16xf32, #tpu.memory_space<vmem>>, vector<1x1x10x16xf32>
    %260 = vector.shape_cast %259 : vector<1x1x10x16xf32> to vector<10x16xf32>
    %c0_472 = arith.constant 0 : index
    %c35_473 = arith.constant 35 : index
    %c1_474 = arith.constant 1 : index
    %c0_475 = arith.constant 0 : index
    %261 = vector.load %arg1[%c0_472, %c35_473, %c1_474, %c0_475] : memref<2x44x11x16xf32, #tpu.memory_space<vmem>>, vector<1x1x10x16xf32>
    %262 = vector.shape_cast %261 : vector<1x1x10x16xf32> to vector<10x16xf32>
    %263 = tpu.concatenate %232, %234, %236, %238, %240, %242, %244, %246, %248, %250, %252, %254, %256, %258, %260, %262 in 1 : vector<10x16xf32>, vector<10x16xf32>, vector<10x16xf32>, vector<10x16xf32>, vector<10x16xf32>, vector<10x16xf32>, vector<10x16xf32>, vector<10x16xf32>, vector<10x16xf32>, vector<10x16xf32>, vector<10x16xf32>, vector<10x16xf32>, vector<10x16xf32>, vector<10x16xf32>, vector<10x16xf32>, vector<10x16xf32> -> vector<10x256xf32>
    %c0_476 = arith.constant 0 : index
    %c32_477 = arith.constant 32 : index
    %c0_478 = arith.constant 0 : index
    %c0_479 = arith.constant 0 : index
    %264 = vector.load %arg1[%c0_476, %c32_477, %c0_478, %c0_479] : memref<2x44x11x16xf32, #tpu.memory_space<vmem>>, vector<1x1x10x16xf32>
    %265 = vector.shape_cast %264 : vector<1x1x10x16xf32> to vector<10x16xf32>
    %c0_480 = arith.constant 0 : index
    %c32_481 = arith.constant 32 : index
    %c1_482 = arith.constant 1 : index
    %c0_483 = arith.constant 0 : index
    %266 = vector.load %arg1[%c0_480, %c32_481, %c1_482, %c0_483] : memref<2x44x11x16xf32, #tpu.memory_space<vmem>>, vector<1x1x10x16xf32>
    %267 = vector.shape_cast %266 : vector<1x1x10x16xf32> to vector<10x16xf32>
    %c0_484 = arith.constant 0 : index
    %c33_485 = arith.constant 33 : index
    %c0_486 = arith.constant 0 : index
    %c0_487 = arith.constant 0 : index
    %268 = vector.load %arg1[%c0_484, %c33_485, %c0_486, %c0_487] : memref<2x44x11x16xf32, #tpu.memory_space<vmem>>, vector<1x1x10x16xf32>
    %269 = vector.shape_cast %268 : vector<1x1x10x16xf32> to vector<10x16xf32>
    %c0_488 = arith.constant 0 : index
    %c33_489 = arith.constant 33 : index
    %c1_490 = arith.constant 1 : index
    %c0_491 = arith.constant 0 : index
    %270 = vector.load %arg1[%c0_488, %c33_489, %c1_490, %c0_491] : memref<2x44x11x16xf32, #tpu.memory_space<vmem>>, vector<1x1x10x16xf32>
    %271 = vector.shape_cast %270 : vector<1x1x10x16xf32> to vector<10x16xf32>
    %c0_492 = arith.constant 0 : index
    %c34_493 = arith.constant 34 : index
    %c0_494 = arith.constant 0 : index
    %c0_495 = arith.constant 0 : index
    %272 = vector.load %arg1[%c0_492, %c34_493, %c0_494, %c0_495] : memref<2x44x11x16xf32, #tpu.memory_space<vmem>>, vector<1x1x10x16xf32>
    %273 = vector.shape_cast %272 : vector<1x1x10x16xf32> to vector<10x16xf32>
    %c0_496 = arith.constant 0 : index
    %c34_497 = arith.constant 34 : index
    %c1_498 = arith.constant 1 : index
    %c0_499 = arith.constant 0 : index
    %274 = vector.load %arg1[%c0_496, %c34_497, %c1_498, %c0_499] : memref<2x44x11x16xf32, #tpu.memory_space<vmem>>, vector<1x1x10x16xf32>
    %275 = vector.shape_cast %274 : vector<1x1x10x16xf32> to vector<10x16xf32>
    %c0_500 = arith.constant 0 : index
    %c35_501 = arith.constant 35 : index
    %c0_502 = arith.constant 0 : index
    %c0_503 = arith.constant 0 : index
    %276 = vector.load %arg1[%c0_500, %c35_501, %c0_502, %c0_503] : memref<2x44x11x16xf32, #tpu.memory_space<vmem>>, vector<1x1x10x16xf32>
    %277 = vector.shape_cast %276 : vector<1x1x10x16xf32> to vector<10x16xf32>
    %c0_504 = arith.constant 0 : index
    %c35_505 = arith.constant 35 : index
    %c1_506 = arith.constant 1 : index
    %c0_507 = arith.constant 0 : index
    %278 = vector.load %arg1[%c0_504, %c35_505, %c1_506, %c0_507] : memref<2x44x11x16xf32, #tpu.memory_space<vmem>>, vector<1x1x10x16xf32>
    %279 = vector.shape_cast %278 : vector<1x1x10x16xf32> to vector<10x16xf32>
    %c0_508 = arith.constant 0 : index
    %c36 = arith.constant 36 : index
    %c0_509 = arith.constant 0 : index
    %c0_510 = arith.constant 0 : index
    %280 = vector.load %arg1[%c0_508, %c36, %c0_509, %c0_510] : memref<2x44x11x16xf32, #tpu.memory_space<vmem>>, vector<1x1x10x16xf32>
    %281 = vector.shape_cast %280 : vector<1x1x10x16xf32> to vector<10x16xf32>
    %c0_511 = arith.constant 0 : index
    %c36_512 = arith.constant 36 : index
    %c1_513 = arith.constant 1 : index
    %c0_514 = arith.constant 0 : index
    %282 = vector.load %arg1[%c0_511, %c36_512, %c1_513, %c0_514] : memref<2x44x11x16xf32, #tpu.memory_space<vmem>>, vector<1x1x10x16xf32>
    %283 = vector.shape_cast %282 : vector<1x1x10x16xf32> to vector<10x16xf32>
    %c0_515 = arith.constant 0 : index
    %c37 = arith.constant 37 : index
    %c0_516 = arith.constant 0 : index
    %c0_517 = arith.constant 0 : index
    %284 = vector.load %arg1[%c0_515, %c37, %c0_516, %c0_517] : memref<2x44x11x16xf32, #tpu.memory_space<vmem>>, vector<1x1x10x16xf32>
    %285 = vector.shape_cast %284 : vector<1x1x10x16xf32> to vector<10x16xf32>
    %c0_518 = arith.constant 0 : index
    %c37_519 = arith.constant 37 : index
    %c1_520 = arith.constant 1 : index
    %c0_521 = arith.constant 0 : index
    %286 = vector.load %arg1[%c0_518, %c37_519, %c1_520, %c0_521] : memref<2x44x11x16xf32, #tpu.memory_space<vmem>>, vector<1x1x10x16xf32>
    %287 = vector.shape_cast %286 : vector<1x1x10x16xf32> to vector<10x16xf32>
    %c0_522 = arith.constant 0 : index
    %c38 = arith.constant 38 : index
    %c0_523 = arith.constant 0 : index
    %c0_524 = arith.constant 0 : index
    %288 = vector.load %arg1[%c0_522, %c38, %c0_523, %c0_524] : memref<2x44x11x16xf32, #tpu.memory_space<vmem>>, vector<1x1x10x16xf32>
    %289 = vector.shape_cast %288 : vector<1x1x10x16xf32> to vector<10x16xf32>
    %c0_525 = arith.constant 0 : index
    %c38_526 = arith.constant 38 : index
    %c1_527 = arith.constant 1 : index
    %c0_528 = arith.constant 0 : index
    %290 = vector.load %arg1[%c0_525, %c38_526, %c1_527, %c0_528] : memref<2x44x11x16xf32, #tpu.memory_space<vmem>>, vector<1x1x10x16xf32>
    %291 = vector.shape_cast %290 : vector<1x1x10x16xf32> to vector<10x16xf32>
    %c0_529 = arith.constant 0 : index
    %c39 = arith.constant 39 : index
    %c0_530 = arith.constant 0 : index
    %c0_531 = arith.constant 0 : index
    %292 = vector.load %arg1[%c0_529, %c39, %c0_530, %c0_531] : memref<2x44x11x16xf32, #tpu.memory_space<vmem>>, vector<1x1x10x16xf32>
    %293 = vector.shape_cast %292 : vector<1x1x10x16xf32> to vector<10x16xf32>
    %c0_532 = arith.constant 0 : index
    %c39_533 = arith.constant 39 : index
    %c1_534 = arith.constant 1 : index
    %c0_535 = arith.constant 0 : index
    %294 = vector.load %arg1[%c0_532, %c39_533, %c1_534, %c0_535] : memref<2x44x11x16xf32, #tpu.memory_space<vmem>>, vector<1x1x10x16xf32>
    %295 = vector.shape_cast %294 : vector<1x1x10x16xf32> to vector<10x16xf32>
    %296 = tpu.concatenate %265, %267, %269, %271, %273, %275, %277, %279, %281, %283, %285, %287, %289, %291, %293, %295 in 1 : vector<10x16xf32>, vector<10x16xf32>, vector<10x16xf32>, vector<10x16xf32>, vector<10x16xf32>, vector<10x16xf32>, vector<10x16xf32>, vector<10x16xf32>, vector<10x16xf32>, vector<10x16xf32>, vector<10x16xf32>, vector<10x16xf32>, vector<10x16xf32>, vector<10x16xf32>, vector<10x16xf32>, vector<10x16xf32> -> vector<10x256xf32>
    %c0_536 = arith.constant 0 : index
    %c36_537 = arith.constant 36 : index
    %c0_538 = arith.constant 0 : index
    %c0_539 = arith.constant 0 : index
    %297 = vector.load %arg1[%c0_536, %c36_537, %c0_538, %c0_539] : memref<2x44x11x16xf32, #tpu.memory_space<vmem>>, vector<1x1x10x16xf32>
    %298 = vector.shape_cast %297 : vector<1x1x10x16xf32> to vector<10x16xf32>
    %c0_540 = arith.constant 0 : index
    %c36_541 = arith.constant 36 : index
    %c1_542 = arith.constant 1 : index
    %c0_543 = arith.constant 0 : index
    %299 = vector.load %arg1[%c0_540, %c36_541, %c1_542, %c0_543] : memref<2x44x11x16xf32, #tpu.memory_space<vmem>>, vector<1x1x10x16xf32>
    %300 = vector.shape_cast %299 : vector<1x1x10x16xf32> to vector<10x16xf32>
    %c0_544 = arith.constant 0 : index
    %c37_545 = arith.constant 37 : index
    %c0_546 = arith.constant 0 : index
    %c0_547 = arith.constant 0 : index
    %301 = vector.load %arg1[%c0_544, %c37_545, %c0_546, %c0_547] : memref<2x44x11x16xf32, #tpu.memory_space<vmem>>, vector<1x1x10x16xf32>
    %302 = vector.shape_cast %301 : vector<1x1x10x16xf32> to vector<10x16xf32>
    %c0_548 = arith.constant 0 : index
    %c37_549 = arith.constant 37 : index
    %c1_550 = arith.constant 1 : index
    %c0_551 = arith.constant 0 : index
    %303 = vector.load %arg1[%c0_548, %c37_549, %c1_550, %c0_551] : memref<2x44x11x16xf32, #tpu.memory_space<vmem>>, vector<1x1x10x16xf32>
    %304 = vector.shape_cast %303 : vector<1x1x10x16xf32> to vector<10x16xf32>
    %c0_552 = arith.constant 0 : index
    %c38_553 = arith.constant 38 : index
    %c0_554 = arith.constant 0 : index
    %c0_555 = arith.constant 0 : index
    %305 = vector.load %arg1[%c0_552, %c38_553, %c0_554, %c0_555] : memref<2x44x11x16xf32, #tpu.memory_space<vmem>>, vector<1x1x10x16xf32>
    %306 = vector.shape_cast %305 : vector<1x1x10x16xf32> to vector<10x16xf32>
    %c0_556 = arith.constant 0 : index
    %c38_557 = arith.constant 38 : index
    %c1_558 = arith.constant 1 : index
    %c0_559 = arith.constant 0 : index
    %307 = vector.load %arg1[%c0_556, %c38_557, %c1_558, %c0_559] : memref<2x44x11x16xf32, #tpu.memory_space<vmem>>, vector<1x1x10x16xf32>
    %308 = vector.shape_cast %307 : vector<1x1x10x16xf32> to vector<10x16xf32>
    %c0_560 = arith.constant 0 : index
    %c39_561 = arith.constant 39 : index
    %c0_562 = arith.constant 0 : index
    %c0_563 = arith.constant 0 : index
    %309 = vector.load %arg1[%c0_560, %c39_561, %c0_562, %c0_563] : memref<2x44x11x16xf32, #tpu.memory_space<vmem>>, vector<1x1x10x16xf32>
    %310 = vector.shape_cast %309 : vector<1x1x10x16xf32> to vector<10x16xf32>
    %c0_564 = arith.constant 0 : index
    %c39_565 = arith.constant 39 : index
    %c1_566 = arith.constant 1 : index
    %c0_567 = arith.constant 0 : index
    %311 = vector.load %arg1[%c0_564, %c39_565, %c1_566, %c0_567] : memref<2x44x11x16xf32, #tpu.memory_space<vmem>>, vector<1x1x10x16xf32>
    %312 = vector.shape_cast %311 : vector<1x1x10x16xf32> to vector<10x16xf32>
    %c0_568 = arith.constant 0 : index
    %c40 = arith.constant 40 : index
    %c0_569 = arith.constant 0 : index
    %c0_570 = arith.constant 0 : index
    %313 = vector.load %arg1[%c0_568, %c40, %c0_569, %c0_570] : memref<2x44x11x16xf32, #tpu.memory_space<vmem>>, vector<1x1x10x16xf32>
    %314 = vector.shape_cast %313 : vector<1x1x10x16xf32> to vector<10x16xf32>
    %c0_571 = arith.constant 0 : index
    %c40_572 = arith.constant 40 : index
    %c1_573 = arith.constant 1 : index
    %c0_574 = arith.constant 0 : index
    %315 = vector.load %arg1[%c0_571, %c40_572, %c1_573, %c0_574] : memref<2x44x11x16xf32, #tpu.memory_space<vmem>>, vector<1x1x10x16xf32>
    %316 = vector.shape_cast %315 : vector<1x1x10x16xf32> to vector<10x16xf32>
    %c0_575 = arith.constant 0 : index
    %c41 = arith.constant 41 : index
    %c0_576 = arith.constant 0 : index
    %c0_577 = arith.constant 0 : index
    %317 = vector.load %arg1[%c0_575, %c41, %c0_576, %c0_577] : memref<2x44x11x16xf32, #tpu.memory_space<vmem>>, vector<1x1x10x16xf32>
    %318 = vector.shape_cast %317 : vector<1x1x10x16xf32> to vector<10x16xf32>
    %c0_578 = arith.constant 0 : index
    %c41_579 = arith.constant 41 : index
    %c1_580 = arith.constant 1 : index
    %c0_581 = arith.constant 0 : index
    %319 = vector.load %arg1[%c0_578, %c41_579, %c1_580, %c0_581] : memref<2x44x11x16xf32, #tpu.memory_space<vmem>>, vector<1x1x10x16xf32>
    %320 = vector.shape_cast %319 : vector<1x1x10x16xf32> to vector<10x16xf32>
    %c0_582 = arith.constant 0 : index
    %c42 = arith.constant 42 : index
    %c0_583 = arith.constant 0 : index
    %c0_584 = arith.constant 0 : index
    %321 = vector.load %arg1[%c0_582, %c42, %c0_583, %c0_584] : memref<2x44x11x16xf32, #tpu.memory_space<vmem>>, vector<1x1x10x16xf32>
    %322 = vector.shape_cast %321 : vector<1x1x10x16xf32> to vector<10x16xf32>
    %c0_585 = arith.constant 0 : index
    %c42_586 = arith.constant 42 : index
    %c1_587 = arith.constant 1 : index
    %c0_588 = arith.constant 0 : index
    %323 = vector.load %arg1[%c0_585, %c42_586, %c1_587, %c0_588] : memref<2x44x11x16xf32, #tpu.memory_space<vmem>>, vector<1x1x10x16xf32>
    %324 = vector.shape_cast %323 : vector<1x1x10x16xf32> to vector<10x16xf32>
    %c0_589 = arith.constant 0 : index
    %c43 = arith.constant 43 : index
    %c0_590 = arith.constant 0 : index
    %c0_591 = arith.constant 0 : index
    %325 = vector.load %arg1[%c0_589, %c43, %c0_590, %c0_591] : memref<2x44x11x16xf32, #tpu.memory_space<vmem>>, vector<1x1x10x16xf32>
    %326 = vector.shape_cast %325 : vector<1x1x10x16xf32> to vector<10x16xf32>
    %c0_592 = arith.constant 0 : index
    %c43_593 = arith.constant 43 : index
    %c1_594 = arith.constant 1 : index
    %c0_595 = arith.constant 0 : index
    %327 = vector.load %arg1[%c0_592, %c43_593, %c1_594, %c0_595] : memref<2x44x11x16xf32, #tpu.memory_space<vmem>>, vector<1x1x10x16xf32>
    %328 = vector.shape_cast %327 : vector<1x1x10x16xf32> to vector<10x16xf32>
    %329 = tpu.concatenate %298, %300, %302, %304, %306, %308, %310, %312, %314, %316, %318, %320, %322, %324, %326, %328 in 1 : vector<10x16xf32>, vector<10x16xf32>, vector<10x16xf32>, vector<10x16xf32>, vector<10x16xf32>, vector<10x16xf32>, vector<10x16xf32>, vector<10x16xf32>, vector<10x16xf32>, vector<10x16xf32>, vector<10x16xf32>, vector<10x16xf32>, vector<10x16xf32>, vector<10x16xf32>, vector<10x16xf32>, vector<10x16xf32> -> vector<10x256xf32>
    %c1_596 = arith.constant 1 : index
    %c0_597 = arith.constant 0 : index
    %c0_598 = arith.constant 0 : index
    %c0_599 = arith.constant 0 : index
    %330 = vector.load %arg1[%c1_596, %c0_597, %c0_598, %c0_599] : memref<2x44x11x16xf32, #tpu.memory_space<vmem>>, vector<1x1x10x16xf32>
    %331 = vector.shape_cast %330 : vector<1x1x10x16xf32> to vector<10x16xf32>
    %c1_600 = arith.constant 1 : index
    %c0_601 = arith.constant 0 : index
    %c1_602 = arith.constant 1 : index
    %c0_603 = arith.constant 0 : index
    %332 = vector.load %arg1[%c1_600, %c0_601, %c1_602, %c0_603] : memref<2x44x11x16xf32, #tpu.memory_space<vmem>>, vector<1x1x10x16xf32>
    %333 = vector.shape_cast %332 : vector<1x1x10x16xf32> to vector<10x16xf32>
    %c1_604 = arith.constant 1 : index
    %c1_605 = arith.constant 1 : index
    %c0_606 = arith.constant 0 : index
    %c0_607 = arith.constant 0 : index
    %334 = vector.load %arg1[%c1_604, %c1_605, %c0_606, %c0_607] : memref<2x44x11x16xf32, #tpu.memory_space<vmem>>, vector<1x1x10x16xf32>
    %335 = vector.shape_cast %334 : vector<1x1x10x16xf32> to vector<10x16xf32>
    %c1_608 = arith.constant 1 : index
    %c1_609 = arith.constant 1 : index
    %c1_610 = arith.constant 1 : index
    %c0_611 = arith.constant 0 : index
    %336 = vector.load %arg1[%c1_608, %c1_609, %c1_610, %c0_611] : memref<2x44x11x16xf32, #tpu.memory_space<vmem>>, vector<1x1x10x16xf32>
    %337 = vector.shape_cast %336 : vector<1x1x10x16xf32> to vector<10x16xf32>
    %c1_612 = arith.constant 1 : index
    %c2_613 = arith.constant 2 : index
    %c0_614 = arith.constant 0 : index
    %c0_615 = arith.constant 0 : index
    %338 = vector.load %arg1[%c1_612, %c2_613, %c0_614, %c0_615] : memref<2x44x11x16xf32, #tpu.memory_space<vmem>>, vector<1x1x10x16xf32>
    %339 = vector.shape_cast %338 : vector<1x1x10x16xf32> to vector<10x16xf32>
    %c1_616 = arith.constant 1 : index
    %c2_617 = arith.constant 2 : index
    %c1_618 = arith.constant 1 : index
    %c0_619 = arith.constant 0 : index
    %340 = vector.load %arg1[%c1_616, %c2_617, %c1_618, %c0_619] : memref<2x44x11x16xf32, #tpu.memory_space<vmem>>, vector<1x1x10x16xf32>
    %341 = vector.shape_cast %340 : vector<1x1x10x16xf32> to vector<10x16xf32>
    %c1_620 = arith.constant 1 : index
    %c3_621 = arith.constant 3 : index
    %c0_622 = arith.constant 0 : index
    %c0_623 = arith.constant 0 : index
    %342 = vector.load %arg1[%c1_620, %c3_621, %c0_622, %c0_623] : memref<2x44x11x16xf32, #tpu.memory_space<vmem>>, vector<1x1x10x16xf32>
    %343 = vector.shape_cast %342 : vector<1x1x10x16xf32> to vector<10x16xf32>
    %c1_624 = arith.constant 1 : index
    %c3_625 = arith.constant 3 : index
    %c1_626 = arith.constant 1 : index
    %c0_627 = arith.constant 0 : index
    %344 = vector.load %arg1[%c1_624, %c3_625, %c1_626, %c0_627] : memref<2x44x11x16xf32, #tpu.memory_space<vmem>>, vector<1x1x10x16xf32>
    %345 = vector.shape_cast %344 : vector<1x1x10x16xf32> to vector<10x16xf32>
    %c1_628 = arith.constant 1 : index
    %c4_629 = arith.constant 4 : index
    %c0_630 = arith.constant 0 : index
    %c0_631 = arith.constant 0 : index
    %346 = vector.load %arg1[%c1_628, %c4_629, %c0_630, %c0_631] : memref<2x44x11x16xf32, #tpu.memory_space<vmem>>, vector<1x1x10x16xf32>
    %347 = vector.shape_cast %346 : vector<1x1x10x16xf32> to vector<10x16xf32>
    %c1_632 = arith.constant 1 : index
    %c4_633 = arith.constant 4 : index
    %c1_634 = arith.constant 1 : index
    %c0_635 = arith.constant 0 : index
    %348 = vector.load %arg1[%c1_632, %c4_633, %c1_634, %c0_635] : memref<2x44x11x16xf32, #tpu.memory_space<vmem>>, vector<1x1x10x16xf32>
    %349 = vector.shape_cast %348 : vector<1x1x10x16xf32> to vector<10x16xf32>
    %c1_636 = arith.constant 1 : index
    %c5_637 = arith.constant 5 : index
    %c0_638 = arith.constant 0 : index
    %c0_639 = arith.constant 0 : index
    %350 = vector.load %arg1[%c1_636, %c5_637, %c0_638, %c0_639] : memref<2x44x11x16xf32, #tpu.memory_space<vmem>>, vector<1x1x10x16xf32>
    %351 = vector.shape_cast %350 : vector<1x1x10x16xf32> to vector<10x16xf32>
    %c1_640 = arith.constant 1 : index
    %c5_641 = arith.constant 5 : index
    %c1_642 = arith.constant 1 : index
    %c0_643 = arith.constant 0 : index
    %352 = vector.load %arg1[%c1_640, %c5_641, %c1_642, %c0_643] : memref<2x44x11x16xf32, #tpu.memory_space<vmem>>, vector<1x1x10x16xf32>
    %353 = vector.shape_cast %352 : vector<1x1x10x16xf32> to vector<10x16xf32>
    %c1_644 = arith.constant 1 : index
    %c6_645 = arith.constant 6 : index
    %c0_646 = arith.constant 0 : index
    %c0_647 = arith.constant 0 : index
    %354 = vector.load %arg1[%c1_644, %c6_645, %c0_646, %c0_647] : memref<2x44x11x16xf32, #tpu.memory_space<vmem>>, vector<1x1x10x16xf32>
    %355 = vector.shape_cast %354 : vector<1x1x10x16xf32> to vector<10x16xf32>
    %c1_648 = arith.constant 1 : index
    %c6_649 = arith.constant 6 : index
    %c1_650 = arith.constant 1 : index
    %c0_651 = arith.constant 0 : index
    %356 = vector.load %arg1[%c1_648, %c6_649, %c1_650, %c0_651] : memref<2x44x11x16xf32, #tpu.memory_space<vmem>>, vector<1x1x10x16xf32>
    %357 = vector.shape_cast %356 : vector<1x1x10x16xf32> to vector<10x16xf32>
    %c1_652 = arith.constant 1 : index
    %c7_653 = arith.constant 7 : index
    %c0_654 = arith.constant 0 : index
    %c0_655 = arith.constant 0 : index
    %358 = vector.load %arg1[%c1_652, %c7_653, %c0_654, %c0_655] : memref<2x44x11x16xf32, #tpu.memory_space<vmem>>, vector<1x1x10x16xf32>
    %359 = vector.shape_cast %358 : vector<1x1x10x16xf32> to vector<10x16xf32>
    %c1_656 = arith.constant 1 : index
    %c7_657 = arith.constant 7 : index
    %c1_658 = arith.constant 1 : index
    %c0_659 = arith.constant 0 : index
    %360 = vector.load %arg1[%c1_656, %c7_657, %c1_658, %c0_659] : memref<2x44x11x16xf32, #tpu.memory_space<vmem>>, vector<1x1x10x16xf32>
    %361 = vector.shape_cast %360 : vector<1x1x10x16xf32> to vector<10x16xf32>
    %362 = tpu.concatenate %331, %333, %335, %337, %339, %341, %343, %345, %347, %349, %351, %353, %355, %357, %359, %361 in 1 : vector<10x16xf32>, vector<10x16xf32>, vector<10x16xf32>, vector<10x16xf32>, vector<10x16xf32>, vector<10x16xf32>, vector<10x16xf32>, vector<10x16xf32>, vector<10x16xf32>, vector<10x16xf32>, vector<10x16xf32>, vector<10x16xf32>, vector<10x16xf32>, vector<10x16xf32>, vector<10x16xf32>, vector<10x16xf32> -> vector<10x256xf32>
    %c1_660 = arith.constant 1 : index
    %c4_661 = arith.constant 4 : index
    %c0_662 = arith.constant 0 : index
    %c0_663 = arith.constant 0 : index
    %363 = vector.load %arg1[%c1_660, %c4_661, %c0_662, %c0_663] : memref<2x44x11x16xf32, #tpu.memory_space<vmem>>, vector<1x1x10x16xf32>
    %364 = vector.shape_cast %363 : vector<1x1x10x16xf32> to vector<10x16xf32>
    %c1_664 = arith.constant 1 : index
    %c4_665 = arith.constant 4 : index
    %c1_666 = arith.constant 1 : index
    %c0_667 = arith.constant 0 : index
    %365 = vector.load %arg1[%c1_664, %c4_665, %c1_666, %c0_667] : memref<2x44x11x16xf32, #tpu.memory_space<vmem>>, vector<1x1x10x16xf32>
    %366 = vector.shape_cast %365 : vector<1x1x10x16xf32> to vector<10x16xf32>
    %c1_668 = arith.constant 1 : index
    %c5_669 = arith.constant 5 : index
    %c0_670 = arith.constant 0 : index
    %c0_671 = arith.constant 0 : index
    %367 = vector.load %arg1[%c1_668, %c5_669, %c0_670, %c0_671] : memref<2x44x11x16xf32, #tpu.memory_space<vmem>>, vector<1x1x10x16xf32>
    %368 = vector.shape_cast %367 : vector<1x1x10x16xf32> to vector<10x16xf32>
    %c1_672 = arith.constant 1 : index
    %c5_673 = arith.constant 5 : index
    %c1_674 = arith.constant 1 : index
    %c0_675 = arith.constant 0 : index
    %369 = vector.load %arg1[%c1_672, %c5_673, %c1_674, %c0_675] : memref<2x44x11x16xf32, #tpu.memory_space<vmem>>, vector<1x1x10x16xf32>
    %370 = vector.shape_cast %369 : vector<1x1x10x16xf32> to vector<10x16xf32>
    %c1_676 = arith.constant 1 : index
    %c6_677 = arith.constant 6 : index
    %c0_678 = arith.constant 0 : index
    %c0_679 = arith.constant 0 : index
    %371 = vector.load %arg1[%c1_676, %c6_677, %c0_678, %c0_679] : memref<2x44x11x16xf32, #tpu.memory_space<vmem>>, vector<1x1x10x16xf32>
    %372 = vector.shape_cast %371 : vector<1x1x10x16xf32> to vector<10x16xf32>
    %c1_680 = arith.constant 1 : index
    %c6_681 = arith.constant 6 : index
    %c1_682 = arith.constant 1 : index
    %c0_683 = arith.constant 0 : index
    %373 = vector.load %arg1[%c1_680, %c6_681, %c1_682, %c0_683] : memref<2x44x11x16xf32, #tpu.memory_space<vmem>>, vector<1x1x10x16xf32>
    %374 = vector.shape_cast %373 : vector<1x1x10x16xf32> to vector<10x16xf32>
    %c1_684 = arith.constant 1 : index
    %c7_685 = arith.constant 7 : index
    %c0_686 = arith.constant 0 : index
    %c0_687 = arith.constant 0 : index
    %375 = vector.load %arg1[%c1_684, %c7_685, %c0_686, %c0_687] : memref<2x44x11x16xf32, #tpu.memory_space<vmem>>, vector<1x1x10x16xf32>
    %376 = vector.shape_cast %375 : vector<1x1x10x16xf32> to vector<10x16xf32>
    %c1_688 = arith.constant 1 : index
    %c7_689 = arith.constant 7 : index
    %c1_690 = arith.constant 1 : index
    %c0_691 = arith.constant 0 : index
    %377 = vector.load %arg1[%c1_688, %c7_689, %c1_690, %c0_691] : memref<2x44x11x16xf32, #tpu.memory_space<vmem>>, vector<1x1x10x16xf32>
    %378 = vector.shape_cast %377 : vector<1x1x10x16xf32> to vector<10x16xf32>
    %c1_692 = arith.constant 1 : index
    %c8_693 = arith.constant 8 : index
    %c0_694 = arith.constant 0 : index
    %c0_695 = arith.constant 0 : index
    %379 = vector.load %arg1[%c1_692, %c8_693, %c0_694, %c0_695] : memref<2x44x11x16xf32, #tpu.memory_space<vmem>>, vector<1x1x10x16xf32>
    %380 = vector.shape_cast %379 : vector<1x1x10x16xf32> to vector<10x16xf32>
    %c1_696 = arith.constant 1 : index
    %c8_697 = arith.constant 8 : index
    %c1_698 = arith.constant 1 : index
    %c0_699 = arith.constant 0 : index
    %381 = vector.load %arg1[%c1_696, %c8_697, %c1_698, %c0_699] : memref<2x44x11x16xf32, #tpu.memory_space<vmem>>, vector<1x1x10x16xf32>
    %382 = vector.shape_cast %381 : vector<1x1x10x16xf32> to vector<10x16xf32>
    %c1_700 = arith.constant 1 : index
    %c9_701 = arith.constant 9 : index
    %c0_702 = arith.constant 0 : index
    %c0_703 = arith.constant 0 : index
    %383 = vector.load %arg1[%c1_700, %c9_701, %c0_702, %c0_703] : memref<2x44x11x16xf32, #tpu.memory_space<vmem>>, vector<1x1x10x16xf32>
    %384 = vector.shape_cast %383 : vector<1x1x10x16xf32> to vector<10x16xf32>
    %c1_704 = arith.constant 1 : index
    %c9_705 = arith.constant 9 : index
    %c1_706 = arith.constant 1 : index
    %c0_707 = arith.constant 0 : index
    %385 = vector.load %arg1[%c1_704, %c9_705, %c1_706, %c0_707] : memref<2x44x11x16xf32, #tpu.memory_space<vmem>>, vector<1x1x10x16xf32>
    %386 = vector.shape_cast %385 : vector<1x1x10x16xf32> to vector<10x16xf32>
    %c1_708 = arith.constant 1 : index
    %c10_709 = arith.constant 10 : index
    %c0_710 = arith.constant 0 : index
    %c0_711 = arith.constant 0 : index
    %387 = vector.load %arg1[%c1_708, %c10_709, %c0_710, %c0_711] : memref<2x44x11x16xf32, #tpu.memory_space<vmem>>, vector<1x1x10x16xf32>
    %388 = vector.shape_cast %387 : vector<1x1x10x16xf32> to vector<10x16xf32>
    %c1_712 = arith.constant 1 : index
    %c10_713 = arith.constant 10 : index
    %c1_714 = arith.constant 1 : index
    %c0_715 = arith.constant 0 : index
    %389 = vector.load %arg1[%c1_712, %c10_713, %c1_714, %c0_715] : memref<2x44x11x16xf32, #tpu.memory_space<vmem>>, vector<1x1x10x16xf32>
    %390 = vector.shape_cast %389 : vector<1x1x10x16xf32> to vector<10x16xf32>
    %c1_716 = arith.constant 1 : index
    %c11_717 = arith.constant 11 : index
    %c0_718 = arith.constant 0 : index
    %c0_719 = arith.constant 0 : index
    %391 = vector.load %arg1[%c1_716, %c11_717, %c0_718, %c0_719] : memref<2x44x11x16xf32, #tpu.memory_space<vmem>>, vector<1x1x10x16xf32>
    %392 = vector.shape_cast %391 : vector<1x1x10x16xf32> to vector<10x16xf32>
    %c1_720 = arith.constant 1 : index
    %c11_721 = arith.constant 11 : index
    %c1_722 = arith.constant 1 : index
    %c0_723 = arith.constant 0 : index
    %393 = vector.load %arg1[%c1_720, %c11_721, %c1_722, %c0_723] : memref<2x44x11x16xf32, #tpu.memory_space<vmem>>, vector<1x1x10x16xf32>
    %394 = vector.shape_cast %393 : vector<1x1x10x16xf32> to vector<10x16xf32>
    %395 = tpu.concatenate %364, %366, %368, %370, %372, %374, %376, %378, %380, %382, %384, %386, %388, %390, %392, %394 in 1 : vector<10x16xf32>, vector<10x16xf32>, vector<10x16xf32>, vector<10x16xf32>, vector<10x16xf32>, vector<10x16xf32>, vector<10x16xf32>, vector<10x16xf32>, vector<10x16xf32>, vector<10x16xf32>, vector<10x16xf32>, vector<10x16xf32>, vector<10x16xf32>, vector<10x16xf32>, vector<10x16xf32>, vector<10x16xf32> -> vector<10x256xf32>
    %c1_724 = arith.constant 1 : index
    %c8_725 = arith.constant 8 : index
    %c0_726 = arith.constant 0 : index
    %c0_727 = arith.constant 0 : index
    %396 = vector.load %arg1[%c1_724, %c8_725, %c0_726, %c0_727] : memref<2x44x11x16xf32, #tpu.memory_space<vmem>>, vector<1x1x10x16xf32>
    %397 = vector.shape_cast %396 : vector<1x1x10x16xf32> to vector<10x16xf32>
    %c1_728 = arith.constant 1 : index
    %c8_729 = arith.constant 8 : index
    %c1_730 = arith.constant 1 : index
    %c0_731 = arith.constant 0 : index
    %398 = vector.load %arg1[%c1_728, %c8_729, %c1_730, %c0_731] : memref<2x44x11x16xf32, #tpu.memory_space<vmem>>, vector<1x1x10x16xf32>
    %399 = vector.shape_cast %398 : vector<1x1x10x16xf32> to vector<10x16xf32>
    %c1_732 = arith.constant 1 : index
    %c9_733 = arith.constant 9 : index
    %c0_734 = arith.constant 0 : index
    %c0_735 = arith.constant 0 : index
    %400 = vector.load %arg1[%c1_732, %c9_733, %c0_734, %c0_735] : memref<2x44x11x16xf32, #tpu.memory_space<vmem>>, vector<1x1x10x16xf32>
    %401 = vector.shape_cast %400 : vector<1x1x10x16xf32> to vector<10x16xf32>
    %c1_736 = arith.constant 1 : index
    %c9_737 = arith.constant 9 : index
    %c1_738 = arith.constant 1 : index
    %c0_739 = arith.constant 0 : index
    %402 = vector.load %arg1[%c1_736, %c9_737, %c1_738, %c0_739] : memref<2x44x11x16xf32, #tpu.memory_space<vmem>>, vector<1x1x10x16xf32>
    %403 = vector.shape_cast %402 : vector<1x1x10x16xf32> to vector<10x16xf32>
    %c1_740 = arith.constant 1 : index
    %c10_741 = arith.constant 10 : index
    %c0_742 = arith.constant 0 : index
    %c0_743 = arith.constant 0 : index
    %404 = vector.load %arg1[%c1_740, %c10_741, %c0_742, %c0_743] : memref<2x44x11x16xf32, #tpu.memory_space<vmem>>, vector<1x1x10x16xf32>
    %405 = vector.shape_cast %404 : vector<1x1x10x16xf32> to vector<10x16xf32>
    %c1_744 = arith.constant 1 : index
    %c10_745 = arith.constant 10 : index
    %c1_746 = arith.constant 1 : index
    %c0_747 = arith.constant 0 : index
    %406 = vector.load %arg1[%c1_744, %c10_745, %c1_746, %c0_747] : memref<2x44x11x16xf32, #tpu.memory_space<vmem>>, vector<1x1x10x16xf32>
    %407 = vector.shape_cast %406 : vector<1x1x10x16xf32> to vector<10x16xf32>
    %c1_748 = arith.constant 1 : index
    %c11_749 = arith.constant 11 : index
    %c0_750 = arith.constant 0 : index
    %c0_751 = arith.constant 0 : index
    %408 = vector.load %arg1[%c1_748, %c11_749, %c0_750, %c0_751] : memref<2x44x11x16xf32, #tpu.memory_space<vmem>>, vector<1x1x10x16xf32>
    %409 = vector.shape_cast %408 : vector<1x1x10x16xf32> to vector<10x16xf32>
    %c1_752 = arith.constant 1 : index
    %c11_753 = arith.constant 11 : index
    %c1_754 = arith.constant 1 : index
    %c0_755 = arith.constant 0 : index
    %410 = vector.load %arg1[%c1_752, %c11_753, %c1_754, %c0_755] : memref<2x44x11x16xf32, #tpu.memory_space<vmem>>, vector<1x1x10x16xf32>
    %411 = vector.shape_cast %410 : vector<1x1x10x16xf32> to vector<10x16xf32>
    %c1_756 = arith.constant 1 : index
    %c12_757 = arith.constant 12 : index
    %c0_758 = arith.constant 0 : index
    %c0_759 = arith.constant 0 : index
    %412 = vector.load %arg1[%c1_756, %c12_757, %c0_758, %c0_759] : memref<2x44x11x16xf32, #tpu.memory_space<vmem>>, vector<1x1x10x16xf32>
    %413 = vector.shape_cast %412 : vector<1x1x10x16xf32> to vector<10x16xf32>
    %c1_760 = arith.constant 1 : index
    %c12_761 = arith.constant 12 : index
    %c1_762 = arith.constant 1 : index
    %c0_763 = arith.constant 0 : index
    %414 = vector.load %arg1[%c1_760, %c12_761, %c1_762, %c0_763] : memref<2x44x11x16xf32, #tpu.memory_space<vmem>>, vector<1x1x10x16xf32>
    %415 = vector.shape_cast %414 : vector<1x1x10x16xf32> to vector<10x16xf32>
    %c1_764 = arith.constant 1 : index
    %c13_765 = arith.constant 13 : index
    %c0_766 = arith.constant 0 : index
    %c0_767 = arith.constant 0 : index
    %416 = vector.load %arg1[%c1_764, %c13_765, %c0_766, %c0_767] : memref<2x44x11x16xf32, #tpu.memory_space<vmem>>, vector<1x1x10x16xf32>
    %417 = vector.shape_cast %416 : vector<1x1x10x16xf32> to vector<10x16xf32>
    %c1_768 = arith.constant 1 : index
    %c13_769 = arith.constant 13 : index
    %c1_770 = arith.constant 1 : index
    %c0_771 = arith.constant 0 : index
    %418 = vector.load %arg1[%c1_768, %c13_769, %c1_770, %c0_771] : memref<2x44x11x16xf32, #tpu.memory_space<vmem>>, vector<1x1x10x16xf32>
    %419 = vector.shape_cast %418 : vector<1x1x10x16xf32> to vector<10x16xf32>
    %c1_772 = arith.constant 1 : index
    %c14_773 = arith.constant 14 : index
    %c0_774 = arith.constant 0 : index
    %c0_775 = arith.constant 0 : index
    %420 = vector.load %arg1[%c1_772, %c14_773, %c0_774, %c0_775] : memref<2x44x11x16xf32, #tpu.memory_space<vmem>>, vector<1x1x10x16xf32>
    %421 = vector.shape_cast %420 : vector<1x1x10x16xf32> to vector<10x16xf32>
    %c1_776 = arith.constant 1 : index
    %c14_777 = arith.constant 14 : index
    %c1_778 = arith.constant 1 : index
    %c0_779 = arith.constant 0 : index
    %422 = vector.load %arg1[%c1_776, %c14_777, %c1_778, %c0_779] : memref<2x44x11x16xf32, #tpu.memory_space<vmem>>, vector<1x1x10x16xf32>
    %423 = vector.shape_cast %422 : vector<1x1x10x16xf32> to vector<10x16xf32>
    %c1_780 = arith.constant 1 : index
    %c15_781 = arith.constant 15 : index
    %c0_782 = arith.constant 0 : index
    %c0_783 = arith.constant 0 : index
    %424 = vector.load %arg1[%c1_780, %c15_781, %c0_782, %c0_783] : memref<2x44x11x16xf32, #tpu.memory_space<vmem>>, vector<1x1x10x16xf32>
    %425 = vector.shape_cast %424 : vector<1x1x10x16xf32> to vector<10x16xf32>
    %c1_784 = arith.constant 1 : index
    %c15_785 = arith.constant 15 : index
    %c1_786 = arith.constant 1 : index
    %c0_787 = arith.constant 0 : index
    %426 = vector.load %arg1[%c1_784, %c15_785, %c1_786, %c0_787] : memref<2x44x11x16xf32, #tpu.memory_space<vmem>>, vector<1x1x10x16xf32>
    %427 = vector.shape_cast %426 : vector<1x1x10x16xf32> to vector<10x16xf32>
    %428 = tpu.concatenate %397, %399, %401, %403, %405, %407, %409, %411, %413, %415, %417, %419, %421, %423, %425, %427 in 1 : vector<10x16xf32>, vector<10x16xf32>, vector<10x16xf32>, vector<10x16xf32>, vector<10x16xf32>, vector<10x16xf32>, vector<10x16xf32>, vector<10x16xf32>, vector<10x16xf32>, vector<10x16xf32>, vector<10x16xf32>, vector<10x16xf32>, vector<10x16xf32>, vector<10x16xf32>, vector<10x16xf32>, vector<10x16xf32> -> vector<10x256xf32>
    %c1_788 = arith.constant 1 : index
    %c12_789 = arith.constant 12 : index
    %c0_790 = arith.constant 0 : index
    %c0_791 = arith.constant 0 : index
    %429 = vector.load %arg1[%c1_788, %c12_789, %c0_790, %c0_791] : memref<2x44x11x16xf32, #tpu.memory_space<vmem>>, vector<1x1x10x16xf32>
    %430 = vector.shape_cast %429 : vector<1x1x10x16xf32> to vector<10x16xf32>
    %c1_792 = arith.constant 1 : index
    %c12_793 = arith.constant 12 : index
    %c1_794 = arith.constant 1 : index
    %c0_795 = arith.constant 0 : index
    %431 = vector.load %arg1[%c1_792, %c12_793, %c1_794, %c0_795] : memref<2x44x11x16xf32, #tpu.memory_space<vmem>>, vector<1x1x10x16xf32>
    %432 = vector.shape_cast %431 : vector<1x1x10x16xf32> to vector<10x16xf32>
    %c1_796 = arith.constant 1 : index
    %c13_797 = arith.constant 13 : index
    %c0_798 = arith.constant 0 : index
    %c0_799 = arith.constant 0 : index
    %433 = vector.load %arg1[%c1_796, %c13_797, %c0_798, %c0_799] : memref<2x44x11x16xf32, #tpu.memory_space<vmem>>, vector<1x1x10x16xf32>
    %434 = vector.shape_cast %433 : vector<1x1x10x16xf32> to vector<10x16xf32>
    %c1_800 = arith.constant 1 : index
    %c13_801 = arith.constant 13 : index
    %c1_802 = arith.constant 1 : index
    %c0_803 = arith.constant 0 : index
    %435 = vector.load %arg1[%c1_800, %c13_801, %c1_802, %c0_803] : memref<2x44x11x16xf32, #tpu.memory_space<vmem>>, vector<1x1x10x16xf32>
    %436 = vector.shape_cast %435 : vector<1x1x10x16xf32> to vector<10x16xf32>
    %c1_804 = arith.constant 1 : index
    %c14_805 = arith.constant 14 : index
    %c0_806 = arith.constant 0 : index
    %c0_807 = arith.constant 0 : index
    %437 = vector.load %arg1[%c1_804, %c14_805, %c0_806, %c0_807] : memref<2x44x11x16xf32, #tpu.memory_space<vmem>>, vector<1x1x10x16xf32>
    %438 = vector.shape_cast %437 : vector<1x1x10x16xf32> to vector<10x16xf32>
    %c1_808 = arith.constant 1 : index
    %c14_809 = arith.constant 14 : index
    %c1_810 = arith.constant 1 : index
    %c0_811 = arith.constant 0 : index
    %439 = vector.load %arg1[%c1_808, %c14_809, %c1_810, %c0_811] : memref<2x44x11x16xf32, #tpu.memory_space<vmem>>, vector<1x1x10x16xf32>
    %440 = vector.shape_cast %439 : vector<1x1x10x16xf32> to vector<10x16xf32>
    %c1_812 = arith.constant 1 : index
    %c15_813 = arith.constant 15 : index
    %c0_814 = arith.constant 0 : index
    %c0_815 = arith.constant 0 : index
    %441 = vector.load %arg1[%c1_812, %c15_813, %c0_814, %c0_815] : memref<2x44x11x16xf32, #tpu.memory_space<vmem>>, vector<1x1x10x16xf32>
    %442 = vector.shape_cast %441 : vector<1x1x10x16xf32> to vector<10x16xf32>
    %c1_816 = arith.constant 1 : index
    %c15_817 = arith.constant 15 : index
    %c1_818 = arith.constant 1 : index
    %c0_819 = arith.constant 0 : index
    %443 = vector.load %arg1[%c1_816, %c15_817, %c1_818, %c0_819] : memref<2x44x11x16xf32, #tpu.memory_space<vmem>>, vector<1x1x10x16xf32>
    %444 = vector.shape_cast %443 : vector<1x1x10x16xf32> to vector<10x16xf32>
    %c1_820 = arith.constant 1 : index
    %c16_821 = arith.constant 16 : index
    %c0_822 = arith.constant 0 : index
    %c0_823 = arith.constant 0 : index
    %445 = vector.load %arg1[%c1_820, %c16_821, %c0_822, %c0_823] : memref<2x44x11x16xf32, #tpu.memory_space<vmem>>, vector<1x1x10x16xf32>
    %446 = vector.shape_cast %445 : vector<1x1x10x16xf32> to vector<10x16xf32>
    %c1_824 = arith.constant 1 : index
    %c16_825 = arith.constant 16 : index
    %c1_826 = arith.constant 1 : index
    %c0_827 = arith.constant 0 : index
    %447 = vector.load %arg1[%c1_824, %c16_825, %c1_826, %c0_827] : memref<2x44x11x16xf32, #tpu.memory_space<vmem>>, vector<1x1x10x16xf32>
    %448 = vector.shape_cast %447 : vector<1x1x10x16xf32> to vector<10x16xf32>
    %c1_828 = arith.constant 1 : index
    %c17_829 = arith.constant 17 : index
    %c0_830 = arith.constant 0 : index
    %c0_831 = arith.constant 0 : index
    %449 = vector.load %arg1[%c1_828, %c17_829, %c0_830, %c0_831] : memref<2x44x11x16xf32, #tpu.memory_space<vmem>>, vector<1x1x10x16xf32>
    %450 = vector.shape_cast %449 : vector<1x1x10x16xf32> to vector<10x16xf32>
    %c1_832 = arith.constant 1 : index
    %c17_833 = arith.constant 17 : index
    %c1_834 = arith.constant 1 : index
    %c0_835 = arith.constant 0 : index
    %451 = vector.load %arg1[%c1_832, %c17_833, %c1_834, %c0_835] : memref<2x44x11x16xf32, #tpu.memory_space<vmem>>, vector<1x1x10x16xf32>
    %452 = vector.shape_cast %451 : vector<1x1x10x16xf32> to vector<10x16xf32>
    %c1_836 = arith.constant 1 : index
    %c18_837 = arith.constant 18 : index
    %c0_838 = arith.constant 0 : index
    %c0_839 = arith.constant 0 : index
    %453 = vector.load %arg1[%c1_836, %c18_837, %c0_838, %c0_839] : memref<2x44x11x16xf32, #tpu.memory_space<vmem>>, vector<1x1x10x16xf32>
    %454 = vector.shape_cast %453 : vector<1x1x10x16xf32> to vector<10x16xf32>
    %c1_840 = arith.constant 1 : index
    %c18_841 = arith.constant 18 : index
    %c1_842 = arith.constant 1 : index
    %c0_843 = arith.constant 0 : index
    %455 = vector.load %arg1[%c1_840, %c18_841, %c1_842, %c0_843] : memref<2x44x11x16xf32, #tpu.memory_space<vmem>>, vector<1x1x10x16xf32>
    %456 = vector.shape_cast %455 : vector<1x1x10x16xf32> to vector<10x16xf32>
    %c1_844 = arith.constant 1 : index
    %c19_845 = arith.constant 19 : index
    %c0_846 = arith.constant 0 : index
    %c0_847 = arith.constant 0 : index
    %457 = vector.load %arg1[%c1_844, %c19_845, %c0_846, %c0_847] : memref<2x44x11x16xf32, #tpu.memory_space<vmem>>, vector<1x1x10x16xf32>
    %458 = vector.shape_cast %457 : vector<1x1x10x16xf32> to vector<10x16xf32>
    %c1_848 = arith.constant 1 : index
    %c19_849 = arith.constant 19 : index
    %c1_850 = arith.constant 1 : index
    %c0_851 = arith.constant 0 : index
    %459 = vector.load %arg1[%c1_848, %c19_849, %c1_850, %c0_851] : memref<2x44x11x16xf32, #tpu.memory_space<vmem>>, vector<1x1x10x16xf32>
    %460 = vector.shape_cast %459 : vector<1x1x10x16xf32> to vector<10x16xf32>
    %461 = tpu.concatenate %430, %432, %434, %436, %438, %440, %442, %444, %446, %448, %450, %452, %454, %456, %458, %460 in 1 : vector<10x16xf32>, vector<10x16xf32>, vector<10x16xf32>, vector<10x16xf32>, vector<10x16xf32>, vector<10x16xf32>, vector<10x16xf32>, vector<10x16xf32>, vector<10x16xf32>, vector<10x16xf32>, vector<10x16xf32>, vector<10x16xf32>, vector<10x16xf32>, vector<10x16xf32>, vector<10x16xf32>, vector<10x16xf32> -> vector<10x256xf32>
    %c1_852 = arith.constant 1 : index
    %c16_853 = arith.constant 16 : index
    %c0_854 = arith.constant 0 : index
    %c0_855 = arith.constant 0 : index
    %462 = vector.load %arg1[%c1_852, %c16_853, %c0_854, %c0_855] : memref<2x44x11x16xf32, #tpu.memory_space<vmem>>, vector<1x1x10x16xf32>
    %463 = vector.shape_cast %462 : vector<1x1x10x16xf32> to vector<10x16xf32>
    %c1_856 = arith.constant 1 : index
    %c16_857 = arith.constant 16 : index
    %c1_858 = arith.constant 1 : index
    %c0_859 = arith.constant 0 : index
    %464 = vector.load %arg1[%c1_856, %c16_857, %c1_858, %c0_859] : memref<2x44x11x16xf32, #tpu.memory_space<vmem>>, vector<1x1x10x16xf32>
    %465 = vector.shape_cast %464 : vector<1x1x10x16xf32> to vector<10x16xf32>
    %c1_860 = arith.constant 1 : index
    %c17_861 = arith.constant 17 : index
    %c0_862 = arith.constant 0 : index
    %c0_863 = arith.constant 0 : index
    %466 = vector.load %arg1[%c1_860, %c17_861, %c0_862, %c0_863] : memref<2x44x11x16xf32, #tpu.memory_space<vmem>>, vector<1x1x10x16xf32>
    %467 = vector.shape_cast %466 : vector<1x1x10x16xf32> to vector<10x16xf32>
    %c1_864 = arith.constant 1 : index
    %c17_865 = arith.constant 17 : index
    %c1_866 = arith.constant 1 : index
    %c0_867 = arith.constant 0 : index
    %468 = vector.load %arg1[%c1_864, %c17_865, %c1_866, %c0_867] : memref<2x44x11x16xf32, #tpu.memory_space<vmem>>, vector<1x1x10x16xf32>
    %469 = vector.shape_cast %468 : vector<1x1x10x16xf32> to vector<10x16xf32>
    %c1_868 = arith.constant 1 : index
    %c18_869 = arith.constant 18 : index
    %c0_870 = arith.constant 0 : index
    %c0_871 = arith.constant 0 : index
    %470 = vector.load %arg1[%c1_868, %c18_869, %c0_870, %c0_871] : memref<2x44x11x16xf32, #tpu.memory_space<vmem>>, vector<1x1x10x16xf32>
    %471 = vector.shape_cast %470 : vector<1x1x10x16xf32> to vector<10x16xf32>
    %c1_872 = arith.constant 1 : index
    %c18_873 = arith.constant 18 : index
    %c1_874 = arith.constant 1 : index
    %c0_875 = arith.constant 0 : index
    %472 = vector.load %arg1[%c1_872, %c18_873, %c1_874, %c0_875] : memref<2x44x11x16xf32, #tpu.memory_space<vmem>>, vector<1x1x10x16xf32>
    %473 = vector.shape_cast %472 : vector<1x1x10x16xf32> to vector<10x16xf32>
    %c1_876 = arith.constant 1 : index
    %c19_877 = arith.constant 19 : index
    %c0_878 = arith.constant 0 : index
    %c0_879 = arith.constant 0 : index
    %474 = vector.load %arg1[%c1_876, %c19_877, %c0_878, %c0_879] : memref<2x44x11x16xf32, #tpu.memory_space<vmem>>, vector<1x1x10x16xf32>
    %475 = vector.shape_cast %474 : vector<1x1x10x16xf32> to vector<10x16xf32>
    %c1_880 = arith.constant 1 : index
    %c19_881 = arith.constant 19 : index
    %c1_882 = arith.constant 1 : index
    %c0_883 = arith.constant 0 : index
    %476 = vector.load %arg1[%c1_880, %c19_881, %c1_882, %c0_883] : memref<2x44x11x16xf32, #tpu.memory_space<vmem>>, vector<1x1x10x16xf32>
    %477 = vector.shape_cast %476 : vector<1x1x10x16xf32> to vector<10x16xf32>
    %c1_884 = arith.constant 1 : index
    %c20_885 = arith.constant 20 : index
    %c0_886 = arith.constant 0 : index
    %c0_887 = arith.constant 0 : index
    %478 = vector.load %arg1[%c1_884, %c20_885, %c0_886, %c0_887] : memref<2x44x11x16xf32, #tpu.memory_space<vmem>>, vector<1x1x10x16xf32>
    %479 = vector.shape_cast %478 : vector<1x1x10x16xf32> to vector<10x16xf32>
    %c1_888 = arith.constant 1 : index
    %c20_889 = arith.constant 20 : index
    %c1_890 = arith.constant 1 : index
    %c0_891 = arith.constant 0 : index
    %480 = vector.load %arg1[%c1_888, %c20_889, %c1_890, %c0_891] : memref<2x44x11x16xf32, #tpu.memory_space<vmem>>, vector<1x1x10x16xf32>
    %481 = vector.shape_cast %480 : vector<1x1x10x16xf32> to vector<10x16xf32>
    %c1_892 = arith.constant 1 : index
    %c21_893 = arith.constant 21 : index
    %c0_894 = arith.constant 0 : index
    %c0_895 = arith.constant 0 : index
    %482 = vector.load %arg1[%c1_892, %c21_893, %c0_894, %c0_895] : memref<2x44x11x16xf32, #tpu.memory_space<vmem>>, vector<1x1x10x16xf32>
    %483 = vector.shape_cast %482 : vector<1x1x10x16xf32> to vector<10x16xf32>
    %c1_896 = arith.constant 1 : index
    %c21_897 = arith.constant 21 : index
    %c1_898 = arith.constant 1 : index
    %c0_899 = arith.constant 0 : index
    %484 = vector.load %arg1[%c1_896, %c21_897, %c1_898, %c0_899] : memref<2x44x11x16xf32, #tpu.memory_space<vmem>>, vector<1x1x10x16xf32>
    %485 = vector.shape_cast %484 : vector<1x1x10x16xf32> to vector<10x16xf32>
    %c1_900 = arith.constant 1 : index
    %c22_901 = arith.constant 22 : index
    %c0_902 = arith.constant 0 : index
    %c0_903 = arith.constant 0 : index
    %486 = vector.load %arg1[%c1_900, %c22_901, %c0_902, %c0_903] : memref<2x44x11x16xf32, #tpu.memory_space<vmem>>, vector<1x1x10x16xf32>
    %487 = vector.shape_cast %486 : vector<1x1x10x16xf32> to vector<10x16xf32>
    %c1_904 = arith.constant 1 : index
    %c22_905 = arith.constant 22 : index
    %c1_906 = arith.constant 1 : index
    %c0_907 = arith.constant 0 : index
    %488 = vector.load %arg1[%c1_904, %c22_905, %c1_906, %c0_907] : memref<2x44x11x16xf32, #tpu.memory_space<vmem>>, vector<1x1x10x16xf32>
    %489 = vector.shape_cast %488 : vector<1x1x10x16xf32> to vector<10x16xf32>
    %c1_908 = arith.constant 1 : index
    %c23_909 = arith.constant 23 : index
    %c0_910 = arith.constant 0 : index
    %c0_911 = arith.constant 0 : index
    %490 = vector.load %arg1[%c1_908, %c23_909, %c0_910, %c0_911] : memref<2x44x11x16xf32, #tpu.memory_space<vmem>>, vector<1x1x10x16xf32>
    %491 = vector.shape_cast %490 : vector<1x1x10x16xf32> to vector<10x16xf32>
    %c1_912 = arith.constant 1 : index
    %c23_913 = arith.constant 23 : index
    %c1_914 = arith.constant 1 : index
    %c0_915 = arith.constant 0 : index
    %492 = vector.load %arg1[%c1_912, %c23_913, %c1_914, %c0_915] : memref<2x44x11x16xf32, #tpu.memory_space<vmem>>, vector<1x1x10x16xf32>
    %493 = vector.shape_cast %492 : vector<1x1x10x16xf32> to vector<10x16xf32>
    %494 = tpu.concatenate %463, %465, %467, %469, %471, %473, %475, %477, %479, %481, %483, %485, %487, %489, %491, %493 in 1 : vector<10x16xf32>, vector<10x16xf32>, vector<10x16xf32>, vector<10x16xf32>, vector<10x16xf32>, vector<10x16xf32>, vector<10x16xf32>, vector<10x16xf32>, vector<10x16xf32>, vector<10x16xf32>, vector<10x16xf32>, vector<10x16xf32>, vector<10x16xf32>, vector<10x16xf32>, vector<10x16xf32>, vector<10x16xf32> -> vector<10x256xf32>
    %c1_916 = arith.constant 1 : index
    %c20_917 = arith.constant 20 : index
    %c0_918 = arith.constant 0 : index
    %c0_919 = arith.constant 0 : index
    %495 = vector.load %arg1[%c1_916, %c20_917, %c0_918, %c0_919] : memref<2x44x11x16xf32, #tpu.memory_space<vmem>>, vector<1x1x10x16xf32>
    %496 = vector.shape_cast %495 : vector<1x1x10x16xf32> to vector<10x16xf32>
    %c1_920 = arith.constant 1 : index
    %c20_921 = arith.constant 20 : index
    %c1_922 = arith.constant 1 : index
    %c0_923 = arith.constant 0 : index
    %497 = vector.load %arg1[%c1_920, %c20_921, %c1_922, %c0_923] : memref<2x44x11x16xf32, #tpu.memory_space<vmem>>, vector<1x1x10x16xf32>
    %498 = vector.shape_cast %497 : vector<1x1x10x16xf32> to vector<10x16xf32>
    %c1_924 = arith.constant 1 : index
    %c21_925 = arith.constant 21 : index
    %c0_926 = arith.constant 0 : index
    %c0_927 = arith.constant 0 : index
    %499 = vector.load %arg1[%c1_924, %c21_925, %c0_926, %c0_927] : memref<2x44x11x16xf32, #tpu.memory_space<vmem>>, vector<1x1x10x16xf32>
    %500 = vector.shape_cast %499 : vector<1x1x10x16xf32> to vector<10x16xf32>
    %c1_928 = arith.constant 1 : index
    %c21_929 = arith.constant 21 : index
    %c1_930 = arith.constant 1 : index
    %c0_931 = arith.constant 0 : index
    %501 = vector.load %arg1[%c1_928, %c21_929, %c1_930, %c0_931] : memref<2x44x11x16xf32, #tpu.memory_space<vmem>>, vector<1x1x10x16xf32>
    %502 = vector.shape_cast %501 : vector<1x1x10x16xf32> to vector<10x16xf32>
    %c1_932 = arith.constant 1 : index
    %c22_933 = arith.constant 22 : index
    %c0_934 = arith.constant 0 : index
    %c0_935 = arith.constant 0 : index
    %503 = vector.load %arg1[%c1_932, %c22_933, %c0_934, %c0_935] : memref<2x44x11x16xf32, #tpu.memory_space<vmem>>, vector<1x1x10x16xf32>
    %504 = vector.shape_cast %503 : vector<1x1x10x16xf32> to vector<10x16xf32>
    %c1_936 = arith.constant 1 : index
    %c22_937 = arith.constant 22 : index
    %c1_938 = arith.constant 1 : index
    %c0_939 = arith.constant 0 : index
    %505 = vector.load %arg1[%c1_936, %c22_937, %c1_938, %c0_939] : memref<2x44x11x16xf32, #tpu.memory_space<vmem>>, vector<1x1x10x16xf32>
    %506 = vector.shape_cast %505 : vector<1x1x10x16xf32> to vector<10x16xf32>
    %c1_940 = arith.constant 1 : index
    %c23_941 = arith.constant 23 : index
    %c0_942 = arith.constant 0 : index
    %c0_943 = arith.constant 0 : index
    %507 = vector.load %arg1[%c1_940, %c23_941, %c0_942, %c0_943] : memref<2x44x11x16xf32, #tpu.memory_space<vmem>>, vector<1x1x10x16xf32>
    %508 = vector.shape_cast %507 : vector<1x1x10x16xf32> to vector<10x16xf32>
    %c1_944 = arith.constant 1 : index
    %c23_945 = arith.constant 23 : index
    %c1_946 = arith.constant 1 : index
    %c0_947 = arith.constant 0 : index
    %509 = vector.load %arg1[%c1_944, %c23_945, %c1_946, %c0_947] : memref<2x44x11x16xf32, #tpu.memory_space<vmem>>, vector<1x1x10x16xf32>
    %510 = vector.shape_cast %509 : vector<1x1x10x16xf32> to vector<10x16xf32>
    %c1_948 = arith.constant 1 : index
    %c24_949 = arith.constant 24 : index
    %c0_950 = arith.constant 0 : index
    %c0_951 = arith.constant 0 : index
    %511 = vector.load %arg1[%c1_948, %c24_949, %c0_950, %c0_951] : memref<2x44x11x16xf32, #tpu.memory_space<vmem>>, vector<1x1x10x16xf32>
    %512 = vector.shape_cast %511 : vector<1x1x10x16xf32> to vector<10x16xf32>
    %c1_952 = arith.constant 1 : index
    %c24_953 = arith.constant 24 : index
    %c1_954 = arith.constant 1 : index
    %c0_955 = arith.constant 0 : index
    %513 = vector.load %arg1[%c1_952, %c24_953, %c1_954, %c0_955] : memref<2x44x11x16xf32, #tpu.memory_space<vmem>>, vector<1x1x10x16xf32>
    %514 = vector.shape_cast %513 : vector<1x1x10x16xf32> to vector<10x16xf32>
    %c1_956 = arith.constant 1 : index
    %c25_957 = arith.constant 25 : index
    %c0_958 = arith.constant 0 : index
    %c0_959 = arith.constant 0 : index
    %515 = vector.load %arg1[%c1_956, %c25_957, %c0_958, %c0_959] : memref<2x44x11x16xf32, #tpu.memory_space<vmem>>, vector<1x1x10x16xf32>
    %516 = vector.shape_cast %515 : vector<1x1x10x16xf32> to vector<10x16xf32>
    %c1_960 = arith.constant 1 : index
    %c25_961 = arith.constant 25 : index
    %c1_962 = arith.constant 1 : index
    %c0_963 = arith.constant 0 : index
    %517 = vector.load %arg1[%c1_960, %c25_961, %c1_962, %c0_963] : memref<2x44x11x16xf32, #tpu.memory_space<vmem>>, vector<1x1x10x16xf32>
    %518 = vector.shape_cast %517 : vector<1x1x10x16xf32> to vector<10x16xf32>
    %c1_964 = arith.constant 1 : index
    %c26_965 = arith.constant 26 : index
    %c0_966 = arith.constant 0 : index
    %c0_967 = arith.constant 0 : index
    %519 = vector.load %arg1[%c1_964, %c26_965, %c0_966, %c0_967] : memref<2x44x11x16xf32, #tpu.memory_space<vmem>>, vector<1x1x10x16xf32>
    %520 = vector.shape_cast %519 : vector<1x1x10x16xf32> to vector<10x16xf32>
    %c1_968 = arith.constant 1 : index
    %c26_969 = arith.constant 26 : index
    %c1_970 = arith.constant 1 : index
    %c0_971 = arith.constant 0 : index
    %521 = vector.load %arg1[%c1_968, %c26_969, %c1_970, %c0_971] : memref<2x44x11x16xf32, #tpu.memory_space<vmem>>, vector<1x1x10x16xf32>
    %522 = vector.shape_cast %521 : vector<1x1x10x16xf32> to vector<10x16xf32>
    %c1_972 = arith.constant 1 : index
    %c27_973 = arith.constant 27 : index
    %c0_974 = arith.constant 0 : index
    %c0_975 = arith.constant 0 : index
    %523 = vector.load %arg1[%c1_972, %c27_973, %c0_974, %c0_975] : memref<2x44x11x16xf32, #tpu.memory_space<vmem>>, vector<1x1x10x16xf32>
    %524 = vector.shape_cast %523 : vector<1x1x10x16xf32> to vector<10x16xf32>
    %c1_976 = arith.constant 1 : index
    %c27_977 = arith.constant 27 : index
    %c1_978 = arith.constant 1 : index
    %c0_979 = arith.constant 0 : index
    %525 = vector.load %arg1[%c1_976, %c27_977, %c1_978, %c0_979] : memref<2x44x11x16xf32, #tpu.memory_space<vmem>>, vector<1x1x10x16xf32>
    %526 = vector.shape_cast %525 : vector<1x1x10x16xf32> to vector<10x16xf32>
    %527 = tpu.concatenate %496, %498, %500, %502, %504, %506, %508, %510, %512, %514, %516, %518, %520, %522, %524, %526 in 1 : vector<10x16xf32>, vector<10x16xf32>, vector<10x16xf32>, vector<10x16xf32>, vector<10x16xf32>, vector<10x16xf32>, vector<10x16xf32>, vector<10x16xf32>, vector<10x16xf32>, vector<10x16xf32>, vector<10x16xf32>, vector<10x16xf32>, vector<10x16xf32>, vector<10x16xf32>, vector<10x16xf32>, vector<10x16xf32> -> vector<10x256xf32>
    %c1_980 = arith.constant 1 : index
    %c24_981 = arith.constant 24 : index
    %c0_982 = arith.constant 0 : index
    %c0_983 = arith.constant 0 : index
    %528 = vector.load %arg1[%c1_980, %c24_981, %c0_982, %c0_983] : memref<2x44x11x16xf32, #tpu.memory_space<vmem>>, vector<1x1x10x16xf32>
    %529 = vector.shape_cast %528 : vector<1x1x10x16xf32> to vector<10x16xf32>
    %c1_984 = arith.constant 1 : index
    %c24_985 = arith.constant 24 : index
    %c1_986 = arith.constant 1 : index
    %c0_987 = arith.constant 0 : index
    %530 = vector.load %arg1[%c1_984, %c24_985, %c1_986, %c0_987] : memref<2x44x11x16xf32, #tpu.memory_space<vmem>>, vector<1x1x10x16xf32>
    %531 = vector.shape_cast %530 : vector<1x1x10x16xf32> to vector<10x16xf32>
    %c1_988 = arith.constant 1 : index
    %c25_989 = arith.constant 25 : index
    %c0_990 = arith.constant 0 : index
    %c0_991 = arith.constant 0 : index
    %532 = vector.load %arg1[%c1_988, %c25_989, %c0_990, %c0_991] : memref<2x44x11x16xf32, #tpu.memory_space<vmem>>, vector<1x1x10x16xf32>
    %533 = vector.shape_cast %532 : vector<1x1x10x16xf32> to vector<10x16xf32>
    %c1_992 = arith.constant 1 : index
    %c25_993 = arith.constant 25 : index
    %c1_994 = arith.constant 1 : index
    %c0_995 = arith.constant 0 : index
    %534 = vector.load %arg1[%c1_992, %c25_993, %c1_994, %c0_995] : memref<2x44x11x16xf32, #tpu.memory_space<vmem>>, vector<1x1x10x16xf32>
    %535 = vector.shape_cast %534 : vector<1x1x10x16xf32> to vector<10x16xf32>
    %c1_996 = arith.constant 1 : index
    %c26_997 = arith.constant 26 : index
    %c0_998 = arith.constant 0 : index
    %c0_999 = arith.constant 0 : index
    %536 = vector.load %arg1[%c1_996, %c26_997, %c0_998, %c0_999] : memref<2x44x11x16xf32, #tpu.memory_space<vmem>>, vector<1x1x10x16xf32>
    %537 = vector.shape_cast %536 : vector<1x1x10x16xf32> to vector<10x16xf32>
    %c1_1000 = arith.constant 1 : index
    %c26_1001 = arith.constant 26 : index
    %c1_1002 = arith.constant 1 : index
    %c0_1003 = arith.constant 0 : index
    %538 = vector.load %arg1[%c1_1000, %c26_1001, %c1_1002, %c0_1003] : memref<2x44x11x16xf32, #tpu.memory_space<vmem>>, vector<1x1x10x16xf32>
    %539 = vector.shape_cast %538 : vector<1x1x10x16xf32> to vector<10x16xf32>
    %c1_1004 = arith.constant 1 : index
    %c27_1005 = arith.constant 27 : index
    %c0_1006 = arith.constant 0 : index
    %c0_1007 = arith.constant 0 : index
    %540 = vector.load %arg1[%c1_1004, %c27_1005, %c0_1006, %c0_1007] : memref<2x44x11x16xf32, #tpu.memory_space<vmem>>, vector<1x1x10x16xf32>
    %541 = vector.shape_cast %540 : vector<1x1x10x16xf32> to vector<10x16xf32>
    %c1_1008 = arith.constant 1 : index
    %c27_1009 = arith.constant 27 : index
    %c1_1010 = arith.constant 1 : index
    %c0_1011 = arith.constant 0 : index
    %542 = vector.load %arg1[%c1_1008, %c27_1009, %c1_1010, %c0_1011] : memref<2x44x11x16xf32, #tpu.memory_space<vmem>>, vector<1x1x10x16xf32>
    %543 = vector.shape_cast %542 : vector<1x1x10x16xf32> to vector<10x16xf32>
    %c1_1012 = arith.constant 1 : index
    %c28_1013 = arith.constant 28 : index
    %c0_1014 = arith.constant 0 : index
    %c0_1015 = arith.constant 0 : index
    %544 = vector.load %arg1[%c1_1012, %c28_1013, %c0_1014, %c0_1015] : memref<2x44x11x16xf32, #tpu.memory_space<vmem>>, vector<1x1x10x16xf32>
    %545 = vector.shape_cast %544 : vector<1x1x10x16xf32> to vector<10x16xf32>
    %c1_1016 = arith.constant 1 : index
    %c28_1017 = arith.constant 28 : index
    %c1_1018 = arith.constant 1 : index
    %c0_1019 = arith.constant 0 : index
    %546 = vector.load %arg1[%c1_1016, %c28_1017, %c1_1018, %c0_1019] : memref<2x44x11x16xf32, #tpu.memory_space<vmem>>, vector<1x1x10x16xf32>
    %547 = vector.shape_cast %546 : vector<1x1x10x16xf32> to vector<10x16xf32>
    %c1_1020 = arith.constant 1 : index
    %c29_1021 = arith.constant 29 : index
    %c0_1022 = arith.constant 0 : index
    %c0_1023 = arith.constant 0 : index
    %548 = vector.load %arg1[%c1_1020, %c29_1021, %c0_1022, %c0_1023] : memref<2x44x11x16xf32, #tpu.memory_space<vmem>>, vector<1x1x10x16xf32>
    %549 = vector.shape_cast %548 : vector<1x1x10x16xf32> to vector<10x16xf32>
    %c1_1024 = arith.constant 1 : index
    %c29_1025 = arith.constant 29 : index
    %c1_1026 = arith.constant 1 : index
    %c0_1027 = arith.constant 0 : index
    %550 = vector.load %arg1[%c1_1024, %c29_1025, %c1_1026, %c0_1027] : memref<2x44x11x16xf32, #tpu.memory_space<vmem>>, vector<1x1x10x16xf32>
    %551 = vector.shape_cast %550 : vector<1x1x10x16xf32> to vector<10x16xf32>
    %c1_1028 = arith.constant 1 : index
    %c30_1029 = arith.constant 30 : index
    %c0_1030 = arith.constant 0 : index
    %c0_1031 = arith.constant 0 : index
    %552 = vector.load %arg1[%c1_1028, %c30_1029, %c0_1030, %c0_1031] : memref<2x44x11x16xf32, #tpu.memory_space<vmem>>, vector<1x1x10x16xf32>
    %553 = vector.shape_cast %552 : vector<1x1x10x16xf32> to vector<10x16xf32>
    %c1_1032 = arith.constant 1 : index
    %c30_1033 = arith.constant 30 : index
    %c1_1034 = arith.constant 1 : index
    %c0_1035 = arith.constant 0 : index
    %554 = vector.load %arg1[%c1_1032, %c30_1033, %c1_1034, %c0_1035] : memref<2x44x11x16xf32, #tpu.memory_space<vmem>>, vector<1x1x10x16xf32>
    %555 = vector.shape_cast %554 : vector<1x1x10x16xf32> to vector<10x16xf32>
    %c1_1036 = arith.constant 1 : index
    %c31_1037 = arith.constant 31 : index
    %c0_1038 = arith.constant 0 : index
    %c0_1039 = arith.constant 0 : index
    %556 = vector.load %arg1[%c1_1036, %c31_1037, %c0_1038, %c0_1039] : memref<2x44x11x16xf32, #tpu.memory_space<vmem>>, vector<1x1x10x16xf32>
    %557 = vector.shape_cast %556 : vector<1x1x10x16xf32> to vector<10x16xf32>
    %c1_1040 = arith.constant 1 : index
    %c31_1041 = arith.constant 31 : index
    %c1_1042 = arith.constant 1 : index
    %c0_1043 = arith.constant 0 : index
    %558 = vector.load %arg1[%c1_1040, %c31_1041, %c1_1042, %c0_1043] : memref<2x44x11x16xf32, #tpu.memory_space<vmem>>, vector<1x1x10x16xf32>
    %559 = vector.shape_cast %558 : vector<1x1x10x16xf32> to vector<10x16xf32>
    %560 = tpu.concatenate %529, %531, %533, %535, %537, %539, %541, %543, %545, %547, %549, %551, %553, %555, %557, %559 in 1 : vector<10x16xf32>, vector<10x16xf32>, vector<10x16xf32>, vector<10x16xf32>, vector<10x16xf32>, vector<10x16xf32>, vector<10x16xf32>, vector<10x16xf32>, vector<10x16xf32>, vector<10x16xf32>, vector<10x16xf32>, vector<10x16xf32>, vector<10x16xf32>, vector<10x16xf32>, vector<10x16xf32>, vector<10x16xf32> -> vector<10x256xf32>
    %c1_1044 = arith.constant 1 : index
    %c28_1045 = arith.constant 28 : index
    %c0_1046 = arith.constant 0 : index
    %c0_1047 = arith.constant 0 : index
    %561 = vector.load %arg1[%c1_1044, %c28_1045, %c0_1046, %c0_1047] : memref<2x44x11x16xf32, #tpu.memory_space<vmem>>, vector<1x1x10x16xf32>
    %562 = vector.shape_cast %561 : vector<1x1x10x16xf32> to vector<10x16xf32>
    %c1_1048 = arith.constant 1 : index
    %c28_1049 = arith.constant 28 : index
    %c1_1050 = arith.constant 1 : index
    %c0_1051 = arith.constant 0 : index
    %563 = vector.load %arg1[%c1_1048, %c28_1049, %c1_1050, %c0_1051] : memref<2x44x11x16xf32, #tpu.memory_space<vmem>>, vector<1x1x10x16xf32>
    %564 = vector.shape_cast %563 : vector<1x1x10x16xf32> to vector<10x16xf32>
    %c1_1052 = arith.constant 1 : index
    %c29_1053 = arith.constant 29 : index
    %c0_1054 = arith.constant 0 : index
    %c0_1055 = arith.constant 0 : index
    %565 = vector.load %arg1[%c1_1052, %c29_1053, %c0_1054, %c0_1055] : memref<2x44x11x16xf32, #tpu.memory_space<vmem>>, vector<1x1x10x16xf32>
    %566 = vector.shape_cast %565 : vector<1x1x10x16xf32> to vector<10x16xf32>
    %c1_1056 = arith.constant 1 : index
    %c29_1057 = arith.constant 29 : index
    %c1_1058 = arith.constant 1 : index
    %c0_1059 = arith.constant 0 : index
    %567 = vector.load %arg1[%c1_1056, %c29_1057, %c1_1058, %c0_1059] : memref<2x44x11x16xf32, #tpu.memory_space<vmem>>, vector<1x1x10x16xf32>
    %568 = vector.shape_cast %567 : vector<1x1x10x16xf32> to vector<10x16xf32>
    %c1_1060 = arith.constant 1 : index
    %c30_1061 = arith.constant 30 : index
    %c0_1062 = arith.constant 0 : index
    %c0_1063 = arith.constant 0 : index
    %569 = vector.load %arg1[%c1_1060, %c30_1061, %c0_1062, %c0_1063] : memref<2x44x11x16xf32, #tpu.memory_space<vmem>>, vector<1x1x10x16xf32>
    %570 = vector.shape_cast %569 : vector<1x1x10x16xf32> to vector<10x16xf32>
    %c1_1064 = arith.constant 1 : index
    %c30_1065 = arith.constant 30 : index
    %c1_1066 = arith.constant 1 : index
    %c0_1067 = arith.constant 0 : index
    %571 = vector.load %arg1[%c1_1064, %c30_1065, %c1_1066, %c0_1067] : memref<2x44x11x16xf32, #tpu.memory_space<vmem>>, vector<1x1x10x16xf32>
    %572 = vector.shape_cast %571 : vector<1x1x10x16xf32> to vector<10x16xf32>
    %c1_1068 = arith.constant 1 : index
    %c31_1069 = arith.constant 31 : index
    %c0_1070 = arith.constant 0 : index
    %c0_1071 = arith.constant 0 : index
    %573 = vector.load %arg1[%c1_1068, %c31_1069, %c0_1070, %c0_1071] : memref<2x44x11x16xf32, #tpu.memory_space<vmem>>, vector<1x1x10x16xf32>
    %574 = vector.shape_cast %573 : vector<1x1x10x16xf32> to vector<10x16xf32>
    %c1_1072 = arith.constant 1 : index
    %c31_1073 = arith.constant 31 : index
    %c1_1074 = arith.constant 1 : index
    %c0_1075 = arith.constant 0 : index
    %575 = vector.load %arg1[%c1_1072, %c31_1073, %c1_1074, %c0_1075] : memref<2x44x11x16xf32, #tpu.memory_space<vmem>>, vector<1x1x10x16xf32>
    %576 = vector.shape_cast %575 : vector<1x1x10x16xf32> to vector<10x16xf32>
    %c1_1076 = arith.constant 1 : index
    %c32_1077 = arith.constant 32 : index
    %c0_1078 = arith.constant 0 : index
    %c0_1079 = arith.constant 0 : index
    %577 = vector.load %arg1[%c1_1076, %c32_1077, %c0_1078, %c0_1079] : memref<2x44x11x16xf32, #tpu.memory_space<vmem>>, vector<1x1x10x16xf32>
    %578 = vector.shape_cast %577 : vector<1x1x10x16xf32> to vector<10x16xf32>
    %c1_1080 = arith.constant 1 : index
    %c32_1081 = arith.constant 32 : index
    %c1_1082 = arith.constant 1 : index
    %c0_1083 = arith.constant 0 : index
    %579 = vector.load %arg1[%c1_1080, %c32_1081, %c1_1082, %c0_1083] : memref<2x44x11x16xf32, #tpu.memory_space<vmem>>, vector<1x1x10x16xf32>
    %580 = vector.shape_cast %579 : vector<1x1x10x16xf32> to vector<10x16xf32>
    %c1_1084 = arith.constant 1 : index
    %c33_1085 = arith.constant 33 : index
    %c0_1086 = arith.constant 0 : index
    %c0_1087 = arith.constant 0 : index
    %581 = vector.load %arg1[%c1_1084, %c33_1085, %c0_1086, %c0_1087] : memref<2x44x11x16xf32, #tpu.memory_space<vmem>>, vector<1x1x10x16xf32>
    %582 = vector.shape_cast %581 : vector<1x1x10x16xf32> to vector<10x16xf32>
    %c1_1088 = arith.constant 1 : index
    %c33_1089 = arith.constant 33 : index
    %c1_1090 = arith.constant 1 : index
    %c0_1091 = arith.constant 0 : index
    %583 = vector.load %arg1[%c1_1088, %c33_1089, %c1_1090, %c0_1091] : memref<2x44x11x16xf32, #tpu.memory_space<vmem>>, vector<1x1x10x16xf32>
    %584 = vector.shape_cast %583 : vector<1x1x10x16xf32> to vector<10x16xf32>
    %c1_1092 = arith.constant 1 : index
    %c34_1093 = arith.constant 34 : index
    %c0_1094 = arith.constant 0 : index
    %c0_1095 = arith.constant 0 : index
    %585 = vector.load %arg1[%c1_1092, %c34_1093, %c0_1094, %c0_1095] : memref<2x44x11x16xf32, #tpu.memory_space<vmem>>, vector<1x1x10x16xf32>
    %586 = vector.shape_cast %585 : vector<1x1x10x16xf32> to vector<10x16xf32>
    %c1_1096 = arith.constant 1 : index
    %c34_1097 = arith.constant 34 : index
    %c1_1098 = arith.constant 1 : index
    %c0_1099 = arith.constant 0 : index
    %587 = vector.load %arg1[%c1_1096, %c34_1097, %c1_1098, %c0_1099] : memref<2x44x11x16xf32, #tpu.memory_space<vmem>>, vector<1x1x10x16xf32>
    %588 = vector.shape_cast %587 : vector<1x1x10x16xf32> to vector<10x16xf32>
    %c1_1100 = arith.constant 1 : index
    %c35_1101 = arith.constant 35 : index
    %c0_1102 = arith.constant 0 : index
    %c0_1103 = arith.constant 0 : index
    %589 = vector.load %arg1[%c1_1100, %c35_1101, %c0_1102, %c0_1103] : memref<2x44x11x16xf32, #tpu.memory_space<vmem>>, vector<1x1x10x16xf32>
    %590 = vector.shape_cast %589 : vector<1x1x10x16xf32> to vector<10x16xf32>
    %c1_1104 = arith.constant 1 : index
    %c35_1105 = arith.constant 35 : index
    %c1_1106 = arith.constant 1 : index
    %c0_1107 = arith.constant 0 : index
    %591 = vector.load %arg1[%c1_1104, %c35_1105, %c1_1106, %c0_1107] : memref<2x44x11x16xf32, #tpu.memory_space<vmem>>, vector<1x1x10x16xf32>
    %592 = vector.shape_cast %591 : vector<1x1x10x16xf32> to vector<10x16xf32>
    %593 = tpu.concatenate %562, %564, %566, %568, %570, %572, %574, %576, %578, %580, %582, %584, %586, %588, %590, %592 in 1 : vector<10x16xf32>, vector<10x16xf32>, vector<10x16xf32>, vector<10x16xf32>, vector<10x16xf32>, vector<10x16xf32>, vector<10x16xf32>, vector<10x16xf32>, vector<10x16xf32>, vector<10x16xf32>, vector<10x16xf32>, vector<10x16xf32>, vector<10x16xf32>, vector<10x16xf32>, vector<10x16xf32>, vector<10x16xf32> -> vector<10x256xf32>
    %c1_1108 = arith.constant 1 : index
    %c32_1109 = arith.constant 32 : index
    %c0_1110 = arith.constant 0 : index
    %c0_1111 = arith.constant 0 : index
    %594 = vector.load %arg1[%c1_1108, %c32_1109, %c0_1110, %c0_1111] : memref<2x44x11x16xf32, #tpu.memory_space<vmem>>, vector<1x1x10x16xf32>
    %595 = vector.shape_cast %594 : vector<1x1x10x16xf32> to vector<10x16xf32>
    %c1_1112 = arith.constant 1 : index
    %c32_1113 = arith.constant 32 : index
    %c1_1114 = arith.constant 1 : index
    %c0_1115 = arith.constant 0 : index
    %596 = vector.load %arg1[%c1_1112, %c32_1113, %c1_1114, %c0_1115] : memref<2x44x11x16xf32, #tpu.memory_space<vmem>>, vector<1x1x10x16xf32>
    %597 = vector.shape_cast %596 : vector<1x1x10x16xf32> to vector<10x16xf32>
    %c1_1116 = arith.constant 1 : index
    %c33_1117 = arith.constant 33 : index
    %c0_1118 = arith.constant 0 : index
    %c0_1119 = arith.constant 0 : index
    %598 = vector.load %arg1[%c1_1116, %c33_1117, %c0_1118, %c0_1119] : memref<2x44x11x16xf32, #tpu.memory_space<vmem>>, vector<1x1x10x16xf32>
    %599 = vector.shape_cast %598 : vector<1x1x10x16xf32> to vector<10x16xf32>
    %c1_1120 = arith.constant 1 : index
    %c33_1121 = arith.constant 33 : index
    %c1_1122 = arith.constant 1 : index
    %c0_1123 = arith.constant 0 : index
    %600 = vector.load %arg1[%c1_1120, %c33_1121, %c1_1122, %c0_1123] : memref<2x44x11x16xf32, #tpu.memory_space<vmem>>, vector<1x1x10x16xf32>
    %601 = vector.shape_cast %600 : vector<1x1x10x16xf32> to vector<10x16xf32>
    %c1_1124 = arith.constant 1 : index
    %c34_1125 = arith.constant 34 : index
    %c0_1126 = arith.constant 0 : index
    %c0_1127 = arith.constant 0 : index
    %602 = vector.load %arg1[%c1_1124, %c34_1125, %c0_1126, %c0_1127] : memref<2x44x11x16xf32, #tpu.memory_space<vmem>>, vector<1x1x10x16xf32>
    %603 = vector.shape_cast %602 : vector<1x1x10x16xf32> to vector<10x16xf32>
    %c1_1128 = arith.constant 1 : index
    %c34_1129 = arith.constant 34 : index
    %c1_1130 = arith.constant 1 : index
    %c0_1131 = arith.constant 0 : index
    %604 = vector.load %arg1[%c1_1128, %c34_1129, %c1_1130, %c0_1131] : memref<2x44x11x16xf32, #tpu.memory_space<vmem>>, vector<1x1x10x16xf32>
    %605 = vector.shape_cast %604 : vector<1x1x10x16xf32> to vector<10x16xf32>
    %c1_1132 = arith.constant 1 : index
    %c35_1133 = arith.constant 35 : index
    %c0_1134 = arith.constant 0 : index
    %c0_1135 = arith.constant 0 : index
    %606 = vector.load %arg1[%c1_1132, %c35_1133, %c0_1134, %c0_1135] : memref<2x44x11x16xf32, #tpu.memory_space<vmem>>, vector<1x1x10x16xf32>
    %607 = vector.shape_cast %606 : vector<1x1x10x16xf32> to vector<10x16xf32>
    %c1_1136 = arith.constant 1 : index
    %c35_1137 = arith.constant 35 : index
    %c1_1138 = arith.constant 1 : index
    %c0_1139 = arith.constant 0 : index
    %608 = vector.load %arg1[%c1_1136, %c35_1137, %c1_1138, %c0_1139] : memref<2x44x11x16xf32, #tpu.memory_space<vmem>>, vector<1x1x10x16xf32>
    %609 = vector.shape_cast %608 : vector<1x1x10x16xf32> to vector<10x16xf32>
    %c1_1140 = arith.constant 1 : index
    %c36_1141 = arith.constant 36 : index
    %c0_1142 = arith.constant 0 : index
    %c0_1143 = arith.constant 0 : index
    %610 = vector.load %arg1[%c1_1140, %c36_1141, %c0_1142, %c0_1143] : memref<2x44x11x16xf32, #tpu.memory_space<vmem>>, vector<1x1x10x16xf32>
    %611 = vector.shape_cast %610 : vector<1x1x10x16xf32> to vector<10x16xf32>
    %c1_1144 = arith.constant 1 : index
    %c36_1145 = arith.constant 36 : index
    %c1_1146 = arith.constant 1 : index
    %c0_1147 = arith.constant 0 : index
    %612 = vector.load %arg1[%c1_1144, %c36_1145, %c1_1146, %c0_1147] : memref<2x44x11x16xf32, #tpu.memory_space<vmem>>, vector<1x1x10x16xf32>
    %613 = vector.shape_cast %612 : vector<1x1x10x16xf32> to vector<10x16xf32>
    %c1_1148 = arith.constant 1 : index
    %c37_1149 = arith.constant 37 : index
    %c0_1150 = arith.constant 0 : index
    %c0_1151 = arith.constant 0 : index
    %614 = vector.load %arg1[%c1_1148, %c37_1149, %c0_1150, %c0_1151] : memref<2x44x11x16xf32, #tpu.memory_space<vmem>>, vector<1x1x10x16xf32>
    %615 = vector.shape_cast %614 : vector<1x1x10x16xf32> to vector<10x16xf32>
    %c1_1152 = arith.constant 1 : index
    %c37_1153 = arith.constant 37 : index
    %c1_1154 = arith.constant 1 : index
    %c0_1155 = arith.constant 0 : index
    %616 = vector.load %arg1[%c1_1152, %c37_1153, %c1_1154, %c0_1155] : memref<2x44x11x16xf32, #tpu.memory_space<vmem>>, vector<1x1x10x16xf32>
    %617 = vector.shape_cast %616 : vector<1x1x10x16xf32> to vector<10x16xf32>
    %c1_1156 = arith.constant 1 : index
    %c38_1157 = arith.constant 38 : index
    %c0_1158 = arith.constant 0 : index
    %c0_1159 = arith.constant 0 : index
    %618 = vector.load %arg1[%c1_1156, %c38_1157, %c0_1158, %c0_1159] : memref<2x44x11x16xf32, #tpu.memory_space<vmem>>, vector<1x1x10x16xf32>
    %619 = vector.shape_cast %618 : vector<1x1x10x16xf32> to vector<10x16xf32>
    %c1_1160 = arith.constant 1 : index
    %c38_1161 = arith.constant 38 : index
    %c1_1162 = arith.constant 1 : index
    %c0_1163 = arith.constant 0 : index
    %620 = vector.load %arg1[%c1_1160, %c38_1161, %c1_1162, %c0_1163] : memref<2x44x11x16xf32, #tpu.memory_space<vmem>>, vector<1x1x10x16xf32>
    %621 = vector.shape_cast %620 : vector<1x1x10x16xf32> to vector<10x16xf32>
    %c1_1164 = arith.constant 1 : index
    %c39_1165 = arith.constant 39 : index
    %c0_1166 = arith.constant 0 : index
    %c0_1167 = arith.constant 0 : index
    %622 = vector.load %arg1[%c1_1164, %c39_1165, %c0_1166, %c0_1167] : memref<2x44x11x16xf32, #tpu.memory_space<vmem>>, vector<1x1x10x16xf32>
    %623 = vector.shape_cast %622 : vector<1x1x10x16xf32> to vector<10x16xf32>
    %c1_1168 = arith.constant 1 : index
    %c39_1169 = arith.constant 39 : index
    %c1_1170 = arith.constant 1 : index
    %c0_1171 = arith.constant 0 : index
    %624 = vector.load %arg1[%c1_1168, %c39_1169, %c1_1170, %c0_1171] : memref<2x44x11x16xf32, #tpu.memory_space<vmem>>, vector<1x1x10x16xf32>
    %625 = vector.shape_cast %624 : vector<1x1x10x16xf32> to vector<10x16xf32>
    %626 = tpu.concatenate %595, %597, %599, %601, %603, %605, %607, %609, %611, %613, %615, %617, %619, %621, %623, %625 in 1 : vector<10x16xf32>, vector<10x16xf32>, vector<10x16xf32>, vector<10x16xf32>, vector<10x16xf32>, vector<10x16xf32>, vector<10x16xf32>, vector<10x16xf32>, vector<10x16xf32>, vector<10x16xf32>, vector<10x16xf32>, vector<10x16xf32>, vector<10x16xf32>, vector<10x16xf32>, vector<10x16xf32>, vector<10x16xf32> -> vector<10x256xf32>
    %c1_1172 = arith.constant 1 : index
    %c36_1173 = arith.constant 36 : index
    %c0_1174 = arith.constant 0 : index
    %c0_1175 = arith.constant 0 : index
    %627 = vector.load %arg1[%c1_1172, %c36_1173, %c0_1174, %c0_1175] : memref<2x44x11x16xf32, #tpu.memory_space<vmem>>, vector<1x1x10x16xf32>
    %628 = vector.shape_cast %627 : vector<1x1x10x16xf32> to vector<10x16xf32>
    %c1_1176 = arith.constant 1 : index
    %c36_1177 = arith.constant 36 : index
    %c1_1178 = arith.constant 1 : index
    %c0_1179 = arith.constant 0 : index
    %629 = vector.load %arg1[%c1_1176, %c36_1177, %c1_1178, %c0_1179] : memref<2x44x11x16xf32, #tpu.memory_space<vmem>>, vector<1x1x10x16xf32>
    %630 = vector.shape_cast %629 : vector<1x1x10x16xf32> to vector<10x16xf32>
    %c1_1180 = arith.constant 1 : index
    %c37_1181 = arith.constant 37 : index
    %c0_1182 = arith.constant 0 : index
    %c0_1183 = arith.constant 0 : index
    %631 = vector.load %arg1[%c1_1180, %c37_1181, %c0_1182, %c0_1183] : memref<2x44x11x16xf32, #tpu.memory_space<vmem>>, vector<1x1x10x16xf32>
    %632 = vector.shape_cast %631 : vector<1x1x10x16xf32> to vector<10x16xf32>
    %c1_1184 = arith.constant 1 : index
    %c37_1185 = arith.constant 37 : index
    %c1_1186 = arith.constant 1 : index
    %c0_1187 = arith.constant 0 : index
    %633 = vector.load %arg1[%c1_1184, %c37_1185, %c1_1186, %c0_1187] : memref<2x44x11x16xf32, #tpu.memory_space<vmem>>, vector<1x1x10x16xf32>
    %634 = vector.shape_cast %633 : vector<1x1x10x16xf32> to vector<10x16xf32>
    %c1_1188 = arith.constant 1 : index
    %c38_1189 = arith.constant 38 : index
    %c0_1190 = arith.constant 0 : index
    %c0_1191 = arith.constant 0 : index
    %635 = vector.load %arg1[%c1_1188, %c38_1189, %c0_1190, %c0_1191] : memref<2x44x11x16xf32, #tpu.memory_space<vmem>>, vector<1x1x10x16xf32>
    %636 = vector.shape_cast %635 : vector<1x1x10x16xf32> to vector<10x16xf32>
    %c1_1192 = arith.constant 1 : index
    %c38_1193 = arith.constant 38 : index
    %c1_1194 = arith.constant 1 : index
    %c0_1195 = arith.constant 0 : index
    %637 = vector.load %arg1[%c1_1192, %c38_1193, %c1_1194, %c0_1195] : memref<2x44x11x16xf32, #tpu.memory_space<vmem>>, vector<1x1x10x16xf32>
    %638 = vector.shape_cast %637 : vector<1x1x10x16xf32> to vector<10x16xf32>
    %c1_1196 = arith.constant 1 : index
    %c39_1197 = arith.constant 39 : index
    %c0_1198 = arith.constant 0 : index
    %c0_1199 = arith.constant 0 : index
    %639 = vector.load %arg1[%c1_1196, %c39_1197, %c0_1198, %c0_1199] : memref<2x44x11x16xf32, #tpu.memory_space<vmem>>, vector<1x1x10x16xf32>
    %640 = vector.shape_cast %639 : vector<1x1x10x16xf32> to vector<10x16xf32>
    %c1_1200 = arith.constant 1 : index
    %c39_1201 = arith.constant 39 : index
    %c1_1202 = arith.constant 1 : index
    %c0_1203 = arith.constant 0 : index
    %641 = vector.load %arg1[%c1_1200, %c39_1201, %c1_1202, %c0_1203] : memref<2x44x11x16xf32, #tpu.memory_space<vmem>>, vector<1x1x10x16xf32>
    %642 = vector.shape_cast %641 : vector<1x1x10x16xf32> to vector<10x16xf32>
    %c1_1204 = arith.constant 1 : index
    %c40_1205 = arith.constant 40 : index
    %c0_1206 = arith.constant 0 : index
    %c0_1207 = arith.constant 0 : index
    %643 = vector.load %arg1[%c1_1204, %c40_1205, %c0_1206, %c0_1207] : memref<2x44x11x16xf32, #tpu.memory_space<vmem>>, vector<1x1x10x16xf32>
    %644 = vector.shape_cast %643 : vector<1x1x10x16xf32> to vector<10x16xf32>
    %c1_1208 = arith.constant 1 : index
    %c40_1209 = arith.constant 40 : index
    %c1_1210 = arith.constant 1 : index
    %c0_1211 = arith.constant 0 : index
    %645 = vector.load %arg1[%c1_1208, %c40_1209, %c1_1210, %c0_1211] : memref<2x44x11x16xf32, #tpu.memory_space<vmem>>, vector<1x1x10x16xf32>
    %646 = vector.shape_cast %645 : vector<1x1x10x16xf32> to vector<10x16xf32>
    %c1_1212 = arith.constant 1 : index
    %c41_1213 = arith.constant 41 : index
    %c0_1214 = arith.constant 0 : index
    %c0_1215 = arith.constant 0 : index
    %647 = vector.load %arg1[%c1_1212, %c41_1213, %c0_1214, %c0_1215] : memref<2x44x11x16xf32, #tpu.memory_space<vmem>>, vector<1x1x10x16xf32>
    %648 = vector.shape_cast %647 : vector<1x1x10x16xf32> to vector<10x16xf32>
    %c1_1216 = arith.constant 1 : index
    %c41_1217 = arith.constant 41 : index
    %c1_1218 = arith.constant 1 : index
    %c0_1219 = arith.constant 0 : index
    %649 = vector.load %arg1[%c1_1216, %c41_1217, %c1_1218, %c0_1219] : memref<2x44x11x16xf32, #tpu.memory_space<vmem>>, vector<1x1x10x16xf32>
    %650 = vector.shape_cast %649 : vector<1x1x10x16xf32> to vector<10x16xf32>
    %c1_1220 = arith.constant 1 : index
    %c42_1221 = arith.constant 42 : index
    %c0_1222 = arith.constant 0 : index
    %c0_1223 = arith.constant 0 : index
    %651 = vector.load %arg1[%c1_1220, %c42_1221, %c0_1222, %c0_1223] : memref<2x44x11x16xf32, #tpu.memory_space<vmem>>, vector<1x1x10x16xf32>
    %652 = vector.shape_cast %651 : vector<1x1x10x16xf32> to vector<10x16xf32>
    %c1_1224 = arith.constant 1 : index
    %c42_1225 = arith.constant 42 : index
    %c1_1226 = arith.constant 1 : index
    %c0_1227 = arith.constant 0 : index
    %653 = vector.load %arg1[%c1_1224, %c42_1225, %c1_1226, %c0_1227] : memref<2x44x11x16xf32, #tpu.memory_space<vmem>>, vector<1x1x10x16xf32>
    %654 = vector.shape_cast %653 : vector<1x1x10x16xf32> to vector<10x16xf32>
    %c1_1228 = arith.constant 1 : index
    %c43_1229 = arith.constant 43 : index
    %c0_1230 = arith.constant 0 : index
    %c0_1231 = arith.constant 0 : index
    %655 = vector.load %arg1[%c1_1228, %c43_1229, %c0_1230, %c0_1231] : memref<2x44x11x16xf32, #tpu.memory_space<vmem>>, vector<1x1x10x16xf32>
    %656 = vector.shape_cast %655 : vector<1x1x10x16xf32> to vector<10x16xf32>
    %c1_1232 = arith.constant 1 : index
    %c43_1233 = arith.constant 43 : index
    %c1_1234 = arith.constant 1 : index
    %c0_1235 = arith.constant 0 : index
    %657 = vector.load %arg1[%c1_1232, %c43_1233, %c1_1234, %c0_1235] : memref<2x44x11x16xf32, #tpu.memory_space<vmem>>, vector<1x1x10x16xf32>
    %658 = vector.shape_cast %657 : vector<1x1x10x16xf32> to vector<10x16xf32>
    %659 = tpu.concatenate %628, %630, %632, %634, %636, %638, %640, %642, %644, %646, %648, %650, %652, %654, %656, %658 in 1 : vector<10x16xf32>, vector<10x16xf32>, vector<10x16xf32>, vector<10x16xf32>, vector<10x16xf32>, vector<10x16xf32>, vector<10x16xf32>, vector<10x16xf32>, vector<10x16xf32>, vector<10x16xf32>, vector<10x16xf32>, vector<10x16xf32>, vector<10x16xf32>, vector<10x16xf32>, vector<10x16xf32>, vector<10x16xf32> -> vector<10x256xf32>
    %660 = tpu.concatenate %32, %65, %98, %131, %164, %197, %230, %263, %296, %329, %362, %395, %428, %461, %494, %527 in 0 : vector<10x256xf32>, vector<10x256xf32>, vector<10x256xf32>, vector<10x256xf32>, vector<10x256xf32>, vector<10x256xf32>, vector<10x256xf32>, vector<10x256xf32>, vector<10x256xf32>, vector<10x256xf32>, vector<10x256xf32>, vector<10x256xf32>, vector<10x256xf32>, vector<10x256xf32>, vector<10x256xf32>, vector<10x256xf32> -> vector<160x256xf32>
    %661 = tpu.concatenate %560, %593, %626, %659 in 0 : vector<10x256xf32>, vector<10x256xf32>, vector<10x256xf32>, vector<10x256xf32> -> vector<40x256xf32>
    %662 = tpu.concatenate %660, %661 in 0 : vector<160x256xf32>, vector<40x256xf32> -> vector<200x256xf32>
    %663 = arith.truncf %662 : vector<200x256xf32> to vector<200x256xbf16>
    %c0_1236 = arith.constant 0 : index
    %c0_1237 = arith.constant 0 : index
    %664 = vector.load %arg2[%c0_1236, %c0_1237] : memref<256x32xbf16, #tpu.memory_space<vmem>>, vector<256x32xbf16>
    %cst = arith.constant dense<0.000000e+00> : vector<200x32xf32>
    %665 = tpu.matmul %663, %664, %cst {dimension_numbers = #tpu.dot_dimension_numbers<[1], [0], [0], [1], [0, 0, 1, 1], [], []>} : vector<200x256xbf16>, vector<256x32xbf16>, vector<200x32xf32> -> vector<200x32xf32>
    %c0_1238 = arith.constant 0 : index
    %c0_1239 = arith.constant 0 : index
    %666 = vector.load %arg3[%c0_1238, %c0_1239] : memref<1x32xf32, #tpu.memory_space<vmem>>, vector<1x32xf32>
    %667 = vector.broadcast %666 : vector<1x32xf32> to vector<200x32xf32>
    %668 = arith.addf %665, %667 : vector<200x32xf32>
    %cst_1240 = arith.constant 0.000000e+00 : f32
    %669 = vector.broadcast %cst_1240 : f32 to vector<200x32xf32>
    %670 = arith.maximumf %668, %669 : vector<200x32xf32>
    %c0_1241 = arith.constant 0 : index
    %c0_1242 = arith.constant 0 : index
    %671 = vector.load %arg4[%c0_1241, %c0_1242] : memref<200x32xf32, #tpu.memory_space<vmem>>, vector<200x32xf32>
    tpu.vector_store %arg4[%c0_1241, %c0_1242], %670 {strides = array<i32>} : memref<200x32xf32, #tpu.memory_space<vmem>>, vector<200x32xf32>,
    return
  }
  func.func @transform_0(%arg0: i32) -> (i32, i32, i32, i32) {
    %c0_i32 = arith.constant 0 : i32
    %c0_i32_0 = arith.constant 0 : i32
    %c0_i32_1 = arith.constant 0 : i32
    %c0_i32_2 = arith.constant 0 : i32
    return %arg0, %c0_i32, %c0_i32_0, %c0_i32_1 : i32, i32, i32, i32
  }
  func.func @transform_1(%arg0: i32) -> (i32, i32) {
    %c0_i32 = arith.constant 0 : i32
    %c0_i32_0 = arith.constant 0 : i32
    %c0_i32_1 = arith.constant 0 : i32
    return %c0_i32, %c0_i32_0 : i32, i32
  }
  func.func @transform_2(%arg0: i32) -> (i32, i32) {
    %c0_i32 = arith.constant 0 : i32
    %c0_i32_0 = arith.constant 0 : i32
    %c0_i32_1 = arith.constant 0 : i32
    return %c0_i32, %c0_i32_0 : i32, i32
  }
  func.func @transform_3(%arg0: i32) -> (i32, i32) {
    %c0_i32 = arith.constant 0 : i32
    %c0_i32_0 = arith.constant 0 : i32
    return %arg0, %c0_i32 : i32, i32
  }
}

module attributes {stable_mosaic.version = 11 : i64} {
  func.func @_head_kernel(%arg0: i32, %arg1: memref<4x10x5x64xf32, #tpu.memory_space<vmem>>, %arg2: memref<512x64xbf16, #tpu.memory_space<vmem>>, %arg3: memref<1x64xf32, #tpu.memory_space<vmem>>, %arg4: memref<576x64xbf16, #tpu.memory_space<vmem>>, %arg5: memref<1x64xf32, #tpu.memory_space<vmem>>, %arg6: memref<256x512xbf16, #tpu.memory_space<vmem>>, %arg7: memref<1x512xf32, #tpu.memory_space<vmem>>, %arg8: memref<512x6xbf16, #tpu.memory_space<vmem>>, %arg9: memref<1x6xf32, #tpu.memory_space<vmem>>, %arg10: memref<1x4x6xf32, #tpu.memory_space<vmem>>) attributes {dimension_semantics = [#tpu.dimension_semantics<parallel>], iteration_bounds = array<i64: 2>, scalar_prefetch = 0 : i64, scratch_operands = 0 : i64, tpu.core_type = #tpu.core_type<tc>, window_params = [{transform_indices = @transform_0, window_bounds = array<i64: 4, 10, 5, 64>}, {pipeline_mode = #tpu.pipeline_mode<synchronous>, transform_indices = @transform_1, window_bounds = array<i64: 512, 64>}, {pipeline_mode = #tpu.pipeline_mode<synchronous>, transform_indices = @transform_2, window_bounds = array<i64: 1, 64>}, {pipeline_mode = #tpu.pipeline_mode<synchronous>, transform_indices = @transform_3, window_bounds = array<i64: 576, 64>}, {pipeline_mode = #tpu.pipeline_mode<synchronous>, transform_indices = @transform_4, window_bounds = array<i64: 1, 64>}, {pipeline_mode = #tpu.pipeline_mode<synchronous>, transform_indices = @transform_5, window_bounds = array<i64: 256, 512>}, {pipeline_mode = #tpu.pipeline_mode<synchronous>, transform_indices = @transform_6, window_bounds = array<i64: 1, 512>}, {pipeline_mode = #tpu.pipeline_mode<synchronous>, transform_indices = @transform_7, window_bounds = array<i64: 512, 6>}, {pipeline_mode = #tpu.pipeline_mode<synchronous>, transform_indices = @transform_8, window_bounds = array<i64: 1, 6>}, {transform_indices = @transform_9, window_bounds = array<i64: 1, 4, 6>}]} {
    %c0 = arith.constant 0 : index
    %c0_0 = arith.constant 0 : index
    %c0_1 = arith.constant 0 : index
    %c0_2 = arith.constant 0 : index
    %0 = vector.load %arg1[%c0, %c0_0, %c0_1, %c0_2] : memref<4x10x5x64xf32, #tpu.memory_space<vmem>>, vector<1x1x4x64xf32>
    %1 = vector.shape_cast %0 : vector<1x1x4x64xf32> to vector<4x64xf32>
    %c0_3 = arith.constant 0 : index
    %c0_4 = arith.constant 0 : index
    %c1 = arith.constant 1 : index
    %c0_5 = arith.constant 0 : index
    %2 = vector.load %arg1[%c0_3, %c0_4, %c1, %c0_5] : memref<4x10x5x64xf32, #tpu.memory_space<vmem>>, vector<1x1x4x64xf32>
    %3 = vector.shape_cast %2 : vector<1x1x4x64xf32> to vector<4x64xf32>
    %c0_6 = arith.constant 0 : index
    %c1_7 = arith.constant 1 : index
    %c0_8 = arith.constant 0 : index
    %c0_9 = arith.constant 0 : index
    %4 = vector.load %arg1[%c0_6, %c1_7, %c0_8, %c0_9] : memref<4x10x5x64xf32, #tpu.memory_space<vmem>>, vector<1x1x4x64xf32>
    %5 = vector.shape_cast %4 : vector<1x1x4x64xf32> to vector<4x64xf32>
    %c0_10 = arith.constant 0 : index
    %c1_11 = arith.constant 1 : index
    %c1_12 = arith.constant 1 : index
    %c0_13 = arith.constant 0 : index
    %6 = vector.load %arg1[%c0_10, %c1_11, %c1_12, %c0_13] : memref<4x10x5x64xf32, #tpu.memory_space<vmem>>, vector<1x1x4x64xf32>
    %7 = vector.shape_cast %6 : vector<1x1x4x64xf32> to vector<4x64xf32>
    %c0_14 = arith.constant 0 : index
    %c2 = arith.constant 2 : index
    %c0_15 = arith.constant 0 : index
    %c0_16 = arith.constant 0 : index
    %8 = vector.load %arg1[%c0_14, %c2, %c0_15, %c0_16] : memref<4x10x5x64xf32, #tpu.memory_space<vmem>>, vector<1x1x4x64xf32>
    %9 = vector.shape_cast %8 : vector<1x1x4x64xf32> to vector<4x64xf32>
    %c0_17 = arith.constant 0 : index
    %c2_18 = arith.constant 2 : index
    %c1_19 = arith.constant 1 : index
    %c0_20 = arith.constant 0 : index
    %10 = vector.load %arg1[%c0_17, %c2_18, %c1_19, %c0_20] : memref<4x10x5x64xf32, #tpu.memory_space<vmem>>, vector<1x1x4x64xf32>
    %11 = vector.shape_cast %10 : vector<1x1x4x64xf32> to vector<4x64xf32>
    %c0_21 = arith.constant 0 : index
    %c3 = arith.constant 3 : index
    %c0_22 = arith.constant 0 : index
    %c0_23 = arith.constant 0 : index
    %12 = vector.load %arg1[%c0_21, %c3, %c0_22, %c0_23] : memref<4x10x5x64xf32, #tpu.memory_space<vmem>>, vector<1x1x4x64xf32>
    %13 = vector.shape_cast %12 : vector<1x1x4x64xf32> to vector<4x64xf32>
    %c0_24 = arith.constant 0 : index
    %c3_25 = arith.constant 3 : index
    %c1_26 = arith.constant 1 : index
    %c0_27 = arith.constant 0 : index
    %14 = vector.load %arg1[%c0_24, %c3_25, %c1_26, %c0_27] : memref<4x10x5x64xf32, #tpu.memory_space<vmem>>, vector<1x1x4x64xf32>
    %15 = vector.shape_cast %14 : vector<1x1x4x64xf32> to vector<4x64xf32>
    %16 = tpu.concatenate %1, %3, %5, %7, %9, %11, %13, %15 in 1 : vector<4x64xf32>, vector<4x64xf32>, vector<4x64xf32>, vector<4x64xf32>, vector<4x64xf32>, vector<4x64xf32>, vector<4x64xf32>, vector<4x64xf32> -> vector<4x512xf32>
    %c0_28 = arith.constant 0 : index
    %c2_29 = arith.constant 2 : index
    %c0_30 = arith.constant 0 : index
    %c0_31 = arith.constant 0 : index
    %17 = vector.load %arg1[%c0_28, %c2_29, %c0_30, %c0_31] : memref<4x10x5x64xf32, #tpu.memory_space<vmem>>, vector<1x1x4x64xf32>
    %18 = vector.shape_cast %17 : vector<1x1x4x64xf32> to vector<4x64xf32>
    %c0_32 = arith.constant 0 : index
    %c2_33 = arith.constant 2 : index
    %c1_34 = arith.constant 1 : index
    %c0_35 = arith.constant 0 : index
    %19 = vector.load %arg1[%c0_32, %c2_33, %c1_34, %c0_35] : memref<4x10x5x64xf32, #tpu.memory_space<vmem>>, vector<1x1x4x64xf32>
    %20 = vector.shape_cast %19 : vector<1x1x4x64xf32> to vector<4x64xf32>
    %c0_36 = arith.constant 0 : index
    %c3_37 = arith.constant 3 : index
    %c0_38 = arith.constant 0 : index
    %c0_39 = arith.constant 0 : index
    %21 = vector.load %arg1[%c0_36, %c3_37, %c0_38, %c0_39] : memref<4x10x5x64xf32, #tpu.memory_space<vmem>>, vector<1x1x4x64xf32>
    %22 = vector.shape_cast %21 : vector<1x1x4x64xf32> to vector<4x64xf32>
    %c0_40 = arith.constant 0 : index
    %c3_41 = arith.constant 3 : index
    %c1_42 = arith.constant 1 : index
    %c0_43 = arith.constant 0 : index
    %23 = vector.load %arg1[%c0_40, %c3_41, %c1_42, %c0_43] : memref<4x10x5x64xf32, #tpu.memory_space<vmem>>, vector<1x1x4x64xf32>
    %24 = vector.shape_cast %23 : vector<1x1x4x64xf32> to vector<4x64xf32>
    %c0_44 = arith.constant 0 : index
    %c4 = arith.constant 4 : index
    %c0_45 = arith.constant 0 : index
    %c0_46 = arith.constant 0 : index
    %25 = vector.load %arg1[%c0_44, %c4, %c0_45, %c0_46] : memref<4x10x5x64xf32, #tpu.memory_space<vmem>>, vector<1x1x4x64xf32>
    %26 = vector.shape_cast %25 : vector<1x1x4x64xf32> to vector<4x64xf32>
    %c0_47 = arith.constant 0 : index
    %c4_48 = arith.constant 4 : index
    %c1_49 = arith.constant 1 : index
    %c0_50 = arith.constant 0 : index
    %27 = vector.load %arg1[%c0_47, %c4_48, %c1_49, %c0_50] : memref<4x10x5x64xf32, #tpu.memory_space<vmem>>, vector<1x1x4x64xf32>
    %28 = vector.shape_cast %27 : vector<1x1x4x64xf32> to vector<4x64xf32>
    %c0_51 = arith.constant 0 : index
    %c5 = arith.constant 5 : index
    %c0_52 = arith.constant 0 : index
    %c0_53 = arith.constant 0 : index
    %29 = vector.load %arg1[%c0_51, %c5, %c0_52, %c0_53] : memref<4x10x5x64xf32, #tpu.memory_space<vmem>>, vector<1x1x4x64xf32>
    %30 = vector.shape_cast %29 : vector<1x1x4x64xf32> to vector<4x64xf32>
    %c0_54 = arith.constant 0 : index
    %c5_55 = arith.constant 5 : index
    %c1_56 = arith.constant 1 : index
    %c0_57 = arith.constant 0 : index
    %31 = vector.load %arg1[%c0_54, %c5_55, %c1_56, %c0_57] : memref<4x10x5x64xf32, #tpu.memory_space<vmem>>, vector<1x1x4x64xf32>
    %32 = vector.shape_cast %31 : vector<1x1x4x64xf32> to vector<4x64xf32>
    %33 = tpu.concatenate %18, %20, %22, %24, %26, %28, %30, %32 in 1 : vector<4x64xf32>, vector<4x64xf32>, vector<4x64xf32>, vector<4x64xf32>, vector<4x64xf32>, vector<4x64xf32>, vector<4x64xf32>, vector<4x64xf32> -> vector<4x512xf32>
    %c0_58 = arith.constant 0 : index
    %c4_59 = arith.constant 4 : index
    %c0_60 = arith.constant 0 : index
    %c0_61 = arith.constant 0 : index
    %34 = vector.load %arg1[%c0_58, %c4_59, %c0_60, %c0_61] : memref<4x10x5x64xf32, #tpu.memory_space<vmem>>, vector<1x1x4x64xf32>
    %35 = vector.shape_cast %34 : vector<1x1x4x64xf32> to vector<4x64xf32>
    %c0_62 = arith.constant 0 : index
    %c4_63 = arith.constant 4 : index
    %c1_64 = arith.constant 1 : index
    %c0_65 = arith.constant 0 : index
    %36 = vector.load %arg1[%c0_62, %c4_63, %c1_64, %c0_65] : memref<4x10x5x64xf32, #tpu.memory_space<vmem>>, vector<1x1x4x64xf32>
    %37 = vector.shape_cast %36 : vector<1x1x4x64xf32> to vector<4x64xf32>
    %c0_66 = arith.constant 0 : index
    %c5_67 = arith.constant 5 : index
    %c0_68 = arith.constant 0 : index
    %c0_69 = arith.constant 0 : index
    %38 = vector.load %arg1[%c0_66, %c5_67, %c0_68, %c0_69] : memref<4x10x5x64xf32, #tpu.memory_space<vmem>>, vector<1x1x4x64xf32>
    %39 = vector.shape_cast %38 : vector<1x1x4x64xf32> to vector<4x64xf32>
    %c0_70 = arith.constant 0 : index
    %c5_71 = arith.constant 5 : index
    %c1_72 = arith.constant 1 : index
    %c0_73 = arith.constant 0 : index
    %40 = vector.load %arg1[%c0_70, %c5_71, %c1_72, %c0_73] : memref<4x10x5x64xf32, #tpu.memory_space<vmem>>, vector<1x1x4x64xf32>
    %41 = vector.shape_cast %40 : vector<1x1x4x64xf32> to vector<4x64xf32>
    %c0_74 = arith.constant 0 : index
    %c6 = arith.constant 6 : index
    %c0_75 = arith.constant 0 : index
    %c0_76 = arith.constant 0 : index
    %42 = vector.load %arg1[%c0_74, %c6, %c0_75, %c0_76] : memref<4x10x5x64xf32, #tpu.memory_space<vmem>>, vector<1x1x4x64xf32>
    %43 = vector.shape_cast %42 : vector<1x1x4x64xf32> to vector<4x64xf32>
    %c0_77 = arith.constant 0 : index
    %c6_78 = arith.constant 6 : index
    %c1_79 = arith.constant 1 : index
    %c0_80 = arith.constant 0 : index
    %44 = vector.load %arg1[%c0_77, %c6_78, %c1_79, %c0_80] : memref<4x10x5x64xf32, #tpu.memory_space<vmem>>, vector<1x1x4x64xf32>
    %45 = vector.shape_cast %44 : vector<1x1x4x64xf32> to vector<4x64xf32>
    %c0_81 = arith.constant 0 : index
    %c7 = arith.constant 7 : index
    %c0_82 = arith.constant 0 : index
    %c0_83 = arith.constant 0 : index
    %46 = vector.load %arg1[%c0_81, %c7, %c0_82, %c0_83] : memref<4x10x5x64xf32, #tpu.memory_space<vmem>>, vector<1x1x4x64xf32>
    %47 = vector.shape_cast %46 : vector<1x1x4x64xf32> to vector<4x64xf32>
    %c0_84 = arith.constant 0 : index
    %c7_85 = arith.constant 7 : index
    %c1_86 = arith.constant 1 : index
    %c0_87 = arith.constant 0 : index
    %48 = vector.load %arg1[%c0_84, %c7_85, %c1_86, %c0_87] : memref<4x10x5x64xf32, #tpu.memory_space<vmem>>, vector<1x1x4x64xf32>
    %49 = vector.shape_cast %48 : vector<1x1x4x64xf32> to vector<4x64xf32>
    %50 = tpu.concatenate %35, %37, %39, %41, %43, %45, %47, %49 in 1 : vector<4x64xf32>, vector<4x64xf32>, vector<4x64xf32>, vector<4x64xf32>, vector<4x64xf32>, vector<4x64xf32>, vector<4x64xf32>, vector<4x64xf32> -> vector<4x512xf32>
    %c0_88 = arith.constant 0 : index
    %c6_89 = arith.constant 6 : index
    %c0_90 = arith.constant 0 : index
    %c0_91 = arith.constant 0 : index
    %51 = vector.load %arg1[%c0_88, %c6_89, %c0_90, %c0_91] : memref<4x10x5x64xf32, #tpu.memory_space<vmem>>, vector<1x1x4x64xf32>
    %52 = vector.shape_cast %51 : vector<1x1x4x64xf32> to vector<4x64xf32>
    %c0_92 = arith.constant 0 : index
    %c6_93 = arith.constant 6 : index
    %c1_94 = arith.constant 1 : index
    %c0_95 = arith.constant 0 : index
    %53 = vector.load %arg1[%c0_92, %c6_93, %c1_94, %c0_95] : memref<4x10x5x64xf32, #tpu.memory_space<vmem>>, vector<1x1x4x64xf32>
    %54 = vector.shape_cast %53 : vector<1x1x4x64xf32> to vector<4x64xf32>
    %c0_96 = arith.constant 0 : index
    %c7_97 = arith.constant 7 : index
    %c0_98 = arith.constant 0 : index
    %c0_99 = arith.constant 0 : index
    %55 = vector.load %arg1[%c0_96, %c7_97, %c0_98, %c0_99] : memref<4x10x5x64xf32, #tpu.memory_space<vmem>>, vector<1x1x4x64xf32>
    %56 = vector.shape_cast %55 : vector<1x1x4x64xf32> to vector<4x64xf32>
    %c0_100 = arith.constant 0 : index
    %c7_101 = arith.constant 7 : index
    %c1_102 = arith.constant 1 : index
    %c0_103 = arith.constant 0 : index
    %57 = vector.load %arg1[%c0_100, %c7_101, %c1_102, %c0_103] : memref<4x10x5x64xf32, #tpu.memory_space<vmem>>, vector<1x1x4x64xf32>
    %58 = vector.shape_cast %57 : vector<1x1x4x64xf32> to vector<4x64xf32>
    %c0_104 = arith.constant 0 : index
    %c8 = arith.constant 8 : index
    %c0_105 = arith.constant 0 : index
    %c0_106 = arith.constant 0 : index
    %59 = vector.load %arg1[%c0_104, %c8, %c0_105, %c0_106] : memref<4x10x5x64xf32, #tpu.memory_space<vmem>>, vector<1x1x4x64xf32>
    %60 = vector.shape_cast %59 : vector<1x1x4x64xf32> to vector<4x64xf32>
    %c0_107 = arith.constant 0 : index
    %c8_108 = arith.constant 8 : index
    %c1_109 = arith.constant 1 : index
    %c0_110 = arith.constant 0 : index
    %61 = vector.load %arg1[%c0_107, %c8_108, %c1_109, %c0_110] : memref<4x10x5x64xf32, #tpu.memory_space<vmem>>, vector<1x1x4x64xf32>
    %62 = vector.shape_cast %61 : vector<1x1x4x64xf32> to vector<4x64xf32>
    %c0_111 = arith.constant 0 : index
    %c9 = arith.constant 9 : index
    %c0_112 = arith.constant 0 : index
    %c0_113 = arith.constant 0 : index
    %63 = vector.load %arg1[%c0_111, %c9, %c0_112, %c0_113] : memref<4x10x5x64xf32, #tpu.memory_space<vmem>>, vector<1x1x4x64xf32>
    %64 = vector.shape_cast %63 : vector<1x1x4x64xf32> to vector<4x64xf32>
    %c0_114 = arith.constant 0 : index
    %c9_115 = arith.constant 9 : index
    %c1_116 = arith.constant 1 : index
    %c0_117 = arith.constant 0 : index
    %65 = vector.load %arg1[%c0_114, %c9_115, %c1_116, %c0_117] : memref<4x10x5x64xf32, #tpu.memory_space<vmem>>, vector<1x1x4x64xf32>
    %66 = vector.shape_cast %65 : vector<1x1x4x64xf32> to vector<4x64xf32>
    %67 = tpu.concatenate %52, %54, %56, %58, %60, %62, %64, %66 in 1 : vector<4x64xf32>, vector<4x64xf32>, vector<4x64xf32>, vector<4x64xf32>, vector<4x64xf32>, vector<4x64xf32>, vector<4x64xf32>, vector<4x64xf32> -> vector<4x512xf32>
    %c1_118 = arith.constant 1 : index
    %c0_119 = arith.constant 0 : index
    %c0_120 = arith.constant 0 : index
    %c0_121 = arith.constant 0 : index
    %68 = vector.load %arg1[%c1_118, %c0_119, %c0_120, %c0_121] : memref<4x10x5x64xf32, #tpu.memory_space<vmem>>, vector<1x1x4x64xf32>
    %69 = vector.shape_cast %68 : vector<1x1x4x64xf32> to vector<4x64xf32>
    %c1_122 = arith.constant 1 : index
    %c0_123 = arith.constant 0 : index
    %c1_124 = arith.constant 1 : index
    %c0_125 = arith.constant 0 : index
    %70 = vector.load %arg1[%c1_122, %c0_123, %c1_124, %c0_125] : memref<4x10x5x64xf32, #tpu.memory_space<vmem>>, vector<1x1x4x64xf32>
    %71 = vector.shape_cast %70 : vector<1x1x4x64xf32> to vector<4x64xf32>
    %c1_126 = arith.constant 1 : index
    %c1_127 = arith.constant 1 : index
    %c0_128 = arith.constant 0 : index
    %c0_129 = arith.constant 0 : index
    %72 = vector.load %arg1[%c1_126, %c1_127, %c0_128, %c0_129] : memref<4x10x5x64xf32, #tpu.memory_space<vmem>>, vector<1x1x4x64xf32>
    %73 = vector.shape_cast %72 : vector<1x1x4x64xf32> to vector<4x64xf32>
    %c1_130 = arith.constant 1 : index
    %c1_131 = arith.constant 1 : index
    %c1_132 = arith.constant 1 : index
    %c0_133 = arith.constant 0 : index
    %74 = vector.load %arg1[%c1_130, %c1_131, %c1_132, %c0_133] : memref<4x10x5x64xf32, #tpu.memory_space<vmem>>, vector<1x1x4x64xf32>
    %75 = vector.shape_cast %74 : vector<1x1x4x64xf32> to vector<4x64xf32>
    %c1_134 = arith.constant 1 : index
    %c2_135 = arith.constant 2 : index
    %c0_136 = arith.constant 0 : index
    %c0_137 = arith.constant 0 : index
    %76 = vector.load %arg1[%c1_134, %c2_135, %c0_136, %c0_137] : memref<4x10x5x64xf32, #tpu.memory_space<vmem>>, vector<1x1x4x64xf32>
    %77 = vector.shape_cast %76 : vector<1x1x4x64xf32> to vector<4x64xf32>
    %c1_138 = arith.constant 1 : index
    %c2_139 = arith.constant 2 : index
    %c1_140 = arith.constant 1 : index
    %c0_141 = arith.constant 0 : index
    %78 = vector.load %arg1[%c1_138, %c2_139, %c1_140, %c0_141] : memref<4x10x5x64xf32, #tpu.memory_space<vmem>>, vector<1x1x4x64xf32>
    %79 = vector.shape_cast %78 : vector<1x1x4x64xf32> to vector<4x64xf32>
    %c1_142 = arith.constant 1 : index
    %c3_143 = arith.constant 3 : index
    %c0_144 = arith.constant 0 : index
    %c0_145 = arith.constant 0 : index
    %80 = vector.load %arg1[%c1_142, %c3_143, %c0_144, %c0_145] : memref<4x10x5x64xf32, #tpu.memory_space<vmem>>, vector<1x1x4x64xf32>
    %81 = vector.shape_cast %80 : vector<1x1x4x64xf32> to vector<4x64xf32>
    %c1_146 = arith.constant 1 : index
    %c3_147 = arith.constant 3 : index
    %c1_148 = arith.constant 1 : index
    %c0_149 = arith.constant 0 : index
    %82 = vector.load %arg1[%c1_146, %c3_147, %c1_148, %c0_149] : memref<4x10x5x64xf32, #tpu.memory_space<vmem>>, vector<1x1x4x64xf32>
    %83 = vector.shape_cast %82 : vector<1x1x4x64xf32> to vector<4x64xf32>
    %84 = tpu.concatenate %69, %71, %73, %75, %77, %79, %81, %83 in 1 : vector<4x64xf32>, vector<4x64xf32>, vector<4x64xf32>, vector<4x64xf32>, vector<4x64xf32>, vector<4x64xf32>, vector<4x64xf32>, vector<4x64xf32> -> vector<4x512xf32>
    %c1_150 = arith.constant 1 : index
    %c2_151 = arith.constant 2 : index
    %c0_152 = arith.constant 0 : index
    %c0_153 = arith.constant 0 : index
    %85 = vector.load %arg1[%c1_150, %c2_151, %c0_152, %c0_153] : memref<4x10x5x64xf32, #tpu.memory_space<vmem>>, vector<1x1x4x64xf32>
    %86 = vector.shape_cast %85 : vector<1x1x4x64xf32> to vector<4x64xf32>
    %c1_154 = arith.constant 1 : index
    %c2_155 = arith.constant 2 : index
    %c1_156 = arith.constant 1 : index
    %c0_157 = arith.constant 0 : index
    %87 = vector.load %arg1[%c1_154, %c2_155, %c1_156, %c0_157] : memref<4x10x5x64xf32, #tpu.memory_space<vmem>>, vector<1x1x4x64xf32>
    %88 = vector.shape_cast %87 : vector<1x1x4x64xf32> to vector<4x64xf32>
    %c1_158 = arith.constant 1 : index
    %c3_159 = arith.constant 3 : index
    %c0_160 = arith.constant 0 : index
    %c0_161 = arith.constant 0 : index
    %89 = vector.load %arg1[%c1_158, %c3_159, %c0_160, %c0_161] : memref<4x10x5x64xf32, #tpu.memory_space<vmem>>, vector<1x1x4x64xf32>
    %90 = vector.shape_cast %89 : vector<1x1x4x64xf32> to vector<4x64xf32>
    %c1_162 = arith.constant 1 : index
    %c3_163 = arith.constant 3 : index
    %c1_164 = arith.constant 1 : index
    %c0_165 = arith.constant 0 : index
    %91 = vector.load %arg1[%c1_162, %c3_163, %c1_164, %c0_165] : memref<4x10x5x64xf32, #tpu.memory_space<vmem>>, vector<1x1x4x64xf32>
    %92 = vector.shape_cast %91 : vector<1x1x4x64xf32> to vector<4x64xf32>
    %c1_166 = arith.constant 1 : index
    %c4_167 = arith.constant 4 : index
    %c0_168 = arith.constant 0 : index
    %c0_169 = arith.constant 0 : index
    %93 = vector.load %arg1[%c1_166, %c4_167, %c0_168, %c0_169] : memref<4x10x5x64xf32, #tpu.memory_space<vmem>>, vector<1x1x4x64xf32>
    %94 = vector.shape_cast %93 : vector<1x1x4x64xf32> to vector<4x64xf32>
    %c1_170 = arith.constant 1 : index
    %c4_171 = arith.constant 4 : index
    %c1_172 = arith.constant 1 : index
    %c0_173 = arith.constant 0 : index
    %95 = vector.load %arg1[%c1_170, %c4_171, %c1_172, %c0_173] : memref<4x10x5x64xf32, #tpu.memory_space<vmem>>, vector<1x1x4x64xf32>
    %96 = vector.shape_cast %95 : vector<1x1x4x64xf32> to vector<4x64xf32>
    %c1_174 = arith.constant 1 : index
    %c5_175 = arith.constant 5 : index
    %c0_176 = arith.constant 0 : index
    %c0_177 = arith.constant 0 : index
    %97 = vector.load %arg1[%c1_174, %c5_175, %c0_176, %c0_177] : memref<4x10x5x64xf32, #tpu.memory_space<vmem>>, vector<1x1x4x64xf32>
    %98 = vector.shape_cast %97 : vector<1x1x4x64xf32> to vector<4x64xf32>
    %c1_178 = arith.constant 1 : index
    %c5_179 = arith.constant 5 : index
    %c1_180 = arith.constant 1 : index
    %c0_181 = arith.constant 0 : index
    %99 = vector.load %arg1[%c1_178, %c5_179, %c1_180, %c0_181] : memref<4x10x5x64xf32, #tpu.memory_space<vmem>>, vector<1x1x4x64xf32>
    %100 = vector.shape_cast %99 : vector<1x1x4x64xf32> to vector<4x64xf32>
    %101 = tpu.concatenate %86, %88, %90, %92, %94, %96, %98, %100 in 1 : vector<4x64xf32>, vector<4x64xf32>, vector<4x64xf32>, vector<4x64xf32>, vector<4x64xf32>, vector<4x64xf32>, vector<4x64xf32>, vector<4x64xf32> -> vector<4x512xf32>
    %c1_182 = arith.constant 1 : index
    %c4_183 = arith.constant 4 : index
    %c0_184 = arith.constant 0 : index
    %c0_185 = arith.constant 0 : index
    %102 = vector.load %arg1[%c1_182, %c4_183, %c0_184, %c0_185] : memref<4x10x5x64xf32, #tpu.memory_space<vmem>>, vector<1x1x4x64xf32>
    %103 = vector.shape_cast %102 : vector<1x1x4x64xf32> to vector<4x64xf32>
    %c1_186 = arith.constant 1 : index
    %c4_187 = arith.constant 4 : index
    %c1_188 = arith.constant 1 : index
    %c0_189 = arith.constant 0 : index
    %104 = vector.load %arg1[%c1_186, %c4_187, %c1_188, %c0_189] : memref<4x10x5x64xf32, #tpu.memory_space<vmem>>, vector<1x1x4x64xf32>
    %105 = vector.shape_cast %104 : vector<1x1x4x64xf32> to vector<4x64xf32>
    %c1_190 = arith.constant 1 : index
    %c5_191 = arith.constant 5 : index
    %c0_192 = arith.constant 0 : index
    %c0_193 = arith.constant 0 : index
    %106 = vector.load %arg1[%c1_190, %c5_191, %c0_192, %c0_193] : memref<4x10x5x64xf32, #tpu.memory_space<vmem>>, vector<1x1x4x64xf32>
    %107 = vector.shape_cast %106 : vector<1x1x4x64xf32> to vector<4x64xf32>
    %c1_194 = arith.constant 1 : index
    %c5_195 = arith.constant 5 : index
    %c1_196 = arith.constant 1 : index
    %c0_197 = arith.constant 0 : index
    %108 = vector.load %arg1[%c1_194, %c5_195, %c1_196, %c0_197] : memref<4x10x5x64xf32, #tpu.memory_space<vmem>>, vector<1x1x4x64xf32>
    %109 = vector.shape_cast %108 : vector<1x1x4x64xf32> to vector<4x64xf32>
    %c1_198 = arith.constant 1 : index
    %c6_199 = arith.constant 6 : index
    %c0_200 = arith.constant 0 : index
    %c0_201 = arith.constant 0 : index
    %110 = vector.load %arg1[%c1_198, %c6_199, %c0_200, %c0_201] : memref<4x10x5x64xf32, #tpu.memory_space<vmem>>, vector<1x1x4x64xf32>
    %111 = vector.shape_cast %110 : vector<1x1x4x64xf32> to vector<4x64xf32>
    %c1_202 = arith.constant 1 : index
    %c6_203 = arith.constant 6 : index
    %c1_204 = arith.constant 1 : index
    %c0_205 = arith.constant 0 : index
    %112 = vector.load %arg1[%c1_202, %c6_203, %c1_204, %c0_205] : memref<4x10x5x64xf32, #tpu.memory_space<vmem>>, vector<1x1x4x64xf32>
    %113 = vector.shape_cast %112 : vector<1x1x4x64xf32> to vector<4x64xf32>
    %c1_206 = arith.constant 1 : index
    %c7_207 = arith.constant 7 : index
    %c0_208 = arith.constant 0 : index
    %c0_209 = arith.constant 0 : index
    %114 = vector.load %arg1[%c1_206, %c7_207, %c0_208, %c0_209] : memref<4x10x5x64xf32, #tpu.memory_space<vmem>>, vector<1x1x4x64xf32>
    %115 = vector.shape_cast %114 : vector<1x1x4x64xf32> to vector<4x64xf32>
    %c1_210 = arith.constant 1 : index
    %c7_211 = arith.constant 7 : index
    %c1_212 = arith.constant 1 : index
    %c0_213 = arith.constant 0 : index
    %116 = vector.load %arg1[%c1_210, %c7_211, %c1_212, %c0_213] : memref<4x10x5x64xf32, #tpu.memory_space<vmem>>, vector<1x1x4x64xf32>
    %117 = vector.shape_cast %116 : vector<1x1x4x64xf32> to vector<4x64xf32>
    %118 = tpu.concatenate %103, %105, %107, %109, %111, %113, %115, %117 in 1 : vector<4x64xf32>, vector<4x64xf32>, vector<4x64xf32>, vector<4x64xf32>, vector<4x64xf32>, vector<4x64xf32>, vector<4x64xf32>, vector<4x64xf32> -> vector<4x512xf32>
    %c1_214 = arith.constant 1 : index
    %c6_215 = arith.constant 6 : index
    %c0_216 = arith.constant 0 : index
    %c0_217 = arith.constant 0 : index
    %119 = vector.load %arg1[%c1_214, %c6_215, %c0_216, %c0_217] : memref<4x10x5x64xf32, #tpu.memory_space<vmem>>, vector<1x1x4x64xf32>
    %120 = vector.shape_cast %119 : vector<1x1x4x64xf32> to vector<4x64xf32>
    %c1_218 = arith.constant 1 : index
    %c6_219 = arith.constant 6 : index
    %c1_220 = arith.constant 1 : index
    %c0_221 = arith.constant 0 : index
    %121 = vector.load %arg1[%c1_218, %c6_219, %c1_220, %c0_221] : memref<4x10x5x64xf32, #tpu.memory_space<vmem>>, vector<1x1x4x64xf32>
    %122 = vector.shape_cast %121 : vector<1x1x4x64xf32> to vector<4x64xf32>
    %c1_222 = arith.constant 1 : index
    %c7_223 = arith.constant 7 : index
    %c0_224 = arith.constant 0 : index
    %c0_225 = arith.constant 0 : index
    %123 = vector.load %arg1[%c1_222, %c7_223, %c0_224, %c0_225] : memref<4x10x5x64xf32, #tpu.memory_space<vmem>>, vector<1x1x4x64xf32>
    %124 = vector.shape_cast %123 : vector<1x1x4x64xf32> to vector<4x64xf32>
    %c1_226 = arith.constant 1 : index
    %c7_227 = arith.constant 7 : index
    %c1_228 = arith.constant 1 : index
    %c0_229 = arith.constant 0 : index
    %125 = vector.load %arg1[%c1_226, %c7_227, %c1_228, %c0_229] : memref<4x10x5x64xf32, #tpu.memory_space<vmem>>, vector<1x1x4x64xf32>
    %126 = vector.shape_cast %125 : vector<1x1x4x64xf32> to vector<4x64xf32>
    %c1_230 = arith.constant 1 : index
    %c8_231 = arith.constant 8 : index
    %c0_232 = arith.constant 0 : index
    %c0_233 = arith.constant 0 : index
    %127 = vector.load %arg1[%c1_230, %c8_231, %c0_232, %c0_233] : memref<4x10x5x64xf32, #tpu.memory_space<vmem>>, vector<1x1x4x64xf32>
    %128 = vector.shape_cast %127 : vector<1x1x4x64xf32> to vector<4x64xf32>
    %c1_234 = arith.constant 1 : index
    %c8_235 = arith.constant 8 : index
    %c1_236 = arith.constant 1 : index
    %c0_237 = arith.constant 0 : index
    %129 = vector.load %arg1[%c1_234, %c8_235, %c1_236, %c0_237] : memref<4x10x5x64xf32, #tpu.memory_space<vmem>>, vector<1x1x4x64xf32>
    %130 = vector.shape_cast %129 : vector<1x1x4x64xf32> to vector<4x64xf32>
    %c1_238 = arith.constant 1 : index
    %c9_239 = arith.constant 9 : index
    %c0_240 = arith.constant 0 : index
    %c0_241 = arith.constant 0 : index
    %131 = vector.load %arg1[%c1_238, %c9_239, %c0_240, %c0_241] : memref<4x10x5x64xf32, #tpu.memory_space<vmem>>, vector<1x1x4x64xf32>
    %132 = vector.shape_cast %131 : vector<1x1x4x64xf32> to vector<4x64xf32>
    %c1_242 = arith.constant 1 : index
    %c9_243 = arith.constant 9 : index
    %c1_244 = arith.constant 1 : index
    %c0_245 = arith.constant 0 : index
    %133 = vector.load %arg1[%c1_242, %c9_243, %c1_244, %c0_245] : memref<4x10x5x64xf32, #tpu.memory_space<vmem>>, vector<1x1x4x64xf32>
    %134 = vector.shape_cast %133 : vector<1x1x4x64xf32> to vector<4x64xf32>
    %135 = tpu.concatenate %120, %122, %124, %126, %128, %130, %132, %134 in 1 : vector<4x64xf32>, vector<4x64xf32>, vector<4x64xf32>, vector<4x64xf32>, vector<4x64xf32>, vector<4x64xf32>, vector<4x64xf32>, vector<4x64xf32> -> vector<4x512xf32>
    %c2_246 = arith.constant 2 : index
    %c0_247 = arith.constant 0 : index
    %c0_248 = arith.constant 0 : index
    %c0_249 = arith.constant 0 : index
    %136 = vector.load %arg1[%c2_246, %c0_247, %c0_248, %c0_249] : memref<4x10x5x64xf32, #tpu.memory_space<vmem>>, vector<1x1x4x64xf32>
    %137 = vector.shape_cast %136 : vector<1x1x4x64xf32> to vector<4x64xf32>
    %c2_250 = arith.constant 2 : index
    %c0_251 = arith.constant 0 : index
    %c1_252 = arith.constant 1 : index
    %c0_253 = arith.constant 0 : index
    %138 = vector.load %arg1[%c2_250, %c0_251, %c1_252, %c0_253] : memref<4x10x5x64xf32, #tpu.memory_space<vmem>>, vector<1x1x4x64xf32>
    %139 = vector.shape_cast %138 : vector<1x1x4x64xf32> to vector<4x64xf32>
    %c2_254 = arith.constant 2 : index
    %c1_255 = arith.constant 1 : index
    %c0_256 = arith.constant 0 : index
    %c0_257 = arith.constant 0 : index
    %140 = vector.load %arg1[%c2_254, %c1_255, %c0_256, %c0_257] : memref<4x10x5x64xf32, #tpu.memory_space<vmem>>, vector<1x1x4x64xf32>
    %141 = vector.shape_cast %140 : vector<1x1x4x64xf32> to vector<4x64xf32>
    %c2_258 = arith.constant 2 : index
    %c1_259 = arith.constant 1 : index
    %c1_260 = arith.constant 1 : index
    %c0_261 = arith.constant 0 : index
    %142 = vector.load %arg1[%c2_258, %c1_259, %c1_260, %c0_261] : memref<4x10x5x64xf32, #tpu.memory_space<vmem>>, vector<1x1x4x64xf32>
    %143 = vector.shape_cast %142 : vector<1x1x4x64xf32> to vector<4x64xf32>
    %c2_262 = arith.constant 2 : index
    %c2_263 = arith.constant 2 : index
    %c0_264 = arith.constant 0 : index
    %c0_265 = arith.constant 0 : index
    %144 = vector.load %arg1[%c2_262, %c2_263, %c0_264, %c0_265] : memref<4x10x5x64xf32, #tpu.memory_space<vmem>>, vector<1x1x4x64xf32>
    %145 = vector.shape_cast %144 : vector<1x1x4x64xf32> to vector<4x64xf32>
    %c2_266 = arith.constant 2 : index
    %c2_267 = arith.constant 2 : index
    %c1_268 = arith.constant 1 : index
    %c0_269 = arith.constant 0 : index
    %146 = vector.load %arg1[%c2_266, %c2_267, %c1_268, %c0_269] : memref<4x10x5x64xf32, #tpu.memory_space<vmem>>, vector<1x1x4x64xf32>
    %147 = vector.shape_cast %146 : vector<1x1x4x64xf32> to vector<4x64xf32>
    %c2_270 = arith.constant 2 : index
    %c3_271 = arith.constant 3 : index
    %c0_272 = arith.constant 0 : index
    %c0_273 = arith.constant 0 : index
    %148 = vector.load %arg1[%c2_270, %c3_271, %c0_272, %c0_273] : memref<4x10x5x64xf32, #tpu.memory_space<vmem>>, vector<1x1x4x64xf32>
    %149 = vector.shape_cast %148 : vector<1x1x4x64xf32> to vector<4x64xf32>
    %c2_274 = arith.constant 2 : index
    %c3_275 = arith.constant 3 : index
    %c1_276 = arith.constant 1 : index
    %c0_277 = arith.constant 0 : index
    %150 = vector.load %arg1[%c2_274, %c3_275, %c1_276, %c0_277] : memref<4x10x5x64xf32, #tpu.memory_space<vmem>>, vector<1x1x4x64xf32>
    %151 = vector.shape_cast %150 : vector<1x1x4x64xf32> to vector<4x64xf32>
    %152 = tpu.concatenate %137, %139, %141, %143, %145, %147, %149, %151 in 1 : vector<4x64xf32>, vector<4x64xf32>, vector<4x64xf32>, vector<4x64xf32>, vector<4x64xf32>, vector<4x64xf32>, vector<4x64xf32>, vector<4x64xf32> -> vector<4x512xf32>
    %c2_278 = arith.constant 2 : index
    %c2_279 = arith.constant 2 : index
    %c0_280 = arith.constant 0 : index
    %c0_281 = arith.constant 0 : index
    %153 = vector.load %arg1[%c2_278, %c2_279, %c0_280, %c0_281] : memref<4x10x5x64xf32, #tpu.memory_space<vmem>>, vector<1x1x4x64xf32>
    %154 = vector.shape_cast %153 : vector<1x1x4x64xf32> to vector<4x64xf32>
    %c2_282 = arith.constant 2 : index
    %c2_283 = arith.constant 2 : index
    %c1_284 = arith.constant 1 : index
    %c0_285 = arith.constant 0 : index
    %155 = vector.load %arg1[%c2_282, %c2_283, %c1_284, %c0_285] : memref<4x10x5x64xf32, #tpu.memory_space<vmem>>, vector<1x1x4x64xf32>
    %156 = vector.shape_cast %155 : vector<1x1x4x64xf32> to vector<4x64xf32>
    %c2_286 = arith.constant 2 : index
    %c3_287 = arith.constant 3 : index
    %c0_288 = arith.constant 0 : index
    %c0_289 = arith.constant 0 : index
    %157 = vector.load %arg1[%c2_286, %c3_287, %c0_288, %c0_289] : memref<4x10x5x64xf32, #tpu.memory_space<vmem>>, vector<1x1x4x64xf32>
    %158 = vector.shape_cast %157 : vector<1x1x4x64xf32> to vector<4x64xf32>
    %c2_290 = arith.constant 2 : index
    %c3_291 = arith.constant 3 : index
    %c1_292 = arith.constant 1 : index
    %c0_293 = arith.constant 0 : index
    %159 = vector.load %arg1[%c2_290, %c3_291, %c1_292, %c0_293] : memref<4x10x5x64xf32, #tpu.memory_space<vmem>>, vector<1x1x4x64xf32>
    %160 = vector.shape_cast %159 : vector<1x1x4x64xf32> to vector<4x64xf32>
    %c2_294 = arith.constant 2 : index
    %c4_295 = arith.constant 4 : index
    %c0_296 = arith.constant 0 : index
    %c0_297 = arith.constant 0 : index
    %161 = vector.load %arg1[%c2_294, %c4_295, %c0_296, %c0_297] : memref<4x10x5x64xf32, #tpu.memory_space<vmem>>, vector<1x1x4x64xf32>
    %162 = vector.shape_cast %161 : vector<1x1x4x64xf32> to vector<4x64xf32>
    %c2_298 = arith.constant 2 : index
    %c4_299 = arith.constant 4 : index
    %c1_300 = arith.constant 1 : index
    %c0_301 = arith.constant 0 : index
    %163 = vector.load %arg1[%c2_298, %c4_299, %c1_300, %c0_301] : memref<4x10x5x64xf32, #tpu.memory_space<vmem>>, vector<1x1x4x64xf32>
    %164 = vector.shape_cast %163 : vector<1x1x4x64xf32> to vector<4x64xf32>
    %c2_302 = arith.constant 2 : index
    %c5_303 = arith.constant 5 : index
    %c0_304 = arith.constant 0 : index
    %c0_305 = arith.constant 0 : index
    %165 = vector.load %arg1[%c2_302, %c5_303, %c0_304, %c0_305] : memref<4x10x5x64xf32, #tpu.memory_space<vmem>>, vector<1x1x4x64xf32>
    %166 = vector.shape_cast %165 : vector<1x1x4x64xf32> to vector<4x64xf32>
    %c2_306 = arith.constant 2 : index
    %c5_307 = arith.constant 5 : index
    %c1_308 = arith.constant 1 : index
    %c0_309 = arith.constant 0 : index
    %167 = vector.load %arg1[%c2_306, %c5_307, %c1_308, %c0_309] : memref<4x10x5x64xf32, #tpu.memory_space<vmem>>, vector<1x1x4x64xf32>
    %168 = vector.shape_cast %167 : vector<1x1x4x64xf32> to vector<4x64xf32>
    %169 = tpu.concatenate %154, %156, %158, %160, %162, %164, %166, %168 in 1 : vector<4x64xf32>, vector<4x64xf32>, vector<4x64xf32>, vector<4x64xf32>, vector<4x64xf32>, vector<4x64xf32>, vector<4x64xf32>, vector<4x64xf32> -> vector<4x512xf32>
    %c2_310 = arith.constant 2 : index
    %c4_311 = arith.constant 4 : index
    %c0_312 = arith.constant 0 : index
    %c0_313 = arith.constant 0 : index
    %170 = vector.load %arg1[%c2_310, %c4_311, %c0_312, %c0_313] : memref<4x10x5x64xf32, #tpu.memory_space<vmem>>, vector<1x1x4x64xf32>
    %171 = vector.shape_cast %170 : vector<1x1x4x64xf32> to vector<4x64xf32>
    %c2_314 = arith.constant 2 : index
    %c4_315 = arith.constant 4 : index
    %c1_316 = arith.constant 1 : index
    %c0_317 = arith.constant 0 : index
    %172 = vector.load %arg1[%c2_314, %c4_315, %c1_316, %c0_317] : memref<4x10x5x64xf32, #tpu.memory_space<vmem>>, vector<1x1x4x64xf32>
    %173 = vector.shape_cast %172 : vector<1x1x4x64xf32> to vector<4x64xf32>
    %c2_318 = arith.constant 2 : index
    %c5_319 = arith.constant 5 : index
    %c0_320 = arith.constant 0 : index
    %c0_321 = arith.constant 0 : index
    %174 = vector.load %arg1[%c2_318, %c5_319, %c0_320, %c0_321] : memref<4x10x5x64xf32, #tpu.memory_space<vmem>>, vector<1x1x4x64xf32>
    %175 = vector.shape_cast %174 : vector<1x1x4x64xf32> to vector<4x64xf32>
    %c2_322 = arith.constant 2 : index
    %c5_323 = arith.constant 5 : index
    %c1_324 = arith.constant 1 : index
    %c0_325 = arith.constant 0 : index
    %176 = vector.load %arg1[%c2_322, %c5_323, %c1_324, %c0_325] : memref<4x10x5x64xf32, #tpu.memory_space<vmem>>, vector<1x1x4x64xf32>
    %177 = vector.shape_cast %176 : vector<1x1x4x64xf32> to vector<4x64xf32>
    %c2_326 = arith.constant 2 : index
    %c6_327 = arith.constant 6 : index
    %c0_328 = arith.constant 0 : index
    %c0_329 = arith.constant 0 : index
    %178 = vector.load %arg1[%c2_326, %c6_327, %c0_328, %c0_329] : memref<4x10x5x64xf32, #tpu.memory_space<vmem>>, vector<1x1x4x64xf32>
    %179 = vector.shape_cast %178 : vector<1x1x4x64xf32> to vector<4x64xf32>
    %c2_330 = arith.constant 2 : index
    %c6_331 = arith.constant 6 : index
    %c1_332 = arith.constant 1 : index
    %c0_333 = arith.constant 0 : index
    %180 = vector.load %arg1[%c2_330, %c6_331, %c1_332, %c0_333] : memref<4x10x5x64xf32, #tpu.memory_space<vmem>>, vector<1x1x4x64xf32>
    %181 = vector.shape_cast %180 : vector<1x1x4x64xf32> to vector<4x64xf32>
    %c2_334 = arith.constant 2 : index
    %c7_335 = arith.constant 7 : index
    %c0_336 = arith.constant 0 : index
    %c0_337 = arith.constant 0 : index
    %182 = vector.load %arg1[%c2_334, %c7_335, %c0_336, %c0_337] : memref<4x10x5x64xf32, #tpu.memory_space<vmem>>, vector<1x1x4x64xf32>
    %183 = vector.shape_cast %182 : vector<1x1x4x64xf32> to vector<4x64xf32>
    %c2_338 = arith.constant 2 : index
    %c7_339 = arith.constant 7 : index
    %c1_340 = arith.constant 1 : index
    %c0_341 = arith.constant 0 : index
    %184 = vector.load %arg1[%c2_338, %c7_339, %c1_340, %c0_341] : memref<4x10x5x64xf32, #tpu.memory_space<vmem>>, vector<1x1x4x64xf32>
    %185 = vector.shape_cast %184 : vector<1x1x4x64xf32> to vector<4x64xf32>
    %186 = tpu.concatenate %171, %173, %175, %177, %179, %181, %183, %185 in 1 : vector<4x64xf32>, vector<4x64xf32>, vector<4x64xf32>, vector<4x64xf32>, vector<4x64xf32>, vector<4x64xf32>, vector<4x64xf32>, vector<4x64xf32> -> vector<4x512xf32>
    %c2_342 = arith.constant 2 : index
    %c6_343 = arith.constant 6 : index
    %c0_344 = arith.constant 0 : index
    %c0_345 = arith.constant 0 : index
    %187 = vector.load %arg1[%c2_342, %c6_343, %c0_344, %c0_345] : memref<4x10x5x64xf32, #tpu.memory_space<vmem>>, vector<1x1x4x64xf32>
    %188 = vector.shape_cast %187 : vector<1x1x4x64xf32> to vector<4x64xf32>
    %c2_346 = arith.constant 2 : index
    %c6_347 = arith.constant 6 : index
    %c1_348 = arith.constant 1 : index
    %c0_349 = arith.constant 0 : index
    %189 = vector.load %arg1[%c2_346, %c6_347, %c1_348, %c0_349] : memref<4x10x5x64xf32, #tpu.memory_space<vmem>>, vector<1x1x4x64xf32>
    %190 = vector.shape_cast %189 : vector<1x1x4x64xf32> to vector<4x64xf32>
    %c2_350 = arith.constant 2 : index
    %c7_351 = arith.constant 7 : index
    %c0_352 = arith.constant 0 : index
    %c0_353 = arith.constant 0 : index
    %191 = vector.load %arg1[%c2_350, %c7_351, %c0_352, %c0_353] : memref<4x10x5x64xf32, #tpu.memory_space<vmem>>, vector<1x1x4x64xf32>
    %192 = vector.shape_cast %191 : vector<1x1x4x64xf32> to vector<4x64xf32>
    %c2_354 = arith.constant 2 : index
    %c7_355 = arith.constant 7 : index
    %c1_356 = arith.constant 1 : index
    %c0_357 = arith.constant 0 : index
    %193 = vector.load %arg1[%c2_354, %c7_355, %c1_356, %c0_357] : memref<4x10x5x64xf32, #tpu.memory_space<vmem>>, vector<1x1x4x64xf32>
    %194 = vector.shape_cast %193 : vector<1x1x4x64xf32> to vector<4x64xf32>
    %c2_358 = arith.constant 2 : index
    %c8_359 = arith.constant 8 : index
    %c0_360 = arith.constant 0 : index
    %c0_361 = arith.constant 0 : index
    %195 = vector.load %arg1[%c2_358, %c8_359, %c0_360, %c0_361] : memref<4x10x5x64xf32, #tpu.memory_space<vmem>>, vector<1x1x4x64xf32>
    %196 = vector.shape_cast %195 : vector<1x1x4x64xf32> to vector<4x64xf32>
    %c2_362 = arith.constant 2 : index
    %c8_363 = arith.constant 8 : index
    %c1_364 = arith.constant 1 : index
    %c0_365 = arith.constant 0 : index
    %197 = vector.load %arg1[%c2_362, %c8_363, %c1_364, %c0_365] : memref<4x10x5x64xf32, #tpu.memory_space<vmem>>, vector<1x1x4x64xf32>
    %198 = vector.shape_cast %197 : vector<1x1x4x64xf32> to vector<4x64xf32>
    %c2_366 = arith.constant 2 : index
    %c9_367 = arith.constant 9 : index
    %c0_368 = arith.constant 0 : index
    %c0_369 = arith.constant 0 : index
    %199 = vector.load %arg1[%c2_366, %c9_367, %c0_368, %c0_369] : memref<4x10x5x64xf32, #tpu.memory_space<vmem>>, vector<1x1x4x64xf32>
    %200 = vector.shape_cast %199 : vector<1x1x4x64xf32> to vector<4x64xf32>
    %c2_370 = arith.constant 2 : index
    %c9_371 = arith.constant 9 : index
    %c1_372 = arith.constant 1 : index
    %c0_373 = arith.constant 0 : index
    %201 = vector.load %arg1[%c2_370, %c9_371, %c1_372, %c0_373] : memref<4x10x5x64xf32, #tpu.memory_space<vmem>>, vector<1x1x4x64xf32>
    %202 = vector.shape_cast %201 : vector<1x1x4x64xf32> to vector<4x64xf32>
    %203 = tpu.concatenate %188, %190, %192, %194, %196, %198, %200, %202 in 1 : vector<4x64xf32>, vector<4x64xf32>, vector<4x64xf32>, vector<4x64xf32>, vector<4x64xf32>, vector<4x64xf32>, vector<4x64xf32>, vector<4x64xf32> -> vector<4x512xf32>
    %c3_374 = arith.constant 3 : index
    %c0_375 = arith.constant 0 : index
    %c0_376 = arith.constant 0 : index
    %c0_377 = arith.constant 0 : index
    %204 = vector.load %arg1[%c3_374, %c0_375, %c0_376, %c0_377] : memref<4x10x5x64xf32, #tpu.memory_space<vmem>>, vector<1x1x4x64xf32>
    %205 = vector.shape_cast %204 : vector<1x1x4x64xf32> to vector<4x64xf32>
    %c3_378 = arith.constant 3 : index
    %c0_379 = arith.constant 0 : index
    %c1_380 = arith.constant 1 : index
    %c0_381 = arith.constant 0 : index
    %206 = vector.load %arg1[%c3_378, %c0_379, %c1_380, %c0_381] : memref<4x10x5x64xf32, #tpu.memory_space<vmem>>, vector<1x1x4x64xf32>
    %207 = vector.shape_cast %206 : vector<1x1x4x64xf32> to vector<4x64xf32>
    %c3_382 = arith.constant 3 : index
    %c1_383 = arith.constant 1 : index
    %c0_384 = arith.constant 0 : index
    %c0_385 = arith.constant 0 : index
    %208 = vector.load %arg1[%c3_382, %c1_383, %c0_384, %c0_385] : memref<4x10x5x64xf32, #tpu.memory_space<vmem>>, vector<1x1x4x64xf32>
    %209 = vector.shape_cast %208 : vector<1x1x4x64xf32> to vector<4x64xf32>
    %c3_386 = arith.constant 3 : index
    %c1_387 = arith.constant 1 : index
    %c1_388 = arith.constant 1 : index
    %c0_389 = arith.constant 0 : index
    %210 = vector.load %arg1[%c3_386, %c1_387, %c1_388, %c0_389] : memref<4x10x5x64xf32, #tpu.memory_space<vmem>>, vector<1x1x4x64xf32>
    %211 = vector.shape_cast %210 : vector<1x1x4x64xf32> to vector<4x64xf32>
    %c3_390 = arith.constant 3 : index
    %c2_391 = arith.constant 2 : index
    %c0_392 = arith.constant 0 : index
    %c0_393 = arith.constant 0 : index
    %212 = vector.load %arg1[%c3_390, %c2_391, %c0_392, %c0_393] : memref<4x10x5x64xf32, #tpu.memory_space<vmem>>, vector<1x1x4x64xf32>
    %213 = vector.shape_cast %212 : vector<1x1x4x64xf32> to vector<4x64xf32>
    %c3_394 = arith.constant 3 : index
    %c2_395 = arith.constant 2 : index
    %c1_396 = arith.constant 1 : index
    %c0_397 = arith.constant 0 : index
    %214 = vector.load %arg1[%c3_394, %c2_395, %c1_396, %c0_397] : memref<4x10x5x64xf32, #tpu.memory_space<vmem>>, vector<1x1x4x64xf32>
    %215 = vector.shape_cast %214 : vector<1x1x4x64xf32> to vector<4x64xf32>
    %c3_398 = arith.constant 3 : index
    %c3_399 = arith.constant 3 : index
    %c0_400 = arith.constant 0 : index
    %c0_401 = arith.constant 0 : index
    %216 = vector.load %arg1[%c3_398, %c3_399, %c0_400, %c0_401] : memref<4x10x5x64xf32, #tpu.memory_space<vmem>>, vector<1x1x4x64xf32>
    %217 = vector.shape_cast %216 : vector<1x1x4x64xf32> to vector<4x64xf32>
    %c3_402 = arith.constant 3 : index
    %c3_403 = arith.constant 3 : index
    %c1_404 = arith.constant 1 : index
    %c0_405 = arith.constant 0 : index
    %218 = vector.load %arg1[%c3_402, %c3_403, %c1_404, %c0_405] : memref<4x10x5x64xf32, #tpu.memory_space<vmem>>, vector<1x1x4x64xf32>
    %219 = vector.shape_cast %218 : vector<1x1x4x64xf32> to vector<4x64xf32>
    %220 = tpu.concatenate %205, %207, %209, %211, %213, %215, %217, %219 in 1 : vector<4x64xf32>, vector<4x64xf32>, vector<4x64xf32>, vector<4x64xf32>, vector<4x64xf32>, vector<4x64xf32>, vector<4x64xf32>, vector<4x64xf32> -> vector<4x512xf32>
    %c3_406 = arith.constant 3 : index
    %c2_407 = arith.constant 2 : index
    %c0_408 = arith.constant 0 : index
    %c0_409 = arith.constant 0 : index
    %221 = vector.load %arg1[%c3_406, %c2_407, %c0_408, %c0_409] : memref<4x10x5x64xf32, #tpu.memory_space<vmem>>, vector<1x1x4x64xf32>
    %222 = vector.shape_cast %221 : vector<1x1x4x64xf32> to vector<4x64xf32>
    %c3_410 = arith.constant 3 : index
    %c2_411 = arith.constant 2 : index
    %c1_412 = arith.constant 1 : index
    %c0_413 = arith.constant 0 : index
    %223 = vector.load %arg1[%c3_410, %c2_411, %c1_412, %c0_413] : memref<4x10x5x64xf32, #tpu.memory_space<vmem>>, vector<1x1x4x64xf32>
    %224 = vector.shape_cast %223 : vector<1x1x4x64xf32> to vector<4x64xf32>
    %c3_414 = arith.constant 3 : index
    %c3_415 = arith.constant 3 : index
    %c0_416 = arith.constant 0 : index
    %c0_417 = arith.constant 0 : index
    %225 = vector.load %arg1[%c3_414, %c3_415, %c0_416, %c0_417] : memref<4x10x5x64xf32, #tpu.memory_space<vmem>>, vector<1x1x4x64xf32>
    %226 = vector.shape_cast %225 : vector<1x1x4x64xf32> to vector<4x64xf32>
    %c3_418 = arith.constant 3 : index
    %c3_419 = arith.constant 3 : index
    %c1_420 = arith.constant 1 : index
    %c0_421 = arith.constant 0 : index
    %227 = vector.load %arg1[%c3_418, %c3_419, %c1_420, %c0_421] : memref<4x10x5x64xf32, #tpu.memory_space<vmem>>, vector<1x1x4x64xf32>
    %228 = vector.shape_cast %227 : vector<1x1x4x64xf32> to vector<4x64xf32>
    %c3_422 = arith.constant 3 : index
    %c4_423 = arith.constant 4 : index
    %c0_424 = arith.constant 0 : index
    %c0_425 = arith.constant 0 : index
    %229 = vector.load %arg1[%c3_422, %c4_423, %c0_424, %c0_425] : memref<4x10x5x64xf32, #tpu.memory_space<vmem>>, vector<1x1x4x64xf32>
    %230 = vector.shape_cast %229 : vector<1x1x4x64xf32> to vector<4x64xf32>
    %c3_426 = arith.constant 3 : index
    %c4_427 = arith.constant 4 : index
    %c1_428 = arith.constant 1 : index
    %c0_429 = arith.constant 0 : index
    %231 = vector.load %arg1[%c3_426, %c4_427, %c1_428, %c0_429] : memref<4x10x5x64xf32, #tpu.memory_space<vmem>>, vector<1x1x4x64xf32>
    %232 = vector.shape_cast %231 : vector<1x1x4x64xf32> to vector<4x64xf32>
    %c3_430 = arith.constant 3 : index
    %c5_431 = arith.constant 5 : index
    %c0_432 = arith.constant 0 : index
    %c0_433 = arith.constant 0 : index
    %233 = vector.load %arg1[%c3_430, %c5_431, %c0_432, %c0_433] : memref<4x10x5x64xf32, #tpu.memory_space<vmem>>, vector<1x1x4x64xf32>
    %234 = vector.shape_cast %233 : vector<1x1x4x64xf32> to vector<4x64xf32>
    %c3_434 = arith.constant 3 : index
    %c5_435 = arith.constant 5 : index
    %c1_436 = arith.constant 1 : index
    %c0_437 = arith.constant 0 : index
    %235 = vector.load %arg1[%c3_434, %c5_435, %c1_436, %c0_437] : memref<4x10x5x64xf32, #tpu.memory_space<vmem>>, vector<1x1x4x64xf32>
    %236 = vector.shape_cast %235 : vector<1x1x4x64xf32> to vector<4x64xf32>
    %237 = tpu.concatenate %222, %224, %226, %228, %230, %232, %234, %236 in 1 : vector<4x64xf32>, vector<4x64xf32>, vector<4x64xf32>, vector<4x64xf32>, vector<4x64xf32>, vector<4x64xf32>, vector<4x64xf32>, vector<4x64xf32> -> vector<4x512xf32>
    %c3_438 = arith.constant 3 : index
    %c4_439 = arith.constant 4 : index
    %c0_440 = arith.constant 0 : index
    %c0_441 = arith.constant 0 : index
    %238 = vector.load %arg1[%c3_438, %c4_439, %c0_440, %c0_441] : memref<4x10x5x64xf32, #tpu.memory_space<vmem>>, vector<1x1x4x64xf32>
    %239 = vector.shape_cast %238 : vector<1x1x4x64xf32> to vector<4x64xf32>
    %c3_442 = arith.constant 3 : index
    %c4_443 = arith.constant 4 : index
    %c1_444 = arith.constant 1 : index
    %c0_445 = arith.constant 0 : index
    %240 = vector.load %arg1[%c3_442, %c4_443, %c1_444, %c0_445] : memref<4x10x5x64xf32, #tpu.memory_space<vmem>>, vector<1x1x4x64xf32>
    %241 = vector.shape_cast %240 : vector<1x1x4x64xf32> to vector<4x64xf32>
    %c3_446 = arith.constant 3 : index
    %c5_447 = arith.constant 5 : index
    %c0_448 = arith.constant 0 : index
    %c0_449 = arith.constant 0 : index
    %242 = vector.load %arg1[%c3_446, %c5_447, %c0_448, %c0_449] : memref<4x10x5x64xf32, #tpu.memory_space<vmem>>, vector<1x1x4x64xf32>
    %243 = vector.shape_cast %242 : vector<1x1x4x64xf32> to vector<4x64xf32>
    %c3_450 = arith.constant 3 : index
    %c5_451 = arith.constant 5 : index
    %c1_452 = arith.constant 1 : index
    %c0_453 = arith.constant 0 : index
    %244 = vector.load %arg1[%c3_450, %c5_451, %c1_452, %c0_453] : memref<4x10x5x64xf32, #tpu.memory_space<vmem>>, vector<1x1x4x64xf32>
    %245 = vector.shape_cast %244 : vector<1x1x4x64xf32> to vector<4x64xf32>
    %c3_454 = arith.constant 3 : index
    %c6_455 = arith.constant 6 : index
    %c0_456 = arith.constant 0 : index
    %c0_457 = arith.constant 0 : index
    %246 = vector.load %arg1[%c3_454, %c6_455, %c0_456, %c0_457] : memref<4x10x5x64xf32, #tpu.memory_space<vmem>>, vector<1x1x4x64xf32>
    %247 = vector.shape_cast %246 : vector<1x1x4x64xf32> to vector<4x64xf32>
    %c3_458 = arith.constant 3 : index
    %c6_459 = arith.constant 6 : index
    %c1_460 = arith.constant 1 : index
    %c0_461 = arith.constant 0 : index
    %248 = vector.load %arg1[%c3_458, %c6_459, %c1_460, %c0_461] : memref<4x10x5x64xf32, #tpu.memory_space<vmem>>, vector<1x1x4x64xf32>
    %249 = vector.shape_cast %248 : vector<1x1x4x64xf32> to vector<4x64xf32>
    %c3_462 = arith.constant 3 : index
    %c7_463 = arith.constant 7 : index
    %c0_464 = arith.constant 0 : index
    %c0_465 = arith.constant 0 : index
    %250 = vector.load %arg1[%c3_462, %c7_463, %c0_464, %c0_465] : memref<4x10x5x64xf32, #tpu.memory_space<vmem>>, vector<1x1x4x64xf32>
    %251 = vector.shape_cast %250 : vector<1x1x4x64xf32> to vector<4x64xf32>
    %c3_466 = arith.constant 3 : index
    %c7_467 = arith.constant 7 : index
    %c1_468 = arith.constant 1 : index
    %c0_469 = arith.constant 0 : index
    %252 = vector.load %arg1[%c3_466, %c7_467, %c1_468, %c0_469] : memref<4x10x5x64xf32, #tpu.memory_space<vmem>>, vector<1x1x4x64xf32>
    %253 = vector.shape_cast %252 : vector<1x1x4x64xf32> to vector<4x64xf32>
    %254 = tpu.concatenate %239, %241, %243, %245, %247, %249, %251, %253 in 1 : vector<4x64xf32>, vector<4x64xf32>, vector<4x64xf32>, vector<4x64xf32>, vector<4x64xf32>, vector<4x64xf32>, vector<4x64xf32>, vector<4x64xf32> -> vector<4x512xf32>
    %c3_470 = arith.constant 3 : index
    %c6_471 = arith.constant 6 : index
    %c0_472 = arith.constant 0 : index
    %c0_473 = arith.constant 0 : index
    %255 = vector.load %arg1[%c3_470, %c6_471, %c0_472, %c0_473] : memref<4x10x5x64xf32, #tpu.memory_space<vmem>>, vector<1x1x4x64xf32>
    %256 = vector.shape_cast %255 : vector<1x1x4x64xf32> to vector<4x64xf32>
    %c3_474 = arith.constant 3 : index
    %c6_475 = arith.constant 6 : index
    %c1_476 = arith.constant 1 : index
    %c0_477 = arith.constant 0 : index
    %257 = vector.load %arg1[%c3_474, %c6_475, %c1_476, %c0_477] : memref<4x10x5x64xf32, #tpu.memory_space<vmem>>, vector<1x1x4x64xf32>
    %258 = vector.shape_cast %257 : vector<1x1x4x64xf32> to vector<4x64xf32>
    %c3_478 = arith.constant 3 : index
    %c7_479 = arith.constant 7 : index
    %c0_480 = arith.constant 0 : index
    %c0_481 = arith.constant 0 : index
    %259 = vector.load %arg1[%c3_478, %c7_479, %c0_480, %c0_481] : memref<4x10x5x64xf32, #tpu.memory_space<vmem>>, vector<1x1x4x64xf32>
    %260 = vector.shape_cast %259 : vector<1x1x4x64xf32> to vector<4x64xf32>
    %c3_482 = arith.constant 3 : index
    %c7_483 = arith.constant 7 : index
    %c1_484 = arith.constant 1 : index
    %c0_485 = arith.constant 0 : index
    %261 = vector.load %arg1[%c3_482, %c7_483, %c1_484, %c0_485] : memref<4x10x5x64xf32, #tpu.memory_space<vmem>>, vector<1x1x4x64xf32>
    %262 = vector.shape_cast %261 : vector<1x1x4x64xf32> to vector<4x64xf32>
    %c3_486 = arith.constant 3 : index
    %c8_487 = arith.constant 8 : index
    %c0_488 = arith.constant 0 : index
    %c0_489 = arith.constant 0 : index
    %263 = vector.load %arg1[%c3_486, %c8_487, %c0_488, %c0_489] : memref<4x10x5x64xf32, #tpu.memory_space<vmem>>, vector<1x1x4x64xf32>
    %264 = vector.shape_cast %263 : vector<1x1x4x64xf32> to vector<4x64xf32>
    %c3_490 = arith.constant 3 : index
    %c8_491 = arith.constant 8 : index
    %c1_492 = arith.constant 1 : index
    %c0_493 = arith.constant 0 : index
    %265 = vector.load %arg1[%c3_490, %c8_491, %c1_492, %c0_493] : memref<4x10x5x64xf32, #tpu.memory_space<vmem>>, vector<1x1x4x64xf32>
    %266 = vector.shape_cast %265 : vector<1x1x4x64xf32> to vector<4x64xf32>
    %c3_494 = arith.constant 3 : index
    %c9_495 = arith.constant 9 : index
    %c0_496 = arith.constant 0 : index
    %c0_497 = arith.constant 0 : index
    %267 = vector.load %arg1[%c3_494, %c9_495, %c0_496, %c0_497] : memref<4x10x5x64xf32, #tpu.memory_space<vmem>>, vector<1x1x4x64xf32>
    %268 = vector.shape_cast %267 : vector<1x1x4x64xf32> to vector<4x64xf32>
    %c3_498 = arith.constant 3 : index
    %c9_499 = arith.constant 9 : index
    %c1_500 = arith.constant 1 : index
    %c0_501 = arith.constant 0 : index
    %269 = vector.load %arg1[%c3_498, %c9_499, %c1_500, %c0_501] : memref<4x10x5x64xf32, #tpu.memory_space<vmem>>, vector<1x1x4x64xf32>
    %270 = vector.shape_cast %269 : vector<1x1x4x64xf32> to vector<4x64xf32>
    %271 = tpu.concatenate %256, %258, %260, %262, %264, %266, %268, %270 in 1 : vector<4x64xf32>, vector<4x64xf32>, vector<4x64xf32>, vector<4x64xf32>, vector<4x64xf32>, vector<4x64xf32>, vector<4x64xf32>, vector<4x64xf32> -> vector<4x512xf32>
    %272 = tpu.concatenate %16, %33, %50, %67, %84, %101, %118, %135, %152, %169, %186, %203, %220, %237, %254, %271 in 0 : vector<4x512xf32>, vector<4x512xf32>, vector<4x512xf32>, vector<4x512xf32>, vector<4x512xf32>, vector<4x512xf32>, vector<4x512xf32>, vector<4x512xf32>, vector<4x512xf32>, vector<4x512xf32>, vector<4x512xf32>, vector<4x512xf32>, vector<4x512xf32>, vector<4x512xf32>, vector<4x512xf32>, vector<4x512xf32> -> vector<64x512xf32>
    %273 = arith.truncf %272 : vector<64x512xf32> to vector<64x512xbf16>
    %c0_502 = arith.constant 0 : index
    %c0_503 = arith.constant 0 : index
    %274 = vector.load %arg2[%c0_502, %c0_503] : memref<512x64xbf16, #tpu.memory_space<vmem>>, vector<512x64xbf16>
    %cst = arith.constant dense<0.000000e+00> : vector<64x64xf32>
    %275 = tpu.matmul %273, %274, %cst {dimension_numbers = #tpu.dot_dimension_numbers<[1], [0], [0], [1], [0, 0, 1, 1], [], []>} : vector<64x512xbf16>, vector<512x64xbf16>, vector<64x64xf32> -> vector<64x64xf32>
    %c0_504 = arith.constant 0 : index
    %c0_505 = arith.constant 0 : index
    %276 = vector.load %arg3[%c0_504, %c0_505] : memref<1x64xf32, #tpu.memory_space<vmem>>, vector<1x64xf32>
    %277 = vector.broadcast %276 : vector<1x64xf32> to vector<64x64xf32>
    %278 = arith.addf %275, %277 : vector<64x64xf32>
    %cst_506 = arith.constant 0.000000e+00 : f32
    %279 = vector.broadcast %cst_506 : f32 to vector<64x64xf32>
    %280 = arith.maximumf %278, %279 : vector<64x64xf32>
    %281 = vector.extract_strided_slice %280 {offsets = [0, 0], sizes = [1, 64], strides = [1, 1]} : vector<64x64xf32> to vector<1x64xf32>
    %282 = vector.extract_strided_slice %280 {offsets = [1, 0], sizes = [1, 64], strides = [1, 1]} : vector<64x64xf32> to vector<1x64xf32>
    %283 = vector.extract_strided_slice %280 {offsets = [2, 0], sizes = [1, 64], strides = [1, 1]} : vector<64x64xf32> to vector<1x64xf32>
    %284 = vector.extract_strided_slice %280 {offsets = [4, 0], sizes = [1, 64], strides = [1, 1]} : vector<64x64xf32> to vector<1x64xf32>
    %285 = vector.extract_strided_slice %280 {offsets = [5, 0], sizes = [1, 64], strides = [1, 1]} : vector<64x64xf32> to vector<1x64xf32>
    %286 = vector.extract_strided_slice %280 {offsets = [6, 0], sizes = [1, 64], strides = [1, 1]} : vector<64x64xf32> to vector<1x64xf32>
    %287 = vector.extract_strided_slice %280 {offsets = [8, 0], sizes = [1, 64], strides = [1, 1]} : vector<64x64xf32> to vector<1x64xf32>
    %288 = vector.extract_strided_slice %280 {offsets = [9, 0], sizes = [1, 64], strides = [1, 1]} : vector<64x64xf32> to vector<1x64xf32>
    %289 = vector.extract_strided_slice %280 {offsets = [10, 0], sizes = [1, 64], strides = [1, 1]} : vector<64x64xf32> to vector<1x64xf32>
    %290 = tpu.concatenate %281, %282, %283, %284, %285, %286, %287, %288, %289 in 1 : vector<1x64xf32>, vector<1x64xf32>, vector<1x64xf32>, vector<1x64xf32>, vector<1x64xf32>, vector<1x64xf32>, vector<1x64xf32>, vector<1x64xf32>, vector<1x64xf32> -> vector<1x576xf32>
    %291 = vector.extract_strided_slice %280 {offsets = [16, 0], sizes = [1, 64], strides = [1, 1]} : vector<64x64xf32> to vector<1x64xf32>
    %292 = vector.extract_strided_slice %280 {offsets = [17, 0], sizes = [1, 64], strides = [1, 1]} : vector<64x64xf32> to vector<1x64xf32>
    %293 = vector.extract_strided_slice %280 {offsets = [18, 0], sizes = [1, 64], strides = [1, 1]} : vector<64x64xf32> to vector<1x64xf32>
    %294 = vector.extract_strided_slice %280 {offsets = [20, 0], sizes = [1, 64], strides = [1, 1]} : vector<64x64xf32> to vector<1x64xf32>
    %295 = vector.extract_strided_slice %280 {offsets = [21, 0], sizes = [1, 64], strides = [1, 1]} : vector<64x64xf32> to vector<1x64xf32>
    %296 = vector.extract_strided_slice %280 {offsets = [22, 0], sizes = [1, 64], strides = [1, 1]} : vector<64x64xf32> to vector<1x64xf32>
    %297 = vector.extract_strided_slice %280 {offsets = [24, 0], sizes = [1, 64], strides = [1, 1]} : vector<64x64xf32> to vector<1x64xf32>
    %298 = vector.extract_strided_slice %280 {offsets = [25, 0], sizes = [1, 64], strides = [1, 1]} : vector<64x64xf32> to vector<1x64xf32>
    %299 = vector.extract_strided_slice %280 {offsets = [26, 0], sizes = [1, 64], strides = [1, 1]} : vector<64x64xf32> to vector<1x64xf32>
    %300 = tpu.concatenate %291, %292, %293, %294, %295, %296, %297, %298, %299 in 1 : vector<1x64xf32>, vector<1x64xf32>, vector<1x64xf32>, vector<1x64xf32>, vector<1x64xf32>, vector<1x64xf32>, vector<1x64xf32>, vector<1x64xf32>, vector<1x64xf32> -> vector<1x576xf32>
    %301 = vector.extract_strided_slice %280 {offsets = [32, 0], sizes = [1, 64], strides = [1, 1]} : vector<64x64xf32> to vector<1x64xf32>
    %302 = vector.extract_strided_slice %280 {offsets = [33, 0], sizes = [1, 64], strides = [1, 1]} : vector<64x64xf32> to vector<1x64xf32>
    %303 = vector.extract_strided_slice %280 {offsets = [34, 0], sizes = [1, 64], strides = [1, 1]} : vector<64x64xf32> to vector<1x64xf32>
    %304 = vector.extract_strided_slice %280 {offsets = [36, 0], sizes = [1, 64], strides = [1, 1]} : vector<64x64xf32> to vector<1x64xf32>
    %305 = vector.extract_strided_slice %280 {offsets = [37, 0], sizes = [1, 64], strides = [1, 1]} : vector<64x64xf32> to vector<1x64xf32>
    %306 = vector.extract_strided_slice %280 {offsets = [38, 0], sizes = [1, 64], strides = [1, 1]} : vector<64x64xf32> to vector<1x64xf32>
    %307 = vector.extract_strided_slice %280 {offsets = [40, 0], sizes = [1, 64], strides = [1, 1]} : vector<64x64xf32> to vector<1x64xf32>
    %308 = vector.extract_strided_slice %280 {offsets = [41, 0], sizes = [1, 64], strides = [1, 1]} : vector<64x64xf32> to vector<1x64xf32>
    %309 = vector.extract_strided_slice %280 {offsets = [42, 0], sizes = [1, 64], strides = [1, 1]} : vector<64x64xf32> to vector<1x64xf32>
    %310 = tpu.concatenate %301, %302, %303, %304, %305, %306, %307, %308, %309 in 1 : vector<1x64xf32>, vector<1x64xf32>, vector<1x64xf32>, vector<1x64xf32>, vector<1x64xf32>, vector<1x64xf32>, vector<1x64xf32>, vector<1x64xf32>, vector<1x64xf32> -> vector<1x576xf32>
    %311 = vector.extract_strided_slice %280 {offsets = [48, 0], sizes = [1, 64], strides = [1, 1]} : vector<64x64xf32> to vector<1x64xf32>
    %312 = vector.extract_strided_slice %280 {offsets = [49, 0], sizes = [1, 64], strides = [1, 1]} : vector<64x64xf32> to vector<1x64xf32>
    %313 = vector.extract_strided_slice %280 {offsets = [50, 0], sizes = [1, 64], strides = [1, 1]} : vector<64x64xf32> to vector<1x64xf32>
    %314 = vector.extract_strided_slice %280 {offsets = [52, 0], sizes = [1, 64], strides = [1, 1]} : vector<64x64xf32> to vector<1x64xf32>
    %315 = vector.extract_strided_slice %280 {offsets = [53, 0], sizes = [1, 64], strides = [1, 1]} : vector<64x64xf32> to vector<1x64xf32>
    %316 = vector.extract_strided_slice %280 {offsets = [54, 0], sizes = [1, 64], strides = [1, 1]} : vector<64x64xf32> to vector<1x64xf32>
    %317 = vector.extract_strided_slice %280 {offsets = [56, 0], sizes = [1, 64], strides = [1, 1]} : vector<64x64xf32> to vector<1x64xf32>
    %318 = vector.extract_strided_slice %280 {offsets = [57, 0], sizes = [1, 64], strides = [1, 1]} : vector<64x64xf32> to vector<1x64xf32>
    %319 = vector.extract_strided_slice %280 {offsets = [58, 0], sizes = [1, 64], strides = [1, 1]} : vector<64x64xf32> to vector<1x64xf32>
    %320 = tpu.concatenate %311, %312, %313, %314, %315, %316, %317, %318, %319 in 1 : vector<1x64xf32>, vector<1x64xf32>, vector<1x64xf32>, vector<1x64xf32>, vector<1x64xf32>, vector<1x64xf32>, vector<1x64xf32>, vector<1x64xf32>, vector<1x64xf32> -> vector<1x576xf32>
    %321 = vector.extract_strided_slice %280 {offsets = [1, 0], sizes = [1, 64], strides = [1, 1]} : vector<64x64xf32> to vector<1x64xf32>
    %322 = vector.extract_strided_slice %280 {offsets = [2, 0], sizes = [1, 64], strides = [1, 1]} : vector<64x64xf32> to vector<1x64xf32>
    %323 = vector.extract_strided_slice %280 {offsets = [3, 0], sizes = [1, 64], strides = [1, 1]} : vector<64x64xf32> to vector<1x64xf32>
    %324 = vector.extract_strided_slice %280 {offsets = [5, 0], sizes = [1, 64], strides = [1, 1]} : vector<64x64xf32> to vector<1x64xf32>
    %325 = vector.extract_strided_slice %280 {offsets = [6, 0], sizes = [1, 64], strides = [1, 1]} : vector<64x64xf32> to vector<1x64xf32>
    %326 = vector.extract_strided_slice %280 {offsets = [7, 0], sizes = [1, 64], strides = [1, 1]} : vector<64x64xf32> to vector<1x64xf32>
    %327 = vector.extract_strided_slice %280 {offsets = [9, 0], sizes = [1, 64], strides = [1, 1]} : vector<64x64xf32> to vector<1x64xf32>
    %328 = vector.extract_strided_slice %280 {offsets = [10, 0], sizes = [1, 64], strides = [1, 1]} : vector<64x64xf32> to vector<1x64xf32>
    %329 = vector.extract_strided_slice %280 {offsets = [11, 0], sizes = [1, 64], strides = [1, 1]} : vector<64x64xf32> to vector<1x64xf32>
    %330 = tpu.concatenate %321, %322, %323, %324, %325, %326, %327, %328, %329 in 1 : vector<1x64xf32>, vector<1x64xf32>, vector<1x64xf32>, vector<1x64xf32>, vector<1x64xf32>, vector<1x64xf32>, vector<1x64xf32>, vector<1x64xf32>, vector<1x64xf32> -> vector<1x576xf32>
    %331 = vector.extract_strided_slice %280 {offsets = [17, 0], sizes = [1, 64], strides = [1, 1]} : vector<64x64xf32> to vector<1x64xf32>
    %332 = vector.extract_strided_slice %280 {offsets = [18, 0], sizes = [1, 64], strides = [1, 1]} : vector<64x64xf32> to vector<1x64xf32>
    %333 = vector.extract_strided_slice %280 {offsets = [19, 0], sizes = [1, 64], strides = [1, 1]} : vector<64x64xf32> to vector<1x64xf32>
    %334 = vector.extract_strided_slice %280 {offsets = [21, 0], sizes = [1, 64], strides = [1, 1]} : vector<64x64xf32> to vector<1x64xf32>
    %335 = vector.extract_strided_slice %280 {offsets = [22, 0], sizes = [1, 64], strides = [1, 1]} : vector<64x64xf32> to vector<1x64xf32>
    %336 = vector.extract_strided_slice %280 {offsets = [23, 0], sizes = [1, 64], strides = [1, 1]} : vector<64x64xf32> to vector<1x64xf32>
    %337 = vector.extract_strided_slice %280 {offsets = [25, 0], sizes = [1, 64], strides = [1, 1]} : vector<64x64xf32> to vector<1x64xf32>
    %338 = vector.extract_strided_slice %280 {offsets = [26, 0], sizes = [1, 64], strides = [1, 1]} : vector<64x64xf32> to vector<1x64xf32>
    %339 = vector.extract_strided_slice %280 {offsets = [27, 0], sizes = [1, 64], strides = [1, 1]} : vector<64x64xf32> to vector<1x64xf32>
    %340 = tpu.concatenate %331, %332, %333, %334, %335, %336, %337, %338, %339 in 1 : vector<1x64xf32>, vector<1x64xf32>, vector<1x64xf32>, vector<1x64xf32>, vector<1x64xf32>, vector<1x64xf32>, vector<1x64xf32>, vector<1x64xf32>, vector<1x64xf32> -> vector<1x576xf32>
    %341 = vector.extract_strided_slice %280 {offsets = [33, 0], sizes = [1, 64], strides = [1, 1]} : vector<64x64xf32> to vector<1x64xf32>
    %342 = vector.extract_strided_slice %280 {offsets = [34, 0], sizes = [1, 64], strides = [1, 1]} : vector<64x64xf32> to vector<1x64xf32>
    %343 = vector.extract_strided_slice %280 {offsets = [35, 0], sizes = [1, 64], strides = [1, 1]} : vector<64x64xf32> to vector<1x64xf32>
    %344 = vector.extract_strided_slice %280 {offsets = [37, 0], sizes = [1, 64], strides = [1, 1]} : vector<64x64xf32> to vector<1x64xf32>
    %345 = vector.extract_strided_slice %280 {offsets = [38, 0], sizes = [1, 64], strides = [1, 1]} : vector<64x64xf32> to vector<1x64xf32>
    %346 = vector.extract_strided_slice %280 {offsets = [39, 0], sizes = [1, 64], strides = [1, 1]} : vector<64x64xf32> to vector<1x64xf32>
    %347 = vector.extract_strided_slice %280 {offsets = [41, 0], sizes = [1, 64], strides = [1, 1]} : vector<64x64xf32> to vector<1x64xf32>
    %348 = vector.extract_strided_slice %280 {offsets = [42, 0], sizes = [1, 64], strides = [1, 1]} : vector<64x64xf32> to vector<1x64xf32>
    %349 = vector.extract_strided_slice %280 {offsets = [43, 0], sizes = [1, 64], strides = [1, 1]} : vector<64x64xf32> to vector<1x64xf32>
    %350 = tpu.concatenate %341, %342, %343, %344, %345, %346, %347, %348, %349 in 1 : vector<1x64xf32>, vector<1x64xf32>, vector<1x64xf32>, vector<1x64xf32>, vector<1x64xf32>, vector<1x64xf32>, vector<1x64xf32>, vector<1x64xf32>, vector<1x64xf32> -> vector<1x576xf32>
    %351 = vector.extract_strided_slice %280 {offsets = [49, 0], sizes = [1, 64], strides = [1, 1]} : vector<64x64xf32> to vector<1x64xf32>
    %352 = vector.extract_strided_slice %280 {offsets = [50, 0], sizes = [1, 64], strides = [1, 1]} : vector<64x64xf32> to vector<1x64xf32>
    %353 = vector.extract_strided_slice %280 {offsets = [51, 0], sizes = [1, 64], strides = [1, 1]} : vector<64x64xf32> to vector<1x64xf32>
    %354 = vector.extract_strided_slice %280 {offsets = [53, 0], sizes = [1, 64], strides = [1, 1]} : vector<64x64xf32> to vector<1x64xf32>
    %355 = vector.extract_strided_slice %280 {offsets = [54, 0], sizes = [1, 64], strides = [1, 1]} : vector<64x64xf32> to vector<1x64xf32>
    %356 = vector.extract_strided_slice %280 {offsets = [55, 0], sizes = [1, 64], strides = [1, 1]} : vector<64x64xf32> to vector<1x64xf32>
    %357 = vector.extract_strided_slice %280 {offsets = [57, 0], sizes = [1, 64], strides = [1, 1]} : vector<64x64xf32> to vector<1x64xf32>
    %358 = vector.extract_strided_slice %280 {offsets = [58, 0], sizes = [1, 64], strides = [1, 1]} : vector<64x64xf32> to vector<1x64xf32>
    %359 = vector.extract_strided_slice %280 {offsets = [59, 0], sizes = [1, 64], strides = [1, 1]} : vector<64x64xf32> to vector<1x64xf32>
    %360 = tpu.concatenate %351, %352, %353, %354, %355, %356, %357, %358, %359 in 1 : vector<1x64xf32>, vector<1x64xf32>, vector<1x64xf32>, vector<1x64xf32>, vector<1x64xf32>, vector<1x64xf32>, vector<1x64xf32>, vector<1x64xf32>, vector<1x64xf32> -> vector<1x576xf32>
    %361 = vector.extract_strided_slice %280 {offsets = [4, 0], sizes = [1, 64], strides = [1, 1]} : vector<64x64xf32> to vector<1x64xf32>
    %362 = vector.extract_strided_slice %280 {offsets = [5, 0], sizes = [1, 64], strides = [1, 1]} : vector<64x64xf32> to vector<1x64xf32>
    %363 = vector.extract_strided_slice %280 {offsets = [6, 0], sizes = [1, 64], strides = [1, 1]} : vector<64x64xf32> to vector<1x64xf32>
    %364 = vector.extract_strided_slice %280 {offsets = [8, 0], sizes = [1, 64], strides = [1, 1]} : vector<64x64xf32> to vector<1x64xf32>
    %365 = vector.extract_strided_slice %280 {offsets = [9, 0], sizes = [1, 64], strides = [1, 1]} : vector<64x64xf32> to vector<1x64xf32>
    %366 = vector.extract_strided_slice %280 {offsets = [10, 0], sizes = [1, 64], strides = [1, 1]} : vector<64x64xf32> to vector<1x64xf32>
    %367 = vector.extract_strided_slice %280 {offsets = [12, 0], sizes = [1, 64], strides = [1, 1]} : vector<64x64xf32> to vector<1x64xf32>
    %368 = vector.extract_strided_slice %280 {offsets = [13, 0], sizes = [1, 64], strides = [1, 1]} : vector<64x64xf32> to vector<1x64xf32>
    %369 = vector.extract_strided_slice %280 {offsets = [14, 0], sizes = [1, 64], strides = [1, 1]} : vector<64x64xf32> to vector<1x64xf32>
    %370 = tpu.concatenate %361, %362, %363, %364, %365, %366, %367, %368, %369 in 1 : vector<1x64xf32>, vector<1x64xf32>, vector<1x64xf32>, vector<1x64xf32>, vector<1x64xf32>, vector<1x64xf32>, vector<1x64xf32>, vector<1x64xf32>, vector<1x64xf32> -> vector<1x576xf32>
    %371 = vector.extract_strided_slice %280 {offsets = [20, 0], sizes = [1, 64], strides = [1, 1]} : vector<64x64xf32> to vector<1x64xf32>
    %372 = vector.extract_strided_slice %280 {offsets = [21, 0], sizes = [1, 64], strides = [1, 1]} : vector<64x64xf32> to vector<1x64xf32>
    %373 = vector.extract_strided_slice %280 {offsets = [22, 0], sizes = [1, 64], strides = [1, 1]} : vector<64x64xf32> to vector<1x64xf32>
    %374 = vector.extract_strided_slice %280 {offsets = [24, 0], sizes = [1, 64], strides = [1, 1]} : vector<64x64xf32> to vector<1x64xf32>
    %375 = vector.extract_strided_slice %280 {offsets = [25, 0], sizes = [1, 64], strides = [1, 1]} : vector<64x64xf32> to vector<1x64xf32>
    %376 = vector.extract_strided_slice %280 {offsets = [26, 0], sizes = [1, 64], strides = [1, 1]} : vector<64x64xf32> to vector<1x64xf32>
    %377 = vector.extract_strided_slice %280 {offsets = [28, 0], sizes = [1, 64], strides = [1, 1]} : vector<64x64xf32> to vector<1x64xf32>
    %378 = vector.extract_strided_slice %280 {offsets = [29, 0], sizes = [1, 64], strides = [1, 1]} : vector<64x64xf32> to vector<1x64xf32>
    %379 = vector.extract_strided_slice %280 {offsets = [30, 0], sizes = [1, 64], strides = [1, 1]} : vector<64x64xf32> to vector<1x64xf32>
    %380 = tpu.concatenate %371, %372, %373, %374, %375, %376, %377, %378, %379 in 1 : vector<1x64xf32>, vector<1x64xf32>, vector<1x64xf32>, vector<1x64xf32>, vector<1x64xf32>, vector<1x64xf32>, vector<1x64xf32>, vector<1x64xf32>, vector<1x64xf32> -> vector<1x576xf32>
    %381 = vector.extract_strided_slice %280 {offsets = [36, 0], sizes = [1, 64], strides = [1, 1]} : vector<64x64xf32> to vector<1x64xf32>
    %382 = vector.extract_strided_slice %280 {offsets = [37, 0], sizes = [1, 64], strides = [1, 1]} : vector<64x64xf32> to vector<1x64xf32>
    %383 = vector.extract_strided_slice %280 {offsets = [38, 0], sizes = [1, 64], strides = [1, 1]} : vector<64x64xf32> to vector<1x64xf32>
    %384 = vector.extract_strided_slice %280 {offsets = [40, 0], sizes = [1, 64], strides = [1, 1]} : vector<64x64xf32> to vector<1x64xf32>
    %385 = vector.extract_strided_slice %280 {offsets = [41, 0], sizes = [1, 64], strides = [1, 1]} : vector<64x64xf32> to vector<1x64xf32>
    %386 = vector.extract_strided_slice %280 {offsets = [42, 0], sizes = [1, 64], strides = [1, 1]} : vector<64x64xf32> to vector<1x64xf32>
    %387 = vector.extract_strided_slice %280 {offsets = [44, 0], sizes = [1, 64], strides = [1, 1]} : vector<64x64xf32> to vector<1x64xf32>
    %388 = vector.extract_strided_slice %280 {offsets = [45, 0], sizes = [1, 64], strides = [1, 1]} : vector<64x64xf32> to vector<1x64xf32>
    %389 = vector.extract_strided_slice %280 {offsets = [46, 0], sizes = [1, 64], strides = [1, 1]} : vector<64x64xf32> to vector<1x64xf32>
    %390 = tpu.concatenate %381, %382, %383, %384, %385, %386, %387, %388, %389 in 1 : vector<1x64xf32>, vector<1x64xf32>, vector<1x64xf32>, vector<1x64xf32>, vector<1x64xf32>, vector<1x64xf32>, vector<1x64xf32>, vector<1x64xf32>, vector<1x64xf32> -> vector<1x576xf32>
    %391 = vector.extract_strided_slice %280 {offsets = [52, 0], sizes = [1, 64], strides = [1, 1]} : vector<64x64xf32> to vector<1x64xf32>
    %392 = vector.extract_strided_slice %280 {offsets = [53, 0], sizes = [1, 64], strides = [1, 1]} : vector<64x64xf32> to vector<1x64xf32>
    %393 = vector.extract_strided_slice %280 {offsets = [54, 0], sizes = [1, 64], strides = [1, 1]} : vector<64x64xf32> to vector<1x64xf32>
    %394 = vector.extract_strided_slice %280 {offsets = [56, 0], sizes = [1, 64], strides = [1, 1]} : vector<64x64xf32> to vector<1x64xf32>
    %395 = vector.extract_strided_slice %280 {offsets = [57, 0], sizes = [1, 64], strides = [1, 1]} : vector<64x64xf32> to vector<1x64xf32>
    %396 = vector.extract_strided_slice %280 {offsets = [58, 0], sizes = [1, 64], strides = [1, 1]} : vector<64x64xf32> to vector<1x64xf32>
    %397 = vector.extract_strided_slice %280 {offsets = [60, 0], sizes = [1, 64], strides = [1, 1]} : vector<64x64xf32> to vector<1x64xf32>
    %398 = vector.extract_strided_slice %280 {offsets = [61, 0], sizes = [1, 64], strides = [1, 1]} : vector<64x64xf32> to vector<1x64xf32>
    %399 = vector.extract_strided_slice %280 {offsets = [62, 0], sizes = [1, 64], strides = [1, 1]} : vector<64x64xf32> to vector<1x64xf32>
    %400 = tpu.concatenate %391, %392, %393, %394, %395, %396, %397, %398, %399 in 1 : vector<1x64xf32>, vector<1x64xf32>, vector<1x64xf32>, vector<1x64xf32>, vector<1x64xf32>, vector<1x64xf32>, vector<1x64xf32>, vector<1x64xf32>, vector<1x64xf32> -> vector<1x576xf32>
    %401 = vector.extract_strided_slice %280 {offsets = [5, 0], sizes = [1, 64], strides = [1, 1]} : vector<64x64xf32> to vector<1x64xf32>
    %402 = vector.extract_strided_slice %280 {offsets = [6, 0], sizes = [1, 64], strides = [1, 1]} : vector<64x64xf32> to vector<1x64xf32>
    %403 = vector.extract_strided_slice %280 {offsets = [7, 0], sizes = [1, 64], strides = [1, 1]} : vector<64x64xf32> to vector<1x64xf32>
    %404 = vector.extract_strided_slice %280 {offsets = [9, 0], sizes = [1, 64], strides = [1, 1]} : vector<64x64xf32> to vector<1x64xf32>
    %405 = vector.extract_strided_slice %280 {offsets = [10, 0], sizes = [1, 64], strides = [1, 1]} : vector<64x64xf32> to vector<1x64xf32>
    %406 = vector.extract_strided_slice %280 {offsets = [11, 0], sizes = [1, 64], strides = [1, 1]} : vector<64x64xf32> to vector<1x64xf32>
    %407 = vector.extract_strided_slice %280 {offsets = [13, 0], sizes = [1, 64], strides = [1, 1]} : vector<64x64xf32> to vector<1x64xf32>
    %408 = vector.extract_strided_slice %280 {offsets = [14, 0], sizes = [1, 64], strides = [1, 1]} : vector<64x64xf32> to vector<1x64xf32>
    %409 = vector.extract_strided_slice %280 {offsets = [15, 0], sizes = [1, 64], strides = [1, 1]} : vector<64x64xf32> to vector<1x64xf32>
    %410 = tpu.concatenate %401, %402, %403, %404, %405, %406, %407, %408, %409 in 1 : vector<1x64xf32>, vector<1x64xf32>, vector<1x64xf32>, vector<1x64xf32>, vector<1x64xf32>, vector<1x64xf32>, vector<1x64xf32>, vector<1x64xf32>, vector<1x64xf32> -> vector<1x576xf32>
    %411 = vector.extract_strided_slice %280 {offsets = [21, 0], sizes = [1, 64], strides = [1, 1]} : vector<64x64xf32> to vector<1x64xf32>
    %412 = vector.extract_strided_slice %280 {offsets = [22, 0], sizes = [1, 64], strides = [1, 1]} : vector<64x64xf32> to vector<1x64xf32>
    %413 = vector.extract_strided_slice %280 {offsets = [23, 0], sizes = [1, 64], strides = [1, 1]} : vector<64x64xf32> to vector<1x64xf32>
    %414 = vector.extract_strided_slice %280 {offsets = [25, 0], sizes = [1, 64], strides = [1, 1]} : vector<64x64xf32> to vector<1x64xf32>
    %415 = vector.extract_strided_slice %280 {offsets = [26, 0], sizes = [1, 64], strides = [1, 1]} : vector<64x64xf32> to vector<1x64xf32>
    %416 = vector.extract_strided_slice %280 {offsets = [27, 0], sizes = [1, 64], strides = [1, 1]} : vector<64x64xf32> to vector<1x64xf32>
    %417 = vector.extract_strided_slice %280 {offsets = [29, 0], sizes = [1, 64], strides = [1, 1]} : vector<64x64xf32> to vector<1x64xf32>
    %418 = vector.extract_strided_slice %280 {offsets = [30, 0], sizes = [1, 64], strides = [1, 1]} : vector<64x64xf32> to vector<1x64xf32>
    %419 = vector.extract_strided_slice %280 {offsets = [31, 0], sizes = [1, 64], strides = [1, 1]} : vector<64x64xf32> to vector<1x64xf32>
    %420 = tpu.concatenate %411, %412, %413, %414, %415, %416, %417, %418, %419 in 1 : vector<1x64xf32>, vector<1x64xf32>, vector<1x64xf32>, vector<1x64xf32>, vector<1x64xf32>, vector<1x64xf32>, vector<1x64xf32>, vector<1x64xf32>, vector<1x64xf32> -> vector<1x576xf32>
    %421 = vector.extract_strided_slice %280 {offsets = [37, 0], sizes = [1, 64], strides = [1, 1]} : vector<64x64xf32> to vector<1x64xf32>
    %422 = vector.extract_strided_slice %280 {offsets = [38, 0], sizes = [1, 64], strides = [1, 1]} : vector<64x64xf32> to vector<1x64xf32>
    %423 = vector.extract_strided_slice %280 {offsets = [39, 0], sizes = [1, 64], strides = [1, 1]} : vector<64x64xf32> to vector<1x64xf32>
    %424 = vector.extract_strided_slice %280 {offsets = [41, 0], sizes = [1, 64], strides = [1, 1]} : vector<64x64xf32> to vector<1x64xf32>
    %425 = vector.extract_strided_slice %280 {offsets = [42, 0], sizes = [1, 64], strides = [1, 1]} : vector<64x64xf32> to vector<1x64xf32>
    %426 = vector.extract_strided_slice %280 {offsets = [43, 0], sizes = [1, 64], strides = [1, 1]} : vector<64x64xf32> to vector<1x64xf32>
    %427 = vector.extract_strided_slice %280 {offsets = [45, 0], sizes = [1, 64], strides = [1, 1]} : vector<64x64xf32> to vector<1x64xf32>
    %428 = vector.extract_strided_slice %280 {offsets = [46, 0], sizes = [1, 64], strides = [1, 1]} : vector<64x64xf32> to vector<1x64xf32>
    %429 = vector.extract_strided_slice %280 {offsets = [47, 0], sizes = [1, 64], strides = [1, 1]} : vector<64x64xf32> to vector<1x64xf32>
    %430 = tpu.concatenate %421, %422, %423, %424, %425, %426, %427, %428, %429 in 1 : vector<1x64xf32>, vector<1x64xf32>, vector<1x64xf32>, vector<1x64xf32>, vector<1x64xf32>, vector<1x64xf32>, vector<1x64xf32>, vector<1x64xf32>, vector<1x64xf32> -> vector<1x576xf32>
    %431 = vector.extract_strided_slice %280 {offsets = [53, 0], sizes = [1, 64], strides = [1, 1]} : vector<64x64xf32> to vector<1x64xf32>
    %432 = vector.extract_strided_slice %280 {offsets = [54, 0], sizes = [1, 64], strides = [1, 1]} : vector<64x64xf32> to vector<1x64xf32>
    %433 = vector.extract_strided_slice %280 {offsets = [55, 0], sizes = [1, 64], strides = [1, 1]} : vector<64x64xf32> to vector<1x64xf32>
    %434 = vector.extract_strided_slice %280 {offsets = [57, 0], sizes = [1, 64], strides = [1, 1]} : vector<64x64xf32> to vector<1x64xf32>
    %435 = vector.extract_strided_slice %280 {offsets = [58, 0], sizes = [1, 64], strides = [1, 1]} : vector<64x64xf32> to vector<1x64xf32>
    %436 = vector.extract_strided_slice %280 {offsets = [59, 0], sizes = [1, 64], strides = [1, 1]} : vector<64x64xf32> to vector<1x64xf32>
    %437 = vector.extract_strided_slice %280 {offsets = [61, 0], sizes = [1, 64], strides = [1, 1]} : vector<64x64xf32> to vector<1x64xf32>
    %438 = vector.extract_strided_slice %280 {offsets = [62, 0], sizes = [1, 64], strides = [1, 1]} : vector<64x64xf32> to vector<1x64xf32>
    %439 = vector.extract_strided_slice %280 {offsets = [63, 0], sizes = [1, 64], strides = [1, 1]} : vector<64x64xf32> to vector<1x64xf32>
    %440 = tpu.concatenate %431, %432, %433, %434, %435, %436, %437, %438, %439 in 1 : vector<1x64xf32>, vector<1x64xf32>, vector<1x64xf32>, vector<1x64xf32>, vector<1x64xf32>, vector<1x64xf32>, vector<1x64xf32>, vector<1x64xf32>, vector<1x64xf32> -> vector<1x576xf32>
    %441 = tpu.concatenate %290, %300, %310, %320, %330, %340, %350, %360, %370, %380, %390, %400, %410, %420, %430, %440 in 0 : vector<1x576xf32>, vector<1x576xf32>, vector<1x576xf32>, vector<1x576xf32>, vector<1x576xf32>, vector<1x576xf32>, vector<1x576xf32>, vector<1x576xf32>, vector<1x576xf32>, vector<1x576xf32>, vector<1x576xf32>, vector<1x576xf32>, vector<1x576xf32>, vector<1x576xf32>, vector<1x576xf32>, vector<1x576xf32> -> vector<16x576xf32>
    %442 = arith.truncf %441 : vector<16x576xf32> to vector<16x576xbf16>
    %c0_507 = arith.constant 0 : index
    %c0_508 = arith.constant 0 : index
    %443 = vector.load %arg4[%c0_507, %c0_508] : memref<576x64xbf16, #tpu.memory_space<vmem>>, vector<576x64xbf16>
    %cst_509 = arith.constant dense<0.000000e+00> : vector<16x64xf32>
    %444 = tpu.matmul %442, %443, %cst_509 {dimension_numbers = #tpu.dot_dimension_numbers<[1], [0], [0], [1], [0, 0, 1, 1], [], []>} : vector<16x576xbf16>, vector<576x64xbf16>, vector<16x64xf32> -> vector<16x64xf32>
    %c0_510 = arith.constant 0 : index
    %c0_511 = arith.constant 0 : index
    %445 = vector.load %arg5[%c0_510, %c0_511] : memref<1x64xf32, #tpu.memory_space<vmem>>, vector<1x64xf32>
    %446 = vector.broadcast %445 : vector<1x64xf32> to vector<16x64xf32>
    %447 = arith.addf %444, %446 : vector<16x64xf32>
    %cst_512 = arith.constant 0.000000e+00 : f32
    %448 = vector.broadcast %cst_512 : f32 to vector<16x64xf32>
    %449 = arith.maximumf %447, %448 : vector<16x64xf32>
    %450 = vector.extract_strided_slice %449 {offsets = [0, 0], sizes = [4, 64], strides = [1, 1]} : vector<16x64xf32> to vector<4x64xf32>
    %451 = vector.extract_strided_slice %449 {offsets = [4, 0], sizes = [4, 64], strides = [1, 1]} : vector<16x64xf32> to vector<4x64xf32>
    %452 = vector.extract_strided_slice %449 {offsets = [8, 0], sizes = [4, 64], strides = [1, 1]} : vector<16x64xf32> to vector<4x64xf32>
    %453 = vector.extract_strided_slice %449 {offsets = [12, 0], sizes = [4, 64], strides = [1, 1]} : vector<16x64xf32> to vector<4x64xf32>
    %454 = tpu.concatenate %450, %451, %452, %453 in 1 : vector<4x64xf32>, vector<4x64xf32>, vector<4x64xf32>, vector<4x64xf32> -> vector<4x256xf32>
    %455 = arith.truncf %454 : vector<4x256xf32> to vector<4x256xbf16>
    %c0_513 = arith.constant 0 : index
    %c0_514 = arith.constant 0 : index
    %456 = vector.load %arg6[%c0_513, %c0_514] : memref<256x512xbf16, #tpu.memory_space<vmem>>, vector<256x512xbf16>
    %cst_515 = arith.constant dense<0.000000e+00> : vector<4x512xf32>
    %457 = tpu.matmul %455, %456, %cst_515 {dimension_numbers = #tpu.dot_dimension_numbers<[1], [0], [0], [1], [0, 0, 1, 1], [], []>} : vector<4x256xbf16>, vector<256x512xbf16>, vector<4x512xf32> -> vector<4x512xf32>
    %c0_516 = arith.constant 0 : index
    %c0_517 = arith.constant 0 : index
    %458 = vector.load %arg7[%c0_516, %c0_517] : memref<1x512xf32, #tpu.memory_space<vmem>>, vector<1x512xf32>
    %459 = vector.broadcast %458 : vector<1x512xf32> to vector<4x512xf32>
    %460 = arith.addf %457, %459 : vector<4x512xf32>
    %cst_518 = arith.constant 0.000000e+00 : f32
    %461 = vector.broadcast %cst_518 : f32 to vector<4x512xf32>
    %462 = arith.maximumf %460, %461 : vector<4x512xf32>
    %463 = arith.truncf %462 : vector<4x512xf32> to vector<4x512xbf16>
    %c0_519 = arith.constant 0 : index
    %c0_520 = arith.constant 0 : index
    %464 = vector.load %arg8[%c0_519, %c0_520] : memref<512x6xbf16, #tpu.memory_space<vmem>>, vector<512x6xbf16>
    %cst_521 = arith.constant dense<0.000000e+00> : vector<4x6xf32>
    %465 = tpu.matmul %463, %464, %cst_521 {dimension_numbers = #tpu.dot_dimension_numbers<[1], [0], [0], [1], [0, 0, 1, 1], [], []>} : vector<4x512xbf16>, vector<512x6xbf16>, vector<4x6xf32> -> vector<4x6xf32>
    %c0_522 = arith.constant 0 : index
    %c0_523 = arith.constant 0 : index
    %466 = vector.load %arg9[%c0_522, %c0_523] : memref<1x6xf32, #tpu.memory_space<vmem>>, vector<1x6xf32>
    %467 = vector.broadcast %466 : vector<1x6xf32> to vector<4x6xf32>
    %468 = arith.addf %465, %467 : vector<4x6xf32>
    %c0_524 = arith.constant 0 : index
    %c0_525 = arith.constant 0 : index
    %c0_526 = arith.constant 0 : index
    %469 = vector.load %arg10[%c0_524, %c0_525, %c0_526] : memref<1x4x6xf32, #tpu.memory_space<vmem>>, vector<1x4x6xf32>
    %470 = vector.shape_cast %469 : vector<1x4x6xf32> to vector<4x6xf32>
    %471 = vector.shape_cast %468 : vector<4x6xf32> to vector<1x4x6xf32>
    tpu.vector_store %arg10[%c0_524, %c0_525, %c0_526], %471 {strides = array<i32>} : memref<1x4x6xf32, #tpu.memory_space<vmem>>, vector<1x4x6xf32>,
    return
  }
  func.func @transform_0(%arg0: i32) -> (i32, i32, i32, i32) {
    %c0_i32 = arith.constant 0 : i32
    %c0_i32_0 = arith.constant 0 : i32
    %c0_i32_1 = arith.constant 0 : i32
    %c0_i32_2 = arith.constant 0 : i32
    return %arg0, %c0_i32, %c0_i32_0, %c0_i32_1 : i32, i32, i32, i32
  }
  func.func @transform_1(%arg0: i32) -> (i32, i32) {
    %c0_i32 = arith.constant 0 : i32
    %c0_i32_0 = arith.constant 0 : i32
    %c0_i32_1 = arith.constant 0 : i32
    return %c0_i32, %c0_i32_0 : i32, i32
  }
  func.func @transform_2(%arg0: i32) -> (i32, i32) {
    %c0_i32 = arith.constant 0 : i32
    %c0_i32_0 = arith.constant 0 : i32
    %c0_i32_1 = arith.constant 0 : i32
    return %c0_i32, %c0_i32_0 : i32, i32
  }
  func.func @transform_3(%arg0: i32) -> (i32, i32) {
    %c0_i32 = arith.constant 0 : i32
    %c0_i32_0 = arith.constant 0 : i32
    %c0_i32_1 = arith.constant 0 : i32
    return %c0_i32, %c0_i32_0 : i32, i32
  }
  func.func @transform_4(%arg0: i32) -> (i32, i32) {
    %c0_i32 = arith.constant 0 : i32
    %c0_i32_0 = arith.constant 0 : i32
    %c0_i32_1 = arith.constant 0 : i32
    return %c0_i32, %c0_i32_0 : i32, i32
  }
  func.func @transform_5(%arg0: i32) -> (i32, i32) {
    %c0_i32 = arith.constant 0 : i32
    %c0_i32_0 = arith.constant 0 : i32
    %c0_i32_1 = arith.constant 0 : i32
    return %c0_i32, %c0_i32_0 : i32, i32
  }
  func.func @transform_6(%arg0: i32) -> (i32, i32) {
    %c0_i32 = arith.constant 0 : i32
    %c0_i32_0 = arith.constant 0 : i32
    %c0_i32_1 = arith.constant 0 : i32
    return %c0_i32, %c0_i32_0 : i32, i32
  }
  func.func @transform_7(%arg0: i32) -> (i32, i32) {
    %c0_i32 = arith.constant 0 : i32
    %c0_i32_0 = arith.constant 0 : i32
    %c0_i32_1 = arith.constant 0 : i32
    return %c0_i32, %c0_i32_0 : i32, i32
  }
  func.func @transform_8(%arg0: i32) -> (i32, i32) {
    %c0_i32 = arith.constant 0 : i32
    %c0_i32_0 = arith.constant 0 : i32
    %c0_i32_1 = arith.constant 0 : i32
    return %c0_i32, %c0_i32_0 : i32, i32
  }
  func.func @transform_9(%arg0: i32) -> (i32, i32, i32) {
    %c0_i32 = arith.constant 0 : i32
    %c0_i32_0 = arith.constant 0 : i32
    %c0_i32_1 = arith.constant 0 : i32
    return %arg0, %c0_i32, %c0_i32_0 : i32, i32, i32
  }
}

</mosaic_0001>

<bundles_post_ra>
// kernel: dqlearn_forward.2
= control target key start
LH: loop header
LB: loop body
LE: loop exit
PB: predicated region body
PF: predicated region fallthrough
CT: control target
= control target key end

     0   :  { %s4109_s12 = smov 0   ;;  %s5692_s0 = inlined_call_operand.vmem [shape: f32[8,44,11,16], index: 0, kind: input, shape index: {}]   ;;  %s5693_s1 = inlined_call_operand.vmem [shape: bf16[256,32], index: 1, kind: input, shape index: {}]   ;;  %s5694_s2 = inlined_call_operand.vmem [shape: f32[1,32], index: 2, kind: input, shape index: {}]   ;;  %s5695_s3 = inlined_call_operand.vmem [shape: f32[800,32], index: 3, kind: output, shape index: {}]  }
   0x1 LB: > { %s2792_s13 = sadd.s32 4294967295, %s4080_s12   ;;  %p2796_p0 = scmp.ge.s32.totalorder %s4080_s12, 1  ;;  %s4080_s12 = sphi %s4109_s12, %s13_s12  }
   0x2   : > { %p139_p1 = scmp.lt.s32.totalorder %s4080_s12, 5 }
   0x4   : > { %p140_p2 = pnand %p2796_p0, %p139_p1 }
   0x5   : > { %s2797_s14 = sshll.u32 (!%p140_p2), %s2792_s13, 1  ;;  %s4082_s19 = smov (!%p140_p2), 48   ;;  %vm329_vm0 = vcmask (!%p140_p2), 130048   ;;  %vm332_vm1 = vcmask (!%p140_p2), 261120   ;;  %vm335_vm2 = vcmask (!%p140_p2), 392192   ;;  %vm338_vm3 = vcmask (!%p140_p2), 523264  }
   0x6   : > { %143 = sbr.rel (%p140_p2) target bundleno = 672 (0x2a0), region = 32  ;;  %p165_p3 = scmp.lt.s32.totalorder (!%p140_p2), %s2797_s14, 7  ;;  %vm341_vm4 = vcmask (!%p140_p2), 654336   ;;  %vm344_vm5 = vcmask (!%p140_p2), 785408   ;;  %vm347_vm6 = vcmask (!%p140_p2), 916480   ;;  %vm2168_vm7 = vcmask (!%p140_p2), 1041408  }
   0x7   : > { %s4083_s20 = smov (!%p140_p2), 16   ;;  %s4084_s21 = smov (!%p140_p2), 64   ;;  %vm2181_vm8 = vcmask (!%p140_p2), 1043456   ;;  %vm2194_vm9 = vcmask (!%p140_p2), 1045504  }
   0x8   : > { %s4085_s22 = smov (!%p140_p2), 32   ;;  %s4086_s23 = smov (!%p140_p2), 96  }
   0x9   : > { %s4087_s24 = smov (!%p140_p2), 80   ;;  %s4088_s25 = smov (!%p140_p2), 112  }
   0xd   : > { %s5697_s14 = smov (!%p165_p3, %s2797_s14), 7 }
   0xe   : > { %s3277_s15 = smul.u32 704, %s5697_s14 }
  0x10   : > { %s4122_s18 = scalar_lea.vmem %s5692_s0, %s3277_s15 }
  0x11   : > { %v2802_v0 = vld [vmem:[%s4122_s18 + $0x11] sm:$0xff]  ;;  %v2803_v1 = vld [vmem:[%s4122_s18 + $0x19] sm:$0x3]  ;;  %v180_v2 = vld [vmem:[%s4122_s18 + $0x1] sm:$0xff] }
  0x12   : > { %v3303_v3 = vpack.i.bf16 %v2803_v1, %v2802_v0  ;;  %v181_v4 = vld [vmem:[%s4122_s18 + $0x9] sm:$0x3]  ;;  %v2804_v5 = vld [vmem:[%s4122_s18 + $0x20] sm:$0xff]  ;;  %v2800_v8 = vld [vmem:[%s4122_s18 + $0x10] sm:$0xff] }
  0x13   : > { %v2805_v6 = vld [vmem:[%s4122_s18 + $0x28] sm:$0x3]  ;;  %v3293_v7 = vpack.i.bf16 %v181_v4, %v180_v2  ;;  %v2801_v9 = vld [vmem:[%s4122_s18 + $0x18] sm:$0x3]  ;;  %v2808_v12 = vld [vmem:[%s4122_s18 + $0x30] sm:$0xff] }
  0x14   : > { %3304 = vrot.lane.b32.xlu1 %v3303_v3, %s4082_s19  ;;  %v3308_v10 = vpack.i.bf16 %v2805_v6, %v2804_v5  ;;  %v3298_v11 = vpack.i.bf16 %v2801_v9, %v2800_v8  ;;  %v2809_v13 = vld [vmem:[%s4122_s18 + $0x38] sm:$0x3]  ;;  %v2806_v14 = vld [vmem:[%s4122_s18 + $0x21] sm:$0xff]  ;;  %v2807_v15 = vld [vmem:[%s4122_s18 + $0x29] sm:$0x3] }
  0x15   : > { %3294 = vrot.lane.b32.xlu0 %v3293_v7, %s4083_s20  ;;  %v3318_v16 = vpack.i.bf16 %v2809_v13, %v2808_v12  ;;  %v3313_v17 = vpack.i.bf16 %v2807_v15, %v2806_v14  ;;  %v2814_v18 = vld [vmem:[%s4122_s18 + $0x41] sm:$0xff]  ;;  %v2815_v19 = vld [vmem:[%s4122_s18 + $0x49] sm:$0x3]  ;;  %v2810_v20 = vld [vmem:[%s4122_s18 + $0x31] sm:$0xff] }
  0x16   : > { %v2811_v21 = vld [vmem:[%s4122_s18 + $0x39] sm:$0x3]  ;;  %v3328_v22 = vpack.i.bf16 %v2815_v19, %v2814_v18  ;;  %v2818_v24 = vld [vmem:[%s4122_s18 + $0x51] sm:$0xff]  ;;  %v2822_v30 = vld [vmem:[%s4122_s18 + $0x61] sm:$0xff] }
  0x17   : > { %v3323_v23 = vpack.i.bf16 %v2811_v21, %v2810_v20  ;;  %v2819_v25 = vld [vmem:[%s4122_s18 + $0x59] sm:$0x3]  ;;  %v2816_v26 = vld [vmem:[%s4122_s18 + $0x50] sm:$0xff]  ;;  %v2823_v31 = vld [vmem:[%s4122_s18 + $0x69] sm:$0x3] }
  0x18   : > { %3309 = vrot.lane.b32.xlu1 %v3308_v10, %s4084_s21  ;;  %v2817_v27 = vld [vmem:[%s4122_s18 + $0x58] sm:$0x3]  ;;  %v3338_v28 = vpack.i.bf16 %v2819_v25, %v2818_v24  ;;  %v2820_v32 = vld [vmem:[%s4122_s18 + $0x60] sm:$0xff]  ;;  %v2821_v33 = vld [vmem:[%s4122_s18 + $0x68] sm:$0x3]  ;;  %v3348_v34 = vpack.i.bf16 %v2823_v31, %v2822_v30 }
  0x19   : > { %3299 = vrot.lane.b32.xlu0 %v3298_v11, %s4085_s22  ;;  %v3333_v29 = vpack.i.bf16 %v2817_v27, %v2816_v26  ;;  %v3343_v35 = vpack.i.bf16 %v2821_v33, %v2820_v32  ;;  %v2826_v36 = vld [vmem:[%s4122_s18 + $0x71] sm:$0xff]  ;;  %v2827_v37 = vld [vmem:[%s4122_s18 + $0x79] sm:$0x3]  ;;  %v2830_v44 = vld [vmem:[%s4122_s18 + $0x81] sm:$0xff] }
  0x1a   : > { %v2824_v38 = vld [vmem:[%s4122_s18 + $0x70] sm:$0xff]  ;;  %v2825_v39 = vld [vmem:[%s4122_s18 + $0x78] sm:$0x3]  ;;  %v3358_v40 = vpack.i.bf16 %v2827_v37, %v2826_v36  ;;  %v2831_v45 = vld [vmem:[%s4122_s18 + $0x89] sm:$0x3] }
  0x1b   : > { %v3353_v41 = vpack.i.bf16 %v2825_v39, %v2824_v38  ;;  %v2832_v42 = vld [vmem:[%s4122_s18 + $0x90] sm:$0xff]  ;;  %v2833_v43 = vld [vmem:[%s4122_s18 + $0x98] sm:$0x3]  ;;  %v3363_v47 = vpack.i.bf16 %v2831_v45, %v2830_v44  ;;  %v2836_v48 = vld [vmem:[%s4122_s18 + $0xa0] sm:$0xff] }
  0x1c   : > { %3319 = vrot.lane.b32.xlu1 %v3318_v16, %s4086_s23  ;;  %v3368_v46 = vpack.i.bf16 %v2833_v43, %v2832_v42  ;;  %v2837_v49 = vld [vmem:[%s4122_s18 + $0xa8] sm:$0x3]  ;;  %v2834_v50 = vld [vmem:[%s4122_s18 + $0x91] sm:$0xff]  ;;  %v2835_v51 = vld [vmem:[%s4122_s18 + $0x99] sm:$0x3] }
  0x1d   : > { %3314 = vrot.lane.b32.xlu0 %v3313_v17, %s4087_s24  ;;  %v3378_v52 = vpack.i.bf16 %v2837_v49, %v2836_v48  ;;  %v3373_v53 = vpack.i.bf16 %v2835_v51, %v2834_v50  ;;  %v2840_v54 = vld [vmem:[%s4122_s18 + $0xb0] sm:$0xff]  ;;  %v2841_v55 = vld [vmem:[%s4122_s18 + $0xb8] sm:$0x3]  ;;  %v2838_v56 = vld [vmem:[%s4122_s18 + $0xa1] sm:$0xff] }
  0x1e   : > { %v2839_v57 = vld [vmem:[%s4122_s18 + $0xa9] sm:$0x3]  ;;  %v3388_v58 = vpack.i.bf16 %v2841_v55, %v2840_v54  ;;  %v2846_v60 = vld [vmem:[%s4122_s18 + $0xc1] sm:$0xff]  ;;  %v2842_v62 = vld [vmem:[%s4122_s18 + $0xb1] sm:$0xff] }
  0x1f   : > { %v3383_v59 = vpack.i.bf16 %v2839_v57, %v2838_v56  ;;  %v2847_v61 = vld [vmem:[%s4122_s18 + $0xc9] sm:$0x3]  ;;  %v2843_v63 = vld [vmem:[%s4122_s18 + $0xb9] sm:$0x3]  ;;  %v2850_v2 = vld [vmem:[%s4122_s18 + $0xd1] sm:$0xff] }
  0x20   : > { %3329 = vrot.lane.b32.xlu1 %v3328_v22, %s4083_s20  ;;  %v3398_v0 = vpack.i.bf16 %v2847_v61, %v2846_v60  ;;  %v3393_v1 = vpack.i.bf16 %v2843_v63, %v2842_v62  ;;  %v2851_v3 = vld [vmem:[%s4122_s18 + $0xd9] sm:$0x3]  ;;  %v2848_v4 = vld [vmem:[%s4122_s18 + $0xd0] sm:$0xff]  ;;  %v2854_v8 = vld [vmem:[%s4122_s18 + $0xe1] sm:$0xff] }
  0x21   : > { %3324 = vrot.lane.b32.xlu0 %v3323_v23, %s4088_s25  ;;  %v2849_v5 = vld [vmem:[%s4122_s18 + $0xd8] sm:$0x3]  ;;  %v3408_v6 = vpack.i.bf16 %v2851_v3, %v2850_v2  ;;  %v2855_v9 = vld [vmem:[%s4122_s18 + $0xe9] sm:$0x3]  ;;  %v2852_v10 = vld [vmem:[%s4122_s18 + $0xe0] sm:$0xff] }
  0x22   : > { %v3403_v7 = vpack.i.bf16 %v2849_v5, %v2848_v4  ;;  %v2853_v11 = vld [vmem:[%s4122_s18 + $0xe8] sm:$0x3]  ;;  %v4058_v12 = vld [vmem:[%s5693_s1 + $0x40] sm:$0xff]   ;;  %v3418_v13 = vpack.i.bf16 %v2855_v9, %v2854_v8  ;;  %v2858_v17 = vld [vmem:[%s4122_s18 + $0xf1] sm:$0xff] }
  0x23   : > { %3167 = vmatprep.subr.bf16.mxu0 %v4058_v12  ;;  %v4059_v14 = vld [vmem:[%s5693_s1] sm:$0xff]   ;;  %v4060_v15 = vld [vmem:[%s5693_s1 + $0x48] sm:$0xff]   ;;  %v3413_v16 = vpack.i.bf16 %v2853_v11, %v2852_v10  ;;  %v2859_v18 = vld [vmem:[%s4122_s18 + $0xf9] sm:$0x3]  ;;  %3261 = vmatprep.subr.bf16.mxu1 %v4058_v12 }
  0x24   : > { %3339 = vrot.lane.b32.xlu1 %v3338_v28, %s4082_s19  ;;  %v2856_v19 = vld [vmem:[%s4122_s18 + $0xf0] sm:$0xff]  ;;  %v2857_v20 = vld [vmem:[%s4122_s18 + $0xf8] sm:$0x3]  ;;  %3168 = vmatpush3.bf16.msra.mxu0 %v4059_v14  ;;  %v4061_v21 = vld [vmem:[%s5693_s1 + $0x8] sm:$0xff]   ;;  %v3428_v23 = vpack.i.bf16 %v2859_v18, %v2858_v17 }
  0x25   : > { %3334 = vrot.lane.b32.xlu0 %v3333_v29, %s4085_s22  ;;  %3269 = vmatpush3.bf16.msra.mxu1 %v4059_v14  ;;  %v4062_v22 = vld [vmem:[%s5693_s1 + $0x50] sm:$0xff]   ;;  %v3423_v24 = vpack.i.bf16 %v2857_v20, %v2856_v19  ;;  %v2865_v26 = vld [vmem:[%s4122_s18 + $0x118] sm:$0x3]  ;;  %v2862_v27 = vld [vmem:[%s4122_s18 + $0x101] sm:$0xff] }
  0x26   : > { %3169 = vmatprep.subr.bf16.mxu0 %v4060_v15  ;;  %3262 = vmatprep.subr.bf16.mxu1 %v4060_v15  ;;  %v2864_v25 = vld [vmem:[%s4122_s18 + $0x110] sm:$0xff]  ;;  %v2863_v28 = vld [vmem:[%s4122_s18 + $0x109] sm:$0x3]  ;;  %v4064_v30 = vld [vmem:[%s5693_s1 + $0x58] sm:$0xff]  }
  0x27   : > { %v4063_v29 = vld [vmem:[%s5693_s1 + $0x10] sm:$0xff]   ;;  %v3438_v31 = vpack.i.bf16 %v2865_v26, %v2864_v25  ;;  %v2868_v32 = vld [vmem:[%s4122_s18 + $0x120] sm:$0xff]  ;;  %v2869_v33 = vld [vmem:[%s4122_s18 + $0x128] sm:$0x3] }
  0x28   : > { %3349 = vrot.lane.b32.xlu1 %v3348_v34, %s4087_s24  ;;  %3170 = vmatpush3.bf16.msra.mxu0 %v4061_v21  ;;  %v3433_v34 = vpack.i.bf16 %v2863_v28, %v2862_v27  ;;  %v2867_v36 = vld [vmem:[%s4122_s18 + $0x119] sm:$0x3]  ;;  %v4066_v38 = vld [vmem:[%s5693_s1 + $0x60] sm:$0xff]   ;;  %v3448_v39 = vpack.i.bf16 %v2869_v33, %v2868_v32  ;;  %v2871_v44 = vld [vmem:[%s4122_s18 + $0x129] sm:$0x3] }
  0x29   : > { %3344 = vrot.lane.b32.xlu0 %v3343_v35, %s4084_s21  ;;  %3270 = vmatpush3.bf16.msra.mxu1 %v4061_v21  ;;  %v2866_v35 = vld [vmem:[%s4122_s18 + $0x111] sm:$0xff]  ;;  %v2870_v43 = vld [vmem:[%s4122_s18 + $0x121] sm:$0xff]  ;;  %v2879_v49 = vld [vmem:[%s4122_s18 + $0x149] sm:$0x3] }
  0x2a   : > { %3171 = vmatprep.subr.bf16.mxu0 %v4062_v22  ;;  %3263 = vmatprep.subr.bf16.mxu1 %v4062_v22  ;;  %v4065_v37 = vld [vmem:[%s5693_s1 + $0x18] sm:$0xff]   ;;  %v3443_v42 = vpack.i.bf16 %v2867_v36, %v2866_v35  ;;  %v4067_v45 = vld [vmem:[%s5693_s1 + $0x20] sm:$0xff]   ;;  %v3453_v51 = vpack.i.bf16 %v2871_v44, %v2870_v43  ;;  %v4070_v54 = vld [vmem:[%s5693_s1 + $0x70] sm:$0xff]  }
  0x2b   : > { %v2878_v48 = vld [vmem:[%s4122_s18 + $0x141] sm:$0xff]  ;;  %v2874_v50 = vld [vmem:[%s4122_s18 + $0x131] sm:$0xff]  ;;  %v2887_v2 = vld [vmem:[%s4122_s18 + $0x169] sm:$0x3] }
  0x2c   : > { %3359 = vrot.lane.b32.xlu1 %v3358_v40, %s4088_s25  ;;  %3172 = vmatpush3.bf16.msra.mxu0 %v4063_v29  ;;  %v2872_v40 = vld [vmem:[%s4122_s18 + $0x130] sm:$0xff]  ;;  %v3468_v55 = vpack.i.bf16 %v2879_v49, %v2878_v48  ;;  %v2881_v60 = vld [vmem:[%s4122_s18 + $0x158] sm:$0x3]  ;;  %v2884_v3 = vld [vmem:[%s4122_s18 + $0x160] sm:$0xff] }
  0x2d   : > { %3354 = vrot.lane.b32.xlu0 %v3353_v41, %s4086_s23  ;;  %3271 = vmatpush3.bf16.msra.mxu1 %v4063_v29  ;;  %v2873_v41 = vld [vmem:[%s4122_s18 + $0x138] sm:$0x3]  ;;  %v4071_v61 = vld [vmem:[%s5693_s1 + $0x30] sm:$0xff]   ;;  %v2885_v4 = vld [vmem:[%s4122_s18 + $0x168] sm:$0x3] }
  0x2e   : > { %3173 = vmatprep.subr.bf16.mxu0 %v4064_v30  ;;  %3264 = vmatprep.subr.bf16.mxu1 %v4064_v30  ;;  %v2882_v57 = vld [vmem:[%s4122_s18 + $0x151] sm:$0xff]  ;;  %v2891_v9 = vld [vmem:[%s4122_s18 + $0x179] sm:$0x3]  ;;  %v2895_v17 = vld [vmem:[%s4122_s18 + $0x189] sm:$0x3] }
  0x2f   : > { %v4072_v62 = vld [vmem:[%s5693_s1 + $0x78] sm:$0xff]   ;;  %v2888_v10 = vld [vmem:[%s4122_s18 + $0x170] sm:$0xff]  ;;  %v2900_v20 = vld [vmem:[%s4122_s18 + $0x1a0] sm:$0xff] }
  0x30   : > { %3369 = vrot.lane.b32.xlu1 %v3368_v46, %s4085_s22  ;;  %3174 = vmatpush3.bf16.msra.mxu0 %v4065_v37  ;;  %v4068_v46 = vld [vmem:[%s5693_s1 + $0x68] sm:$0xff]   ;;  %v4073_v5 = vld [vmem:[%s5693_s1 + $0x38] sm:$0xff]   ;;  %v2896_v14 = vld [vmem:[%s4122_s18 + $0x190] sm:$0xff] }
  0x31   : > { %3364 = vrot.lane.b32.xlu0 %v3363_v47, %s4083_s20  ;;  %3272 = vmatpush3.bf16.msra.mxu1 %v4065_v37  ;;  %v3458_v47 = vpack.i.bf16 %v2873_v41, %v2872_v40  ;;  %v2890_v8 = vld [vmem:[%s4122_s18 + $0x171] sm:$0xff]  ;;  %v2901_v21 = vld [vmem:[%s4122_s18 + $0x1a8] sm:$0x3]  ;;  %v2907_v35 = vld [vmem:[%s4122_s18 + $0x1b9] sm:$0x3] }
  0x32   : > { %3175 = vmatprep.subr.bf16.mxu0 %v4066_v38  ;;  %3265 = vmatprep.subr.bf16.mxu1 %v4066_v38  ;;  %v2889_v11 = vld [vmem:[%s4122_s18 + $0x178] sm:$0x3]  ;;  %v3498_v12 = vpack.i.bf16 %v2891_v9, %v2890_v8  ;;  %v2904_v26 = vld [vmem:[%s4122_s18 + $0x1b0] sm:$0xff]  ;;  %v2902_v28 = vld [vmem:[%s4122_s18 + $0x1a1] sm:$0xff] }
  0x33   : > { %v2897_v15 = vld [vmem:[%s4122_s18 + $0x198] sm:$0x3]  ;;  %v2903_v29 = vld [vmem:[%s4122_s18 + $0x1a9] sm:$0x3]  ;;  %v2910_v32 = vld [vmem:[%s4122_s18 + $0x1c1] sm:$0xff] }
  0x34   : > { %3379 = vrot.lane.b32.xlu1 %v3378_v52, %s4084_s21  ;;  %v2875_v52 = vld [vmem:[%s4122_s18 + $0x139] sm:$0x3]  ;;  %3176 = vmatpush3.bf16.msra.mxu0 %v4067_v45  ;;  %v3508_v18 = vpack.i.bf16 %v2897_v15, %v2896_v14  ;;  %v2898_v22 = vld [vmem:[%s4122_s18 + $0x191] sm:$0xff]  ;;  %v2911_v33 = vld [vmem:[%s4122_s18 + $0x1c9] sm:$0x3] }
  0x35   : > { %3374 = vrot.lane.b32.xlu0 %v3373_v53, %s4082_s19  ;;  %v4069_v53 = vld [vmem:[%s5693_s1 + $0x28] sm:$0xff]   ;;  %3273 = vmatpush3.bf16.msra.mxu1 %v4067_v45  ;;  %v3463_v56 = vpack.i.bf16 %v2875_v52, %v2874_v50  ;;  %v2905_v27 = vld [vmem:[%s4122_s18 + $0x1b8] sm:$0x3]  ;;  %v3538_v36 = vpack.i.bf16 %v2911_v33, %v2910_v32  ;;  %v2912_v40 = vld [vmem:[%s4122_s18 + $0x1d0] sm:$0xff] }
  0x36   : > { %3177 = vmatprep.subr.bf16.mxu0 %v4068_v46  ;;  %3266 = vmatprep.subr.bf16.mxu1 %v4068_v46  ;;  %v3528_v30 = vpack.i.bf16 %v2905_v27, %v2904_v26  ;;  %v2914_v38 = vld [vmem:[%s4122_s18 + $0x1d1] sm:$0xff]  ;;  %v2918_v44 = vld [vmem:[%s4122_s18 + $0x1e1] sm:$0xff]  ;;  %v2919_v45 = vld [vmem:[%s4122_s18 + $0x1e9] sm:$0x3] }
  0x37   : > { %v2913_v41 = vld [vmem:[%s4122_s18 + $0x1d8] sm:$0x3]  ;;  %v2916_v46 = vld [vmem:[%s4122_s18 + $0x1e0] sm:$0xff]  ;;  %v3558_v48 = vpack.i.bf16 %v2919_v45, %v2918_v44  ;;  %v2920_v52 = vld [vmem:[%s4122_s18 + $0x1f0] sm:$0xff] }
  0x38   : > { %3389 = vrot.lane.b32.xlu1 %v3388_v58, %s4086_s23  ;;  %v2883_v58 = vld [vmem:[%s4122_s18 + $0x159] sm:$0x3]  ;;  %3178 = vmatpush3.bf16.msra.mxu0 %v4069_v53  ;;  %v3543_v43 = vpack.i.bf16 %v2913_v41, %v2912_v40  ;;  %v2922_v50 = vld [vmem:[%s4122_s18 + $0x1f1] sm:$0xff]  ;;  %v2935_v8 = vld [vmem:[%s4122_s18 + $0x229] sm:$0x3] }
  0x39   : > { %3384 = vrot.lane.b32.xlu0 %v3383_v59, %s4087_s24  ;;  %v2880_v59 = vld [vmem:[%s4122_s18 + $0x150] sm:$0xff]  ;;  %3274 = vmatpush3.bf16.msra.mxu1 %v4069_v53  ;;  %v3478_v63 = vpack.i.bf16 %v2883_v58, %v2882_v57  ;;  %v2921_v53 = vld [vmem:[%s4122_s18 + $0x1f8] sm:$0x3]  ;;  %v2926_v58 = vld [vmem:[%s4122_s18 + $0x201] sm:$0xff] }
  0x3a   : > { %3179 = vmatprep.subr.bf16.mxu0 %v4070_v54  ;;  %3267 = vmatprep.subr.bf16.mxu1 %v4070_v54  ;;  %v2929_v57 = vld [vmem:[%s4122_s18 + $0x218] sm:$0x3]  ;;  %v2949_v32 = vld [vmem:[%s4122_s18 + $0x268] sm:$0x3]  ;;  %v2960_v44 = vld [vmem:[%s4122_s18 + $0x290] sm:$0xff] }
  0x3b   : > { %v2938_v15 = vld [vmem:[%s4122_s18 + $0x231] sm:$0xff] }
  0x3c   : > { %3399 = vrot.lane.b32.xlu1 %v3398_v0, %s4083_s20  ;;  %v3473_v0 = vpack.i.bf16 %v2881_v60, %v2880_v59  ;;  %3180 = vmatpush3.bf16.msra.mxu0 %v4071_v61  ;;  %v2927_v59 = vld [vmem:[%s4122_s18 + $0x209] sm:$0x3]  ;;  %v2953_v40 = vld [vmem:[%s4122_s18 + $0x278] sm:$0x3]  ;;  %v3008_v45 = vld [vmem:[%s4122_s18 + $0x350] sm:$0xff] }
  0x3d   : > { %3394 = vrot.lane.b32.xlu0 %v3393_v1, %s4088_s25  ;;  %v2886_v1 = vld [vmem:[%s4122_s18 + $0x161] sm:$0xff]  ;;  %3275 = vmatpush3.bf16.msra.mxu1 %v4071_v61  ;;  %v3573_v61 = vpack.i.bf16 %v2927_v59, %v2926_v58  ;;  %v4417_v58 = vld [vmem:[%s4122_s18 + $0x318] sm:$0x3] }
  0x3e   : > { %3181 = vmatprep.subr.bf16.mxu0 %v4072_v62  ;;  %3268 = vmatprep.subr.bf16.mxu1 %v4072_v62  ;;  %v2932_v62 = vld [vmem:[%s4122_s18 + $0x220] sm:$0xff] }
  0x40   : > { %3409 = vrot.lane.b32.xlu1 %v3408_v6, %s4082_s19  ;;  %v3488_v6 = vpack.i.bf16 %v2887_v2, %v2886_v1  ;;  %3182 = vmatpush3.bf16.msra.mxu0 %v4073_v5  ;;  %v2931_v1 = vld [vmem:[%s4122_s18 + $0x219] sm:$0x3] }
  0x41   : > { %3404 = vrot.lane.b32.xlu0 %v3403_v7, %s4085_s22  ;;  %v3483_v7 = vpack.i.bf16 %v2885_v4, %v2884_v3  ;;  %3276 = vmatpush3.bf16.msra.mxu1 %v4073_v5  ;;  %v2936_v4 = vld [vmem:[%s4122_s18 + $0x230] sm:$0xff]  ;;  %v2937_v5 = vld [vmem:[%s4122_s18 + $0x238] sm:$0x3] }
  0x44   : > { %3419 = vrot.lane.b32.xlu1 %v3418_v13, %s4087_s24  ;;  %v3493_v13 = vpack.i.bf16 %v2889_v11, %v2888_v10  ;;  %v3598_v10 = vpack.i.bf16 %v2937_v5, %v2936_v4  ;;  %v4444_v5 = vld [vmem:[%s4122_s18 + $0x359] sm:$0x3] }
  0x45   : > { %3414 = vrot.lane.b32.xlu0 %v3413_v16, %s4084_s21  ;;  %v2894_v16 = vld [vmem:[%s4122_s18 + $0x181] sm:$0xff] }
  0x46   : > { %v3503_v19 = vpack.i.bf16 %v2895_v17, %v2894_v16  ;;  %v2939_v16 = vld [vmem:[%s4122_s18 + $0x239] sm:$0x3] }
  0x48   : > { %3429 = vrot.lane.b32.xlu1 %v3428_v23, %s4088_s25  ;;  %v2899_v23 = vld [vmem:[%s4122_s18 + $0x199] sm:$0x3] }
  0x49   : > { %3424 = vrot.lane.b32.xlu0 %v3423_v24, %s4086_s23  ;;  %v3518_v24 = vpack.i.bf16 %v2901_v21, %v2900_v20  ;;  %v3513_v25 = vpack.i.bf16 %v2899_v23, %v2898_v22  ;;  %v2946_v20 = vld [vmem:[%s4122_s18 + $0x251] sm:$0xff]  ;;  %v2947_v21 = vld [vmem:[%s4122_s18 + $0x259] sm:$0x3] }
  0x4a   : > { %v2944_v23 = vld [vmem:[%s4122_s18 + $0x250] sm:$0xff]  ;;  %v3618_v26 = vpack.i.bf16 %v2947_v21, %v2946_v20 }
  0x4c   : > { %3439 = vrot.lane.b32.xlu1 %v3438_v31, %s4085_s22  ;;  %v3523_v31 = vpack.i.bf16 %v2903_v29, %v2902_v28  ;;  %v2950_v28 = vld [vmem:[%s4122_s18 + $0x261] sm:$0xff]  ;;  %v2951_v29 = vld [vmem:[%s4122_s18 + $0x269] sm:$0x3] }
  0x4d   : > { %3434 = vrot.lane.b32.xlu0 %v3433_v34, %s4083_s20  ;;  %v2906_v34 = vld [vmem:[%s4122_s18 + $0x1b1] sm:$0xff] }
  0x4e   : > { %v3533_v37 = vpack.i.bf16 %v2907_v35, %v2906_v34  ;;  %v3628_v34 = vpack.i.bf16 %v2951_v29, %v2950_v28 }
  0x50   : > { %3449 = vrot.lane.b32.xlu1 %v3448_v39, %s4084_s21  ;;  %v2915_v39 = vld [vmem:[%s4122_s18 + $0x1d9] sm:$0x3] }
  0x51   : > { %3444 = vrot.lane.b32.xlu0 %v3443_v42, %s4082_s19  ;;  %v3548_v42 = vpack.i.bf16 %v2915_v39, %v2914_v38  ;;  %v2952_v39 = vld [vmem:[%s4122_s18 + $0x270] sm:$0xff] }
  0x54   : > { %3459 = vrot.lane.b32.xlu1 %v3458_v47, %s4086_s23  ;;  %v2917_v47 = vld [vmem:[%s4122_s18 + $0x1e8] sm:$0x3] }
  0x55   : > { %3454 = vrot.lane.b32.xlu0 %v3453_v51, %s4087_s24  ;;  %v3553_v49 = vpack.i.bf16 %v2917_v47, %v2916_v46  ;;  %v2923_v51 = vld [vmem:[%s4122_s18 + $0x1f9] sm:$0x3]  ;;  %v2958_v47 = vld [vmem:[%s4122_s18 + $0x281] sm:$0xff] }
  0x56   : > { %v3568_v54 = vpack.i.bf16 %v2923_v51, %v2922_v50  ;;  %v2812_v50 = vld [vmem:[%s4122_s18 + $0x40] sm:$0xff]  ;;  %v3648_v51 = vpack.i.bf16 %v3008_v45, %v2960_v44 }
  0x58   : > { %3469 = vrot.lane.b32.xlu1 %v3468_v55, %s4083_s20  ;;  %v3563_v55 = vpack.i.bf16 %v2921_v53, %v2920_v52  ;;  %v2990_v52 = vld [vmem:[%s4122_s18 + $0x301] sm:$0xff]  ;;  %v2991_v53 = vld [vmem:[%s4122_s18 + $0x309] sm:$0x3] }
  0x59   : > { %3464 = vrot.lane.b32.xlu0 %v3463_v56, %s4088_s25  ;;  %v2928_v56 = vld [vmem:[%s4122_s18 + $0x210] sm:$0xff]  ;;  %v3658_v4 = vpack.i.bf16 %v2991_v53, %v2990_v52  ;;  %v3013_v52 = vld [vmem:[%s4122_s18 + $0x368] sm:$0x3] }
  0x5a   : > { %v3578_v60 = vpack.i.bf16 %v2929_v57, %v2928_v56  ;;  %v3006_v56 = vld [vmem:[%s4122_s18 + $0x341] sm:$0xff]  ;;  %v3007_v57 = vld [vmem:[%s4122_s18 + $0x349] sm:$0x3] }
  0x5c   : > { %3479 = vrot.lane.b32.xlu1 %v3478_v63, %s4082_s19  ;;  %v2933_v63 = vld [vmem:[%s4122_s18 + $0x228] sm:$0x3] }
  0x5d   : > { %3474 = vrot.lane.b32.xlu0 %v3473_v0, %s4085_s22  ;;  %v2930_v0 = vld [vmem:[%s4122_s18 + $0x211] sm:$0xff]  ;;  %v3588_v2 = vpack.i.bf16 %v2933_v63, %v2932_v62 }
  0x5e   : > { %v3583_v3 = vpack.i.bf16 %v2931_v1, %v2930_v0  ;;  %v4428_v62 = vld [vmem:[%s4122_s18 + $0x358] sm:$0x3] }
  0x5f   : > { %v4433_v0 = vld [vmem:[%s4122_s18 + $0x311] sm:$0xff]  ;;  %v4436_v1 = vld [vmem:[%s4122_s18 + $0x319] sm:$0x3] }
  0x60   : > { %3489 = vrot.lane.b32.xlu1 %v3488_v6, %s4087_s24  ;;  %v3678_v21 = vpack.i.bf16 %v4436_v1, %v4433_v0 }
  0x61   : > { %3484 = vrot.lane.b32.xlu0 %v3483_v7, %s4084_s21  ;;  %v2934_v7 = vld [vmem:[%s4122_s18 + $0x221] sm:$0xff] }
  0x62   : > { %v3593_v11 = vpack.i.bf16 %v2935_v8, %v2934_v7  ;;  %v4447_v7 = vld [vmem:[%s4122_s18 + $0x381] sm:$0xff] }
  0x63   : > { %v4450_v8 = vld [vmem:[%s4122_s18 + $0x3c1] sm:$0xff] }
  0x64   : > { %3499 = vrot.lane.b32.xlu1 %v3498_v12, %s4088_s25  ;;  %v2942_v12 = vld [vmem:[%s4122_s18 + $0x241] sm:$0xff]  ;;  %v3688_v29 = vpack.i.bf16 %v4450_v8, %v4447_v7 }
  0x65   : > { %3494 = vrot.lane.b32.xlu0 %v3493_v13, %s4086_s23  ;;  %v2943_v13 = vld [vmem:[%s4122_s18 + $0x249] sm:$0x3] }
  0x68   : > { %3509 = vrot.lane.b32.xlu1 %v3508_v18, %s4085_s22  ;;  %v3608_v18 = vpack.i.bf16 %v2943_v13, %v2942_v12  ;;  %v3653_v12 = vpack.i.bf16 %v3007_v57, %v3006_v56 }
  0x69   : > { %3504 = vrot.lane.b32.xlu0 %v3503_v19, %s4083_s20  ;;  %v3603_v19 = vpack.i.bf16 %v2939_v16, %v2938_v15  ;;  %v179_v16 = vld [vmem:[%s4122_s18 + $0x8] sm:$0x3] }
  0x6c   : > { %3519 = vrot.lane.b32.xlu1 %v3518_v24, %s4084_s21  ;;  %v2945_v24 = vld [vmem:[%s4122_s18 + $0x258] sm:$0x3] }
  0x6d   : > { %3514 = vrot.lane.b32.xlu0 %v3513_v25, %s4082_s19  ;;  %v3613_v27 = vpack.i.bf16 %v2945_v24, %v2944_v23  ;;  %v178_v23 = vld [vmem:[%s4122_s18] sm:$0xff] }
  0x70   : > { %3529 = vrot.lane.b32.xlu1 %v3528_v30, %s4086_s23 }
  0x71   : > { %3524 = vrot.lane.b32.xlu0 %v3523_v31, %s4087_s24  ;;  %v2948_v31 = vld [vmem:[%s4122_s18 + $0x260] sm:$0xff] }
  0x72   : > { %v3623_v35 = vpack.i.bf16 %v2949_v32, %v2948_v31  ;;  %v2813_v32 = vld [vmem:[%s4122_s18 + $0x48] sm:$0x3] }
  0x74   : > { %3539 = vrot.lane.b32.xlu1 %v3538_v36, %s4083_s20  ;;  %v2954_v36 = vld [vmem:[%s4122_s18 + $0x271] sm:$0xff] }
  0x75   : > { %3534 = vrot.lane.b32.xlu0 %v3533_v37, %s4088_s25  ;;  %v2955_v37 = vld [vmem:[%s4122_s18 + $0x279] sm:$0x3] }
  0x78   : > { %3549 = vrot.lane.b32.xlu1 %v3548_v42, %s4082_s19  ;;  %v3638_v42 = vpack.i.bf16 %v2955_v37, %v2954_v36 }
  0x79   : > { %3544 = vrot.lane.b32.xlu0 %v3543_v43, %s4085_s22  ;;  %v3633_v43 = vpack.i.bf16 %v2953_v40, %v2952_v39 }
  0x7c   : > { %3559 = vrot.lane.b32.xlu1 %v3558_v48, %s4087_s24  ;;  %v2959_v48 = vld [vmem:[%s4122_s18 + $0x289] sm:$0x3] }
  0x7d   : > { %3554 = vrot.lane.b32.xlu0 %v3553_v49, %s4084_s21 }
  0x80   : > { %3569 = vrot.lane.b32.xlu1 %v3568_v54, %s4088_s25 }
  0x81   : > { %3564 = vrot.lane.b32.xlu0 %v3563_v55, %s4086_s23  ;;  %v3643_v55 = vpack.i.bf16 %v2959_v48, %v2958_v47 }
  0x84   : > { %3579 = vrot.lane.b32.xlu1 %v3578_v60, %s4085_s22  ;;  %v4422_v60 = vld [vmem:[%s4122_s18 + $0x390] sm:$0xff] }
  0x85   : > { %3574 = vrot.lane.b32.xlu0 %v3573_v61, %s4083_s20  ;;  %v4425_v61 = vld [vmem:[%s4122_s18 + $0x310] sm:$0xff]  ;;  %v3668_v13 = vpack.i.bf16 %v4422_v60, %v4417_v58 }
  0x86   : > { %v4352_v6 = vpop.permute.xlu1 %3304  ;;  %v3663_v20 = vpack.i.bf16 %v4425_v61, %v4428_v62 }
  0x87   : > { %v4356_v9 = vpop.permute.xlu0 %3294  ;;  %v3307_v36 = vunpack.i.h.bf16 %v4352_v6  ;;  %v3306_v37 = vunpack.i.l.bf16 %v4352_v6 }
  0x88   : > { %3589 = vrot.lane.b32.xlu1 %v3588_v2, %s4084_s21  ;;  %v4439_v2 = vld [vmem:[%s4122_s18 + $0x351] sm:$0xff]  ;;  %v3296_v15 = vunpack.i.l.bf16 %v4356_v9 }
  0x89   : > { %3584 = vrot.lane.b32.xlu0 %v3583_v3, %s4082_s19  ;;  %v3673_v28 = vpack.i.bf16 %v4444_v5, %v4439_v2 }
  0x8a   : > { %v4362_v14 = vpop.permute.xlu1 %3309 }
  0x8b   : > { %v4366_v17 = vpop.permute.xlu0 %3299  ;;  %v3312_v47 = vunpack.i.h.bf16 %v4362_v14 }
  0x8c   : > { %3599 = vrot.lane.b32.xlu1 %v3598_v10, %s4086_s23  ;;  %v3297_v10 = vunpack.i.h.bf16 %v4356_v9  ;;  %v3301_v31 = vunpack.i.l.bf16 %v4366_v17 }
  0x8d   : > { %3594 = vrot.lane.b32.xlu0 %v3593_v11, %s4087_s24 }
  0x8e   : > { %v4372_v22 = vpop.permute.xlu1 %3319  ;;  %v331_v39 = vsel %vm329_vm0, %v179_v16, %v3297_v10  ;;  %v3015_v16 = vld [vmem:[%s4122_s18 + $0x369] sm:$0x3] }
  0x8f   : > { %v4376_v25 = vpop.permute.xlu0 %3314 }
  0x90   : > { %3609 = vrot.lane.b32.xlu1 %v3608_v18, %s4083_s20  ;;  %v3302_v18 = vunpack.i.h.bf16 %v4366_v17  ;;  %v330_v17 = vsel %vm329_vm0, %v178_v23, %v3296_v15 }
  0x91   : > { %3604 = vrot.lane.b32.xlu0 %v3603_v19, %s4088_s25 }
  0x92   : > { %v4382_v30 = vpop.permute.xlu1 %3329 }
  0x93   : > { %v4386_v33 = vpop.permute.xlu0 %3324  ;;  %v3331_v54 = vunpack.i.l.bf16 %v4382_v30  ;;  %v3332_v24 = vunpack.i.h.bf16 %v4382_v30 }
  0x94   : > { %3619 = vrot.lane.b32.xlu1 %v3618_v26, %s4082_s19 }
  0x95   : > { %3614 = vrot.lane.b32.xlu0 %v3613_v27, %s4085_s22  ;;  %v350_v11 = vsel %vm329_vm0, %v2812_v50, %v3331_v54  ;;  %v2828_v27 = vld [vmem:[%s4122_s18 + $0x80] sm:$0xff]  ;;  %v351_v6 = vsel %vm329_vm0, %v2813_v32, %v3332_v24  ;;  %v333_v54 = vsel %vm332_vm1, %v330_v17, %v3301_v31  ;;  %v3017_v17 = vld [vmem:[%s4122_s18 + $0x378] sm:$0x3] }
  0x96   : > { %v4392_v38 = vpop.permute.xlu1 %3339 }
  0x97   : > { %v4396_v41 = vpop.permute.xlu0 %3334  ;;  %v3341_v26 = vunpack.i.l.bf16 %v4392_v38  ;;  %v3342_v58 = vunpack.i.h.bf16 %v4392_v38  ;;  %v3311_v38 = vunpack.i.l.bf16 %v4362_v14  ;;  %v2997_v14 = vld [vmem:[%s4122_s18 + $0x328] sm:$0x3] }
  0x98   : > { %3629 = vrot.lane.b32.xlu1 %v3628_v34, %s4087_s24  ;;  %v3336_v3 = vunpack.i.l.bf16 %v4396_v41 }
  0x99   : > { %3624 = vrot.lane.b32.xlu0 %v3623_v35, %s4084_s21 }
  0x9a   : > { %v4402_v46 = vpop.permute.xlu1 %3349  ;;  %v352_v34 = vsel %vm332_vm1, %v350_v11, %v3336_v3  ;;  %v3014_v11 = vld [vmem:[%s4122_s18 + $0x361] sm:$0xff] }
  0x9b   : > { %v4406_v49 = vpop.permute.xlu0 %3344  ;;  %v3351_v48 = vunpack.i.l.bf16 %v4402_v46  ;;  %v354_v53 = vsel %vm335_vm2, %v352_v34, %v3341_v26  ;;  %v3352_v23 = vunpack.i.h.bf16 %v4402_v46  ;;  %v3316_v46 = vunpack.i.l.bf16 %v4376_v25 }
  0x9c   : > { %3639 = vrot.lane.b32.xlu1 %v3638_v42, %s4088_s25  ;;  %v3346_v35 = vunpack.i.l.bf16 %v4406_v49  ;;  %v334_v42 = vsel %vm332_vm1, %v331_v39, %v3302_v18  ;;  %v3347_v0 = vunpack.i.h.bf16 %v4406_v49  ;;  %v2996_v18 = vld [vmem:[%s4122_s18 + $0x320] sm:$0xff] }
  0x9d   : > { %3634 = vrot.lane.b32.xlu0 %v3633_v43, %s4086_s23  ;;  %v3337_v43 = vunpack.i.h.bf16 %v4396_v41  ;;  %v337_v57 = vsel %vm335_vm2, %v334_v42, %v3307_v36  ;;  %v3693_v36 = vpack.i.bf16 %v2997_v14, %v2996_v18  ;;  %v3327_v42 = vunpack.i.h.bf16 %v4386_v33 }
  0x9e   : > { %v4419_v59 = vpop.permute.xlu1 %3359  ;;  %v356_v56 = vsel %vm338_vm3, %v354_v53, %v3346_v35  ;;  %v340_v49 = vsel %vm338_vm3, %v337_v57, %v3312_v47 }
  0x9f   : > { %v4430_v63 = vpop.permute.xlu0 %3354  ;;  %v353_v62 = vsel %vm332_vm1, %v351_v6, %v3337_v43  ;;  %v3361_v5 = vunpack.i.l.bf16 %v4419_v59  ;;  %v3362_v43 = vunpack.i.h.bf16 %v4419_v59  ;;  %v2999_v59 = vld [vmem:[%s4122_s18 + $0x329] sm:$0x3] }
  0xa0   : > { %3649 = vrot.lane.b32.xlu1 %v3648_v51, %s4085_s22  ;;  %v3012_v51 = vld [vmem:[%s4122_s18 + $0x360] sm:$0xff]  ;;  %v3356_v41 = vunpack.i.l.bf16 %v4430_v63  ;;  %v355_v24 = vsel %vm335_vm2, %v353_v62, %v3342_v58  ;;  %v3001_v58 = vld [vmem:[%s4122_s18 + $0x338] sm:$0x3] }
  0xa1   : > { %3644 = vrot.lane.b32.xlu0 %v3643_v55, %s4083_s20  ;;  %v3683_v3 = vpack.i.bf16 %v3013_v52, %v3012_v51  ;;  %v357_v31 = vsel %vm338_vm3, %v355_v24, %v3347_v0  ;;  %v3321_v51 = vunpack.i.l.bf16 %v4372_v22 }
  0xa2   : > { %v4460_v19 = vpop.permute.xlu1 %3369 }
  0xa3   : > { %v4470_v9 = vpop.permute.xlu0 %3364  ;;  %v3371_v40 = vunpack.i.l.bf16 %v4460_v19  ;;  %v3372_v24 = vunpack.i.h.bf16 %v4460_v19  ;;  %v3018_v19 = vld [vmem:[%s4122_s18 + $0x371] sm:$0xff] }
  0xa4   : > { %v3366_v30 = vunpack.i.l.bf16 %v4470_v9  ;;  %3659 = vrot.lane.b32.xlu1 %v3658_v4, %s4083_s20  ;;  %v336_v4 = vsel %vm335_vm2, %v333_v54, %v3306_v37 }
  0xa5   : > { %3654 = vrot.lane.b32.xlu0 %v3653_v12, %s4083_s20  ;;  %v358_v12 = vsel %vm341_vm4, %v356_v56, %v3351_v48  ;;  %v339_v39 = vsel %vm338_vm3, %v336_v4, %v3311_v38 }
  0xa6   : > { %v440_v44 = vsel %vm329_vm0, %v2828_v27, %v3366_v30  ;;  %v4491_v45 = vpop.permute.xlu1 %3379  ;;  %v3698_v30 = vpack.i.bf16 %v3015_v16, %v3014_v11  ;;  %v342_v52 = vsel %vm341_vm4, %v339_v39, %v3316_v46  ;;  %v3026_v11 = vld [vmem:[%s4122_s18 + $0x391] sm:$0xff] }
  0xa7   : > { %v4496_v50 = vpop.permute.xlu0 %3374  ;;  %v3381_v60 = vunpack.i.l.bf16 %v4491_v45  ;;  %v442_v61 = vsel %vm332_vm1, %v440_v44, %v3371_v40  ;;  %v359_v44 = vsel %vm341_vm4, %v357_v31, %v3352_v23 }
  0xa8   : > { %v3376_v55 = vunpack.i.l.bf16 %v4496_v50  ;;  %3669 = vrot.lane.b32.xlu1 %v3668_v13, %s4085_s22  ;;  %v3317_v13 = vunpack.i.h.bf16 %v4376_v25  ;;  %v3016_v25 = vld [vmem:[%s4122_s18 + $0x370] sm:$0xff]  ;;  %v3377_v46 = vunpack.i.h.bf16 %v4496_v50 }
  0xa9   : > { %3664 = vrot.lane.b32.xlu0 %v3663_v20, %s4085_s22  ;;  %v360_v20 = vsel %vm344_vm5, %v358_v12, %v3356_v41  ;;  %v3708_v54 = vpack.i.bf16 %v3017_v17, %v3016_v25  ;;  %v3326_v41 = vunpack.i.l.bf16 %v4386_v33  ;;  %v3042_v12 = vld [vmem:[%s4122_s18 + $0x3d1] sm:$0xff]  ;;  %v3030_v17 = vld [vmem:[%s4122_s18 + $0x3a1] sm:$0xff] }
  0xaa   : > { %v444_v1 = vsel %vm335_vm2, %v442_v61, %v3376_v55  ;;  %v4514_v2 = vpop.permute.xlu1 %3389  ;;  %v4545_v37 = vsel %vm347_vm6, %v360_v20, %v3361_v5  ;;  %v3713_v31 = vpack.i.bf16 %v3042_v12, %v3026_v11 }
  0xab   : > { %v4519_v10 = vpop.permute.xlu0 %3384  ;;  %v3391_v26 = vunpack.i.l.bf16 %v4514_v2  ;;  %v446_v27 = vsel %vm338_vm3, %v444_v1, %v3381_v60  ;;  %v2169_v8 = vrot.slane %v4545_v37, 6  ;;  %v2844_v60 = vld [vmem:[%s4122_s18 + $0xc0] sm:$0xff]  ;;  %v3367_v1 = vunpack.i.h.bf16 %v4470_v9 }
  0xac   : > { %v3386_v15 = vunpack.i.l.bf16 %v4519_v10  ;;  %3679 = vrot.lane.b32.xlu1 %v3678_v21, %s4082_s19  ;;  %v3357_v21 = vunpack.i.h.bf16 %v4430_v63  ;;  %v343_v63 = vsel %vm341_vm4, %v340_v49, %v3317_v13  ;;  %v2829_v13 = vld [vmem:[%s4122_s18 + $0x88] sm:$0x3]  ;;  %v345_v9 = vsel %vm344_vm5, %v342_v52, %v3321_v51 }
  0xad   : > { %3674 = vrot.lane.b32.xlu0 %v3673_v28, %s4082_s19  ;;  %v3322_v28 = vunpack.i.h.bf16 %v4372_v22  ;;  %v3000_v22 = vld [vmem:[%s4122_s18 + $0x330] sm:$0xff]  ;;  %v348_v23 = vsel %vm347_vm6, %v345_v9, %v3326_v41  ;;  %v3003_v41 = vld [vmem:[%s4122_s18 + $0x339] sm:$0x3] }
  0xae   : > { %v448_v32 = vsel %vm341_vm4, %v446_v27, %v3386_v15  ;;  %v4539_v34 = vpop.permute.xlu1 %3399  ;;  %v361_v48 = vsel %vm344_vm5, %v359_v44, %v3357_v21  ;;  %v3718_v16 = vpack.i.bf16 %v3001_v58, %v3000_v22  ;;  %v3028_v21 = vld [vmem:[%s4122_s18 + $0x3a0] sm:$0xff] }
  0xaf   : > { %v4542_v35 = vpop.permute.xlu0 %3394  ;;  %v450_v47 = vsel %vm344_vm5, %v448_v32, %v3391_v26  ;;  %v3401_v55 = vunpack.i.l.bf16 %v4539_v34  ;;  %v346_v57 = vsel %vm344_vm5, %v343_v63, %v3322_v28  ;;  %v3402_v61 = vunpack.i.h.bf16 %v4539_v34  ;;  %v3044_v32 = vld [vmem:[%s4122_s18 + $0x3e0] sm:$0xff]  ;;  %v3019_v28 = vld [vmem:[%s4122_s18 + $0x379] sm:$0x3] }
  0xb0   : > { %v3396_v40 = vunpack.i.l.bf16 %v4542_v35  ;;  %3689 = vrot.lane.b32.xlu1 %v3688_v29, %s4083_s20  ;;  %v2998_v29 = vld [vmem:[%s4122_s18 + $0x321] sm:$0xff]  ;;  %v4584_v33 = vsel %vm347_vm6, %v361_v48, %v3362_v43  ;;  %v349_v0 = vsel %vm347_vm6, %v346_v57, %v3327_v42  ;;  %v441_v34 = vsel %vm329_vm0, %v2829_v13, %v3367_v1 }
  0xb1   : > { %3684 = vrot.lane.b32.xlu0 %v3683_v3, %s4084_s21  ;;  %v3703_v62 = vpack.i.bf16 %v2999_v59, %v2998_v29  ;;  %v2845_v3 = vld [vmem:[%s4122_s18 + $0xc8] sm:$0x3]  ;;  %v2321_v5 = vsel %vm2168_vm7, %v349_v0, %v2169_v8  ;;  %v530_v18 = vsel %vm329_vm0, %v2844_v60, %v3401_v55  ;;  %v3728_v44 = vpack.i.bf16 %v3044_v32, %v3028_v21  ;;  %v2860_v58 = vld [vmem:[%s4122_s18 + $0x100] sm:$0xff] }
  0xb2   : > { %v4562_v6 = vpop.permute.xlu1 %3409  ;;  %v4566_v7 = vsel %vm347_vm6, %v450_v47, %v3396_v40  ;;  %v531_v26 = vsel %vm329_vm0, %v2845_v3, %v3402_v61  ;;  %v2389_v27 = vpack.c.bf16 %v2321_v5, %v348_v23  ;;  %v3046_v42 = vld [vmem:[%s4122_s18 + $0x3e1] sm:$0xff]  ;;  %v3382_v47 = vunpack.i.h.bf16 %v4491_v45  ;;  %v3032_v61 = vld [vmem:[%s4122_s18 + $0x3b0] sm:$0xff] }
  0xb3   : > { %v3405_v53 = vpop.permute.xlu0 %3404  ;;  %v2170_v56 = vrot.slane %v4566_v7, 6  ;;  %v3412_v39 = vunpack.i.h.bf16 %v4562_v6  ;;  %v3723_v48 = vpack.i.bf16 %v3019_v28, %v3018_v19  ;;  %v3387_v59 = vunpack.i.h.bf16 %v4519_v10 }
  0xb4   : > { %3699 = vrot.lane.b32.xlu1 %v3698_v30, %s4087_s24  ;;  %v3406_v49 = vunpack.i.l.bf16 %v3405_v53  ;;  %v3407_v14 = vunpack.i.h.bf16 %v3405_v53  ;;  %v3411_v30 = vunpack.i.l.bf16 %v4562_v6  ;;  %v443_v6 = vsel %vm332_vm1, %v441_v34, %v3372_v24  ;;  %v3040_v34 = vld [vmem:[%s4122_s18 + $0x3d0] sm:$0xff] }
  0xb5   : > { %3694 = vrot.lane.b32.xlu0 %v3693_v36, %s4084_s21  ;;  %v2322_v4 = vsel %vm2168_vm7, %v4584_v33, %v2170_v56  ;;  %v445_v29 = vsel %vm335_vm2, %v443_v6, %v3377_v46  ;;  %v3738_v53 = vpack.i.bf16 %v3046_v42, %v3030_v17  ;;  %v3397_v13 = vunpack.i.h.bf16 %v4542_v35  ;;  %v3054_v35 = vld [vmem:[%s4122_s18 + $0x401] sm:$0xff]  ;;  %v3041_v46 = vld [vmem:[%s4122_s18 + $0x3d8] sm:$0x3] }
  0xb6   : > { %v4589_v38 = vpop.permute.xlu1 %3419  ;;  %v2390_v20 = vpack.c.bf16 %v2322_v4, %v4545_v37  ;;  %v532_v63 = vsel %vm332_vm1, %v530_v18, %v3406_v49  ;;  %v533_v50 = vsel %vm332_vm1, %v531_v26, %v3407_v14  ;;  %v3392_v4 = vunpack.i.h.bf16 %v4514_v2  ;;  %v3023_v2 = vld [vmem:[%s4122_s18 + $0x389] sm:$0x3]  ;;  %v3058_v37 = vld [vmem:[%s4122_s18 + $0x411] sm:$0xff] }
  0xb7   : > { %v3415_v15 = vpop.permute.xlu0 %3414  ;;  %v534_v51 = vsel %vm335_vm2, %v532_v63, %v3411_v30  ;;  %v3422_v45 = vunpack.i.h.bf16 %v4589_v38  ;;  %v3421_v55 = vunpack.i.l.bf16 %v4589_v38  ;;  %v535_v57 = vsel %vm335_vm2, %v533_v50, %v3412_v39  ;;  %v3055_v26 = vld [vmem:[%s4122_s18 + $0x409] sm:$0x3]  ;;  %v3034_v63 = vld [vmem:[%s4122_s18 + $0x3b1] sm:$0xff] }
  0xb8   : > { %3709 = vrot.lane.b32.xlu1 %v3708_v54, %s4086_s23  ;;  %2582 = vmatprep.mubr.bf16.mxu0 %v2390_v20  ;;  %v3416_v40 = vunpack.i.l.bf16 %v3415_v15  ;;  %v3417_v43 = vunpack.i.h.bf16 %v3415_v15  ;;  %v3002_v54 = vld [vmem:[%s4122_s18 + $0x331] sm:$0xff]  ;;  %v447_v38 = vsel %vm338_vm3, %v445_v29, %v3382_v47  ;;  %v3758_v50 = vpack.i.bf16 %v3055_v26, %v3054_v35 }
  0xb9   : > { %3704 = vrot.lane.b32.xlu0 %v3703_v62, %s4087_s24  ;;  %2583 = vmatmul.mubr.bf16.vlgmr.msra.gmra.mrb[0].mxu0 %v2389_v27  ;;  %v3048_v62 = vld [vmem:[%s4122_s18 + $0x3f0] sm:$0xff]  ;;  %v3733_v11 = vpack.i.bf16 %v3003_v41, %v3002_v54  ;;  %v449_v12 = vsel %vm341_vm4, %v447_v38, %v3387_v59  ;;  %v3025_v54 = vld [vmem:[%s4122_s18 + $0x398] sm:$0x3] }
  0xba   : > { %v4614_v36 = vpop.permute.xlu1 %3429  ;;  %v536_v22 = vsel %vm338_vm3, %v534_v51, %v3416_v40  ;;  %v537_v10 = vsel %vm338_vm3, %v535_v57, %v3417_v43  ;;  %v3748_v9 = vpack.i.bf16 %v3048_v62, %v3032_v61  ;;  %v451_v30 = vsel %vm344_vm5, %v449_v12, %v3392_v4  ;;  %v3050_v40 = vld [vmem:[%s4122_s18 + $0x3f1] sm:$0xff] }
  0xbb   : > { %v3425_v25 = vpop.permute.xlu0 %3424  ;;  %v3432_v18 = vunpack.i.h.bf16 %v4614_v36  ;;  %v3431_v14 = vunpack.i.l.bf16 %v4614_v36  ;;  %v538_v20 = vsel %vm341_vm4, %v536_v22, %v3421_v55  ;;  %v539_v23 = vsel %vm341_vm4, %v537_v10, %v3422_v45  ;;  %v2861_v36 = vld [vmem:[%s4122_s18 + $0x108] sm:$0x3]  ;;  %v3056_v41 = vld [vmem:[%s4122_s18 + $0x410] sm:$0xff] }
  0xbc   : > { %3719 = vrot.lane.b32.xlu1 %v3718_v16, %s4086_s23  ;;  %v3427_v0 = vunpack.i.h.bf16 %v3425_v25  ;;  %v3426_v1 = vunpack.i.l.bf16 %v3425_v25  ;;  %v3039_v16 = vld [vmem:[%s4122_s18 + $0x3c9] sm:$0x3]  ;;  %v453_v25 = vsel %vm347_vm6, %v451_v30, %v3397_v13  ;;  %v2182_v61 = vrot.slane %v4566_v7, 4 }
  0xbd   : > { %3714 = vrot.lane.b32.xlu0 %v3713_v31, %s4082_s19  ;;  %v3743_v39 = vpack.i.bf16 %v3023_v2, %v3039_v16  ;;  %v4688_v45 = vld [vmem:[%s4122_s18 + $0x3a8] sm:$0x3]  ;;  %v2173_v55 = vrot.slane %v453_v25, 6  ;;  %v2184_v57 = vrot.slane %v453_v25, 4  ;;  %v3763_v12 = vpack.i.bf16 %v3056_v41, %v3025_v54 }
  0xbe   : > { %v4630_v52 = vpop.permute.xlu1 %3439  ;;  %v540_v27 = vsel %vm344_vm5, %v538_v20, %v3426_v1  ;;  %v541_v31 = vsel %vm344_vm5, %v539_v23, %v3427_v0 }
  0xbf   : > { %v3435_v60 = vpop.permute.xlu0 %3434  ;;  %v3441_v5 = vunpack.i.l.bf16 %v4630_v52  ;;  %v4677_v43 = vsel %vm347_vm6, %v540_v27, %v3431_v14  ;;  %v3442_v47 = vunpack.i.h.bf16 %v4630_v52  ;;  %v2174_v35 = vsel %vm2168_vm7, %v2170_v56, %v2173_v55  ;;  %v3049_v55 = vld [vmem:[%s4122_s18 + $0x3f8] sm:$0x3] }
  0xc0   : > { %v3436_v3 = vunpack.i.l.bf16 %v3435_v60  ;;  %3729 = vrot.lane.b32.xlu1 %v3728_v44, %s4084_s21  ;;  %v3437_v21 = vunpack.i.h.bf16 %v3435_v60  ;;  %v4680_v44 = vsel %vm347_vm6, %v541_v31, %v3432_v18  ;;  %v3027_v60 = vld [vmem:[%s4122_s18 + $0x399] sm:$0x3]  ;;  %v2183_v1 = vrot.slane %v4677_v43, 4 }
  0xc1   : > { %3724 = vrot.lane.b32.xlu0 %v3723_v48, %s4088_s25  ;;  %v3753_v48 = vpack.i.bf16 %v3041_v46, %v3040_v34  ;;  %v2186_v62 = vrot.slane %v4680_v44, 4  ;;  %v2195_v16 = vrot.slane %v4677_v43, 2  ;;  %v2171_v18 = vrot.slane %v4584_v33, 6  ;;  %v3064_v43 = vld [vmem:[%s4122_s18 + $0x430] sm:$0xff] }
  0xc2   : > { %v620_v49 = vsel %vm329_vm0, %v2860_v58, %v3436_v3  ;;  %v4650_v15 = vpop.permute.xlu1 %3449  ;;  %v621_v29 = vsel %vm329_vm0, %v2861_v36, %v3437_v21  ;;  %v3045_v58 = vld [vmem:[%s4122_s18 + $0x3e8] sm:$0x3]  ;;  %v3043_v3 = vld [vmem:[%s4122_s18 + $0x3d9] sm:$0x3]  ;;  %v2185_v33 = vsel %vm2181_vm8, %v2182_v61, %v2184_v57 }
  0xc3   : > { %v3445_v24 = vpop.permute.xlu0 %3444  ;;  %v3451_v19 = vunpack.i.l.bf16 %v4650_v15  ;;  %v622_v28 = vsel %vm332_vm1, %v620_v49, %v3441_v5  ;;  %v3452_v4 = vunpack.i.h.bf16 %v4650_v15  ;;  %v623_v38 = vsel %vm332_vm1, %v621_v29, %v3442_v47 }
  0xc4   : > { %v3446_v32 = vunpack.i.l.bf16 %v3445_v24  ;;  %3739 = vrot.lane.b32.xlu1 %v3738_v53, %s4087_s24  ;;  %v3447_v59 = vunpack.i.h.bf16 %v3445_v24  ;;  %v3768_v53 = vpack.i.bf16 %v3050_v40, %v3034_v63  ;;  %v3778_v15 = vpack.i.bf16 %v4688_v45, %v3045_v58  ;;  %v3031_v63 = vld [vmem:[%s4122_s18 + $0x3a9] sm:$0x3]  ;;  %v3033_v45 = vld [vmem:[%s4122_s18 + $0x3b8] sm:$0x3] }
  0xc5   : > { %3734 = vrot.lane.b32.xlu0 %v3733_v11, %s4088_s25  ;;  %v3773_v20 = vpack.i.bf16 %v3027_v60, %v3043_v3  ;;  %v2187_v26 = vsel %vm2181_vm8, %v2183_v1, %v2186_v62  ;;  %v2325_v30 = vsel %vm2194_vm9, %v2185_v33, %v2195_v16  ;;  %v2172_v36 = vsel %vm2168_vm7, %v2169_v8, %v2171_v18  ;;  %v3047_v40 = vld [vmem:[%s4122_s18 + $0x3e9] sm:$0x3]  ;;  %v3059_v8 = vld [vmem:[%s4122_s18 + $0x419] sm:$0x3] }
  0xc6   : > { %v624_v17 = vsel %vm335_vm2, %v622_v28, %v3446_v32  ;;  %v4674_v42 = vpop.permute.xlu1 %3459  ;;  %v625_v13 = vsel %vm335_vm2, %v623_v38, %v3447_v59  ;;  %v2324_v28 = vsel %vm2181_vm8, %v2174_v35, %v2183_v1  ;;  %v3783_v41 = vpack.i.bf16 %v3059_v8, %v3058_v37  ;;  %v3061_v58 = vld [vmem:[%s4122_s18 + $0x428] sm:$0x3] }
  0xc7   : > { %v3455_v6 = vpop.permute.xlu0 %3454  ;;  %v3461_v52 = vunpack.i.l.bf16 %v4674_v42  ;;  %v626_v22 = vsel %vm338_vm3, %v624_v17, %v3451_v19  ;;  %v3462_v27 = vunpack.i.h.bf16 %v4674_v42  ;;  %v627_v31 = vsel %vm338_vm3, %v625_v13, %v3452_v4 }
  0xc8   : > { %v3456_v51 = vunpack.i.l.bf16 %v3455_v6  ;;  %3749 = vrot.lane.b32.xlu1 %v3748_v9, %s4086_s23  ;;  %v3457_v49 = vunpack.i.h.bf16 %v3455_v6  ;;  %v2876_v9 = vld [vmem:[%s4122_s18 + $0x140] sm:$0xff]  ;;  %v3798_v1 = vpack.i.bf16 %v3033_v45, %v3049_v55  ;;  %v2197_v3 = vrot.slane %v4680_v44, 2 }
  0xc9   : > { %3744 = vrot.lane.b32.xlu0 %v3743_v39, %s4083_s20 }
  0xca   : > { %v628_v10 = vsel %vm341_vm4, %v626_v22, %v3456_v51  ;;  %v4698_v0 = vpop.permute.xlu1 %3469  ;;  %v629_v7 = vsel %vm341_vm4, %v627_v31, %v3457_v49  ;;  %v3788_v51 = vpack.i.bf16 %v3031_v63, %v3047_v40  ;;  %v3060_v22 = vld [vmem:[%s4122_s18 + $0x420] sm:$0xff]  ;;  %v2198_v35 = vsel %vm2194_vm9, %v2195_v16, %v2197_v3  ;;  %v3067_v31 = vld [vmem:[%s4122_s18 + $0x439] sm:$0x3]  ;;  %v3072_v40 = vld [vmem:[%s4122_s18 + $0x450] sm:$0xff] }
  0xcb   : > { %v3471_v5 = vunpack.i.l.bf16 %v4698_v0  ;;  %v3465_v11 = vpop.permute.xlu0 %3464  ;;  %v630_v14 = vsel %vm344_vm5, %v628_v10, %v3461_v52  ;;  %v631_v47 = vsel %vm344_vm5, %v629_v7, %v3462_v27  ;;  %v3793_v4 = vpack.i.bf16 %v3061_v58, %v3060_v22  ;;  %v3062_v49 = vld [vmem:[%s4122_s18 + $0x421] sm:$0xff]  ;;  %v3066_v27 = vld [vmem:[%s4122_s18 + $0x431] sm:$0xff] }
  0xcc   : > { %v3466_v2 = vunpack.i.l.bf16 %v3465_v11  ;;  %3759 = vrot.lane.b32.xlu1 %v3758_v50, %s4083_s20  ;;  %v3467_v56 = vunpack.i.h.bf16 %v3465_v11  ;;  %v2323_v50 = vsel %vm2181_vm8, %v2172_v36, %v2182_v61  ;;  %v3051_v11 = vld [vmem:[%s4122_s18 + $0x3f9] sm:$0x3]  ;;  %v3071_v36 = vld [vmem:[%s4122_s18 + $0x449] sm:$0x3] }
  0xcd   : > { %3754 = vrot.lane.b32.xlu0 %v3753_v48, %s4085_s22  ;;  %v710_v21 = vsel %vm329_vm0, %v2876_v9, %v3471_v5  ;;  %v2391_v48 = vpack.c.bf16 %v2325_v30, %v2323_v50  ;;  %v3035_v5 = vld [vmem:[%s4122_s18 + $0x3b9] sm:$0x3]  ;;  %v3063_v9 = vld [vmem:[%s4122_s18 + $0x429] sm:$0x3]  ;;  %v3070_v30 = vld [vmem:[%s4122_s18 + $0x441] sm:$0xff] }
  0xce   : > { %v4714_v23 = vsel %vm347_vm6, %v630_v14, %v3466_v2  ;;  %v4716_v24 = vpop.permute.xlu1 %3479  ;;  %v4754_v29 = vsel %vm347_vm6, %v631_v47, %v3467_v56  ;;  %v3472_v2 = vunpack.i.h.bf16 %v4698_v0  ;;  %v3803_v33 = vpack.i.bf16 %v3063_v9, %v3062_v49  ;;  %v3065_v16 = vld [vmem:[%s4122_s18 + $0x438] sm:$0x3]  ;;  %v2893_v50 = vld [vmem:[%s4122_s18 + $0x188] sm:$0x3]  ;;  %v2908_v9 = vld [vmem:[%s4122_s18 + $0x1c0] sm:$0xff] }
  0xcf   : > { %v2196_v32 = vrot.slane %v4714_v23, 2  ;;  %v4727_v34 = vpop.permute.xlu0 %3474  ;;  %v3481_v19 = vunpack.i.l.bf16 %v4716_v24  ;;  %v2199_v60 = vrot.slane %v4754_v29, 2  ;;  %v2393_v0 = vpack.c.bf16 %v4714_v23, %v2198_v35  ;;  %v3057_v63 = vld [vmem:[%s4122_s18 + $0x418] sm:$0x3] }
  0xd0   : > { %v3476_v46 = vunpack.i.l.bf16 %v4727_v34  ;;  %3769 = vrot.lane.b32.xlu1 %v3768_v53, %s4088_s25 }
  0xd1   : > { %3764 = vrot.lane.b32.xlu0 %v3763_v12, %s4085_s22  ;;  %v2326_v39 = vsel %vm2194_vm9, %v2187_v26, %v2196_v32  ;;  %v2200_v14 = vsel %vm2194_vm9, %v2196_v32, %v2199_v60  ;;  %v3808_v26 = vpack.i.bf16 %v3035_v5, %v3051_v11  ;;  %v3078_v5 = vld [vmem:[%s4122_s18 + $0x461] sm:$0xff]  ;;  %v3079_v11 = vld [vmem:[%s4122_s18 + $0x469] sm:$0x3] }
  0xd2   : > { %v712_v25 = vsel %vm332_vm1, %v710_v21, %v3476_v46  ;;  %v4745_v17 = vpop.permute.xlu1 %3489  ;;  %v2392_v42 = vpack.c.bf16 %v2326_v39, %v2324_v28  ;;  %v3477_v21 = vunpack.i.h.bf16 %v4727_v34  ;;  %v3818_v46 = vpack.i.bf16 %v3067_v31, %v3066_v27  ;;  %v3076_v27 = vld [vmem:[%s4122_s18 + $0x460] sm:$0xff]  ;;  %v3077_v31 = vld [vmem:[%s4122_s18 + $0x468] sm:$0x3] }
  0xd3   : > { %v4751_v6 = vpop.permute.xlu0 %3484  ;;  %v3491_v53 = vunpack.i.l.bf16 %v4745_v17  ;;  %v714_v54 = vsel %vm335_vm2, %v712_v25, %v3481_v19  ;;  %v3482_v34 = vunpack.i.h.bf16 %v4716_v24  ;;  %v2892_v19 = vld [vmem:[%s4122_s18 + $0x180] sm:$0xff]  ;;  %v3813_v39 = vpack.i.bf16 %v3065_v16, %v3064_v43  ;;  %v2909_v16 = vld [vmem:[%s4122_s18 + $0x1c8] sm:$0x3] }
  0xd4   : > { %v3486_v59 = vunpack.i.l.bf16 %v4751_v6  ;;  %2590 = vmatprep.mubr.bf16.mxu0 %v2392_v42  ;;  %3779 = vrot.lane.b32.xlu1 %v3778_v15, %s4084_s21  ;;  %v2877_v15 = vld [vmem:[%s4122_s18 + $0x148] sm:$0x3]  ;;  %v3487_v42 = vunpack.i.h.bf16 %v4751_v6  ;;  %v3828_v24 = vpack.i.bf16 %v3071_v36, %v3070_v30  ;;  %v3492_v6 = vunpack.i.h.bf16 %v4745_v17 }
  0xd5   : > { %3774 = vrot.lane.b32.xlu0 %v3773_v20, %s4082_s19  ;;  %2591 = vmatmul.mubr.bf16.gmra.mrb[4].mxu0 %v2391_v48  ;;  %v711_v7 = vsel %vm329_vm0, %v2877_v15, %v3472_v2 }
  0xd6   : > { %v716_v57 = vsel %vm338_vm3, %v714_v54, %v3486_v59  ;;  %v4764_v52 = vpop.permute.xlu1 %3499  ;;  %v713_v25 = vsel %vm332_vm1, %v711_v7, %v3477_v21  ;;  %v3074_v54 = vld [vmem:[%s4122_s18 + $0x451] sm:$0xff] }
  0xd7   : > { %v3501_v61 = vunpack.i.l.bf16 %v4764_v52  ;;  %v4770_v62 = vpop.permute.xlu0 %3494  ;;  %v718_v38 = vsel %vm341_vm4, %v716_v57, %v3491_v53  ;;  %v3823_v53 = vpack.i.bf16 %v3072_v40, %v3057_v63  ;;  %v715_v45 = vsel %vm335_vm2, %v713_v25, %v3482_v34  ;;  %v3083_v34 = vld [vmem:[%s4122_s18 + $0x479] sm:$0x3] }
  0xd8   : > { %v3496_v10 = vunpack.i.l.bf16 %v4770_v62  ;;  %3789 = vrot.lane.b32.xlu1 %v3788_v51, %s4087_s24  ;;  %v717_v22 = vsel %vm338_vm3, %v715_v45, %v3487_v42  ;;  %v3497_v58 = vunpack.i.h.bf16 %v4770_v62  ;;  %v3843_v25 = vpack.i.bf16 %v3077_v31, %v3076_v27 }
  0xd9   : > { %3784 = vrot.lane.b32.xlu0 %v3783_v41, %s4082_s19  ;;  %v3075_v41 = vld [vmem:[%s4122_s18 + $0x459] sm:$0x3]  ;;  %v719_v2 = vsel %vm341_vm4, %v717_v22, %v3492_v6  ;;  %v3102_v22 = vld [vmem:[%s4122_s18 + $0x4c1] sm:$0xff] }
  0xda   : > { %v4779_v12 = vpop.permute.xlu1 %3509  ;;  %v720_v13 = vsel %vm344_vm5, %v718_v38, %v3496_v10  ;;  %v3104_v10 = vld [vmem:[%s4122_s18 + $0x4d0] sm:$0xff]  ;;  %v3838_v38 = vpack.i.bf16 %v3075_v41, %v3074_v54  ;;  %v721_v35 = vsel %vm344_vm5, %v719_v2, %v3497_v58 }
  0xdb   : > { %v3505_v18 = vpop.permute.xlu0 %3504  ;;  %v4786_v44 = vsel %vm347_vm6, %v720_v13, %v3501_v61  ;;  %v3511_v8 = vunpack.i.l.bf16 %v4779_v12  ;;  %v3512_v48 = vunpack.i.h.bf16 %v4779_v12  ;;  %v3073_v61 = vld [vmem:[%s4122_s18 + $0x458] sm:$0x3] }
  0xdc   : > { %3799 = vrot.lane.b32.xlu1 %v3798_v1, %s4086_s23  ;;  %v2394_v20 = vpack.c.bf16 %v4786_v44, %v2200_v14  ;;  %v3506_v23 = vunpack.i.l.bf16 %v3505_v18  ;;  %v3507_v28 = vunpack.i.h.bf16 %v3505_v18  ;;  %v3833_v15 = vpack.i.bf16 %v3104_v10, %v3073_v61 }
  0xdd   : > { %3794 = vrot.lane.b32.xlu0 %v3793_v4, %s4084_s21 }
  0xde   : > { %2598 = vmatprep.mubr.bf16.mxu0 %v2394_v20  ;;  %v4800_v32 = vpop.permute.xlu1 %3519  ;;  %v800_v59 = vsel %vm329_vm0, %v2892_v19, %v3506_v23  ;;  %v801_v55 = vsel %vm329_vm0, %v2893_v50, %v3507_v28  ;;  %v3502_v20 = vunpack.i.h.bf16 %v4764_v52  ;;  %v3080_v19 = vld [vmem:[%s4122_s18 + $0x470] sm:$0xff]  ;;  %v3081_v28 = vld [vmem:[%s4122_s18 + $0x478] sm:$0x3] }
  0xdf   : > { %v3515_v56 = vpop.permute.xlu0 %3514  ;;  %2599 = vmatmul.mubr.bf16.gmra.mrb[8].mxu0 %v2393_v0  ;;  %v3521_v1 = vunpack.i.l.bf16 %v4800_v32  ;;  %v802_v17 = vsel %vm332_vm1, %v800_v59, %v3511_v8  ;;  %v3522_v12 = vunpack.i.h.bf16 %v4800_v32  ;;  %v803_v13 = vsel %vm332_vm1, %v801_v55, %v3512_v48  ;;  %v3103_v55 = vld [vmem:[%s4122_s18 + $0x4c9] sm:$0x3] }
  0xe0   : > { %3809 = vrot.lane.b32.xlu1 %v3808_v26, %s4088_s25  ;;  %v3516_v51 = vunpack.i.l.bf16 %v3515_v56  ;;  %v3517_v57 = vunpack.i.h.bf16 %v3515_v56  ;;  %v3082_v56 = vld [vmem:[%s4122_s18 + $0x471] sm:$0xff]  ;;  %v3853_v59 = vpack.i.bf16 %v3081_v28, %v3080_v19 }
  0xe1   : > { %3804 = vrot.lane.b32.xlu0 %v3803_v33, %s4087_s24  ;;  %v3848_v33 = vpack.i.bf16 %v3079_v11, %v3078_v5  ;;  %v3858_v48 = vpack.i.bf16 %v3083_v34, %v3082_v56 }
  0xe2   : > { %v4816_v37 = vpop.permute.xlu1 %3529  ;;  %v804_v62 = vsel %vm335_vm2, %v802_v17, %v3516_v51  ;;  %v805_v18 = vsel %vm335_vm2, %v803_v13, %v3517_v57  ;;  %v3087_v51 = vld [vmem:[%s4122_s18 + $0x489] sm:$0x3]  ;;  %v3086_v57 = vld [vmem:[%s4122_s18 + $0x481] sm:$0xff] }
  0xe3   : > { %v3525_v47 = vpop.permute.xlu0 %3524  ;;  %v3532_v21 = vunpack.i.h.bf16 %v4816_v37  ;;  %v3531_v32 = vunpack.i.l.bf16 %v4816_v37  ;;  %v806_v43 = vsel %vm338_vm3, %v804_v62, %v3521_v1  ;;  %v807_v23 = vsel %vm338_vm3, %v805_v18, %v3522_v12 }
  0xe4   : > { %3819 = vrot.lane.b32.xlu1 %v3818_v46, %s4088_s25  ;;  %v3526_v49 = vunpack.i.l.bf16 %v3525_v47  ;;  %v3527_v14 = vunpack.i.h.bf16 %v3525_v47  ;;  %v2209_v1 = vrot.slane %v4786_v44, 6  ;;  %v3868_v13 = vpack.i.bf16 %v3103_v55, %v3087_v51 }
  0xe5   : > { %3814 = vrot.lane.b32.xlu0 %v3813_v39, %s4086_s23  ;;  %v3863_v62 = vpack.i.bf16 %v3086_v57, %v3102_v22  ;;  %v2964_v57 = vld [vmem:[%s4122_s18 + $0x2a0] sm:$0xff] }
  0xe6   : > { %v3540_v60 = vpop.permute.xlu1 %3539  ;;  %v808_v46 = vsel %vm341_vm4, %v806_v43, %v3526_v49  ;;  %v809_v39 = vsel %vm341_vm4, %v807_v23, %v3527_v14  ;;  %v3090_v49 = vld [vmem:[%s4122_s18 + $0x491] sm:$0xff] }
  0xe7   : > { %v3541_v3 = vunpack.i.l.bf16 %v3540_v60  ;;  %v4834_v4 = vpop.permute.xlu0 %3534  ;;  %v3542_v26 = vunpack.i.h.bf16 %v3540_v60  ;;  %v810_v47 = vsel %vm344_vm5, %v808_v46, %v3531_v32  ;;  %v811_v54 = vsel %vm344_vm5, %v809_v39, %v3532_v21  ;;  %v3091_v39 = vld [vmem:[%s4122_s18 + $0x499] sm:$0x3] }
  0xe8   : > { %3829 = vrot.lane.b32.xlu1 %v3828_v24, %s4083_s20  ;;  %v3536_v30 = vunpack.i.l.bf16 %v4834_v4  ;;  %v3537_v50 = vunpack.i.h.bf16 %v4834_v4 }
  0xe9   : > { %3824 = vrot.lane.b32.xlu0 %v3823_v53, %s4085_s22  ;;  %v890_v52 = vsel %vm329_vm0, %v2908_v9, %v3541_v3  ;;  %v891_v42 = vsel %vm329_vm0, %v2909_v16, %v3542_v26  ;;  %v4874_v53 = vsel %vm347_vm6, %v721_v35, %v3502_v20  ;;  %v3106_v9 = vld [vmem:[%s4122_s18 + $0x4d1] sm:$0xff] }
  0xea   : > { %v4848_v0 = vpop.permute.xlu1 %3549  ;;  %v4878_v41 = vsel %vm347_vm6, %v810_v47, %v3536_v30  ;;  %v4890_v17 = vsel %vm347_vm6, %v811_v54, %v3537_v50  ;;  %v3089_v20 = vld [vmem:[%s4122_s18 + $0x498] sm:$0x3]  ;;  %v3878_v21 = vpack.i.bf16 %v3090_v49, %v3106_v9 }
  0xeb   : > { %v3545_v7 = vpop.permute.xlu0 %3544  ;;  %v3551_v63 = vunpack.i.l.bf16 %v4848_v0  ;;  %v3552_v6 = vunpack.i.h.bf16 %v4848_v0  ;;  %v2221_v5 = vrot.slane %v4878_v41, 4  ;;  %v2210_v44 = vrot.slane %v4878_v41, 6  ;;  %v2962_v30 = vld [vmem:[%s4122_s18 + $0x291] sm:$0xff] }
  0xec   : > { %v3546_v36 = vunpack.i.l.bf16 %v3545_v7  ;;  %3839 = vrot.lane.b32.xlu1 %v3838_v38, %s4082_s19  ;;  %v3547_v40 = vunpack.i.h.bf16 %v3545_v7  ;;  %v2211_v38 = vrot.slane %v4874_v53, 6  ;;  %v2213_v35 = vrot.slane %v4890_v17, 6  ;;  %v2925_v7 = vld [vmem:[%s4122_s18 + $0x208] sm:$0x3] }
  0xed   : > { %3834 = vrot.lane.b32.xlu0 %v3833_v15, %s4085_s22  ;;  %v3088_v15 = vld [vmem:[%s4122_s18 + $0x490] sm:$0xff]  ;;  %v2328_v54 = vsel %vm2168_vm7, %v4874_v53, %v2210_v44 }
  0xee   : > { %v892_v37 = vsel %vm332_vm1, %v890_v52, %v3546_v36  ;;  %v3560_v8 = vpop.permute.xlu1 %3559  ;;  %v893_v58 = vsel %vm332_vm1, %v891_v42, %v3547_v40  ;;  %v2212_v32 = vsel %vm2168_vm7, %v2209_v1, %v2211_v38  ;;  %v2924_v52 = vld [vmem:[%s4122_s18 + $0x200] sm:$0xff]  ;;  %v3873_v23 = vpack.i.bf16 %v3089_v20, %v3088_v15  ;;  %v3095_v15 = vld [vmem:[%s4122_s18 + $0x4a9] sm:$0x3]  ;;  %v3096_v20 = vld [vmem:[%s4122_s18 + $0x4b0] sm:$0xff] }
  0xef   : > { %v3555_v24 = vpop.permute.xlu0 %3554  ;;  %v3561_v60 = vunpack.i.l.bf16 %v3560_v8  ;;  %v894_v10 = vsel %vm335_vm2, %v892_v37, %v3551_v63  ;;  %v3562_v2 = vunpack.i.h.bf16 %v3560_v8  ;;  %v895_v18 = vsel %vm335_vm2, %v893_v58, %v3552_v6  ;;  %v3092_v63 = vld [vmem:[%s4122_s18 + $0x4a0] sm:$0xff] }
  0xf0   : > { %v3556_v45 = vunpack.i.l.bf16 %v3555_v24  ;;  %3849 = vrot.lane.b32.xlu1 %v3848_v33, %s4087_s24  ;;  %v3557_v61 = vunpack.i.h.bf16 %v3555_v24  ;;  %v2329_v46 = vsel %vm2181_vm8, %v2212_v32, %v2221_v5  ;;  %v3108_v40 = vld [vmem:[%s4122_s18 + $0x4e0] sm:$0xff]  ;;  %v2214_v37 = vsel %vm2168_vm7, %v2210_v44, %v2213_v35  ;;  %v3112_v35 = vld [vmem:[%s4122_s18 + $0x4f0] sm:$0xff] }
  0xf1   : > { %3844 = vrot.lane.b32.xlu0 %v3843_v25, %s4084_s21  ;;  %v3883_v55 = vpack.i.bf16 %v3092_v63, %v3108_v40 }
  0xf2   : > { %v896_v3 = vsel %vm338_vm3, %v894_v10, %v3556_v45  ;;  %v3570_v4 = vpop.permute.xlu1 %3569  ;;  %v897_v26 = vsel %vm338_vm3, %v895_v18, %v3557_v61  ;;  %v3888_v45 = vpack.i.bf16 %v2962_v30, %v3091_v39  ;;  %v3093_v10 = vld [vmem:[%s4122_s18 + $0x4a8] sm:$0x3] }
  0xf3   : > { %v3571_v11 = vunpack.i.l.bf16 %v3570_v4  ;;  %v3565_v12 = vpop.permute.xlu0 %3564  ;;  %v898_v33 = vsel %vm341_vm4, %v896_v3, %v3561_v60  ;;  %v3572_v43 = vunpack.i.h.bf16 %v3570_v4  ;;  %v899_v36 = vsel %vm341_vm4, %v897_v26, %v3562_v2  ;;  %v3094_v3 = vld [vmem:[%s4122_s18 + $0x4a1] sm:$0xff] }
  0xf4   : > { %v3566_v14 = vunpack.i.l.bf16 %v3565_v12  ;;  %3859 = vrot.lane.b32.xlu1 %v3858_v48, %s4088_s25  ;;  %v3567_v0 = vunpack.i.h.bf16 %v3565_v12  ;;  %v3898_v9 = vpack.i.bf16 %v2964_v57, %v3093_v10  ;;  %v2966_v2 = vld [vmem:[%s4122_s18 + $0x2a1] sm:$0xff] }
  0xf5   : > { %3854 = vrot.lane.b32.xlu0 %v3853_v59, %s4086_s23  ;;  %v2327_v59 = vsel %vm2168_vm7, %v4754_v29, %v2209_v1  ;;  %v3110_v29 = vld [vmem:[%s4122_s18 + $0x4e1] sm:$0xff]  ;;  %v3908_v30 = vpack.i.bf16 %v2966_v2, %v3095_v15 }
  0xf6   : > { %v900_v27 = vsel %vm344_vm5, %v898_v33, %v3566_v14  ;;  %v3580_v31 = vpop.permute.xlu1 %3579  ;;  %v901_v25 = vsel %vm344_vm5, %v899_v36, %v3567_v0  ;;  %v2395_v6 = vpack.c.bf16 %v2329_v46, %v2327_v59  ;;  %v3893_v44 = vpack.i.bf16 %v3094_v3, %v3110_v29  ;;  %v3098_v59 = vld [vmem:[%s4122_s18 + $0x4b1] sm:$0xff] }
  0xf7   : > { %v4909_v16 = vsel %vm347_vm6, %v900_v27, %v3571_v11  ;;  %v3575_v56 = vpop.permute.xlu0 %3574  ;;  %v3582_v42 = vunpack.i.h.bf16 %v3580_v31  ;;  %v3581_v50 = vunpack.i.l.bf16 %v3580_v31  ;;  %v4937_v22 = vsel %vm347_vm6, %v901_v25, %v3572_v43 }
  0xf8   : > { %v3577_v34 = vunpack.i.h.bf16 %v3575_v56  ;;  %v3576_v19 = vunpack.i.l.bf16 %v3575_v56  ;;  %3869 = vrot.lane.b32.xlu1 %v3868_v13, %s4083_s20  ;;  %v2222_v28 = vrot.slane %v4909_v16, 4  ;;  %v2233_v26 = vrot.slane %v4909_v16, 2  ;;  %v3118_v16 = vld [vmem:[%s4122_s18 + $0x501] sm:$0xff] }
  0xf9   : > { %3864 = vrot.lane.b32.xlu0 %v3863_v62, %s4083_s20  ;;  %v2223_v62 = vrot.slane %v4890_v17, 4  ;;  %v2235_v0 = vrot.slane %v4937_v22, 2  ;;  %v3903_v36 = vpack.i.bf16 %v3096_v20, %v3112_v35  ;;  %v3121_v35 = vld [vmem:[%s4122_s18 + $0x518] sm:$0x3] }
  0xfa   : > { %v981_v8 = vsel %vm329_vm0, %v2925_v7, %v3577_v34  ;;  %v980_v47 = vsel %vm329_vm0, %v2924_v52, %v3576_v19  ;;  %v3590_v24 = vpop.permute.xlu1 %3589  ;;  %v2330_v48 = vsel %vm2181_vm8, %v2214_v37, %v2222_v28  ;;  %v2940_v52 = vld [vmem:[%s4122_s18 + $0x240] sm:$0xff]  ;;  %v2941_v7 = vld [vmem:[%s4122_s18 + $0x248] sm:$0x3]  ;;  %v2225_v34 = vrot.slane %v4937_v22, 4 }
  0xfb   : > { %v3585_v51 = vpop.permute.xlu0 %3584  ;;  %v2396_v61 = vpack.c.bf16 %v2330_v48, %v2328_v54  ;;  %v3592_v1 = vunpack.i.h.bf16 %v3590_v24  ;;  %v3591_v4 = vunpack.i.l.bf16 %v3590_v24  ;;  %v982_v53 = vsel %vm332_vm1, %v980_v47, %v3581_v50  ;;  %v3097_v50 = vld [vmem:[%s4122_s18 + $0x4b8] sm:$0x3] }
  0xfc   : > { %v3587_v58 = vunpack.i.h.bf16 %v3585_v51  ;;  %v3586_v60 = vunpack.i.l.bf16 %v3585_v51  ;;  %3879 = vrot.lane.b32.xlu1 %v3878_v21, %s4082_s19  ;;  %v983_v38 = vsel %vm332_vm1, %v981_v8, %v3582_v42  ;;  %v2224_v63 = vsel %vm2181_vm8, %v2221_v5, %v2223_v62  ;;  %v2968_v42 = vld [vmem:[%s4122_s18 + $0x2b0] sm:$0xff] }
  0xfd   : > { %3874 = vrot.lane.b32.xlu0 %v3873_v23, %s4085_s22  ;;  %2606 = vmatprep.mubr.bf16.mxu0 %v2396_v61  ;;  %v2236_v37 = vsel %vm2194_vm9, %v2233_v26, %v2235_v0  ;;  %v2331_v8 = vsel %vm2194_vm9, %v2224_v63, %v2233_v26  ;;  %v3114_v51 = vld [vmem:[%s4122_s18 + $0x4f1] sm:$0xff]  ;;  %v3918_v61 = vpack.i.bf16 %v2968_v42, %v3097_v50  ;;  %v2956_v50 = vld [vmem:[%s4122_s18 + $0x280] sm:$0xff] }
  0xfe   : > { %v984_v11 = vsel %vm335_vm2, %v982_v53, %v3586_v60  ;;  %v985_v12 = vsel %vm335_vm2, %v983_v38, %v3587_v58  ;;  %v3600_v13 = vpop.permute.xlu1 %3599  ;;  %2607 = vmatmul.mubr.bf16.gmra.mrb[12].mxu0 %v2395_v6  ;;  %v2226_v60 = vsel %vm2181_vm8, %v2222_v28, %v2225_v34  ;;  %v3913_v29 = vpack.i.bf16 %v3098_v59, %v3114_v51  ;;  %v3119_v28 = vld [vmem:[%s4122_s18 + $0x509] sm:$0x3]  ;;  %v3136_v26 = vld [vmem:[%s4122_s18 + $0x550] sm:$0xff] }
  0xff   : > { %v3595_v49 = vpop.permute.xlu0 %3594  ;;  %v3602_v33 = vunpack.i.h.bf16 %v3600_v13  ;;  %v3601_v17 = vunpack.i.l.bf16 %v3600_v13  ;;  %v986_v27 = vsel %vm338_vm3, %v984_v11, %v3591_v4  ;;  %v987_v31 = vsel %vm338_vm3, %v985_v12, %v3592_v1  ;;  %v2970_v1 = vld [vmem:[%s4122_s18 + $0x2b1] sm:$0xff]  ;;  %v3099_v4 = vld [vmem:[%s4122_s18 + $0x4b9] sm:$0x3] }
 0x100   : > { %v3597_v18 = vunpack.i.h.bf16 %v3595_v49  ;;  %v3596_v14 = vunpack.i.l.bf16 %v3595_v49  ;;  %3889 = vrot.lane.b32.xlu1 %v3888_v45, %s4082_s19  ;;  %v2397_v13 = vpack.c.bf16 %v2236_v37, %v2331_v8  ;;  %v3928_v15 = vpack.i.bf16 %v2970_v1, %v3099_v4  ;;  %v3122_v34 = vld [vmem:[%s4122_s18 + $0x511] sm:$0xff]  ;;  %v3111_v4 = vld [vmem:[%s4122_s18 + $0x4e9] sm:$0x3] }
 0x101   : > { %3884 = vrot.lane.b32.xlu0 %v3883_v55, %s4084_s21  ;;  %v3923_v20 = vpack.i.bf16 %v3119_v28, %v3118_v16 }
 0x102   : > { %v988_v21 = vsel %vm341_vm4, %v986_v27, %v3596_v14  ;;  %v989_v32 = vsel %vm341_vm4, %v987_v31, %v3597_v18  ;;  %v3610_v43 = vpop.permute.xlu1 %3609  ;;  %v3105_v27 = vld [vmem:[%s4122_s18 + $0x4d8] sm:$0x3]  ;;  %v3120_v31 = vld [vmem:[%s4122_s18 + $0x510] sm:$0xff] }
 0x103   : > { %v3612_v56 = vunpack.i.h.bf16 %v3610_v43  ;;  %v3611_v23 = vunpack.i.l.bf16 %v3610_v43  ;;  %v3605_v46 = vpop.permute.xlu0 %3604  ;;  %v990_v40 = vsel %vm344_vm5, %v988_v21, %v3601_v17  ;;  %v991_v25 = vsel %vm344_vm5, %v989_v32, %v3602_v33 }
 0x104   : > { %v3607_v19 = vunpack.i.h.bf16 %v3605_v46  ;;  %v3606_v39 = vunpack.i.l.bf16 %v3605_v46  ;;  %3899 = vrot.lane.b32.xlu1 %v3898_v9, %s4084_s21  ;;  %v3938_v46 = vpack.i.bf16 %v3136_v26, %v3121_v35  ;;  %v3130_v35 = vld [vmem:[%s4122_s18 + $0x531] sm:$0xff] }
 0x105   : > { %3894 = vrot.lane.b32.xlu0 %v3893_v44, %s4087_s24  ;;  %v1071_v47 = vsel %vm329_vm0, %v2941_v7, %v3612_v56  ;;  %v1070_v24 = vsel %vm329_vm0, %v2940_v52, %v3611_v23 }
 0x106   : > { %v4978_v41 = vsel %vm347_vm6, %v990_v40, %v3606_v39  ;;  %v4981_v5 = vsel %vm347_vm6, %v991_v25, %v3607_v19  ;;  %v3620_v48 = vpop.permute.xlu1 %3619  ;;  %v2974_v40 = vld [vmem:[%s4122_s18 + $0x2c1] sm:$0xff] }
 0x107   : > { %v2234_v54 = vrot.slane %v4978_v41, 2  ;;  %v2237_v6 = vrot.slane %v4981_v5, 2  ;;  %v3622_v45 = vunpack.i.h.bf16 %v3620_v48  ;;  %v3621_v55 = vunpack.i.l.bf16 %v3620_v48  ;;  %v3615_v57 = vpop.permute.xlu0 %3614  ;;  %v3134_v25 = vld [vmem:[%s4122_s18 + $0x541] sm:$0xff] }
 0x108   : > { %v3617_v22 = vunpack.i.h.bf16 %v3615_v57  ;;  %v3616_v58 = vunpack.i.l.bf16 %v3615_v57  ;;  %3909 = vrot.lane.b32.xlu1 %v3908_v30, %s4087_s24  ;;  %v3933_v30 = vpack.i.bf16 %v3120_v31, %v3105_v27 }
 0x109   : > { %3904 = vrot.lane.b32.xlu0 %v3903_v36, %s4086_s23  ;;  %v2238_v10 = vsel %vm2194_vm9, %v2234_v54, %v2237_v6  ;;  %v2332_v3 = vsel %vm2194_vm9, %v2226_v60, %v2234_v54  ;;  %v3107_v36 = vld [vmem:[%s4122_s18 + $0x4d9] sm:$0x3]  ;;  %v3943_v54 = vpack.i.bf16 %v2974_v40, %v3134_v25  ;;  %v3109_v6 = vld [vmem:[%s4122_s18 + $0x4e8] sm:$0x3] }
 0x10a   : > { %v1073_v53 = vsel %vm332_vm1, %v1071_v47, %v3617_v22  ;;  %v1072_v38 = vsel %vm332_vm1, %v1070_v24, %v3616_v58  ;;  %v3630_v11 = vpop.permute.xlu1 %3629  ;;  %v2398_v12 = vpack.c.bf16 %v2238_v10, %v2332_v3  ;;  %v3948_v48 = vpack.i.bf16 %v3122_v34, %v3107_v36  ;;  %v3123_v22 = vld [vmem:[%s4122_s18 + $0x519] sm:$0x3]  ;;  %v3138_v58 = vld [vmem:[%s4122_s18 + $0x551] sm:$0xff]  ;;  %v2975_v34 = vld [vmem:[%s4122_s18 + $0x2c9] sm:$0x3] }
 0x10b   : > { %v3632_v62 = vunpack.i.h.bf16 %v3630_v11  ;;  %v3631_v49 = vunpack.i.l.bf16 %v3630_v11  ;;  %v3625_v9 = vpop.permute.xlu0 %3624  ;;  %v1074_v44 = vsel %vm335_vm2, %v1072_v38, %v3621_v55  ;;  %v1075_v2 = vsel %vm335_vm2, %v1073_v53, %v3622_v45  ;;  %v3124_v45 = vld [vmem:[%s4122_s18 + $0x520] sm:$0xff]  ;;  %v3125_v11 = vld [vmem:[%s4122_s18 + $0x528] sm:$0x3]  ;;  %v2978_v36 = vld [vmem:[%s4122_s18 + $0x2d1] sm:$0xff] }
 0x10c   : > { %v3627_v18 = vunpack.i.h.bf16 %v3625_v9  ;;  %v3626_v14 = vunpack.i.l.bf16 %v3625_v9  ;;  %2614 = vmatprep.mubr.bf16.mxu0 %v2398_v12  ;;  %3919 = vrot.lane.b32.xlu1 %v3918_v61, %s4086_s23  ;;  %v3958_v1 = vpack.i.bf16 %v3124_v45, %v3109_v6  ;;  %v3126_v53 = vld [vmem:[%s4122_s18 + $0x521] sm:$0xff]  ;;  %v2977_v6 = vld [vmem:[%s4122_s18 + $0x2d8] sm:$0x3] }
 0x10d   : > { %3914 = vrot.lane.b32.xlu0 %v3913_v29, %s4088_s25  ;;  %2615 = vmatmul.mubr.bf16.gmra.mrb[16].mxu0 %v2397_v13  ;;  %v3140_v12 = vld [vmem:[%s4122_s18 + $0x560] sm:$0xff]  ;;  %v3968_v16 = vpack.i.bf16 %v3126_v53, %v3111_v4  ;;  %v3137_v45 = vld [vmem:[%s4122_s18 + $0x558] sm:$0x3] }
 0x10e   : > { %v1076_v0 = vsel %vm338_vm3, %v1074_v44, %v3626_v14  ;;  %v1077_v33 = vsel %vm338_vm3, %v1075_v2, %v3627_v18  ;;  %v3640_v17 = vpop.permute.xlu1 %3639  ;;  %v3963_v28 = vpack.i.bf16 %v3140_v12, %v3125_v11  ;;  %v3127_v44 = vld [vmem:[%s4122_s18 + $0x529] sm:$0x3]  ;;  %v3142_v2 = vld [vmem:[%s4122_s18 + $0x561] sm:$0xff]  ;;  %v5131_v53 = vld [vmem:[%s4122_s18 + $0x559] sm:$0x3] }
 0x10f   : > { %v3642_v21 = vunpack.i.h.bf16 %v3640_v17  ;;  %v3641_v32 = vunpack.i.l.bf16 %v3640_v17  ;;  %v3635_v43 = vpop.permute.xlu0 %3634  ;;  %v1078_v52 = vsel %vm341_vm4, %v1076_v0, %v3631_v49  ;;  %v1079_v7 = vsel %vm341_vm4, %v1077_v33, %v3632_v62  ;;  %v3113_v62 = vld [vmem:[%s4122_s18 + $0x4f8] sm:$0x3]  ;;  %v3128_v49 = vld [vmem:[%s4122_s18 + $0x530] sm:$0xff] }
 0x110   : > { %v3637_v56 = vunpack.i.h.bf16 %v3635_v43  ;;  %v3636_v23 = vunpack.i.l.bf16 %v3635_v43  ;;  %3929 = vrot.lane.b32.xlu1 %v3928_v15, %s4088_s25  ;;  %v3978_v14 = vpack.i.bf16 %v3128_v49, %v3113_v62  ;;  %v3973_v15 = vpack.i.bf16 %v3142_v2, %v3127_v44  ;;  %v3129_v0 = vld [vmem:[%s4122_s18 + $0x538] sm:$0x3]  ;;  %v3144_v33 = vld [vmem:[%s4122_s18 + $0x570] sm:$0xff] }
 0x111   : > { %3924 = vrot.lane.b32.xlu0 %v3923_v20, %s4083_s20  ;;  %v3115_v20 = vld [vmem:[%s4122_s18 + $0x4f9] sm:$0x3]  ;;  %v3983_v31 = vpack.i.bf16 %v3144_v33, %v3129_v0  ;;  %v5137_v12 = vld [vmem:[%s4122_s18 + $0x2f0] sm:$0xff]  ;;  %v4013_v2 = vpack.i.bf16 %v3137_v45, %v2977_v6 }
 0x112   : > { %v1080_v19 = vsel %vm344_vm5, %v1078_v52, %v3636_v23  ;;  %v1081_v39 = vsel %vm344_vm5, %v1079_v7, %v3637_v56  ;;  %v5018_v63 = vpop.permute.xlu1 %3649  ;;  %v3988_v27 = vpack.i.bf16 %v3130_v35, %v3115_v20  ;;  %v3131_v52 = vld [vmem:[%s4122_s18 + $0x539] sm:$0x3]  ;;  %v3146_v7 = vld [vmem:[%s4122_s18 + $0x571] sm:$0xff] }
 0x113   : > { %v3651_v42 = vunpack.i.l.bf16 %v5018_v63  ;;  %v5024_v37 = vpop.permute.xlu0 %3644  ;;  %v5027_v8 = vsel %vm347_vm6, %v1080_v19, %v3641_v32  ;;  %v5030_v47 = vsel %vm347_vm6, %v1081_v39, %v3642_v21  ;;  %v2961_v21 = vld [vmem:[%s4122_s18 + $0x298] sm:$0x3]  ;;  %v2976_v32 = vld [vmem:[%s4122_s18 + $0x2d0] sm:$0xff]  ;;  %v2988_v19 = vld [vmem:[%s4122_s18 + $0x300] sm:$0xff] }
 0x114   : > { %v3646_v24 = vunpack.i.l.bf16 %v5024_v37  ;;  %3939 = vrot.lane.b32.xlu1 %v3938_v46, %s4085_s22  ;;  %v2247_v59 = vrot.slane %v5027_v8, 6  ;;  %v2249_v51 = vrot.slane %v5030_v47, 6  ;;  %v3998_v23 = vpack.i.bf16 %v2976_v32, %v2961_v21  ;;  %v2989_v39 = vld [vmem:[%s4122_s18 + $0x308] sm:$0x3]  ;;  %v5134_v11 = vld [vmem:[%s4122_s18 + $0x2b8] sm:$0x3] }
 0x115   : > { %3934 = vrot.lane.b32.xlu0 %v3933_v30, %s4085_s22  ;;  %v3993_v46 = vpack.i.bf16 %v3146_v7, %v3131_v52  ;;  %v2963_v30 = vld [vmem:[%s4122_s18 + $0x299] sm:$0x3] }
 0x116   : > { %v1160_v55 = vsel %vm329_vm0, %v2956_v50, %v3646_v24  ;;  %v5040_v57 = vpop.permute.xlu1 %3659  ;;  %v5046_v60 = vsel %vm2168_vm7, %v4981_v5, %v2247_v59  ;;  %v5049_v61 = vsel %vm2168_vm7, %v2247_v59, %v2249_v51  ;;  %v3953_v5 = vpack.i.bf16 %v3138_v58, %v3123_v22  ;;  %v2965_v50 = vld [vmem:[%s4122_s18 + $0x2a8] sm:$0x3]  ;;  %v2980_v24 = vld [vmem:[%s4122_s18 + $0x2e0] sm:$0xff] }
 0x117   : > { %v5051_v10 = vpop.permute.xlu0 %3654  ;;  %v5054_v3 = vsel %vm332_vm1, %v1160_v55, %v3651_v42  ;;  %v2399_v29 = vpack.c.bf16 %v5046_v60, %v4978_v41  ;;  %v3135_v42 = vld [vmem:[%s4122_s18 + $0x549] sm:$0x3]  ;;  %v3661_v59 = vunpack.i.l.bf16 %v5040_v57  ;;  %v3004_v51 = vld [vmem:[%s4122_s18 + $0x340] sm:$0xff]  ;;  %v4008_v55 = vpack.i.bf16 %v2978_v36, %v2963_v30 }
 0x118   : > { %3949 = vrot.lane.b32.xlu1 %v3948_v48, %s4082_s19  ;;  %v3656_v40 = vunpack.i.l.bf16 %v5051_v10  ;;  %v3662_v48 = vunpack.i.h.bf16 %v5040_v57  ;;  %v5120_v22 = vld [vmem:[%s4122_s18 + $0x2a9] sm:$0x3]  ;;  %v5123_v58 = vld [vmem:[%s4122_s18 + $0x2e1] sm:$0xff]  ;;  %v3657_v57 = vunpack.i.h.bf16 %v5051_v10  ;;  %v4018_v4 = vpack.i.bf16 %v2980_v24, %v2965_v50 }
 0x119   : > { %3944 = vrot.lane.b32.xlu0 %v3943_v54, %s4083_s20  ;;  %v5144_v10 = vld [vmem:[%s4122_s18 + $0x2e8] sm:$0x3]  ;;  %v1340_v35 = vsel %vm329_vm0, %v2988_v19, %v3661_v59 }
 0x11a   : > { %v5062_v38 = vpop.permute.xlu1 %3669  ;;  %v1341_v20 = vsel %vm329_vm0, %v2989_v39, %v3662_v48 }
 0x11b   : > { %v5066_v13 = vpop.permute.xlu0 %3664  ;;  %v3671_v62 = vunpack.i.l.bf16 %v5062_v38 }
 0x11c   : > { %3959 = vrot.lane.b32.xlu1 %v3958_v1, %s4084_s21  ;;  %v5126_v1 = vld [vmem:[%s4122_s18 + $0x2d9] sm:$0x3]  ;;  %v3667_v49 = vunpack.i.h.bf16 %v5066_v13  ;;  %v3666_v0 = vunpack.i.l.bf16 %v5066_v13 }
 0x11d   : > { %3954 = vrot.lane.b32.xlu0 %v3953_v5, %s4082_s19  ;;  %v4003_v5 = vpack.i.bf16 %v3135_v42, %v2975_v34  ;;  %v4023_v21 = vpack.i.bf16 %v5131_v53, %v5126_v1 }
 0x11e   : > { %v5072_v9 = vpop.permute.xlu1 %3679 }
 0x11f   : > { %v5076_v18 = vpop.permute.xlu0 %3674  ;;  %v3682_v30 = vunpack.i.h.bf16 %v5072_v9 }
 0x120   : > { %3969 = vrot.lane.b32.xlu1 %v3968_v16, %s4087_s24  ;;  %v3005_v16 = vld [vmem:[%s4122_s18 + $0x348] sm:$0x3]  ;;  %v3676_v52 = vunpack.i.l.bf16 %v5076_v18  ;;  %v3677_v48 = vunpack.i.h.bf16 %v5076_v18 }
 0x121   : > { %3964 = vrot.lane.b32.xlu0 %v3963_v28, %s4084_s21  ;;  %v1430_v28 = vsel %vm329_vm0, %v3004_v51, %v3656_v40  ;;  %v1431_v32 = vsel %vm329_vm0, %v3005_v16, %v3657_v57  ;;  %v3020_v16 = vld [vmem:[%s4122_s18 + $0x380] sm:$0xff] }
 0x122   : > { %v5082_v26 = vpop.permute.xlu1 %3689  ;;  %v1433_v19 = vsel %vm332_vm1, %v1431_v32, %v3666_v0  ;;  %v2986_v0 = vld [vmem:[%s4122_s18 + $0x2f1] sm:$0xff]  ;;  %v3143_v32 = vld [vmem:[%s4122_s18 + $0x569] sm:$0x3] }
 0x123   : > { %v5086_v17 = vpop.permute.xlu0 %3684  ;;  %v3691_v18 = vunpack.i.l.bf16 %v5082_v26 }
 0x124   : > { %3979 = vrot.lane.b32.xlu1 %v3978_v14, %s4086_s23  ;;  %v5147_v14 = vld [vmem:[%s4122_s18 + $0x568] sm:$0x3]  ;;  %v3686_v36 = vunpack.i.l.bf16 %v5086_v17  ;;  %v3687_v1 = vunpack.i.h.bf16 %v5086_v17  ;;  %v2971_v17 = vld [vmem:[%s4122_s18 + $0x2b9] sm:$0x3] }
 0x125   : > { %3974 = vrot.lane.b32.xlu0 %v3973_v15, %s4087_s24  ;;  %v3652_v15 = vunpack.i.h.bf16 %v5018_v63  ;;  %v4038_v63 = vpack.i.bf16 %v5137_v12, %v5134_v11  ;;  %v4033_v7 = vpack.i.bf16 %v5147_v14, %v5144_v10  ;;  %v3672_v11 = vunpack.i.h.bf16 %v5062_v38 }
 0x126   : > { %v5092_v43 = vpop.permute.xlu1 %3699 }
 0x127   : > { %v5096_v56 = vpop.permute.xlu0 %3694  ;;  %v1432_v13 = vsel %vm332_vm1, %v1430_v28, %v3652_v15  ;;  %v3701_v39 = vunpack.i.l.bf16 %v5092_v43 }
 0x128   : > { %3989 = vrot.lane.b32.xlu1 %v3988_v27, %s4088_s25  ;;  %v3681_v27 = vunpack.i.l.bf16 %v5072_v9  ;;  %v3697_v40 = vunpack.i.h.bf16 %v5096_v56  ;;  %v3696_v42 = vunpack.i.l.bf16 %v5096_v56  ;;  %v1434_v51 = vsel %vm335_vm2, %v1432_v13, %v3676_v52 }
 0x129   : > { %3984 = vrot.lane.b32.xlu0 %v3983_v31, %s4086_s23  ;;  %v4028_v31 = vpack.i.bf16 %v5123_v58, %v5120_v22  ;;  %v1436_v22 = vsel %vm338_vm3, %v1434_v51, %v3686_v36  ;;  %v2985_v51 = vld [vmem:[%s4122_s18 + $0x2f8] sm:$0x3] }
 0x12a   : > { %v5106_v25 = vpop.permute.xlu1 %3709  ;;  %v1438_v57 = vsel %vm341_vm4, %v1436_v22, %v3701_v39 }
 0x12b   : > { %v5114_v54 = vpop.permute.xlu0 %3704  ;;  %v3711_v6 = vunpack.i.l.bf16 %v5106_v25  ;;  %v3712_v52 = vunpack.i.h.bf16 %v5106_v25  ;;  %v1520_v25 = vsel %vm329_vm0, %v3020_v16, %v3691_v18 }
 0x12c   : > { %3999 = vrot.lane.b32.xlu1 %v3998_v23, %s4085_s22  ;;  %v1343_v23 = vsel %vm332_vm1, %v1341_v20, %v3671_v62  ;;  %v3707_v9 = vunpack.i.h.bf16 %v5114_v54  ;;  %v3706_v59 = vunpack.i.l.bf16 %v5114_v54  ;;  %v1522_v38 = vsel %vm332_vm1, %v1520_v25, %v3672_v11  ;;  %v3021_v25 = vld [vmem:[%s4122_s18 + $0x388] sm:$0x3] }
 0x12d   : > { %3994 = vrot.lane.b32.xlu0 %v3993_v46, %s4088_s25  ;;  %v1342_v46 = vsel %vm332_vm1, %v1340_v35, %v3667_v49  ;;  %v1345_v56 = vsel %vm335_vm2, %v1343_v23, %v3682_v30  ;;  %v1440_v15 = vsel %vm344_vm5, %v1438_v57, %v3711_v6  ;;  %v3145_v6 = vld [vmem:[%s4122_s18 + $0x578] sm:$0x3] }
 0x12e   : > { %v3720_v44 = vpop.permute.xlu1 %3719  ;;  %v1344_v24 = vsel %vm335_vm2, %v1342_v46, %v3681_v27  ;;  %v2983_v27 = vld [vmem:[%s4122_s18 + $0x2e9] sm:$0x3]  ;;  %v1435_v46 = vsel %vm335_vm2, %v1433_v19, %v3677_v48 }
 0x12f   : > { %v5153_v33 = vpop.permute.xlu0 %3714  ;;  %v3722_v45 = vunpack.i.h.bf16 %v3720_v44  ;;  %v4043_v19 = vpack.i.bf16 %v3143_v32, %v2983_v27 }
 0x130   : > { %4009 = vrot.lane.b32.xlu1 %v4008_v55, %s4082_s19  ;;  %v3721_v55 = vunpack.i.l.bf16 %v3720_v44 }
 0x131   : > { %4004 = vrot.lane.b32.xlu0 %v4003_v5, %s4083_s20  ;;  %v1347_v5 = vsel %vm338_vm3, %v1345_v56, %v3697_v40  ;;  %v1437_v40 = vsel %vm338_vm3, %v1435_v46, %v3687_v1  ;;  %v2987_v1 = vld [vmem:[%s4122_s18 + $0x2f9] sm:$0x3] }
 0x132   : > { %v5173_v34 = vpop.permute.xlu1 %3729  ;;  %v1349_v62 = vsel %vm341_vm4, %v1347_v5, %v3707_v9 }
 0x133   : > { %v5179_v50 = vpop.permute.xlu0 %3724  ;;  %v1351_v35 = vsel %vm344_vm5, %v1349_v62, %v3722_v45  ;;  %v3692_v62 = vunpack.i.h.bf16 %v5082_v26 }
 0x134   : > { %4019 = vrot.lane.b32.xlu1 %v4018_v4, %s4084_s21  ;;  %v3726_v54 = vunpack.i.l.bf16 %v5179_v50  ;;  %v1346_v4 = vsel %vm338_vm3, %v1344_v24, %v3696_v42  ;;  %v3727_v30 = vunpack.i.h.bf16 %v5179_v50  ;;  %v4048_v42 = vpack.i.bf16 %v2986_v0, %v2971_v17 }
 0x135   : > { %4014 = vrot.lane.b32.xlu0 %v4013_v2, %s4085_s22  ;;  %v1348_v28 = vsel %vm341_vm4, %v1346_v4, %v3706_v59  ;;  %v3702_v2 = vunpack.i.h.bf16 %v5092_v43  ;;  %v3716_v24 = vunpack.i.l.bf16 %v5153_v33 }
 0x136   : > { %v5193_v58 = vpop.permute.xlu1 %3739  ;;  %v1350_v20 = vsel %vm344_vm5, %v1348_v28, %v3721_v55  ;;  %v5214_v13 = vsel %vm347_vm6, %v1440_v15, %v3726_v54  ;;  %v4053_v54 = vpack.i.bf16 %v3145_v6, %v2985_v51 }
 0x137   : > { %v3735_v53 = vpop.permute.xlu0 %3734  ;;  %v1439_v50 = vsel %vm341_vm4, %v1437_v40, %v3702_v2  ;;  %v2274_v48 = vrot.slane %v5214_v13, 2  ;;  %v3741_v14 = vunpack.i.l.bf16 %v5193_v58  ;;  %v1524_v56 = vsel %vm335_vm2, %v1522_v38, %v3716_v24  ;;  %v3037_v40 = vld [vmem:[%s4122_s18 + $0x3c8] sm:$0x3] }
 0x138   : > { %v3737_v49 = vunpack.i.h.bf16 %v3735_v53  ;;  %v3736_v44 = vunpack.i.l.bf16 %v3735_v53  ;;  %4029 = vrot.lane.b32.xlu1 %v4028_v31, %s4087_s24  ;;  %v1441_v12 = vsel %vm344_vm5, %v1439_v50, %v3712_v52 }
 0x139   : > { %4024 = vrot.lane.b32.xlu0 %v4023_v21, %s4082_s19  ;;  %v5251_v10 = vsel %vm347_vm6, %v1441_v12, %v3727_v30  ;;  %s171_s19 = smul.u32 25, %s2792_s13 }
 0x13a   : > { %v5217_v31 = vsel %vm347_vm6, %v1350_v20, %v3736_v44  ;;  %v1353_v43 = vsel %vm347_vm6, %v1351_v35, %v3737_v49  ;;  %v5220_v23 = vpop.permute.xlu1 %3749  ;;  %v2277_v4 = vrot.slane %v5251_v10, 2  ;;  %v3036_v44 = vld [vmem:[%s4122_s18 + $0x3c0] sm:$0xff]  ;;  %v3147_v35 = vld [vmem:[%s4122_s18 + $0x579] sm:$0x3] }
 0x13b   : > { %v2262_v21 = vrot.slane %v5217_v31, 4  ;;  %v2265_v36 = vrot.slane %v1353_v43, 4  ;;  %v5225_v39 = vpop.permute.xlu0 %3744  ;;  %v3751_v55 = vunpack.i.l.bf16 %v5220_v23  ;;  %v2273_v18 = vrot.slane %v5217_v31, 2  ;;  %p172_p4 = scmp.lt.s32.totalorder %s171_s19, 99 }
 0x13c   : > { %4039 = vrot.lane.b32.xlu1 %v4038_v63, %s4086_s23  ;;  %v3731_v63 = vunpack.i.l.bf16 %v5173_v34  ;;  %v2275_v22 = vrot.slane %v1353_v43, 2  ;;  %v2278_v26 = vsel %vm2194_vm9, %v2274_v48, %v2277_v4  ;;  %v1610_v32 = vsel %vm329_vm0, %v3036_v44, %v3692_v62 }
 0x13d   : > { %4034 = vrot.lane.b32.xlu0 %v4033_v7, %s4084_s21  ;;  %v2266_v9 = vsel %vm2181_vm8, %v2262_v21, %v2265_v36  ;;  %v3747_v43 = vunpack.i.h.bf16 %v5225_v39  ;;  %v3746_v46 = vunpack.i.l.bf16 %v5225_v39  ;;  %v3717_v36 = vunpack.i.h.bf16 %v5153_v33  ;;  %s5699_s19 = smov (!%p172_p4, %s171_s19), 99 }
 0x13e   : > { %v5246_v59 = vpop.permute.xlu1 %3759  ;;  %v5255_v45 = vsel %vm2194_vm9, %v2266_v9, %v2274_v48  ;;  %v1526_v57 = vsel %vm338_vm3, %v1524_v56, %v3731_v63  ;;  %v2276_v15 = vsel %vm2194_vm9, %v2273_v18, %v2275_v22  ;;  %v3732_v9 = vunpack.i.h.bf16 %v5173_v34  ;;  %v3052_v63 = vld [vmem:[%s4122_s18 + $0x400] sm:$0xff]  ;;  %s2799_s21 = sshll.u32 %s5699_s19, 3 }
 0x13f   : > { %v3755_v7 = vpop.permute.xlu0 %3754  ;;  %v1528_v28 = vsel %vm341_vm4, %v1526_v57, %v3741_v14  ;;  %v2403_v52 = vpack.c.bf16 %v5214_v13, %v2276_v15  ;;  %v1521_v11 = vsel %vm329_vm0, %v3021_v25, %v3747_v43  ;;  %v1611_v12 = vsel %vm329_vm0, %v3037_v40, %v3746_v46 }
 0x140   : > { %4049 = vrot.lane.b32.xlu1 %v4048_v42, %s4088_s25  ;;  %v1530_v49 = vsel %vm344_vm5, %v1528_v28, %v3751_v55  ;;  %v3756_v17 = vunpack.i.l.bf16 %v3755_v7  ;;  %v3757_v42 = vunpack.i.h.bf16 %v3755_v7  ;;  %v3761_v33 = vunpack.i.l.bf16 %v5246_v59 }
 0x141   : > { %4044 = vrot.lane.b32.xlu0 %v4043_v19, %s4087_s24  ;;  %v3762_v25 = vunpack.i.h.bf16 %v5246_v59  ;;  %s5497_s24 = scalar_lea.vmem %s5695_s3, %s2799_s21 }
 0x142   : > { %v5265_v5 = vpop.permute.xlu1 %3769  ;;  %v1612_v30 = vsel %vm332_vm1, %v1610_v32, %v3756_v17  ;;  %v1613_v51 = vsel %vm332_vm1, %v1611_v12, %v3757_v42  ;;  %v1700_v28 = vsel %vm329_vm0, %v3052_v63, %v3761_v33 }
 0x143   : > { %v3771_v53 = vunpack.i.l.bf16 %v5265_v5  ;;  %v5269_v16 = vpop.permute.xlu0 %3764  ;;  %v1614_v39 = vsel %vm335_vm2, %v1612_v30, %v3717_v36 }
 0x144   : > { %1266 = vrot.lane.b32.xlu1 %v2987_v1, %s4088_s25  ;;  %v3766_v19 = vunpack.i.l.bf16 %v5269_v16  ;;  %v1616_v55 = vsel %vm338_vm3, %v1614_v39, %v3732_v9  ;;  %v3742_v1 = vunpack.i.h.bf16 %v5193_v58  ;;  %v3767_v44 = vunpack.i.h.bf16 %v5269_v16 }
 0x145   : > { %4054 = vrot.lane.b32.xlu0 %v4053_v54, %s4086_s23  ;;  %v5278_v2 = vsel %vm347_vm6, %v1530_v49, %v3771_v53  ;;  %v3752_v53 = vunpack.i.h.bf16 %v5220_v23 }
 0x146   : > { %v3780_v20 = vpop.permute.xlu1 %3779  ;;  %v2404_v27 = vpack.c.bf16 %v5278_v2, %v2278_v26  ;;  %v1523_v6 = vsel %vm332_vm1, %v1521_v11, %v3766_v19  ;;  %v1618_v49 = vsel %vm341_vm4, %v1616_v55, %v3742_v1  ;;  %v1702_v40 = vsel %vm332_vm1, %v1700_v28, %v3767_v44  ;;  %v3069_v1 = vld [vmem:[%s4122_s18 + $0x448] sm:$0x3] }
 0x147   : > { %v3775_v0 = vpop.permute.xlu0 %3774  ;;  %v3782_v14 = vunpack.i.h.bf16 %v3780_v20  ;;  %v3781_v7 = vunpack.i.l.bf16 %v3780_v20  ;;  %v1620_v43 = vsel %vm344_vm5, %v1618_v49, %v3752_v53  ;;  %v2287_v59 = vrot.slane %v5278_v2, 6 }
 0x148   : > { %2638 = vmatprep.mubr.bf16.mxu1 %v2404_v27  ;;  %v3777_v13 = vunpack.i.h.bf16 %v3775_v0  ;;  %v3776_v24 = vunpack.i.l.bf16 %v3775_v0  ;;  %v3772_v27 = vunpack.i.h.bf16 %v5265_v5 }
 0x149   : > { %2146 = vrot.lane.b32.xlu0 %v3147_v35, %s4088_s25  ;;  %2639 = vmatmul.mubr.bf16.vlgmr.msra.gmra.mrb[0].mxu1 %v2403_v52  ;;  %v2339_v53 = vsel %vm2168_vm7, %v5251_v10, %v2287_v59 }
 0x14a   : > { %v3790_v50 = vpop.permute.xlu1 %3789  ;;  %v1525_v56 = vsel %vm335_vm2, %v1523_v6, %v3777_v13  ;;  %v1615_v34 = vsel %vm335_vm2, %v1613_v51, %v3776_v24  ;;  %v5338_v9 = vsel %vm347_vm6, %v1620_v43, %v3772_v27 }
 0x14b   : > { %v5296_v48 = vpop.permute.xlu0 %3784  ;;  %v3792_v22 = vunpack.i.h.bf16 %v3790_v50  ;;  %v3791_v57 = vunpack.i.l.bf16 %v3790_v50  ;;  %v1527_v17 = vsel %vm338_vm3, %v1525_v56, %v3782_v14  ;;  %v1617_v15 = vsel %vm338_vm3, %v1615_v34, %v3781_v7  ;;  %v3053_v50 = vld [vmem:[%s4122_s18 + $0x408] sm:$0x3] }
 0x14c   : > { %v3786_v58 = vunpack.i.l.bf16 %v5296_v48  ;;  %v1701_v51 = vsel %vm329_vm0, %v3053_v50, %v3762_v25  ;;  %v2299_v55 = vrot.slane %v5338_v9, 4 }
 0x14d   : > { %v1529_v35 = vsel %vm341_vm4, %v1527_v17, %v3792_v22  ;;  %v1619_v32 = vsel %vm341_vm4, %v1617_v15, %v3791_v57  ;;  %v3787_v22 = vunpack.i.h.bf16 %v5296_v48  ;;  %v3068_v15 = vld [vmem:[%s4122_s18 + $0x440] sm:$0xff] }
 0x14e   : > { %v3800_v38 = vpop.permute.xlu1 %3799  ;;  %v1704_v13 = vsel %vm335_vm2, %v1702_v40, %v3786_v58 }
 0x14f   : > { %v5309_v54 = vpop.permute.xlu0 %3794  ;;  %v3802_v4 = vunpack.i.h.bf16 %v3800_v38  ;;  %v3801_v62 = vunpack.i.l.bf16 %v3800_v38  ;;  %v2288_v38 = vrot.slane %v5338_v9, 6 }
 0x150   : > { %v3796_v16 = vunpack.i.l.bf16 %v5309_v54  ;;  %v3797_v28 = vunpack.i.h.bf16 %v5309_v54 }
 0x151   : > { %v1531_v52 = vsel %vm344_vm5, %v1529_v35, %v3802_v4  ;;  %v1621_v46 = vsel %vm344_vm5, %v1619_v32, %v3801_v62 }
 0x152   : > { %v3810_v20 = vpop.permute.xlu1 %3809  ;;  %v1706_v11 = vsel %vm338_vm3, %v1704_v13, %v3796_v16 }
 0x153   : > { %v3812_v26 = vunpack.i.h.bf16 %v3810_v20  ;;  %v3811_v0 = vunpack.i.l.bf16 %v3810_v20  ;;  %v3805_v23 = vpop.permute.xlu0 %3804 }
 0x154   : > { %v3806_v36 = vunpack.i.l.bf16 %v3805_v23  ;;  %v3807_v17 = vunpack.i.h.bf16 %v3805_v23 }
 0x155   : > { %v1533_v30 = vsel %vm347_vm6, %v1531_v52, %v3812_v26  ;;  %v5330_v42 = vsel %vm347_vm6, %v1621_v46, %v3811_v0 }
 0x156   : > { %v2289_v5 = vrot.slane %v1533_v30, 6  ;;  %v5332_v19 = vpop.permute.xlu1 %3819  ;;  %v2291_v33 = vrot.slane %v5330_v42, 6  ;;  %v1708_v63 = vsel %vm341_vm4, %v1706_v11, %v3806_v36  ;;  %v2340_v35 = vsel %vm2168_vm7, %v1533_v30, %v2288_v38 }
 0x157   : > { %v3821_v24 = vunpack.i.l.bf16 %v5332_v19  ;;  %v3815_v39 = vpop.permute.xlu0 %3814  ;;  %v3822_v13 = vunpack.i.h.bf16 %v5332_v19 }
 0x158   : > { %v3816_v12 = vunpack.i.l.bf16 %v3815_v39  ;;  %v2290_v7 = vsel %vm2168_vm7, %v2287_v59, %v2289_v5  ;;  %v2292_v49 = vsel %vm2168_vm7, %v2288_v38, %v2291_v33  ;;  %v3817_v58 = vunpack.i.h.bf16 %v3815_v39 }
 0x159   : > { %v2341_v44 = vsel %vm2181_vm8, %v2290_v7, %v2299_v55 }
 0x15a   : > { %v1710_v6 = vsel %vm344_vm5, %v1708_v63, %v3816_v12  ;;  %v3830_v14 = vpop.permute.xlu1 %3829  ;;  %v2405_v16 = vpack.c.bf16 %v2341_v44, %v2339_v53 }
 0x15b   : > { %v5350_v2 = vsel %vm347_vm6, %v1710_v6, %v3821_v24  ;;  %v3832_v56 = vunpack.i.h.bf16 %v3830_v14  ;;  %v3825_v34 = vpop.permute.xlu0 %3824  ;;  %v3831_v62 = vunpack.i.l.bf16 %v3830_v14 }
 0x15c   : > { %v3826_v57 = vunpack.i.l.bf16 %v3825_v34  ;;  %v2300_v4 = vrot.slane %v5350_v2, 4  ;;  %v3827_v32 = vunpack.i.h.bf16 %v3825_v34 }
 0x15d   : > { %v1791_v54 = vsel %vm329_vm0, %v3069_v1, %v3832_v56  ;;  %v1790_v43 = vsel %vm329_vm0, %v3068_v15, %v3831_v62  ;;  %v2301_v62 = vrot.slane %v5330_v42, 4 }
 0x15e   : > { %v1703_v48 = vsel %vm332_vm1, %v1701_v51, %v3826_v57  ;;  %v3840_v20 = vpop.permute.xlu1 %3839  ;;  %v2342_v10 = vsel %vm2181_vm8, %v2292_v49, %v2300_v4  ;;  %v1792_v24 = vsel %vm332_vm1, %v1790_v43, %v3827_v32 }
 0x15f   : > { %v1705_v26 = vsel %vm335_vm2, %v1703_v48, %v3787_v22  ;;  %v5370_v0 = vpop.permute.xlu0 %3834  ;;  %v2406_v27 = vpack.c.bf16 %v2342_v10, %v2340_v35  ;;  %v3842_v30 = vunpack.i.h.bf16 %v3840_v20  ;;  %v3841_v36 = vunpack.i.l.bf16 %v3840_v20 }
 0x160   : > { %v1707_v23 = vsel %vm338_vm3, %v1705_v26, %v3797_v28  ;;  %v3836_v52 = vunpack.i.l.bf16 %v5370_v0  ;;  %v2311_v35 = vrot.slane %v5350_v2, 2 }
 0x161   : > { %v1709_v46 = vsel %vm341_vm4, %v1707_v23, %v3807_v17  ;;  %2646 = vmatprep.mubr.bf16.mxu1 %v2406_v27  ;;  %v1794_v11 = vsel %vm335_vm2, %v1792_v24, %v3841_v36  ;;  %v2302_v23 = vsel %vm2181_vm8, %v2299_v55, %v2301_v62 }
 0x162   : > { %v1793_v25 = vsel %vm332_vm1, %v1791_v54, %v3836_v52  ;;  %2647 = vmatmul.mubr.bf16.gmra.mrb[4].mxu1 %v2405_v16  ;;  %v3850_v40 = vpop.permute.xlu1 %3849  ;;  %v1711_v50 = vsel %vm344_vm5, %v1709_v46, %v3817_v58  ;;  %v2343_v2 = vsel %vm2194_vm9, %v2302_v23, %v2311_v35 }
 0x163   : > { %v3845_v5 = vpop.permute.xlu0 %3844  ;;  %v3852_v12 = vunpack.i.h.bf16 %v3850_v40  ;;  %v3851_v33 = vunpack.i.l.bf16 %v3850_v40  ;;  %v1795_v63 = vsel %vm335_vm2, %v1793_v25, %v3842_v30  ;;  %v1713_v7 = vsel %vm347_vm6, %v1711_v50, %v3822_v13  ;;  %v3100_v25 = vld [vmem:[%s4122_s18 + $0x4c0] sm:$0xff] }
 0x164   : > { %v3847_v39 = vunpack.i.h.bf16 %v3845_v5  ;;  %v3846_v59 = vunpack.i.l.bf16 %v3845_v5  ;;  %v2303_v53 = vrot.slane %v1713_v7, 4  ;;  %v2313_v28 = vrot.slane %v1713_v7, 2  ;;  %v3085_v5 = vld [vmem:[%s4122_s18 + $0x488] sm:$0x3]  ;;  %v3084_v50 = vld [vmem:[%s4122_s18 + $0x480] sm:$0xff] }
 0x166   : > { %v1796_v51 = vsel %vm338_vm3, %v1794_v11, %v3846_v59  ;;  %v1797_v6 = vsel %vm338_vm3, %v1795_v63, %v3847_v39  ;;  %v3860_v14 = vpop.permute.xlu1 %3859  ;;  %v2304_v42 = vsel %vm2181_vm8, %v2300_v4, %v2303_v53  ;;  %v2314_v54 = vsel %vm2194_vm9, %v2311_v35, %v2313_v28 }
 0x167   : > { %v3862_v38 = vunpack.i.h.bf16 %v3860_v14  ;;  %v3861_v56 = vunpack.i.l.bf16 %v3860_v14  ;;  %v3855_v19 = vpop.permute.xlu0 %3854  ;;  %v1798_v1 = vsel %vm341_vm4, %v1796_v51, %v3851_v33  ;;  %v1799_v57 = vsel %vm341_vm4, %v1797_v6, %v3852_v12 }
 0x168   : > { %v3857_v34 = vunpack.i.h.bf16 %v3855_v19  ;;  %v3856_v22 = vunpack.i.l.bf16 %v3855_v19  ;;  %v2407_v43 = vpack.c.bf16 %v2314_v54, %v2343_v2  ;;  %v3837_v11 = vunpack.i.h.bf16 %v5370_v0 }
 0x16a   : > { %v1800_v49 = vsel %vm344_vm5, %v1798_v1, %v3856_v22  ;;  %v1801_v44 = vsel %vm344_vm5, %v1799_v57, %v3857_v34  ;;  %v5390_v17 = vpop.permute.xlu1 %3869 }
 0x16b   : > { %v5393_v15 = vsel %vm347_vm6, %v1800_v49, %v3861_v56  ;;  %v5396_v48 = vsel %vm347_vm6, %v1801_v44, %v3862_v38  ;;  %v3865_v20 = vpop.permute.xlu0 %3864  ;;  %v3871_v36 = vunpack.i.l.bf16 %v5390_v17 }
 0x16c   : > { %v2312_v10 = vrot.slane %v5393_v15, 2  ;;  %v2315_v58 = vrot.slane %v5396_v48, 2  ;;  %v3866_v30 = vunpack.i.l.bf16 %v3865_v20  ;;  %v3867_v40 = vunpack.i.h.bf16 %v3865_v20 }
 0x16d   : > { %v1881_v12 = vsel %vm329_vm0, %v3085_v5, %v3871_v36 }
 0x16e   : > { %v3880_v26 = vpop.permute.xlu1 %3879  ;;  %v2316_v27 = vsel %vm2194_vm9, %v2312_v10, %v2315_v58  ;;  %v2344_v32 = vsel %vm2194_vm9, %v2304_v42, %v2312_v10  ;;  %v1970_v55 = vsel %vm329_vm0, %v3100_v25, %v3866_v30  ;;  %v1880_v33 = vsel %vm329_vm0, %v3084_v50, %v3867_v40 }
 0x16f   : > { %v3875_v52 = vpop.permute.xlu0 %3874  ;;  %v2408_v16 = vpack.c.bf16 %v2316_v27, %v2344_v32  ;;  %v3881_v39 = vunpack.i.l.bf16 %v3880_v26  ;;  %v3882_v63 = vunpack.i.h.bf16 %v3880_v26  ;;  %v1972_v38 = vsel %vm332_vm1, %v1970_v55, %v3837_v11 }
 0x170   : > { %v3876_v13 = vunpack.i.l.bf16 %v3875_v52  ;;  %v3877_v59 = vunpack.i.h.bf16 %v3875_v52 }
 0x171   : > { %2654 = vmatprep.mubr.bf16.mxu1 %v2408_v16  ;;  %v1974_v22 = vsel %vm335_vm2, %v1972_v38, %v3881_v39 }
 0x172   : > { %2655 = vmatmul.mubr.bf16.gmra.mrb[8].mxu1 %v2407_v43  ;;  %v3890_v4 = vpop.permute.xlu1 %3889  ;;  %v1882_v51 = vsel %vm332_vm1, %v1880_v33, %v3876_v13  ;;  %v1883_v1 = vsel %vm332_vm1, %v1881_v12, %v3877_v59 }
 0x173   : > { %v3885_v46 = vpop.permute.xlu0 %3884  ;;  %v3892_v0 = vunpack.i.h.bf16 %v3890_v4  ;;  %v3891_v57 = vunpack.i.l.bf16 %v3890_v4  ;;  %v1884_v53 = vsel %vm335_vm2, %v1882_v51, %v3882_v63 }
 0x174   : > { %v3887_v6 = vunpack.i.h.bf16 %v3885_v46  ;;  %v3886_v14 = vunpack.i.l.bf16 %v3885_v46 }
 0x175   : > { %v1164_v2 = vsel %vm335_vm2, %v5054_v3, %v3892_v0  ;;  %v1885_v43 = vsel %vm335_vm2, %v1883_v1, %v3891_v57  ;;  %v3872_v0 = vunpack.i.h.bf16 %v5390_v17 }
 0x176   : > { %v3900_v9 = vpop.permute.xlu1 %3899  ;;  %v1886_v49 = vsel %vm338_vm3, %v1884_v53, %v3887_v6  ;;  %v1976_v44 = vsel %vm338_vm3, %v1974_v22, %v3886_v14  ;;  %v3101_v53 = vld [vmem:[%s4122_s18 + $0x4c8] sm:$0x3] }
 0x177   : > { %v3895_v24 = vpop.permute.xlu0 %3894  ;;  %v3902_v20 = vunpack.i.h.bf16 %v3900_v9  ;;  %v3901_v35 = vunpack.i.l.bf16 %v3900_v9 }
 0x178   : > { %v3897_v56 = vunpack.i.h.bf16 %v3895_v24  ;;  %v3896_v19 = vunpack.i.l.bf16 %v3895_v24 }
 0x179   : > { %v1166_v30 = vsel %vm338_vm3, %v1164_v2, %v3902_v20  ;;  %v1887_v36 = vsel %vm338_vm3, %v1885_v43, %v3901_v35 }
 0x17a   : > { %v3910_v7 = vpop.permute.xlu1 %3909  ;;  %v1888_v58 = vsel %vm341_vm4, %v1886_v49, %v3897_v56  ;;  %v1978_v42 = vsel %vm341_vm4, %v1976_v44, %v3896_v19  ;;  %v3116_v49 = vld [vmem:[%s4122_s18 + $0x500] sm:$0xff]  ;;  %v3117_v44 = vld [vmem:[%s4122_s18 + $0x508] sm:$0x3] }
 0x17b   : > { %v3905_v34 = vpop.permute.xlu0 %3904  ;;  %v3912_v54 = vunpack.i.h.bf16 %v3910_v7  ;;  %v3911_v26 = vunpack.i.l.bf16 %v3910_v7 }
 0x17c   : > { %v3907_v28 = vunpack.i.h.bf16 %v3905_v34  ;;  %v3906_v62 = vunpack.i.l.bf16 %v3905_v34 }
 0x17d   : > { %v1168_v3 = vsel %vm341_vm4, %v1166_v30, %v3912_v54  ;;  %v1889_v50 = vsel %vm341_vm4, %v1887_v36, %v3911_v26  ;;  %v3132_v26 = vld [vmem:[%s4122_s18 + $0x540] sm:$0xff] }
 0x17e   : > { %v3920_v10 = vpop.permute.xlu1 %3919  ;;  %v1890_v4 = vsel %vm344_vm5, %v1888_v58, %v3907_v28  ;;  %v1980_v46 = vsel %vm344_vm5, %v1978_v42, %v3906_v62  ;;  %v1971_v58 = vsel %vm329_vm0, %v3101_v53, %v3872_v0 }
 0x17f   : > { %v3915_v27 = vpop.permute.xlu0 %3914  ;;  %v3922_v32 = vunpack.i.h.bf16 %v3920_v10  ;;  %v3921_v23 = vunpack.i.l.bf16 %v3920_v10 }
 0x180   : > { %v3917_v52 = vunpack.i.h.bf16 %v3915_v27  ;;  %v3916_v16 = vunpack.i.l.bf16 %v3915_v27 }
 0x181   : > { %v1170_v55 = vsel %vm344_vm5, %v1168_v3, %v3922_v32  ;;  %v1891_v39 = vsel %vm344_vm5, %v1889_v50, %v3921_v23 }
 0x182   : > { %v5436_v25 = vsel %vm347_vm6, %v1980_v46, %v3916_v16  ;;  %v3930_v40 = vpop.permute.xlu1 %3929  ;;  %v5439_v5 = vsel %vm347_vm6, %v1890_v4, %v3917_v52 }
 0x183   : > { %v3932_v13 = vunpack.i.h.bf16 %v3930_v40  ;;  %v3931_v9 = vunpack.i.l.bf16 %v3930_v40  ;;  %v3925_v24 = vpop.permute.xlu0 %3924  ;;  %v2349_v59 = vrot.slane %v5439_v5, 6  ;;  %v2350_v11 = vrot.slane %v5436_v25, 6 }
 0x184   : > { %v3927_v41 = vunpack.i.h.bf16 %v3925_v24  ;;  %v3926_v60 = vunpack.i.l.bf16 %v3925_v24  ;;  %v2361_v2 = vrot.slane %v5436_v25, 4 }
 0x185   : > { %v5450_v12 = vsel %vm347_vm6, %v1170_v55, %v3932_v13  ;;  %v5453_v33 = vsel %vm347_vm6, %v1891_v39, %v3931_v9  ;;  %v2383_v7 = vsel %vm2168_vm7, %v5396_v48, %v2349_v59 }
 0x186   : > { %v2248_v63 = vrot.slane %v5450_v12, 6  ;;  %v5456_v51 = vpop.permute.xlu1 %3939  ;;  %v2384_v14 = vsel %vm2168_vm7, %v5453_v33, %v2350_v11  ;;  %v2409_v56 = vpack.c.bf16 %v2383_v7, %v5393_v15  ;;  %v2061_v43 = vsel %vm329_vm0, %v3117_v44, %v3927_v41 }
 0x187   : > { %v3935_v6 = vpop.permute.xlu0 %3934  ;;  %v2410_v38 = vpack.c.bf16 %v2384_v14, %v5439_v5  ;;  %v3941_v42 = vunpack.i.l.bf16 %v5456_v51  ;;  %v2060_v4 = vsel %vm329_vm0, %v3116_v49, %v3926_v60  ;;  %v3942_v13 = vunpack.i.h.bf16 %v5456_v51 }
 0x188   : > { %v2334_v19 = vsel %vm2168_vm7, %v5030_v47, %v2248_v63  ;;  %v5482_v47 = vld [vmem:[%s5694_s2] ss:$0 sm:$0xff]  ;;  %v3936_v54 = vunpack.i.l.bf16 %v3935_v6  ;;  %v3937_v32 = vunpack.i.h.bf16 %v3935_v6 }
 0x189   : > { %2662 = vmatprep.mubr.bf16.mxu1 %v2410_v38  ;;  %v2400_v22 = vpack.c.bf16 %v2334_v19, %v5027_v8  ;;  %v2063_v9 = vsel %vm332_vm1, %v2061_v43, %v3941_v42 }
 0x18a   : > { %v3950_v34 = vpop.permute.xlu1 %3949  ;;  %2663 = vmatmul.mubr.bf16.gmra.mrb[12].mxu1 %v2409_v56  ;;  %v1973_v24 = vsel %vm332_vm1, %v1971_v58, %v3936_v54  ;;  %v2062_v6 = vsel %vm332_vm1, %v2060_v4, %v3937_v32  ;;  %v2351_v32 = vrot.slane %v5453_v33, 6 }
 0x18b   : > { %v5473_v1 = vpop.permute.xlu0 %3944  ;;  %2622 = vmatprep.mubr.bf16.mxu0 %v2400_v22  ;;  %v3951_v23 = vunpack.i.l.bf16 %v3950_v34  ;;  %v3952_v46 = vunpack.i.h.bf16 %v3950_v34 }
 0x18c   : > { %2623 = vmatmul.mubr.bf16.gmra.mrb[20].mxu0 %v2399_v29  ;;  %v3183_v15 = vpop.f32.mrb[0].mxu0  ;;  %v3946_v17 = vunpack.i.l.bf16 %v5473_v1  ;;  %v3947_v5 = vunpack.i.h.bf16 %v5473_v1 }
 0x18d   : > { %v3184_v8 = vpop.f32.mrb[1].mxu0  ;;  %v1975_v14 = vsel %vm335_vm2, %v1973_v24, %v3951_v23  ;;  %v2064_v56 = vsel %vm335_vm2, %v2062_v6, %v3952_v46 }
 0x18e   : > { %v3960_v48 = vpop.permute.xlu1 %3959  ;;  %v3185_v28 = vadd.f32 %v3184_v8, %v3183_v15  ;;  %v3186_v62 = vpop.f32.mrb[2].mxu0  ;;  %v2150_v30 = vsel %vm329_vm0, %v3132_v26, %v3946_v17 }
 0x18f   : > { %v5484_v57 = vpop.permute.xlu0 %3954  ;;  %v3187_v29 = vpop.f32.mrb[3].mxu0  ;;  %v3962_v36 = vunpack.i.h.bf16 %v3960_v48  ;;  %v3961_v40 = vunpack.i.l.bf16 %v3960_v48  ;;  %v2152_v51 = vsel %vm332_vm1, %v2150_v30, %v3942_v13 }
 0x190   : > { %v2585_v20 = vadd.f32 %v3185_v28, %v5482_v47  ;;  %v3188_v35 = vadd.f32 %v3187_v29, %v3186_v62  ;;  %v3957_v19 = vunpack.i.h.bf16 %v5484_v57  ;;  %v3956_v48 = vunpack.i.l.bf16 %v5484_v57 }
 0x191   : > { %v1977_v22 = vsel %vm338_vm3, %v1975_v14, %v3961_v40  ;;  %v2066_v15 = vsel %vm338_vm3, %v2064_v56, %v3962_v36 }
 0x192   : > { %v3970_v10 = vpop.permute.xlu1 %3969  ;;  %v2686_v52 = vmax.f32 %v2585_v20, 0.0  ;;  %v2588_v16 = vadd.f32 %v3188_v35, %v5482_v47  ;;  %v2065_v58 = vsel %vm335_vm2, %v2063_v9, %v3956_v48  ;;  %v2154_v42 = vsel %vm335_vm2, %v2152_v51, %v3957_v19 }
 0x193   : > { %v3965_v27 = vpop.permute.xlu0 %3964  ;;  %v3971_v55 = vunpack.i.l.bf16 %v3970_v10  ;;  %v3972_v7 = vunpack.i.h.bf16 %v3970_v10  ;;  %v3647_v51 = vunpack.i.h.bf16 %v5024_v37 }
 0x194   : > { %2711 = vst.msk [vmem:[%s5497_s24] sm:$0xff] %vm332_vm1, %v2686_v52  ;;  %v2687_v3 = vmax.f32 %v2588_v16, 0.0  ;;  %v3967_v0 = vunpack.i.h.bf16 %v3965_v27  ;;  %v3966_v28 = vunpack.i.l.bf16 %v3965_v27 }
 0x195   : > { %v1979_v53 = vsel %vm341_vm4, %v1977_v22, %v3971_v55  ;;  %v2068_v29 = vsel %vm341_vm4, %v2066_v15, %v3972_v7 }
 0x196   : > { %v3980_v50 = vpop.permute.xlu1 %3979  ;;  %2712 = vst.msk [vmem:[%s5497_s24 + $0x8] sm:$0xff] %vm332_vm1, %v2687_v3  ;;  %v2067_v23 = vsel %vm338_vm3, %v2065_v58, %v3966_v28  ;;  %v2156_v52 = vsel %vm338_vm3, %v2154_v42, %v3967_v0  ;;  %v3133_v58 = vld [vmem:[%s4122_s18 + $0x548] sm:$0x3] }
 0x197   : > { %v3975_v39 = vpop.permute.xlu0 %3974  ;;  %v3981_v38 = vunpack.i.l.bf16 %v3980_v50  ;;  %v3982_v34 = vunpack.i.h.bf16 %v3980_v50 }
 0x198   : > { %v3977_v44 = vunpack.i.h.bf16 %v3975_v39  ;;  %v3976_v17 = vunpack.i.l.bf16 %v3975_v39 }
 0x199   : > { %v1981_v49 = vsel %vm344_vm5, %v1979_v53, %v3981_v38  ;;  %v2070_v20 = vsel %vm344_vm5, %v2068_v29, %v3982_v34  ;;  %v2352_v38 = vsel %vm2168_vm7, %v2349_v59, %v2351_v32 }
 0x19a   : > { %v3990_v8 = vpop.permute.xlu1 %3989  ;;  %v2069_v4 = vsel %vm341_vm4, %v2067_v23, %v3976_v17  ;;  %v2158_v46 = vsel %vm341_vm4, %v2156_v52, %v3977_v44  ;;  %v2385_v0 = vsel %vm2181_vm8, %v2352_v38, %v2361_v2 }
 0x19b   : > { %v3992_v62 = vunpack.i.h.bf16 %v3990_v8  ;;  %v3991_v41 = vunpack.i.l.bf16 %v3990_v8  ;;  %v3985_v60 = vpop.permute.xlu0 %3984  ;;  %v2972_v8 = vld [vmem:[%s4122_s18 + $0x2c0] sm:$0xff] }
 0x19c   : > { %v3987_v10 = vunpack.i.h.bf16 %v3985_v60  ;;  %v3986_v57 = vunpack.i.l.bf16 %v3985_v60  ;;  %v1326_v44 = vsel %vm329_vm0, %v2972_v8, %v3947_v5 }
 0x19d   : > { %v1983_v35 = vsel %vm347_vm6, %v1981_v49, %v3991_v41  ;;  %v5527_v54 = vsel %vm347_vm6, %v2070_v20, %v3992_v62 }
 0x19e   : > { %v2363_v26 = vrot.slane %v1983_v35, 4  ;;  %v4000_v27 = vpop.permute.xlu1 %3999  ;;  %v2353_v16 = vrot.slane %v1983_v35, 6  ;;  %v2373_v40 = vrot.slane %v5527_v54, 2  ;;  %v2071_v3 = vsel %vm344_vm5, %v2069_v4, %v3986_v57 }
 0x19f   : > { %v3995_v43 = vpop.permute.xlu0 %3994  ;;  %v2160_v50 = vsel %vm344_vm5, %v2158_v46, %v3987_v10  ;;  %v2362_v33 = vrot.slane %v5527_v54, 4  ;;  %v4002_v53 = vunpack.i.h.bf16 %v4000_v27  ;;  %v4001_v28 = vunpack.i.l.bf16 %v4000_v27 }
 0x1a0   : > { %v3997_v30 = vunpack.i.h.bf16 %v3995_v43  ;;  %v3996_v36 = vunpack.i.l.bf16 %v3995_v43  ;;  %v2364_v55 = vsel %vm2181_vm8, %v2361_v2, %v2363_v26  ;;  %v2354_v7 = vsel %vm2168_vm7, %v2350_v11, %v2353_v16  ;;  %v2957_v11 = vld [vmem:[%s4122_s18 + $0x288] sm:$0x3] }
 0x1a1   : > { %v2387_v19 = vsel %vm2194_vm9, %v2364_v55, %v2373_v40  ;;  %v2386_v22 = vsel %vm2181_vm8, %v2354_v7, %v2362_v33  ;;  %v1161_v60 = vsel %vm329_vm0, %v2957_v11, %v3647_v51  ;;  %v1328_v57 = vsel %vm332_vm1, %v1326_v44, %v4002_v53  ;;  %v2973_v16 = vld [vmem:[%s4122_s18 + $0x2c8] sm:$0x3] }
 0x1a2   : > { %v5539_v13 = vsel %vm347_vm6, %v2071_v3, %v3996_v36  ;;  %v5542_v9 = vsel %vm347_vm6, %v2160_v50, %v3997_v30  ;;  %v4010_v24 = vpop.permute.xlu1 %4009  ;;  %v2411_v62 = vpack.c.bf16 %v2387_v19, %v2385_v0  ;;  %v1163_v10 = vsel %vm332_vm1, %v1161_v60, %v4001_v28 }
 0x1a3   : > { %v2365_v39 = vrot.slane %v5539_v13, 4  ;;  %v2374_v6 = vrot.slane %v5542_v9, 2  ;;  %v4005_v14 = vpop.permute.xlu0 %4004  ;;  %v4012_v25 = vunpack.i.h.bf16 %v4010_v24  ;;  %v4011_v17 = vunpack.i.l.bf16 %v4010_v24 }
 0x1a4   : > { %v4007_v2 = vunpack.i.h.bf16 %v4005_v14  ;;  %v4006_v27 = vunpack.i.l.bf16 %v4005_v14 }
 0x1a5   : > { %v2366_v56 = vsel %vm2181_vm8, %v2362_v33, %v2365_v39  ;;  %v1165_v3 = vsel %vm335_vm2, %v1163_v10, %v4011_v17  ;;  %v1330_v50 = vsel %vm335_vm2, %v1328_v57, %v4012_v25 }
 0x1a6   : > { %v4020_v34 = vpop.permute.xlu1 %4019  ;;  %v2388_v15 = vsel %vm2194_vm9, %v2366_v56, %v2374_v6  ;;  %v2151_v33 = vsel %vm329_vm0, %v3133_v58, %v4007_v2  ;;  %v1327_v38 = vsel %vm329_vm0, %v2973_v16, %v4006_v27 }
 0x1a7   : > { %v4015_v48 = vpop.permute.xlu0 %4014  ;;  %v2412_v59 = vpack.c.bf16 %v2388_v15, %v2386_v22  ;;  %v4022_v32 = vunpack.i.h.bf16 %v4020_v34  ;;  %v4021_v23 = vunpack.i.l.bf16 %v4020_v34 }
 0x1a8   : > { %v3189_v37 = vpop.f32.mrb[4].mxu0  ;;  %v4017_v52 = vunpack.i.h.bf16 %v4015_v48  ;;  %v4016_v43 = vunpack.i.l.bf16 %v4015_v48 }
 0x1a9   : > { %v3190_v41 = vpop.f32.mrb[5].mxu0  ;;  %2670 = vmatprep.mubr.bf16.mxu1 %v2412_v59  ;;  %v1167_v56 = vsel %vm338_vm3, %v1165_v3, %v4021_v23  ;;  %v1332_v19 = vsel %vm338_vm3, %v1330_v50, %v4022_v32 }
 0x1aa   : > { %v3191_v29 = vadd.f32 %v3190_v41, %v3189_v37  ;;  %v3192_v49 = vpop.f32.mrb[6].mxu0  ;;  %2671 = vmatmul.mubr.bf16.gmra.mrb[16].mxu1 %v2411_v62  ;;  %v4030_v1 = vpop.permute.xlu1 %4029  ;;  %v1329_v34 = vsel %vm332_vm1, %v1327_v38, %v4016_v43  ;;  %v2153_v22 = vsel %vm332_vm1, %v2151_v33, %v4017_v52 }
 0x1ab   : > { %v4025_v20 = vpop.permute.xlu0 %4024  ;;  %v3193_v35 = vpop.f32.mrb[7].mxu0  ;;  %v4031_v46 = vunpack.i.l.bf16 %v4030_v1  ;;  %v4032_v55 = vunpack.i.h.bf16 %v4030_v1 }
 0x1ac   : > { %v2593_v42 = vadd.f32 %v3191_v29, %v5482_v47  ;;  %v3194_v26 = vadd.f32 %v3193_v35, %v3192_v49  ;;  %v4026_v39 = vunpack.i.l.bf16 %v4025_v20  ;;  %v4027_v51 = vunpack.i.h.bf16 %v4025_v20 }
 0x1ad   : > { %v1169_v15 = vsel %vm341_vm4, %v1167_v56, %v4031_v46  ;;  %v1334_v62 = vsel %vm341_vm4, %v1332_v19, %v4032_v55 }
 0x1ae   : > { %v2688_v4 = vmax.f32 %v2593_v42, 0.0  ;;  %v2596_v30 = vadd.f32 %v3194_v26, %v5482_v47  ;;  %v4040_v36 = vpop.permute.xlu1 %4039  ;;  %v1331_v41 = vsel %vm335_vm2, %v1329_v34, %v4026_v39  ;;  %v2155_v1 = vsel %vm335_vm2, %v2153_v22, %v4027_v51 }
 0x1af   : > { %v4035_v24 = vpop.permute.xlu0 %4034  ;;  %v4041_v7 = vunpack.i.l.bf16 %v4040_v36  ;;  %v4042_v11 = vunpack.i.h.bf16 %v4040_v36 }
 0x1b0   : > { %2713 = vst.msk [vmem:[%s5497_s24 + $0x10] sm:$0xff] %vm332_vm1, %v2688_v4  ;;  %v2689_v14 = vmax.f32 %v2596_v30, 0.0  ;;  %v4037_v59 = vunpack.i.h.bf16 %v4035_v24  ;;  %v4036_v0 = vunpack.i.l.bf16 %v4035_v24  ;;  %v2375_v4 = vrot.slane %v5539_v13, 2 }
 0x1b1   : > { %v1171_v60 = vsel %vm344_vm5, %v1169_v15, %v4041_v7  ;;  %v1336_v20 = vsel %vm344_vm5, %v1334_v62, %v4042_v11 }
 0x1b2   : > { %2714 = vst.msk [vmem:[%s5497_s24 + $0x18] sm:$0xff] %vm332_vm1, %v2689_v14  ;;  %v3195_v5 = vpop.f32.mrb[8].mxu0  ;;  %v4050_v48 = vpop.permute.xlu1 %4049  ;;  %v1333_v58 = vsel %vm338_vm3, %v1331_v41, %v4036_v0  ;;  %v2157_v42 = vsel %vm338_vm3, %v2155_v1, %v4037_v59  ;;  %v2376_v56 = vsel %vm2194_vm9, %v2373_v40, %v2375_v4 }
 0x1b3   : > { %v4052_v8 = vunpack.i.h.bf16 %v4050_v48  ;;  %v4051_v53 = vunpack.i.l.bf16 %v4050_v48  ;;  %v4045_v28 = vpop.permute.xlu0 %4044  ;;  %v3196_v37 = vpop.f32.mrb[9].mxu0  ;;  %v2413_v22 = vpack.c.bf16 %v2376_v56, %v2376_v56 }
 0x1b4   : > { %v3197_v29 = vadd.f32 %v3196_v37, %v3195_v5  ;;  %v3198_v49 = vpop.f32.mrb[10].mxu0  ;;  %v4047_v25 = vunpack.i.h.bf16 %v4045_v28  ;;  %v4046_v17 = vunpack.i.l.bf16 %v4045_v28 }
 0x1b5   : > { %v1173_v44 = vsel %vm347_vm6, %v1171_v60, %v4051_v53  ;;  %v3199_v2 = vpop.f32.mrb[11].mxu0  ;;  %v1338_v26 = vsel %vm347_vm6, %v1336_v20, %v4052_v8 }
 0x1b6   : > { %v2251_v35 = vrot.slane %v1173_v44, 6  ;;  %v2601_v10 = vadd.f32 %v3197_v29, %v5482_v47  ;;  %v3200_v57 = vadd.f32 %v3199_v2, %v3198_v49  ;;  %v1267_v43 = vpop.permute.xlu1 %1266  ;;  %v1335_v46 = vsel %vm341_vm4, %v1333_v58, %v4046_v17 }
 0x1b7   : > { %v4055_v27 = vpop.permute.xlu0 %4054  ;;  %v2159_v30 = vsel %vm341_vm4, %v2157_v42, %v4047_v25  ;;  %v2261_v13 = vrot.slane %v1338_v26, 4 }
 0x1b8   : > { %v2690_v32 = vmax.f32 %v2601_v10, 0.0  ;;  %v2604_v23 = vadd.f32 %v3200_v57, %v5482_v47  ;;  %v4057_v52 = vunpack.i.h.bf16 %v4055_v27  ;;  %v4056_v16 = vunpack.i.l.bf16 %v4055_v27 }
 0x1b9   : > { %v2252_v36 = vsel %vm2168_vm7, %v2248_v63, %v2251_v35 }
 0x1ba   : > { %2715 = vst.msk [vmem:[%s5497_s24 + $0x20] sm:$0xff] %vm332_vm1, %v2690_v32  ;;  %v2691_v3 = vmax.f32 %v2604_v23, 0.0  ;;  %v1337_v50 = vsel %vm344_vm5, %v1335_v46, %v4056_v16  ;;  %v2161_v33 = vsel %vm344_vm5, %v2159_v30, %v4057_v52  ;;  %v2336_v24 = vsel %vm2181_vm8, %v2252_v36, %v2262_v21 }
 0x1bb   : > { %v1339_v55 = vsel %vm347_vm6, %v1337_v50, %v1267_v43  ;;  %v2147_v39 = vpop.permute.xlu0 %2146  ;;  %v2402_v14 = vpack.c.bf16 %v5255_v45, %v2336_v24  ;;  %v2335_v21 = vsel %vm2181_vm8, %v5049_v61, %v2261_v13 }
 0x1bc   : > { %2716 = vst.msk [vmem:[%s5497_s24 + $0x28] sm:$0xff] %vm332_vm1, %v2691_v3  ;;  %v2263_v12 = vrot.slane %v1339_v55, 4  ;;  %v2163_v63 = vsel %vm347_vm6, %v2161_v33, %v2147_v39 }
 0x1bd   : > { %v2377_v7 = vrot.slane %v2163_v63, 2  ;;  %2630 = vmatprep.mubr.bf16.mxu0 %v2402_v14 }
 0x1be   : > { %v2264_v38 = vsel %vm2181_vm8, %v2261_v13, %v2263_v12 }
 0x1bf   : > { %v2337_v45 = vsel %vm2194_vm9, %v2264_v38, %v2273_v18  ;;  %v2378_v19 = vsel %vm2194_vm9, %v2374_v6, %v2377_v7 }
 0x1c0   : > { %v2401_v51 = vpack.c.bf16 %v2337_v45, %v2335_v21  ;;  %v2414_v34 = vpack.c.bf16 %v2378_v19, %v2378_v19 }
 0x1c2   : > { %2631 = vmatmul.mubr.bf16.gmra.mrb[24].mxu0 %v2401_v51  ;;  %2678 = vmatprep.mubr.bf16.mxu1 %v2414_v34 }
 0x1c3   : > { %2679 = vmatmul.mubr.bf16.gmra.mrb[20].mxu1 %v2413_v22 }
 0x1d1   : > { %v3201_v54 = vpop.f32.mrb[12].mxu0 }
 0x1d2   : > { %v3202_v40 = vpop.f32.mrb[13].mxu0 }
 0x1d3   : > { %v3203_v15 = vadd.f32 %v3202_v40, %v3201_v54  ;;  %v3204_v61 = vpop.f32.mrb[14].mxu0 }
 0x1d4   : > { %v3205_v11 = vpop.f32.mrb[15].mxu0 }
 0x1d5   : > { %v2609_v31 = vadd.f32 %v3203_v15, %v5482_v47  ;;  %v3206_v18 = vadd.f32 %v3205_v11, %v3204_v61 }
 0x1d7   : > { %v2692_v9 = vmax.f32 %v2609_v31, 0.0  ;;  %v2612_v6 = vadd.f32 %v3206_v18, %v5482_v47 }
 0x1d9   : > { %2717 = vst.msk [vmem:[%s5497_s24 + $0x30] sm:$0xff] %vm332_vm1, %v2692_v9  ;;  %v2693_v5 = vmax.f32 %v2612_v6, 0.0 }
 0x1db   : > { %2718 = vst.msk [vmem:[%s5497_s24 + $0x38] sm:$0xff] %vm332_vm1, %v2693_v5 }
 0x1e0   : > { %v3207_v48 = vpop.f32.mrb[16].mxu0 }
 0x1e1   : > { %v3208_v59 = vpop.f32.mrb[17].mxu0 }
 0x1e2   : > { %v3209_v0 = vadd.f32 %v3208_v59, %v3207_v48  ;;  %v3210_v8 = vpop.f32.mrb[18].mxu0 }
 0x1e3   : > { %v3211_v53 = vpop.f32.mrb[19].mxu0 }
 0x1e4   : > { %v2617_v28 = vadd.f32 %v3209_v0, %v5482_v47  ;;  %v3212_v37 = vadd.f32 %v3211_v53, %v3210_v8 }
 0x1e6   : > { %v2694_v62 = vmax.f32 %v2617_v28, 0.0  ;;  %v2620_v41 = vadd.f32 %v3212_v37, %v5482_v47 }
 0x1e8   : > { %2719 = vst.msk [vmem:[%s5497_s24 + $0x40] sm:$0xff] %vm332_vm1, %v2694_v62  ;;  %v2695_v60 = vmax.f32 %v2620_v41, 0.0 }
 0x1ea   : > { %2720 = vst.msk [vmem:[%s5497_s24 + $0x48] sm:$0xff] %vm332_vm1, %v2695_v60 }
 0x21c   : > { %v3225_v29 = vpop.f32.mrb[0].mxu1 }
 0x21d   : > { %v3226_v49 = vpop.f32.mrb[1].mxu1 }
 0x21e   : > { %v3227_v1 = vadd.f32 %v3226_v49, %v3225_v29  ;;  %v3228_v44 = vpop.f32.mrb[2].mxu1 }
 0x21f   : > { %v3229_v25 = vpop.f32.mrb[3].mxu1 }
 0x220   : > { %v2641_v17 = vadd.f32 %v3227_v1, %v5482_v47  ;;  %v3230_v2 = vadd.f32 %v3229_v25, %v3228_v44 }
 0x222   : > { %v2700_v20 = vmax.f32 %v2641_v17, 0.0  ;;  %v2644_v35 = vadd.f32 %v3230_v2, %v5482_v47 }
 0x224   : > { %2725 = vst.msk [vmem:[%s5497_s24 + $0x70] sm:$0xff] %vm332_vm1, %v2700_v20  ;;  %v2701_v10 = vmax.f32 %v2644_v35, 0.0 }
 0x226   : > { %2726 = vst.msk [vmem:[%s5497_s24 + $0x78] sm:$0xff] %vm332_vm1, %v2701_v10 }
 0x235   : > { %v3231_v57 = vpop.f32.mrb[4].mxu1 }
 0x236   : > { %v3232_v58 = vpop.f32.mrb[5].mxu1 }
 0x237   : > { %v3233_v42 = vadd.f32 %v3232_v58, %v3231_v57  ;;  %v3234_v26 = vpop.f32.mrb[6].mxu1 }
 0x238   : > { %v3235_v27 = vpop.f32.mrb[7].mxu1 }
 0x239   : > { %v2649_v32 = vadd.f32 %v3233_v42, %v5482_v47  ;;  %v3236_v23 = vadd.f32 %v3235_v27, %v3234_v26 }
 0x23b   : > { %v2702_v52 = vmax.f32 %v2649_v32, 0.0  ;;  %v2652_v16 = vadd.f32 %v3236_v23, %v5482_v47 }
 0x23d   : > { %2727 = vst.msk [vmem:[%s5497_s24 + $0x80] sm:$0xff] %vm332_vm1, %v2702_v52  ;;  %v2703_v43 = vmax.f32 %v2652_v16, 0.0 }
 0x23f   : > { %2728 = vst.msk [vmem:[%s5497_s24 + $0x88] sm:$0xff] %vm332_vm1, %v2703_v43 }
 0x245   : > { %v3237_v4 = vpop.f32.mrb[8].mxu1 }
 0x246   : > { %v3238_v46 = vpop.f32.mrb[9].mxu1 }
 0x247   : > { %v3239_v30 = vadd.f32 %v3238_v46, %v3237_v4  ;;  %v3240_v36 = vpop.f32.mrb[10].mxu1 }
 0x248   : > { %v3241_v3 = vpop.f32.mrb[11].mxu1 }
 0x249   : > { %v2657_v50 = vadd.f32 %v3239_v30, %v5482_v47  ;;  %v3242_v33 = vadd.f32 %v3241_v3, %v3240_v36 }
 0x24b   : > { %v2704_v24 = vmax.f32 %v2657_v50, 0.0  ;;  %v2660_v13 = vadd.f32 %v3242_v33, %v5482_v47 }
 0x24d   : > { %2729 = vst.msk [vmem:[%s5497_s24 + $0x90] sm:$0xff] %vm332_vm1, %v2704_v24  ;;  %v2705_v55 = vmax.f32 %v2660_v13, 0.0 }
 0x24f   : > { %2730 = vst.msk [vmem:[%s5497_s24 + $0x98] sm:$0xff] %vm332_vm1, %v2705_v55 }
 0x25d   : > { %v3243_v39 = vpop.f32.mrb[12].mxu1 }
 0x25e   : > { %v3244_v14 = vpop.f32.mrb[13].mxu1 }
 0x25f   : > { %v3245_v12 = vadd.f32 %v3244_v14, %v3243_v39  ;;  %v3213_v63 = vpop.f32.mrb[20].mxu0  ;;  %v3246_v7 = vpop.f32.mrb[14].mxu1 }
 0x260   : > { %v3214_v38 = vpop.f32.mrb[21].mxu0  ;;  %v3247_v56 = vpop.f32.mrb[15].mxu1 }
 0x261   : > { %v2665_v21 = vadd.f32 %v3245_v12, %v5482_v47  ;;  %v3215_v45 = vadd.f32 %v3214_v38, %v3213_v63  ;;  %v3248_v19 = vadd.f32 %v3247_v56, %v3246_v7  ;;  %v3216_v51 = vpop.f32.mrb[22].mxu0 }
 0x262   : > { %v3217_v34 = vpop.f32.mrb[23].mxu0 }
 0x263   : > { %v2706_v22 = vmax.f32 %v2665_v21, 0.0  ;;  %v2625_v54 = vadd.f32 %v3215_v45, %v5482_v47  ;;  %v2668_v40 = vadd.f32 %v3248_v19, %v5482_v47  ;;  %v3218_v15 = vadd.f32 %v3217_v34, %v3216_v51 }
 0x265   : > { %2731 = vst.msk [vmem:[%s5497_s24 + $0xa0] sm:$0xff] %vm332_vm1, %v2706_v22  ;;  %v2696_v61 = vmax.f32 %v2625_v54, 0.0  ;;  %v2707_v11 = vmax.f32 %v2668_v40, 0.0  ;;  %v2628_v31 = vadd.f32 %v3218_v15, %v5482_v47 }
 0x267   : > { %2721 = vst.msk [vmem:[%s5497_s24 + $0x50] sm:$0xff] %vm332_vm1, %v2696_v61  ;;  %2732 = vst.msk [vmem:[%s5497_s24 + $0xa8] sm:$0xff] %vm332_vm1, %v2707_v11  ;;  %v2697_v18 = vmax.f32 %v2628_v31, 0.0 }
 0x269   : > { %2722 = vst.msk [vmem:[%s5497_s24 + $0x58] sm:$0xff] %vm332_vm1, %v2697_v18 }
 0x27d   : > { %v3249_v9 = vpop.f32.mrb[16].mxu1 }
 0x27e   : > { %v3250_v6 = vpop.f32.mrb[17].mxu1 }
 0x27f   : > { %v3251_v5 = vadd.f32 %v3250_v6, %v3249_v9  ;;  %v3252_v48 = vpop.f32.mrb[18].mxu1 }
 0x280   : > { %v3253_v59 = vpop.f32.mrb[19].mxu1 }
 0x281   : > { %v2673_v0 = vadd.f32 %v3251_v5, %v5482_v47  ;;  %v3254_v8 = vadd.f32 %v3253_v59, %v3252_v48 }
 0x283   : > { %v2708_v53 = vmax.f32 %v2673_v0, 0.0  ;;  %v2676_v28 = vadd.f32 %v3254_v8, %v5482_v47 }
 0x285   : > { %2733 = vst.msk [vmem:[%s5497_s24 + $0xb0] sm:$0xff] %vm332_vm1, %v2708_v53  ;;  %v2709_v37 = vmax.f32 %v2676_v28, 0.0 }
 0x287   : > { %2734 = vst.msk [vmem:[%s5497_s24 + $0xb8] sm:$0xff] %vm332_vm1, %v2709_v37 }
 0x295   : > { %v3219_v62 = vpop.f32.mrb[24].mxu0 }
 0x296   : > { %v3220_v41 = vpop.f32.mrb[25].mxu0  ;;  %v3255_v60 = vpop.f32.mrb[20].mxu1 }
 0x297   : > { %v3221_v29 = vadd.f32 %v3220_v41, %v3219_v62  ;;  %v3222_v49 = vpop.f32.mrb[26].mxu0  ;;  %v3256_v1 = vpop.f32.mrb[21].mxu1 }
 0x298   : > { %v3257_v44 = vadd.f32 %v3256_v1, %v3255_v60  ;;  %v3223_v25 = vpop.f32.mrb[27].mxu0  ;;  %v3258_v17 = vpop.f32.mrb[22].mxu1 }
 0x299   : > { %v2633_v2 = vadd.f32 %v3221_v29, %v5482_v47  ;;  %v3224_v20 = vadd.f32 %v3223_v25, %v3222_v49  ;;  %v3259_v35 = vpop.f32.mrb[23].mxu1 }
 0x29a   : > { %v2681_v10 = vadd.f32 %v3257_v44, %v5482_v47 }
 0x29b   : > { %v2698_v57 = vmax.f32 %v2633_v2, 0.0  ;;  %v2636_v58 = vadd.f32 %v3224_v20, %v5482_v47 }
 0x29c   : > { %v2710_v42 = vmax.f32 %v2681_v10, 0.0 }
 0x29d   : > { %2723 = vst.msk [vmem:[%s5497_s24 + $0x60] sm:$0xff] %vm332_vm1, %v2698_v57  ;;  %v2699_v26 = vmax.f32 %v2636_v58, 0.0 }
 0x29e   : > { %2735 = vst.msk [vmem:[%s5497_s24 + $0xc0] sm:$0xff] %vm332_vm1, %v2710_v42 }
 0x29f   : > { %2724 = vst.msk [vmem:[%s5497_s24 + $0x68] sm:$0xff] %vm332_vm1, %v2699_v26 }
 0x2a0 PF: > { %s13_s12 = sadd.s32 1, %s4080_s12  }
 0x2a1   : > { %p10_p5 = scmp.ge.s32.totalorder %s13_s12, 6  }
 0x2a3   :  { %12 = sbr.rel (!%p10_p5) target bundleno = 1 (0x1), region = 149 }

// kernel: dqlearn_forward.3
= control target key start
LH: loop header
LB: loop body
LE: loop exit
PB: predicated region body
PF: predicated region fallthrough
CT: control target
= control target key end

     0   :  { %14 = vsyncpa [#allocation3], 0  ;;  %s5086_s0 = inlined_call_operand.vmem [shape: f32[8,10,5,64], index: 0, kind: input, shape index: {}]   ;;  %s5087_s1 = inlined_call_operand.vmem [shape: bf16[512,64], index: 1, kind: input, shape index: {}]   ;;  %s5088_s2 = inlined_call_operand.vmem [shape: f32[1,64], index: 2, kind: input, shape index: {}]   ;;  %s5089_s3 = inlined_call_operand.vmem [shape: bf16[576,64], index: 3, kind: input, shape index: {}]   ;;  %s5090_s4 = inlined_call_operand.vmem [shape: f32[1,64], index: 4, kind: input, shape index: {}]   ;;  %s5091_s5 = inlined_call_operand.vmem [shape: bf16[256,512], index: 5, kind: input, shape index: {}]   ;;  %s5092_s6 = inlined_call_operand.vmem [shape: f32[1,512], index: 6, kind: input, shape index: {}]   ;;  %s5093_s7 = inlined_call_operand.vmem [shape: bf16[512,6], index: 7, kind: input, shape index: {}]   ;;  %s5094_s8 = inlined_call_operand.vmem [shape: f32[1,6], index: 8, kind: input, shape index: {}]   ;;  %s5095_s9 = inlined_call_operand.hbm [shape: f32[2,4,6], index: 9, kind: output, shape index: {}]  }
   0x1   :  { %16 = vsyncpa [#allocation3 + $0x1], 0  ;;  %s3921_s30 = smov 0   ;;  %s3923_s10 = smov 0  }
   0x2   :  { %s3925_s11 = smov 0   ;;  %s3927_s12 = smov 0  }
   0x3 LB: > { %s3942_s13 = sadd.s32 4294967295, %s3865_s12   ;;  %s2957_s14 = sadd.s32 4294967294, %s3865_s12   ;;  %s3865_s12 = sphi %s3927_s12, %s5118_s12   ;;  %s3861_s11 = sphi %s3925_s11, %s5117_s11   ;;  %s3857_s10 = sphi %s3923_s10, %s5116_s10   ;;  %s3853_s30 = sphi %s3921_s30, %s5115_s30  }
   0x4   : > { %s3946_s15 = sadd.s32 1, %s3865_s12   ;;  %s223_s16 = sadd.s32 1, %s3861_s11 }
   0x5   : > { %s220_s17 = ssub.s32 %s3865_s12, %s3946_s15  ;;  %p233_p0 = scmp.ne.s32.totalorder %s3861_s11, %s3857_s10 }
   0x6   : > { %p221_p1 = scmp.eq.s32.totalorder %s220_s17, 0  ;;  %p234_p2 = scmp.eq.s32.totalorder %s3942_s13, 1 }
   0x7   : > { %p239_p3 = scmp.ne.s32.totalorder %s3857_s10, %s3853_s30  ;;  %p240_p4 = scmp.eq.s32.totalorder %s2957_s14, 1 }
   0x8   : > { %s3957_s18 = scalar_select %p221_p1, %s3861_s11, %s223_s16  }
   0x9   : > { %p3959_p5 = por %p234_p2, %p233_p0  ;;  %p3963_p6 = por %p240_p4, %p239_p3 }
   0xa   : > { %p2960_p7 = scmp.ge.s32.totalorder %s3865_s12, 1  ;;  %p292_p8 = scmp.lt.s32.totalorder %s3865_s12, 3 }
   0xc   : > { %p293_p9 = pnand %p2960_p7, %p292_p8 }
   0xd   : > { %s2962_s21 = sshll.u32 (!%p293_p9), %s3942_s13, 2  ;;  %v3607_v0 = vld [vmem:[%s5087_s1 + $0x40] sm:$0xff] (!%p293_p9)   ;;  %v3611_v4 = vld [vmem:[%s5087_s1 + $0x48] sm:$0xff] (!%p293_p9)   ;;  %s3867_s28 = smov (!%p293_p9), 64   ;;  %v3615_v38 = vld [vmem:[%s5087_s1 + $0x50] sm:$0xff] (!%p293_p9)   ;;  %vm364_vm0 = vcmask (!%p293_p9), 523264  }
   0xe   : > { %296 = sbr.rel (%p293_p9) target bundleno = 1374 (0x55e), region = 56  ;;  %p330_p10 = scmp.lt.s32.totalorder (!%p293_p9), %s2962_s21, 7  ;;  %v3608_v1 = vld [vmem:[%s5087_s1] sm:$0xff] (!%p293_p9)   ;;  %3214 = vmatprep.subr.bf16.mxu0 (!%p293_p9), %v3607_v0  ;;  %v3612_v5 = vld [vmem:[%s5087_s1 + $0x8] sm:$0xff] (!%p293_p9)   ;;  %v3616_v42 = vld [vmem:[%s5087_s1 + $0x10] sm:$0xff] (!%p293_p9)   ;;  %vm753_vm1 = vcmask (!%p293_p9), 1043456  }
   0xf   : > { %v3609_v2 = vld [vmem:[%s5087_s1 + $0xc0] sm:$0xff] (!%p293_p9)   ;;  %3215 = vmatpush3.bf16.msra.mxu0 (!%p293_p9), %v3608_v1  ;;  %v3613_v6 = vld [vmem:[%s5087_s1 + $0xc8] sm:$0xff] (!%p293_p9)   ;;  %v3617_v44 = vld [vmem:[%s5087_s1 + $0xd0] sm:$0xff] (!%p293_p9)   ;;  %vm1525_vm2 = vcmask (!%p293_p9), 1040384   ;;  %vm1531_vm3 = vcmask (!%p293_p9), 1041408   ;;  %vm1537_vm4 = vcmask (!%p293_p9), 1042432  }
  0x10   : > { %v3610_v3 = vld [vmem:[%s5087_s1 + $0x80] sm:$0xff] (!%p293_p9)   ;;  %3254 = vmatprep.subr.bf16.mxu1 (!%p293_p9), %v3609_v2  ;;  %3216 = vmatprep.subr.bf16.mxu0 (!%p293_p9), %v3611_v4  ;;  %v3614_v35 = vld [vmem:[%s5087_s1 + $0x88] sm:$0xff] (!%p293_p9)   ;;  %v3618_v45 = vld [vmem:[%s5087_s1 + $0x90] sm:$0xff] (!%p293_p9)   ;;  %vm1548_vm5 = vcmask (!%p293_p9), 1044480   ;;  %vm1554_vm6 = vcmask (!%p293_p9), 1045504   ;;  %vm1560_vm7 = vcmask (!%p293_p9), 1046528  }
  0x11   : > { %3255 = vmatpush3.bf16.msra.mxu1 (!%p293_p9), %v3610_v3  ;;  %v3619_v48 = vld [vmem:[%s5087_s1 + $0x58] sm:$0xff] (!%p293_p9)   ;;  %v3623_v58 = vld [vmem:[%s5087_s1 + $0x60] sm:$0xff] (!%p293_p9)   ;;  %v3627_v4 = vld [vmem:[%s5087_s1 + $0x68] sm:$0xff] (!%p293_p9)   ;;  %vm3869_vm8 = vmmov (!%p293_p9), 0   ;;  %s326_s29 = sand.u32 (!%p293_p9), 1, %s3857_s10   ;;  %vm2882_vm9 = vcmask (!%p293_p9), 44032  }
  0x12   : > { %3256 = vmatprep.subr.bf16.mxu1 (!%p293_p9), %v3613_v6  ;;  %v3620_v52 = vld [vmem:[%s5087_s1 + $0x18] sm:$0xff] (!%p293_p9)   ;;  %v3624_v61 = vld [vmem:[%s5087_s1 + $0x20] sm:$0xff] (!%p293_p9)   ;;  %s2885_s27 = scalar_lea.sflag (!%p293_p9), [#allocation3], %s326_s29 }
  0x13   : > { %3217 = vmatpush3.bf16.msra.mxu0 (!%p293_p9), %v3612_v5  ;;  %v3621_v54 = vld [vmem:[%s5087_s1 + $0xd8] sm:$0xff] (!%p293_p9)   ;;  %v3625_v0 = vld [vmem:[%s5087_s1 + $0xe0] sm:$0xff] (!%p293_p9)  }
  0x14   : > { %3218 = vmatprep.subr.bf16.mxu0 (!%p293_p9), %v3615_v38  ;;  %v3622_v55 = vld [vmem:[%s5087_s1 + $0x98] sm:$0xff] (!%p293_p9)   ;;  %v3626_v2 = vld [vmem:[%s5087_s1 + $0xa0] sm:$0xff] (!%p293_p9)  }
  0x15   : > { %s5120_s21 = smov (!%p330_p10, %s2962_s21), 7  ;;  %3257 = vmatpush3.bf16.msra.mxu1 %v3614_v35 }
  0x16   : > { %s3399_s14 = smul.u32 80, %s5120_s21  ;;  %3258 = vmatprep.subr.bf16.mxu1 %v3617_v44 }
  0x17   : > { %3219 = vmatpush3.bf16.msra.mxu0 %v3616_v42 }
  0x18   : > { %s3991_s26 = scalar_lea.vmem %s5086_s0, %s3399_s14  ;;  %3220 = vmatprep.subr.bf16.mxu0 %v3619_v48  ;;  %s2961_s14 = sshll.u32 %s326_s29, 2 }
  0x19   : > { %v2969_v7 = vld [vmem:[%s3991_s26 + $0x19] sm:$0xf]  ;;  %v2965_v9 = vld [vmem:[%s3991_s26 + $0x9] sm:$0xf]  ;;  %v2967_v12 = vld [vmem:[%s3991_s26 + $0x11] sm:$0xf]  ;;  %3259 = vmatpush3.bf16.msra.mxu1 %v3618_v45 }
  0x1a   : > { %v2977_v8 = vld [vmem:[%s3991_s26 + $0x39] sm:$0xf]  ;;  %v2973_v11 = vld [vmem:[%s3991_s26 + $0x29] sm:$0xf]  ;;  %v2975_v13 = vld [vmem:[%s3991_s26 + $0x31] sm:$0xf]  ;;  %3260 = vmatprep.subr.bf16.mxu1 %v3621_v54 }
  0x1b   : > { %v3442_v10 = vpack.i.bf16 %v2977_v8, %v2969_v7  ;;  %v3452_v14 = vpack.i.bf16 %v2973_v11, %v2965_v9  ;;  %v338_v15 = vld [vmem:[%s3991_s26 + $0x1] sm:$0xf]  ;;  %v2981_v16 = vld [vmem:[%s3991_s26 + $0x49] sm:$0xf]  ;;  %v3447_v17 = vpack.i.bf16 %v2975_v13, %v2967_v12  ;;  %v2985_v27 = vld [vmem:[%s3991_s26 + $0x59] sm:$0xf]  ;;  %3221 = vmatpush3.bf16.msra.mxu0 %v3620_v52 }
  0x1c   : > { %v3457_v18 = vpack.i.bf16 %v338_v15, %v2981_v16  ;;  %v2971_v19 = vld [vmem:[%s3991_s26 + $0x21] sm:$0xf]  ;;  %v2989_v21 = vld [vmem:[%s3991_s26 + $0x69] sm:$0xf]  ;;  %v2993_v28 = vld [vmem:[%s3991_s26 + $0x79] sm:$0xf]  ;;  %3222 = vmatprep.subr.bf16.mxu0 %v3623_v58 }
  0x1d   : > { %3443 = vrot.lane.b32.xlu0 %v3442_v10, %s3867_s28  ;;  %3453 = vrot.lane.b32.xlu1 %v3452_v14, %s3867_s28  ;;  %v2979_v20 = vld [vmem:[%s3991_s26 + $0x41] sm:$0xf]  ;;  %v2997_v22 = vld [vmem:[%s3991_s26 + $0x89] sm:$0xf]  ;;  %v3477_v30 = vpack.i.bf16 %v2993_v28, %v2985_v27  ;;  %s328_s22 = scalar_lea.vmem [#allocation2], %s2961_s14 }
  0x1e   : > { %v3462_v23 = vpack.i.bf16 %v2979_v20, %v2971_v19  ;;  %v3467_v24 = vpack.i.bf16 %v2997_v22, %v2989_v21  ;;  %v2987_v25 = vld [vmem:[%s3991_s26 + $0x61] sm:$0xf]  ;;  %v2983_v31 = vld [vmem:[%s3991_s26 + $0x51] sm:$0xf]  ;;  %v3001_v32 = vld [vmem:[%s3991_s26 + $0x99] sm:$0xf]  ;;  %3261 = vmatpush3.bf16.msra.mxu1 %v3622_v55 }
  0x1f   : > { %v2995_v26 = vld [vmem:[%s3991_s26 + $0x81] sm:$0xf]  ;;  %v2991_v33 = vld [vmem:[%s3991_s26 + $0x71] sm:$0xf]  ;;  %v3009_v36 = vld [vmem:[%s3991_s26 + $0xb9] sm:$0xf]  ;;  %v3482_v39 = vpack.i.bf16 %v2983_v31, %v3001_v32  ;;  %3223 = vmatpush3.bf16.msra.mxu0 %v3624_v61  ;;  %3262 = vmatprep.subr.bf16.mxu1 %v3625_v0 }
  0x20   : > { %v3472_v29 = vpack.i.bf16 %v2995_v26, %v2987_v25  ;;  %v2999_v34 = vld [vmem:[%s3991_s26 + $0x91] sm:$0xf]  ;;  %v3017_v37 = vld [vmem:[%s3991_s26 + $0xd9] sm:$0xf]  ;;  %v3005_v46 = vld [vmem:[%s3991_s26 + $0xa9] sm:$0xf]  ;;  %3224 = vmatprep.subr.bf16.mxu0 %v3627_v4 }
  0x21   : > { %3448 = vrot.lane.b32.xlu0 %v3447_v17, %s3867_s28  ;;  %3458 = vrot.lane.b32.xlu1 %v3457_v18, %s3867_s28  ;;  %v3007_v40 = vld [vmem:[%s3991_s26 + $0xb1] sm:$0xf]  ;;  %v3487_v43 = vpack.i.bf16 %v2999_v34, %v2991_v33  ;;  %v3013_v47 = vld [vmem:[%s3991_s26 + $0xc9] sm:$0xf]  ;;  %v3492_v49 = vpack.i.bf16 %v3017_v37, %v3009_v36  ;;  %s2898_s23 = sshll.u32 %s328_s22, 4  ;;  %s5046_s23 = int_to_ptr.vmem [resolvable:$true] %s2898_s23 }
  0x22   : > { %v3015_v41 = vld [vmem:[%s3991_s26 + $0xd1] sm:$0xf]  ;;  %v3003_v50 = vld [vmem:[%s3991_s26 + $0xa1] sm:$0xf]  ;;  %v3021_v51 = vld [vmem:[%s3991_s26 + $0xe9] sm:$0xf]  ;;  %v3502_v59 = vpack.i.bf16 %v3013_v47, %v3005_v46  ;;  %3263 = vmatpush3.bf16.msra.mxu1 %v3626_v2 }
  0x23   : > { %v3497_v53 = vpack.i.bf16 %v3015_v41, %v3007_v40  ;;  %v3011_v56 = vld [vmem:[%s3991_s26 + $0xc1] sm:$0xf]  ;;  %v3029_v60 = vld [vmem:[%s3991_s26 + $0x109] sm:$0xf]  ;;  %v3507_v62 = vpack.i.bf16 %v3003_v50, %v3021_v51  ;;  %v3025_v7 = vld [vmem:[%s3991_s26 + $0xf9] sm:$0xf] }
  0x24   : > { %v3019_v57 = vld [vmem:[%s3991_s26 + $0xe1] sm:$0xf]  ;;  %v3037_v63 = vld [vmem:[%s3991_s26 + $0x129] sm:$0xf]  ;;  %v3033_v9 = vld [vmem:[%s3991_s26 + $0x119] sm:$0xf] }
  0x25   : > { %3463 = vrot.lane.b32.xlu0 %v3462_v23, %s3867_s28  ;;  %3468 = vrot.lane.b32.xlu1 %v3467_v24, %s3867_s28  ;;  %v3027_v1 = vld [vmem:[%s3991_s26 + $0x101] sm:$0xf]  ;;  %v3512_v3 = vpack.i.bf16 %v3019_v57, %v3011_v56  ;;  %v3517_v5 = vpack.i.bf16 %v3037_v63, %v3029_v60  ;;  %v3628_v8 = vld [vmem:[%s5087_s1 + $0x28] sm:$0xff]   ;;  %v3527_v15 = vpack.i.bf16 %v3033_v9, %v3025_v7 }
  0x26   : > { %v3035_v6 = vld [vmem:[%s3991_s26 + $0x121] sm:$0xf]  ;;  %v3023_v10 = vld [vmem:[%s3991_s26 + $0xf1] sm:$0xf]  ;;  %v3041_v11 = vld [vmem:[%s3991_s26 + $0x139] sm:$0xf]  ;;  %3225 = vmatpush3.bf16.msra.mxu0 %v3628_v8 }
  0x27   : > { %v3629_v12 = vld [vmem:[%s5087_s1 + $0xe8] sm:$0xff]   ;;  %v3522_v13 = vpack.i.bf16 %v3035_v6, %v3027_v1  ;;  %v3631_v16 = vld [vmem:[%s5087_s1 + $0x70] sm:$0xff]   ;;  %v3532_v20 = vpack.i.bf16 %v3023_v10, %v3041_v11  ;;  %v3635_v24 = vld [vmem:[%s5087_s1 + $0x78] sm:$0xff]  }
  0x28   : > { %v3630_v14 = vld [vmem:[%s5087_s1 + $0xa8] sm:$0xff]   ;;  %3264 = vmatprep.subr.bf16.mxu1 %v3629_v12  ;;  %v3031_v17 = vld [vmem:[%s3991_s26 + $0x111] sm:$0xf]  ;;  %3226 = vmatprep.subr.bf16.mxu0 %v3631_v16  ;;  %v3636_v25 = vld [vmem:[%s5087_s1 + $0x38] sm:$0xff]  }
  0x29   : > { %3473 = vrot.lane.b32.xlu0 %v3472_v29, %s3867_s28  ;;  %3478 = vrot.lane.b32.xlu1 %v3477_v30, %s3867_s28  ;;  %v3039_v18 = vld [vmem:[%s3991_s26 + $0x131] sm:$0xf]  ;;  %v3637_v26 = vld [vmem:[%s5087_s1 + $0xf8] sm:$0xff]  }
  0x2a   : > { %3265 = vmatpush3.bf16.msra.mxu1 %v3630_v14  ;;  %v3632_v19 = vld [vmem:[%s5087_s1 + $0x30] sm:$0xff]   ;;  %v3537_v21 = vpack.i.bf16 %v3039_v18, %v3031_v17  ;;  %v3638_v27 = vld [vmem:[%s5087_s1 + $0xb8] sm:$0xff]   ;;  %v2964_v34 = vld [vmem:[%s3991_s26 + $0x8] sm:$0xf] }
  0x2b   : > { %3227 = vmatpush3.bf16.msra.mxu0 %v3632_v19  ;;  %v3633_v22 = vld [vmem:[%s5087_s1 + $0xf0] sm:$0xff]   ;;  %v2976_v28 = vld [vmem:[%s3991_s26 + $0x38] sm:$0xf]  ;;  %v2972_v35 = vld [vmem:[%s3991_s26 + $0x28] sm:$0xf] }
  0x2c   : > { %v3634_v23 = vld [vmem:[%s5087_s1 + $0xb0] sm:$0xff]   ;;  %3266 = vmatprep.subr.bf16.mxu1 %v3633_v22  ;;  %3228 = vmatprep.subr.bf16.mxu0 %v3635_v24  ;;  %v2968_v30 = vld [vmem:[%s3991_s26 + $0x18] sm:$0xf]  ;;  %v337_v50 = vld [vmem:[%s3991_s26] sm:$0xf] }
  0x2d   : > { %3483 = vrot.lane.b32.xlu0 %v3482_v39, %s3867_s28  ;;  %3488 = vrot.lane.b32.xlu1 %v3487_v43, %s3867_s28  ;;  %v2974_v40 = vld [vmem:[%s3991_s26 + $0x30] sm:$0xf]  ;;  %v2980_v52 = vld [vmem:[%s3991_s26 + $0x48] sm:$0xf] }
  0x2e   : > { %3267 = vmatpush3.bf16.msra.mxu1 %v3634_v23  ;;  %v2966_v42 = vld [vmem:[%s3991_s26 + $0x10] sm:$0xf]  ;;  %v2978_v63 = vld [vmem:[%s3991_s26 + $0x40] sm:$0xf]  ;;  %v2988_v4 = vld [vmem:[%s3991_s26 + $0x68] sm:$0xf] }
  0x2f   : > { %3229 = vmatpush3.bf16.msra.mxu0 %v3636_v25  ;;  %3268 = vmatprep.subr.bf16.mxu1 %v3637_v26 }
  0x31   : > { %3493 = vrot.lane.b32.xlu0 %v3492_v49, %s3867_s28  ;;  %3498 = vrot.lane.b32.xlu1 %v3497_v53, %s3867_s28 }
  0x32   : > { %3269 = vmatpush3.bf16.msra.mxu1 %v3638_v27  ;;  %v2984_v27 = vld [vmem:[%s3991_s26 + $0x58] sm:$0xf] }
  0x35   : > { %3503 = vrot.lane.b32.xlu0 %v3502_v59, %s3867_s28  ;;  %3508 = vrot.lane.b32.xlu1 %v3507_v62, %s3867_s28  ;;  %v2970_v62 = vld [vmem:[%s3991_s26 + $0x20] sm:$0xf] }
  0x39   : > { %3513 = vrot.lane.b32.xlu0 %v3512_v3, %s3867_s28  ;;  %3518 = vrot.lane.b32.xlu1 %v3517_v5, %s3867_s28  ;;  %v2996_v5 = vld [vmem:[%s3991_s26 + $0x88] sm:$0xf] }
  0x3d   : > { %3523 = vrot.lane.b32.xlu0 %v3522_v13, %s3867_s28  ;;  %3528 = vrot.lane.b32.xlu1 %v3527_v15, %s3867_s28 }
  0x41   : > { %3533 = vrot.lane.b32.xlu0 %v3532_v20, %s3867_s28  ;;  %3538 = vrot.lane.b32.xlu1 %v3537_v21, %s3867_s28  ;;  %v2986_v20 = vld [vmem:[%s3991_s26 + $0x60] sm:$0xf] }
  0x42   : > { %v2994_v21 = vld [vmem:[%s3991_s26 + $0x80] sm:$0xf] }
  0x8f   : > { %v3444_v29 = vpop.permute.xlu0 %3443  ;;  %v3454_v33 = vpop.permute.xlu1 %3453 }
  0x90   : > { %v3446_v31 = vunpack.i.h.bf16 %v3444_v29  ;;  %v3445_v32 = vunpack.i.l.bf16 %v3444_v29  ;;  %v3456_v36 = vunpack.i.h.bf16 %v3454_v33  ;;  %v3455_v37 = vunpack.i.l.bf16 %v3454_v33 }
  0x92   : > { %v400_v38 = vsel %vm364_vm0, %v2976_v28, %v3446_v31  ;;  %v368_v39 = vsel %vm364_vm0, %v2968_v30, %v3445_v32  ;;  %v366_v43 = vsel %vm364_vm0, %v2964_v34, %v3455_v37  ;;  %v384_v44 = vsel %vm364_vm0, %v2972_v35, %v3456_v36  ;;  %v2992_v28 = vld [vmem:[%s3991_s26 + $0x78] sm:$0xf] }
  0x93   : > { %v3449_v41 = vpop.permute.xlu0 %3448  ;;  %v662_v45 = vrot.slane %v368_v39, 4  ;;  %v674_v46 = vrot.slane %v400_v38, 4  ;;  %v3459_v49 = vpop.permute.xlu1 %3458  ;;  %v664_v51 = vrot.slane %v384_v44, 4 }
  0x94   : > { %v3451_v47 = vunpack.i.h.bf16 %v3449_v41  ;;  %v3450_v48 = vunpack.i.l.bf16 %v3449_v41  ;;  %v3461_v53 = vunpack.i.h.bf16 %v3459_v49  ;;  %v3460_v54 = vunpack.i.l.bf16 %v3459_v49  ;;  %v2982_v41 = vld [vmem:[%s3991_s26 + $0x50] sm:$0xf] }
  0x95   : > { %v755_v55 = vsel %vm753_vm1, %v366_v43, %v662_v45  ;;  %v759_v56 = vsel %vm753_vm1, %v384_v44, %v674_v46  ;;  %v757_v11 = vsel %vm753_vm1, %v368_v39, %v664_v51 }
  0x96   : > { %v399_v57 = vsel %vm364_vm0, %v2974_v40, %v3451_v47  ;;  %v367_v58 = vsel %vm364_vm0, %v2966_v42, %v3450_v48  ;;  %v787_v59 = vpack.c.bf16 %v759_v56, %v755_v55  ;;  %v365_v61 = vsel %vm364_vm0, %v337_v50, %v3461_v53  ;;  %v3000_v42 = vld [vmem:[%s3991_s26 + $0x98] sm:$0xf]  ;;  %v2990_v47 = vld [vmem:[%s3991_s26 + $0x70] sm:$0xf] }
  0x97   : > { %v661_v60 = vrot.slane %v367_v58, 4  ;;  %v3464_v0 = vpop.permute.xlu0 %3463  ;;  %v416_v1 = vsel %vm364_vm0, %v2980_v52, %v3460_v54  ;;  %v3469_v6 = vpop.permute.xlu1 %3468  ;;  %v673_v8 = vrot.slane %v399_v57, 4  ;;  %v2998_v48 = vld [vmem:[%s3991_s26 + $0x90] sm:$0xf] }
  0x98   : > { %v3466_v2 = vunpack.i.h.bf16 %v3464_v0  ;;  %v3465_v3 = vunpack.i.l.bf16 %v3464_v0  ;;  %1097 = vmatprep.mubr.bf16.mxu0 %v787_v59  ;;  %v676_v7 = vrot.slane %v416_v1, 4  ;;  %v3471_v9 = vunpack.i.h.bf16 %v3469_v6  ;;  %v3016_v0 = vld [vmem:[%s3991_s26 + $0xd8] sm:$0xf] }
  0x99   : > { %v3470_v10 = vunpack.i.l.bf16 %v3469_v6  ;;  %v754_v15 = vsel %vm753_vm1, %v365_v61, %v661_v60  ;;  %v3006_v6 = vld [vmem:[%s3991_s26 + $0xb0] sm:$0xf] }
  0x9a   : > { %v415_v12 = vsel %vm364_vm0, %v2978_v63, %v3466_v2  ;;  %v383_v13 = vsel %vm364_vm0, %v2970_v62, %v3465_v3  ;;  %v761_v14 = vsel %vm753_vm1, %v400_v38, %v676_v7  ;;  %v4159_v18 = vsel %vm364_vm0, %v2996_v5, %v3471_v9  ;;  %v3008_v63 = vld [vmem:[%s3991_s26 + $0xb8] sm:$0xf]  ;;  %v3014_v7 = vld [vmem:[%s3991_s26 + $0xd0] sm:$0xf] }
  0x9b   : > { %v675_v16 = vrot.slane %v415_v12, 4  ;;  %v663_v17 = vrot.slane %v383_v13, 4  ;;  %v4162_v19 = vsel %vm364_vm0, %v2988_v4, %v3470_v10  ;;  %v3474_v22 = vpop.permute.xlu0 %3473  ;;  %v698_v23 = vrot.slane %v4159_v18, 4  ;;  %v3479_v29 = vpop.permute.xlu1 %3478 }
  0x9c   : > { %v686_v24 = vrot.slane %v4162_v19, 4  ;;  %v3476_v25 = vunpack.i.h.bf16 %v3474_v22  ;;  %v3475_v26 = vunpack.i.l.bf16 %v3474_v22  ;;  %v3481_v30 = vunpack.i.h.bf16 %v3479_v29  ;;  %v3004_v22 = vld [vmem:[%s3991_s26 + $0xa8] sm:$0xf] }
  0x9d   : > { %v3480_v31 = vunpack.i.l.bf16 %v3479_v29  ;;  %v789_v32 = vpack.c.bf16 %v761_v14, %v757_v11  ;;  %v758_v33 = vsel %vm753_vm1, %v383_v13, %v673_v8  ;;  %v756_v37 = vsel %vm753_vm1, %v367_v58, %v663_v17 }
  0x9e   : > { %v4172_v34 = vsel %vm364_vm0, %v2994_v21, %v3476_v25  ;;  %v4175_v35 = vsel %vm364_vm0, %v2986_v20, %v3475_v26  ;;  %v786_v36 = vpack.c.bf16 %v758_v33, %v754_v15  ;;  %v464_v39 = vsel %vm364_vm0, %v2992_v28, %v3481_v30  ;;  %v3020_v30 = vld [vmem:[%s3991_s26 + $0xe8] sm:$0xf] }
  0x9f   : > { %v697_v38 = vrot.slane %v4172_v34, 4  ;;  %v446_v40 = vsel %vm364_vm0, %v2984_v27, %v3480_v31  ;;  %1162 = vmatprep.mubr.bf16.mxu1 %v789_v32  ;;  %v3484_v43 = vpop.permute.xlu0 %3483  ;;  %v685_v44 = vrot.slane %v4175_v35, 4  ;;  %v3489_v49 = vpop.permute.xlu1 %3488  ;;  %v760_v50 = vsel %vm753_vm1, %v399_v57, %v675_v16 }
  0xa0   : > { %1098 = vmatmul.mubr.bf16.vlgmr.msra.gmra.mrb[0].mxu0 %v786_v36  ;;  %v3486_v45 = vunpack.i.h.bf16 %v3484_v43  ;;  %v3485_v46 = vunpack.i.l.bf16 %v3484_v43  ;;  %v3491_v51 = vunpack.i.h.bf16 %v3489_v49  ;;  %v3490_v52 = vunpack.i.l.bf16 %v3489_v49 }
  0xa1   : > { %v788_v53 = vpack.c.bf16 %v760_v50, %v756_v37  ;;  %v763_v54 = vsel %vm753_vm1, %v446_v40, %v686_v24  ;;  %v688_v55 = vrot.slane %v464_v39, 4  ;;  %v767_v59 = vsel %vm753_vm1, %v464_v39, %v698_v23  ;;  %v3012_v23 = vld [vmem:[%s3991_s26 + $0xc8] sm:$0xf] }
  0xa2   : > { %v445_v56 = vsel %vm364_vm0, %v2982_v41, %v3486_v45  ;;  %v496_v58 = vsel %vm364_vm0, %v3000_v42, %v3485_v46  ;;  %v495_v61 = vsel %vm364_vm0, %v2998_v48, %v3491_v51  ;;  %v463_v62 = vsel %vm364_vm0, %v2990_v47, %v3490_v52  ;;  %v3010_v45 = vld [vmem:[%s3991_s26 + $0xc0] sm:$0xf]  ;;  %v3028_v50 = vld [vmem:[%s3991_s26 + $0x108] sm:$0xf] }
  0xa3   : > { %v700_v60 = vrot.slane %v496_v58, 4  ;;  %1163 = vmatmul.mubr.bf16.vlgmr.msra.gmra.mrb[0].mxu1 %v788_v53  ;;  %v791_v57 = vpack.c.bf16 %v767_v59, %v763_v54  ;;  %v3494_v1 = vpop.permute.xlu0 %3493  ;;  %v699_v2 = vrot.slane %v495_v61, 4  ;;  %v687_v3 = vrot.slane %v463_v62, 4  ;;  %v3499_v8 = vpop.permute.xlu1 %3498  ;;  %v3036_v51 = vld [vmem:[%s3991_s26 + $0x128] sm:$0xf] }
  0xa4   : > { %v3496_v4 = vunpack.i.h.bf16 %v3494_v1  ;;  %v3495_v5 = vunpack.i.l.bf16 %v3494_v1  ;;  %v3501_v9 = vunpack.i.h.bf16 %v3499_v8  ;;  %v3500_v10 = vunpack.i.l.bf16 %v3499_v8  ;;  %v3026_v1 = vld [vmem:[%s3991_s26 + $0x100] sm:$0xf]  ;;  %v3024_v8 = vld [vmem:[%s3991_s26 + $0xf8] sm:$0xf] }
  0xa5   : > { %1105 = vmatprep.mubr.bf16.mxu0 %v791_v57  ;;  %v762_v11 = vsel %vm753_vm1, %v445_v56, %v685_v44  ;;  %v766_v12 = vsel %vm753_vm1, %v463_v62, %v697_v38  ;;  %v769_v16 = vsel %vm753_vm1, %v4159_v18, %v700_v60  ;;  %v765_v25 = vsel %vm753_vm1, %v4162_v19, %v688_v55  ;;  %v3002_v18 = vld [vmem:[%s3991_s26 + $0xa0] sm:$0xf] }
  0xa6   : > { %v560_v13 = vsel %vm364_vm0, %v3016_v0, %v3496_v4  ;;  %v528_v14 = vsel %vm364_vm0, %v3008_v63, %v3495_v5  ;;  %v790_v15 = vpack.c.bf16 %v766_v12, %v762_v11  ;;  %v4204_v20 = vsel %vm364_vm0, %v3014_v7, %v3501_v9  ;;  %v3032_v9 = vld [vmem:[%s3991_s26 + $0x118] sm:$0xf] }
  0xa7   : > { %v722_v17 = vrot.slane %v560_v13, 4  ;;  %v4207_v21 = vsel %vm364_vm0, %v3006_v6, %v3500_v10  ;;  %v3504_v24 = vpop.permute.xlu0 %3503  ;;  %v710_v26 = vrot.slane %v528_v14, 4  ;;  %v721_v27 = vrot.slane %v4204_v20, 4  ;;  %v3509_v31 = vpop.permute.xlu1 %3508 }
  0xa8   : > { %1106 = vmatmul.mubr.bf16.gmra.mrb[4].mxu0 %v790_v15  ;;  %v3506_v28 = vunpack.i.h.bf16 %v3504_v24  ;;  %v3505_v29 = vunpack.i.l.bf16 %v3504_v24  ;;  %v3511_v32 = vunpack.i.h.bf16 %v3509_v31  ;;  %v3510_v33 = vunpack.i.l.bf16 %v3509_v31 }
  0xa9   : > { %v793_v36 = vpack.c.bf16 %v769_v16, %v765_v25  ;;  %v764_v37 = vsel %vm753_vm1, %v4175_v35, %v687_v3  ;;  %v709_v19 = vrot.slane %v4207_v21, 4  ;;  %v768_v40 = vsel %vm753_vm1, %v4172_v34, %v699_v2  ;;  %v3018_v35 = vld [vmem:[%s3991_s26 + $0xe0] sm:$0xf] }
  0xaa   : > { %v544_v38 = vsel %vm364_vm0, %v3012_v23, %v3506_v28  ;;  %v526_v39 = vsel %vm364_vm0, %v3004_v22, %v3505_v29  ;;  %v525_v42 = vsel %vm364_vm0, %v3002_v18, %v3511_v32  ;;  %v576_v43 = vsel %vm364_vm0, %v3020_v30, %v3510_v33  ;;  %v3034_v2 = vld [vmem:[%s3991_s26 + $0x120] sm:$0xf]  ;;  %v3022_v28 = vld [vmem:[%s3991_s26 + $0xf0] sm:$0xf]  ;;  %v3040_v29 = vld [vmem:[%s3991_s26 + $0x138] sm:$0xf] }
  0xab   : > { %v712_v41 = vrot.slane %v544_v38, 4  ;;  %1170 = vmatprep.mubr.bf16.mxu1 %v793_v36  ;;  %v792_v44 = vpack.c.bf16 %v768_v40, %v764_v37  ;;  %v3514_v46 = vpop.permute.xlu0 %3513  ;;  %v724_v47 = vrot.slane %v576_v43, 4  ;;  %v3519_v52 = vpop.permute.xlu1 %3518  ;;  %v771_v34 = vsel %vm753_vm1, %v526_v39, %v710_v26  ;;  %v3030_v36 = vld [vmem:[%s3991_s26 + $0x110] sm:$0xf] }
  0xac   : > { %v3516_v48 = vunpack.i.h.bf16 %v3514_v46  ;;  %v3515_v49 = vunpack.i.l.bf16 %v3514_v46  ;;  %v3521_v53 = vunpack.i.h.bf16 %v3519_v52  ;;  %v3520_v54 = vunpack.i.l.bf16 %v3519_v52  ;;  %v3038_v37 = vld [vmem:[%s3991_s26 + $0x130] sm:$0xf]  ;;  %s3803_s26 = scalar_lea.vmem %s5046_s23, 64 }
  0xad   : > { %1171 = vmatmul.mubr.bf16.gmra.mrb[4].mxu1 %v792_v44  ;;  %v775_v55 = vsel %vm753_vm1, %v544_v38, %v722_v17  ;;  %v773_v56 = vsel %vm753_vm1, %v528_v14, %v712_v41  ;;  %v777_v61 = vsel %vm753_vm1, %v560_v13, %v724_v47  ;;  %v770_v14 = vsel %vm753_vm1, %v525_v42, %v709_v19  ;;  %p3804_p11 = scmp.ne.s32.totalorder %s5046_s23, %s3803_s26 }
  0xae   : > { %v575_v58 = vsel %vm364_vm0, %v3018_v35, %v3516_v48  ;;  %v543_v59 = vsel %vm364_vm0, %v3010_v45, %v3515_v49  ;;  %v795_v60 = vpack.c.bf16 %v775_v55, %v771_v34  ;;  %v640_v63 = vsel %vm364_vm0, %v3036_v51, %v3521_v53 }
  0xaf   : > { %v723_v62 = vrot.slane %v575_v58, 4  ;;  %v711_v57 = vrot.slane %v543_v59, 4  ;;  %v608_v0 = vsel %vm364_vm0, %v3028_v50, %v3520_v54  ;;  %v3524_v3 = vpop.permute.xlu0 %3523  ;;  %v746_v4 = vrot.slane %v640_v63, 4  ;;  %v3529_v10 = vpop.permute.xlu1 %3528  ;;  %v4270_v58 = vld [vmem:[%s5088_s2] ss:$0 sm:$0xff]  ;;  %p3805_p12 = pnand %p3804_p11, %p3959_p5 }
  0xb0   : > { %v734_v5 = vrot.slane %v608_v0, 4  ;;  %1113 = vmatprep.mubr.bf16.mxu0 %v795_v60  ;;  %v3526_v6 = vunpack.i.h.bf16 %v3524_v3  ;;  %v3525_v7 = vunpack.i.l.bf16 %v3524_v3  ;;  %v3531_v11 = vunpack.i.h.bf16 %v3529_v10 }
  0xb1   : > { %v3530_v12 = vunpack.i.l.bf16 %v3529_v10  ;;  %v797_v13 = vpack.c.bf16 %v777_v61, %v773_v56  ;;  %v774_v17 = vsel %vm753_vm1, %v543_v59, %v721_v27  ;;  %v772_v22 = vsel %vm753_vm1, %v4207_v21, %v711_v57  ;;  %p3806_p13 = pneg %p3805_p12 }
  0xb2   : > { %v639_v15 = vsel %vm364_vm0, %v3034_v2, %v3526_v6  ;;  %v607_v16 = vsel %vm364_vm0, %v3026_v1, %v3525_v7  ;;  %v624_v25 = vsel %vm364_vm0, %v3032_v9, %v3531_v11  ;;  %v794_v31 = vpack.c.bf16 %v774_v17, %v770_v14 }
  0xb3   : > { %v745_v23 = vrot.slane %v639_v15, 4  ;;  %v733_v24 = vrot.slane %v607_v16, 4  ;;  %v606_v26 = vsel %vm364_vm0, %v3024_v8, %v3530_v12  ;;  %1178 = vmatprep.mubr.bf16.mxu1 %v797_v13  ;;  %v3534_v18 = vpop.permute.xlu0 %3533  ;;  %v736_v30 = vrot.slane %v624_v25, 4  ;;  %v3539_v27 = vpop.permute.xlu1 %3538 }
  0xb4   : > { %v3536_v32 = vunpack.i.h.bf16 %v3534_v18  ;;  %v3535_v33 = vunpack.i.l.bf16 %v3534_v18  ;;  %v3541_v19 = vunpack.i.h.bf16 %v3539_v27  ;;  %v3540_v38 = vunpack.i.l.bf16 %v3539_v27  ;;  %1114 = vmatmul.mubr.bf16.gmra.mrb[8].mxu0 %v794_v31  ;;  %v3641_v31 = vld [vmem:[%s5089_s3 + $0x48] sm:$0xff]   ;;  %v3643_v27 = vld [vmem:[%s5089_s3 + $0x50] sm:$0xff]  }
  0xb5   : > { %v776_v21 = vsel %vm753_vm1, %v4204_v20, %v723_v62  ;;  %v779_v39 = vsel %vm753_vm1, %v606_v26, %v734_v5  ;;  %v783_v43 = vsel %vm753_vm1, %v624_v25, %v746_v4  ;;  %v781_v50 = vsel %vm753_vm1, %v608_v0, %v736_v30  ;;  %v3640_v26 = vld [vmem:[%s5089_s3] sm:$0xff]  }
  0xb6   : > { %v605_v40 = vsel %vm364_vm0, %v3022_v28, %v3536_v32  ;;  %v656_v41 = vsel %vm364_vm0, %v3040_v29, %v3535_v33  ;;  %v796_v42 = vpack.c.bf16 %v776_v21, %v772_v22  ;;  %v655_v45 = vsel %vm364_vm0, %v3038_v37, %v3541_v19  ;;  %v3639_v22 = vld [vmem:[%s5089_s3 + $0x40] sm:$0xff]   ;;  %v3642_v37 = vld [vmem:[%s5089_s3 + $0x8] sm:$0xff]  }
  0xb7   : > { %v748_v44 = vrot.slane %v656_v41, 4  ;;  %v623_v35 = vsel %vm364_vm0, %v3030_v36, %v3540_v38  ;;  %v799_v46 = vpack.c.bf16 %v783_v43, %v779_v39  ;;  %v747_v47 = vrot.slane %v655_v45, 4  ;;  %3294 = vmatprep.subr.bf16.mxu0 %v3639_v22  ;;  %v3654_v22 = vld [vmem:[%s5089_s3 + $0x68] sm:$0xff]  }
  0xb8   : > { %v735_v48 = vrot.slane %v623_v35, 4  ;;  %1179 = vmatmul.mubr.bf16.gmra.mrb[8].mxu1 %v796_v42  ;;  %v778_v20 = vsel %vm753_vm1, %v605_v40, %v733_v24  ;;  %v782_v49 = vsel %vm753_vm1, %v623_v35, %v745_v23  ;;  %3295 = vmatpush3.bf16.msra.mxu0 %v3640_v26 }
  0xb9   : > { %1121 = vmatprep.mubr.bf16.mxu0 %v799_v46  ;;  %v785_v51 = vsel %vm753_vm1, %v640_v63, %v748_v44  ;;  %v798_v52 = vpack.c.bf16 %v782_v49, %v778_v20  ;;  %v784_v54 = vsel %vm753_vm1, %v639_v15, %v747_v47  ;;  %3296 = vmatprep.subr.bf16.mxu0 %v3641_v31  ;;  %v3644_v44 = vld [vmem:[%s5089_s3 + $0x10] sm:$0xff]  }
  0xba   : > { %v801_v34 = vpack.c.bf16 %v785_v51, %v781_v50  ;;  %v780_v53 = vsel %vm753_vm1, %v607_v16, %v735_v48 }
  0xbb   : > { %v800_v55 = vpack.c.bf16 %v784_v54, %v780_v53  ;;  %v3646_v53 = vld [vmem:[%s5089_s3 + $0x58] sm:$0xff]  }
  0xbc   : > { %1186 = vmatprep.mubr.bf16.mxu1 %v801_v34  ;;  %1122 = vmatmul.mubr.bf16.gmra.mrb[12].mxu0 %v798_v52  ;;  %v3645_v34 = vld [vmem:[%s5089_s3 + $0xc0] sm:$0xff]  }
  0xbd   : > { %3297 = vmatpush3.bf16.msra.mxu0 %v3642_v37  ;;  %3316 = vmatprep.subr.bf16.mxu1 %v3645_v34 }
  0xbe   : > { %3298 = vmatprep.subr.bf16.mxu0 %v3643_v27 }
  0xc0   : > { %1187 = vmatmul.mubr.bf16.gmra.mrb[12].mxu1 %v800_v55  ;;  %v3647_v55 = vld [vmem:[%s5089_s3 + $0x80] sm:$0xff]  }
  0xc1   : > { %3299 = vmatpush3.bf16.msra.mxu0 %v3644_v44  ;;  %3317 = vmatpush3.bf16.msra.mxu1 %v3647_v55 }
  0xc2   : > { %3300 = vmatprep.subr.bf16.mxu0 %v3646_v53  ;;  %v3663_v53 = vld [vmem:[%s5089_s3 + $0xa0] sm:$0xff]  }
 0x173   : > { %v3230_v56 = vpop.f32.mrb[0].mxu0 }
 0x174   : > { %v3231_v59 = vpop.f32.mrb[1].mxu0 }
 0x175   : > { %v3232_v60 = vadd.f32 %v3231_v59, %v3230_v56  ;;  %v3233_v61 = vpop.f32.mrb[2].mxu0  ;;  %v3648_v56 = vld [vmem:[%s5089_s3 + $0x18] sm:$0xff]  }
 0x176   : > { %v3270_v62 = vpop.f32.mrb[0].mxu1  ;;  %v3234_v57 = vpop.f32.mrb[3].mxu0  ;;  %3301 = vmatpush3.bf16.msra.mxu0 %v3648_v56 }
 0x177   : > { %v1100_v63 = vadd.f32 %v3232_v60, %v4270_v58  ;;  %v3235_v0 = vadd.f32 %v3234_v57, %v3233_v61  ;;  %v3271_v1 = vpop.f32.mrb[1].mxu1 }
 0x178   : > { %v3272_v2 = vadd.f32 %v3271_v1, %v3270_v62  ;;  %v3273_v3 = vpop.f32.mrb[2].mxu1  ;;  %v3650_v1 = vld [vmem:[%s5089_s3 + $0x60] sm:$0xff]  }
 0x179   : > { %v1103_v4 = vadd.f32 %v3235_v0, %v4270_v58  ;;  %v3274_v5 = vpop.f32.mrb[3].mxu1  ;;  %v3649_v0 = vld [vmem:[%s5089_s3 + $0xc8] sm:$0xff]   ;;  %3302 = vmatprep.subr.bf16.mxu0 %v3650_v1 }
 0x17a   : > { %v1165_v6 = vadd.f32 %v3272_v2, %v1100_v63  ;;  %v3275_v7 = vadd.f32 %v3274_v5, %v3273_v3  ;;  %v3651_v3 = vld [vmem:[%s5089_s3 + $0x88] sm:$0xff]   ;;  %3318 = vmatprep.subr.bf16.mxu1 %v3649_v0 }
 0x17b   : > { %v3236_v8 = vpop.f32.mrb[4].mxu0  ;;  %3319 = vmatpush3.bf16.msra.mxu1 %v3651_v3 }
 0x17c   : > { %v1168_v9 = vadd.f32 %v3275_v7, %v1103_v4  ;;  %v3237_v10 = vpop.f32.mrb[5].mxu0  ;;  %v4287_v32 = vmax.f32 %v1165_v6, 0.0  ;;  %v3652_v4 = vld [vmem:[%s5089_s3 + $0x20] sm:$0xff]  }
 0x17d   : > { %v3238_v11 = vadd.f32 %v3237_v10, %v3236_v8  ;;  %v3239_v12 = vpop.f32.mrb[6].mxu0  ;;  %3303 = vmatpush3.bf16.msra.mxu0 %v3652_v4 }
 0x17e   : > { %v3240_v13 = vpop.f32.mrb[7].mxu0  ;;  %v4282_v29 = vmax.f32 %v1168_v9, 0.0  ;;  %v1204_v42 = vrot.slane %v4287_v32, 1  ;;  %3304 = vmatprep.subr.bf16.mxu0 %v3654_v22  ;;  %v1216_v1 = vrot.slane %v4287_v32, 6 }
 0x17f   : > { %v3241_v14 = vadd.f32 %v3240_v13, %v3239_v12  ;;  %v1108_v15 = vadd.f32 %v3238_v11, %v4270_v58 }
 0x180   : > { %v3276_v16 = vpop.f32.mrb[4].mxu1  ;;  %v1312_v21 = vrot.slane %v4282_v29, 4  ;;  %v1318_v56 = vrot.slane %v4282_v29, 6 }
 0x181   : > { %v3277_v17 = vpop.f32.mrb[5].mxu1  ;;  %v1111_v23 = vadd.f32 %v3241_v14, %v4270_v58 }
 0x182   : > { %v3278_v24 = vadd.f32 %v3277_v17, %v3276_v16  ;;  %v3279_v25 = vpop.f32.mrb[6].mxu1  ;;  %v3653_v17 = vld [vmem:[%s5089_s3 + $0xd0] sm:$0xff]  }
 0x183   : > { %v3280_v28 = vpop.f32.mrb[7].mxu1  ;;  %3320 = vmatprep.subr.bf16.mxu1 %v3653_v17 }
 0x184   : > { %v1173_v18 = vadd.f32 %v3278_v24, %v1108_v15  ;;  %v3281_v30 = vadd.f32 %v3280_v28, %v3279_v25  ;;  %v1210_v25 = vrot.slane %v4287_v32, 4  ;;  %v3655_v28 = vld [vmem:[%s5089_s3 + $0x90] sm:$0xff]  }
 0x185   : > { %3321 = vmatpush3.bf16.msra.mxu1 %v3655_v28 }
 0x186   : > { %v4289_v33 = vmax.f32 %v1173_v18, 0.0  ;;  %v1176_v36 = vadd.f32 %v3281_v30, %v1111_v23  ;;  %v3656_v18 = vld [vmem:[%s5089_s3 + $0x28] sm:$0xff]  }
 0x187   : > { %v3242_v39 = vpop.f32.mrb[8].mxu0  ;;  %3305 = vmatpush3.bf16.msra.mxu0 %v3656_v18 }
 0x188   : > { %v4297_v19 = vmax.f32 %v1176_v36, 0.0  ;;  %v1238_v38 = vrot.slane %v4289_v33, 4  ;;  %v3243_v40 = vpop.f32.mrb[9].mxu0  ;;  %v1232_v12 = vrot.slane %v4289_v33, 1 }
 0x189   : > { %v3244_v45 = vadd.f32 %v3243_v40, %v3242_v39  ;;  %v3245_v35 = vpop.f32.mrb[10].mxu0 }
 0x18a   : > { %v3542_v41 = vpack.i.bf16 %v1312_v21, %v1238_v38  ;;  %v1324_v43 = vrot.slane %v4297_v19, 4  ;;  %v3246_v47 = vpop.f32.mrb[11].mxu0  ;;  %v3657_v21 = vld [vmem:[%s5089_s3 + $0xd8] sm:$0xff]   ;;  %v1330_v34 = vrot.slane %v4297_v19, 6 }
 0x18b   : > { %v3282_v46 = vpop.f32.mrb[8].mxu1  ;;  %v1116_v49 = vadd.f32 %v3244_v45, %v4270_v58  ;;  %v3247_v50 = vadd.f32 %v3246_v47, %v3245_v35  ;;  %3322 = vmatprep.subr.bf16.mxu1 %v3657_v21  ;;  %v1328_v21 = vrot.slane %v4297_v19, 5 }
 0x18c   : > { %v3283_v48 = vpop.f32.mrb[9].mxu1  ;;  %3543 = vrot.lane.b32.xlu0 %v3542_v41, %s3867_s28  ;;  %v3547_v20 = vpack.i.bf16 %v1204_v42, %v1324_v43  ;;  %v3659_v42 = vld [vmem:[%s5089_s3 + $0x98] sm:$0xff]   ;;  %v3660_v43 = vld [vmem:[%s5089_s3 + $0x30] sm:$0xff]  }
 0x18d   : > { %v3284_v51 = vadd.f32 %v3283_v48, %v3282_v46  ;;  %v3285_v52 = vpop.f32.mrb[10].mxu1  ;;  %v1119_v59 = vadd.f32 %v3247_v50, %v4270_v58  ;;  %v1249_v46 = vrot.slane %v4297_v19, 1  ;;  %3323 = vmatpush3.bf16.msra.mxu1 %v3659_v42  ;;  %v1221_v48 = vrot.slane %v4282_v29, 1  ;;  %v3662_v50 = vld [vmem:[%s5089_s3 + $0x78] sm:$0xff]  }
 0x18e   : > { %v3286_v54 = vpop.f32.mrb[11].mxu1  ;;  %3548 = vrot.lane.b32.xlu1 %v3547_v20, %s3867_s28 }
 0x18f   : > { %v1181_v60 = vadd.f32 %v3284_v51, %v1116_v49  ;;  %v3287_v61 = vadd.f32 %v3286_v54, %v3285_v52  ;;  %v3248_v63 = vpop.f32.mrb[12].mxu0  ;;  %v3661_v49 = vld [vmem:[%s5089_s3 + $0xe0] sm:$0xff]   ;;  %v3567_v51 = vpack.i.bf16 %v1249_v46, %v1221_v48  ;;  %v1244_v52 = vrot.slane %v4289_v33, 6  ;;  %v3664_v54 = vld [vmem:[%s5089_s3 + $0x38] sm:$0xff]  }
 0x190   : > { %v3249_v2 = vpop.f32.mrb[13].mxu0  ;;  %3324 = vmatprep.subr.bf16.mxu1 %v3661_v49 }
 0x191   : > { %v4322_v62 = vmax.f32 %v1181_v60, 0.0  ;;  %v1184_v57 = vadd.f32 %v3287_v61, %v1119_v59  ;;  %v3250_v6 = vadd.f32 %v3249_v2, %v3248_v63  ;;  %v3251_v7 = vpop.f32.mrb[14].mxu0  ;;  %3325 = vmatpush3.bf16.msra.mxu1 %v3663_v53  ;;  %v3665_v60 = vld [vmem:[%s5089_s3 + $0xe8] sm:$0xff]   ;;  %v3582_v61 = vpack.i.bf16 %v1330_v34, %v1318_v56 }
 0x192   : > { %v3252_v10 = vpop.f32.mrb[15].mxu0  ;;  %3326 = vmatprep.subr.bf16.mxu1 %v3665_v60 }
 0x193   : > { %v4336_v5 = vmax.f32 %v1184_v57, 0.0  ;;  %v3288_v8 = vpop.f32.mrb[12].mxu1  ;;  %v1265_v9 = vrot.slane %v4322_v62, 4  ;;  %v1124_v13 = vadd.f32 %v3250_v6, %v4270_v58  ;;  %v3253_v14 = vadd.f32 %v3252_v10, %v3251_v7  ;;  %v3666_v7 = vld [vmem:[%s5089_s3 + $0xa8] sm:$0xff]   ;;  %v3669_v10 = vld [vmem:[%s5089_s3 + $0xb0] sm:$0xff]  }
 0x194   : > { %v3289_v11 = vpop.f32.mrb[13].mxu1  ;;  %v1259_v40 = vrot.slane %v4322_v62, 1  ;;  %v1271_v57 = vrot.slane %v4322_v62, 6 }
 0x195   : > { %v3290_v15 = vadd.f32 %v3289_v11, %v3288_v8  ;;  %v3291_v16 = vpop.f32.mrb[14].mxu1  ;;  %v3552_v24 = vpack.i.bf16 %v1265_v9, %v1232_v12  ;;  %v1336_v26 = vrot.slane %v4336_v5, 4  ;;  %v1127_v30 = vadd.f32 %v3253_v14, %v4270_v58  ;;  %v3658_v58 = vld [vmem:[%s5089_s3 + $0x70] sm:$0xff]   ;;  %3327 = vmatpush3.bf16.msra.mxu1 %v3666_v7  ;;  %v3671_v11 = vld [vmem:[%s5089_s3 + $0xf8] sm:$0xff]  }
 0x196   : > { %v3292_v23 = vpop.f32.mrb[15].mxu1  ;;  %3306 = vmatprep.subr.bf16.mxu0 %v3658_v58  ;;  %v1276_v20 = vrot.slane %v4336_v5, 1  ;;  %v1342_v63 = vrot.slane %v4336_v5, 6  ;;  %v5096_v8 = vmov 0.0   ;;  %v3668_v9 = vld [vmem:[%s5089_s3 + $0xf0] sm:$0xff]   ;;  %v3672_v12 = vld [vmem:[%s5089_s3 + $0xb8] sm:$0xff]  }
 0x197   : > { %v1189_v31 = vadd.f32 %v3290_v15, %v1124_v13  ;;  %v3293_v36 = vadd.f32 %v3292_v23, %v3291_v16  ;;  %3553 = vrot.lane.b32.xlu0 %v3552_v24, %s3867_s28  ;;  %v3557_v37 = vpack.i.bf16 %v1210_v25, %v1336_v26  ;;  %3307 = vmatpush3.bf16.msra.mxu0 %v3660_v43  ;;  %v4430_v13 = vrot.slane %v4297_v19, 2 }
 0x198   : > { %3308 = vmatprep.subr.bf16.mxu0 %v3662_v50  ;;  %v3577_v55 = vpack.i.bf16 %v1276_v20, %v1244_v52  ;;  %v3587_v3 = vpack.i.bf16 %v1216_v1, %v1342_v63  ;;  %3328 = vmatprep.subr.bf16.mxu1 %v3668_v9  ;;  %v4433_v14 = vrot.slane %v4282_v29, 2  ;;  %v4436_v15 = vrot.slane %v4336_v5, 2 }
 0x199   : > { %v4357_v27 = vmax.f32 %v1189_v31, 0.0  ;;  %v1192_v38 = vadd.f32 %v3293_v36, %v1127_v30  ;;  %3558 = vrot.lane.b32.xlu1 %v3557_v37, %s3867_s28  ;;  %3329 = vmatpush3.bf16.msra.mxu1 %v3669_v10  ;;  %v1369_v17 = vrot.slane %v4430_v13, 7  ;;  %v1465_v23 = vrot.slane %v4430_v13, 3 }
 0x19a   : > { %3330 = vmatprep.subr.bf16.mxu1 %v3671_v11  ;;  %v1208_v24 = vrot.slane %v4287_v32, 2  ;;  %v1316_v25 = vrot.slane %v4282_v29, 5  ;;  %v1214_v26 = vrot.slane %v4287_v32, 5  ;;  %v1453_v28 = vrot.slane %v4433_v14, 4 }
 0x19b   : > { %v4366_v39 = vmax.f32 %v1192_v38, 0.0  ;;  %v1292_v41 = vrot.slane %v4357_v27, 4  ;;  %v1286_v45 = vrot.slane %v4357_v27, 1  ;;  %3309 = vmatpush3.bf16.msra.mxu0 %v3664_v54  ;;  %v1298_v4 = vrot.slane %v4357_v27, 6 }
 0x19c   : > { %3387 = vmatprep.subr.bf16.mxu0 %v5096_v8  ;;  %v1383_v31 = vrot.slane %v4436_v15, 6  ;;  %v1236_v36 = vrot.slane %v4289_v33, 2  ;;  %v1242_v38 = vrot.slane %v4289_v33, 5  ;;  %v1530_v42 = vsel %vm1525_vm2, %v4433_v14, %v1369_v17 }
 0x19d   : > { %v3562_v44 = vpack.i.bf16 %v1292_v41, %v1259_v40  ;;  %v1348_v35 = vrot.slane %v4366_v39, 4  ;;  %v1303_v59 = vrot.slane %v4366_v39, 1  ;;  %v1354_v2 = vrot.slane %v4366_v39, 6  ;;  %3331 = vmatpush3.bf16.msra.mxu1 %v3672_v12 }
 0x19e   : > { %v4445_v18 = vrot.slane %v4366_v39, 2  ;;  %v1477_v41 = vrot.slane %v4436_v15, 2  ;;  %v1263_v43 = vrot.slane %v4322_v62, 2  ;;  %v1290_v48 = vrot.slane %v4357_v27, 2 }
 0x19f   : > { %3563 = vrot.lane.b32.xlu0 %v3562_v44, %s3867_s28  ;;  %v3572_v47 = vpack.i.bf16 %v1286_v45, %v1348_v35  ;;  %v3592_v0 = vpack.i.bf16 %v1303_v59, %v1271_v57  ;;  %v3597_v6 = vpack.i.bf16 %v1354_v2, %v1298_v4  ;;  %v1269_v44 = vrot.slane %v4322_v62, 5 }
 0x1a0   : > { %v1340_v45 = vrot.slane %v4336_v5, 5  ;;  %v1570_v35 = vsel %vm1525_vm2, %v1453_v28, %v1465_v23  ;;  %v1397_v20 = vrot.slane %v4445_v18, 5  ;;  %v1536_v49 = vsel %vm1531_vm3, %v1530_v42, %v1383_v31 }
 0x1a1   : > { %3573 = vrot.lane.b32.xlu1 %v3572_v47, %s3867_s28  ;;  %v1296_v34 = vrot.slane %v4357_v27, 5  ;;  %v1352_v56 = vrot.slane %v4366_v39, 5  ;;  %v4477_v59 = vsel %vm1531_vm3, %v1570_v35, %v1477_v41 }
 0x1a3   : > { %3568 = vrot.lane.b32.xlu0 %v3567_v51, %s3867_s28 }
 0x1a5   : > { %3578 = vrot.lane.b32.xlu1 %v3577_v55, %s3867_s28 }
 0x1a7   : > { %3583 = vrot.lane.b32.xlu0 %v3582_v61, %s3867_s28 }
 0x1a9   : > { %3593 = vrot.lane.b32.xlu1 %v3592_v0, %s3867_s28 }
 0x1ab   : > { %3588 = vrot.lane.b32.xlu0 %v3587_v3, %s3867_s28  ;;  %v4490_v3 = vsel %vm1537_vm4, %v1536_v49, %v1397_v20 }
 0x1ad   : > { %3598 = vrot.lane.b32.xlu1 %v3597_v6, %s3867_s28 }
 0x1fe   : > { %v3544_v22 = vpop.permute.xlu0 %3543 }
 0x1ff   : > { %v3545_v37 = vunpack.i.l.bf16 %v3544_v22  ;;  %v3546_v58 = vunpack.i.h.bf16 %v3544_v22 }
 0x200   : > { %v3549_v16 = vpop.permute.xlu1 %3548 }
 0x201   : > { %v3550_v30 = vunpack.i.l.bf16 %v3549_v16  ;;  %v3551_v40 = vunpack.i.h.bf16 %v3549_v16  ;;  %v4465_v50 = vsel %vm364_vm0, %v1236_v36, %v3545_v37  ;;  %v4469_v53 = vsel %vm364_vm0, %v1208_v24, %v3546_v58 }
 0x202   : > { %v1366_v0 = vrot.slane %v4465_v50, 7  ;;  %v1418_v4 = vrot.slane %v4465_v50, 4  ;;  %v1450_v6 = vrot.slane %v4469_v53, 4  ;;  %v1496_v10 = vrot.slane %v4469_v53, 1 }
 0x203   : > { %v4459_v46 = vsel %vm364_vm0, %v1236_v36, %v3550_v30  ;;  %v4473_v54 = vsel %vm364_vm0, %v4287_v32, %v3551_v40 }
 0x204   : > { %v1462_v60 = vrot.slane %v4459_v46, 3  ;;  %v1407_v11 = vrot.slane %v4473_v54, 5  ;;  %v1449_v12 = vrot.slane %v4473_v54, 4  ;;  %v1495_v17 = vrot.slane %v4473_v54, 1 }
 0x206   : > { %v1567_v22 = vsel %vm1525_vm2, %v1450_v6, %v1462_v60 }
 0x209   : > { %v3554_v47 = vpop.permute.xlu0 %3553 }
 0x20a   : > { %v3556_v51 = vunpack.i.h.bf16 %v3554_v47  ;;  %v3555_v52 = vunpack.i.l.bf16 %v3554_v47 }
 0x20b   : > { %v3559_v55 = vpop.permute.xlu1 %3558 }
 0x20c   : > { %v4482_v61 = vsel %vm364_vm0, %v4289_v33, %v3555_v52  ;;  %v3561_v57 = vunpack.i.h.bf16 %v3559_v55  ;;  %v3560_v63 = vunpack.i.l.bf16 %v3559_v55  ;;  %v4486_v1 = vsel %vm364_vm0, %v1263_v43, %v3556_v51 }
 0x20d   : > { %v1365_v7 = vrot.slane %v4482_v61, 7  ;;  %v1380_v23 = vrot.slane %v4486_v1, 6  ;;  %v1461_v28 = vrot.slane %v4482_v61, 3  ;;  %v1417_v58 = vrot.slane %v4482_v61, 4 }
 0x20e   : > { %v4496_v9 = vsel %vm364_vm0, %v1208_v24, %v3561_v57  ;;  %v4502_v16 = vsel %vm364_vm0, %v1263_v43, %v3560_v63  ;;  %v1428_v24 = vrot.slane %v4486_v1, 3 }
 0x20f   : > { %v1527_v31 = vsel %vm1525_vm2, %v4496_v9, %v1366_v0  ;;  %v1526_v40 = vsel %vm1525_vm2, %v4473_v54, %v1365_v7  ;;  %v1408_v41 = vrot.slane %v4496_v9, 5  ;;  %v1474_v42 = vrot.slane %v4502_v16, 2 }
 0x210   : > { %v1566_v51 = vsel %vm1525_vm2, %v1449_v12, %v1461_v28  ;;  %v1533_v52 = vsel %vm1531_vm3, %v1527_v31, %v1380_v23 }
 0x211   : > { %v3564_v30 = vpop.permute.xlu0 %3563  ;;  %v1572_v7 = vsel %vm1531_vm3, %v1567_v22, %v1474_v42 }
 0x212   : > { %v3566_v36 = vunpack.i.h.bf16 %v3564_v30  ;;  %v3565_v37 = vunpack.i.l.bf16 %v3564_v30 }
 0x213   : > { %v3574_v43 = vpop.permute.xlu1 %3573 }
 0x214   : > { %v4517_v35 = vsel %vm364_vm0, %v1290_v48, %v3566_v36  ;;  %v4521_v47 = vsel %vm364_vm0, %v4322_v62, %v3565_v37  ;;  %v3576_v20 = vunpack.i.h.bf16 %v3574_v43  ;;  %v3575_v49 = vunpack.i.l.bf16 %v3574_v43 }
 0x215   : > { %v1379_v55 = vrot.slane %v4521_v47, 6  ;;  %v3569_v60 = vpop.permute.xlu0 %3568  ;;  %v1394_v57 = vrot.slane %v4517_v35, 5  ;;  %v1473_v63 = vrot.slane %v4521_v47, 2  ;;  %v1438_v12 = vrot.slane %v4517_v35, 2 }
 0x216   : > { %v4531_v0 = vsel %vm364_vm0, %v4357_v27, %v3576_v20  ;;  %v4534_v6 = vsel %vm364_vm0, %v1290_v48, %v3575_v49  ;;  %v3571_v22 = vunpack.i.h.bf16 %v3569_v60  ;;  %v3570_v42 = vunpack.i.l.bf16 %v3569_v60 }
 0x217   : > { %v1532_v23 = vsel %vm1531_vm3, %v1526_v40, %v1379_v55  ;;  %v1393_v28 = vrot.slane %v4531_v0, 5  ;;  %v3579_v30 = vpop.permute.xlu1 %3578  ;;  %v1571_v37 = vsel %vm1531_vm3, %v1566_v51, %v1473_v63  ;;  %v1485_v43 = vrot.slane %v4531_v0, 1 }
 0x218   : > { %v1486_v48 = vrot.slane %v4534_v6, 1  ;;  %v1539_v40 = vsel %vm1537_vm4, %v1533_v52, %v1394_v57  ;;  %v3581_v2 = vunpack.i.h.bf16 %v3579_v30  ;;  %v4552_v51 = vsel %vm364_vm0, %v4297_v19, %v3571_v22 }
 0x219   : > { %v1538_v20 = vsel %vm1537_vm4, %v1532_v23, %v1393_v28  ;;  %v3584_v49 = vpop.permute.xlu0 %3583  ;;  %v1576_v8 = vsel %vm1537_vm4, %v1571_v37, %v1485_v43  ;;  %v4556_v63 = vsel %vm364_vm0, %v4282_v29, %v3570_v42  ;;  %v3580_v23 = vunpack.i.l.bf16 %v3579_v30 }
 0x21a   : > { %v1543_v52 = vsel %vm753_vm1, %v1538_v20, %v1407_v11  ;;  %v1368_v57 = vrot.slane %v4552_v51, 7  ;;  %v1464_v37 = vrot.slane %v4552_v51, 3  ;;  %v1577_v43 = vsel %vm1537_vm4, %v1572_v7, %v1486_v48 }
 0x21b   : > { %v3594_v60 = vpop.permute.xlu1 %3593  ;;  %v4564_v36 = vsel %vm753_vm1, %v1576_v8, %v1495_v17  ;;  %v1452_v22 = vrot.slane %v4556_v63, 4  ;;  %v4569_v42 = vsel %vm364_vm0, %v4336_v5, %v3581_v2  ;;  %v1256_v20 = vsel %vm364_vm0, %v1242_v38, %v3580_v23 }
 0x21c   : > { %v4579_v8 = vsel %vm1525_vm2, %v4556_v63, %v1368_v57  ;;  %v3586_v33 = vunpack.i.h.bf16 %v3584_v49  ;;  %v3585_v31 = vunpack.i.l.bf16 %v3584_v49  ;;  %v3596_v38 = vunpack.i.h.bf16 %v3594_v60 }
 0x21d   : > { %v3589_v7 = vpop.permute.xlu0 %3588  ;;  %v4585_v55 = vsel %vm1525_vm2, %v1452_v22, %v1464_v37  ;;  %v3595_v23 = vunpack.i.l.bf16 %v3594_v60  ;;  %v1367_v54 = vrot.slane %v1256_v20, 7  ;;  %v1544_v5 = vsel %vm753_vm1, %v1539_v40, %v1408_v41 }
 0x21e   : > { %v3591_v28 = vunpack.i.h.bf16 %v3589_v7  ;;  %v3590_v57 = vunpack.i.l.bf16 %v3589_v7  ;;  %v1335_v2 = vsel %vm364_vm0, %v1328_v21, %v3586_v33  ;;  %v1323_v37 = vsel %vm364_vm0, %v1316_v25, %v3585_v31 }
 0x21f   : > { %v3599_v30 = vpop.permute.xlu1 %3598  ;;  %v1463_v11 = vrot.slane %v1335_v2, 3  ;;  %v1451_v48 = vrot.slane %v1323_v37, 4  ;;  %v4596_v49 = vsel %vm364_vm0, %v4366_v39, %v3596_v38  ;;  %v1419_v7 = vrot.slane %v1256_v20, 4 }
 0x220   : > { %v3601_v22 = vunpack.i.h.bf16 %v3599_v30  ;;  %v3600_v60 = vunpack.i.l.bf16 %v3599_v30  ;;  %v1497_v17 = vrot.slane %v1323_v37, 1  ;;  %v1283_v19 = vsel %vm364_vm0, %v1269_v44, %v3595_v23 }
 0x221   : > { %v1229_v29 = vsel %vm364_vm0, %v1214_v26, %v3591_v28  ;;  %v1396_v25 = vrot.slane %v4596_v49, 5  ;;  %v1488_v21 = vrot.slane %v4596_v49, 1  ;;  %v1381_v31 = vrot.slane %v1283_v19, 6 }
 0x222   : > { %v1347_v33 = vsel %vm364_vm0, %v1340_v45, %v3590_v57  ;;  %v1568_v30 = vsel %vm1525_vm2, %v1451_v48, %v1463_v11  ;;  %v1429_v20 = vrot.slane %v1283_v19, 3  ;;  %v1528_v62 = vsel %vm1525_vm2, %v1229_v29, %v1367_v54 }
 0x223   : > { %v1475_v38 = vrot.slane %v1347_v33, 2  ;;  %v1409_v44 = vrot.slane %v1229_v29, 5  ;;  %v1359_v32 = vsel %vm364_vm0, %v1352_v56, %v3601_v22  ;;  %v1310_v26 = vsel %vm364_vm0, %v1296_v34, %v3600_v60 }
 0x224   : > { %v1507_v45 = vrot.slane %v1347_v33, 7  ;;  %v1487_v11 = vrot.slane %v1359_v32, 1  ;;  %v1395_v48 = vrot.slane %v1310_v26, 5  ;;  %v1534_v54 = vsel %vm1531_vm3, %v1528_v62, %v1381_v31 }
 0x225   : > { %v1573_v28 = vsel %vm1531_vm3, %v1568_v30, %v1475_v38  ;;  %v1550_v39 = vsel %vm1548_vm5, %v1544_v5, %v1418_v4  ;;  %v1582_v27 = vsel %vm753_vm1, %v1577_v43, %v1496_v10  ;;  %v1549_v34 = vsel %vm1548_vm5, %v1543_v52, %v1417_v58 }
 0x226   : > { %v1578_v56 = vsel %vm1537_vm4, %v1573_v28, %v1487_v11  ;;  %v1540_v9 = vsel %vm1537_vm4, %v1534_v54, %v1395_v48  ;;  %v1556_v41 = vsel %vm1554_vm6, %v1550_v39, %v1428_v24  ;;  %v1587_v50 = vsel %vm1548_vm5, %v1582_v27, %v4459_v46 }
 0x227   : > { %v1583_v4 = vsel %vm753_vm1, %v1578_v56, %v1497_v17  ;;  %v1545_v53 = vsel %vm753_vm1, %v1540_v9, %v1409_v44  ;;  %v1562_v10 = vsel %vm1560_vm7, %v1556_v41, %v1438_v12  ;;  %v5100_v58 = vrot.slane %v4502_v16, 7 }
 0x228   : > { %v1588_v52 = vsel %vm1548_vm5, %v1583_v4, %v1335_v2  ;;  %v1551_v1 = vsel %vm1548_vm5, %v1545_v53, %v1419_v7  ;;  %v5101_v24 = vrot.slane %v4534_v6, 6  ;;  %v5102_v43 = vrot.slane %v4521_v47, 3 }
 0x229   : > { %v1592_v40 = vsel %vm1554_vm6, %v1587_v50, %v5100_v58  ;;  %v1517_v23 = vrot.slane %v1359_v32, 6  ;;  %v1593_v35 = vsel %vm1554_vm6, %v1588_v52, %v1507_v45  ;;  %v1557_v12 = vsel %vm1554_vm6, %v1551_v1, %v1429_v20  ;;  %v3673_v50 = vld [vmem:[%s5089_s3 + $0x110] sm:$0xff]   ;;  %v3674_v52 = vld [vmem:[%s5089_s3 + $0x118] sm:$0xff]  }
 0x22a   : > { %v1597_v46 = vsel %vm1560_vm7, %v1592_v40, %v5101_v24  ;;  %v1555_v17 = vsel %vm1554_vm6, %v1549_v34, %v5102_v43  ;;  %v5103_v57 = vrot.slane %v4569_v42, 6  ;;  %v1439_v37 = vrot.slane %v1310_v26, 2  ;;  %v3675_v43 = vld [vmem:[%s5091_s5] ss:$16 sps:$4 sm:$0xff]  }
 0x22b   : > { %v1602_v16 = vpack.c.bf16 %v1597_v46, %v1562_v10  ;;  %v5104_v6 = vrot.slane %v4531_v0, 2  ;;  %v1586_v60 = vsel %vm1548_vm5, %v4564_v36, %v4482_v61  ;;  %v5105_v7 = vrot.slane %v4569_v42, 2  ;;  %v3667_v36 = vld [vmem:[%s5089_s3 + $0x100] sm:$0xff]  }
 0x22c   : > { %v1535_v2 = vsel %vm1531_vm3, %v4579_v8, %v5103_v57  ;;  %v1598_v29 = vsel %vm1560_vm7, %v1593_v35, %v1517_v23  ;;  %v5106_v31 = vrot.slane %v4521_v47, 7  ;;  %v1563_v30 = vsel %vm1560_vm7, %v1557_v12, %v1439_v37  ;;  %v3680_v23 = vld [vmem:[%s5091_s5 + $0xc] ss:$16 sps:$4 sm:$0xff]   ;;  %v3683_v35 = vld [vmem:[%s5091_s5 + $0x24] ss:$16 sps:$4 sm:$0xff]  }
 0x22d   : > { %v1561_v22 = vsel %vm1560_vm7, %v1555_v17, %v5104_v6  ;;  %v1574_v19 = vsel %vm1531_vm3, %v4585_v55, %v5105_v7  ;;  %1936 = vmatprep.mubr.bf16.mxu0 %v1602_v16  ;;  %v1541_v33 = vsel %vm1537_vm4, %v1535_v2, %v1396_v25  ;;  %v5107_v20 = vrot.slane %v4531_v0, 6  ;;  %v3677_v17 = vld [vmem:[%s5091_s5 + $0x4] ss:$16 sps:$4 sm:$0xff]   ;;  %v3686_v12 = vld [vmem:[%s5091_s5 + $0x2c] ss:$16 sps:$4 sm:$0xff]  }
 0x22e   : > { %v1591_v8 = vsel %vm1554_vm6, %v1586_v60, %v5106_v31  ;;  %v5108_v55 = vrot.slane %v4556_v63, 5  ;;  %v1579_v47 = vsel %vm1537_vm4, %v1574_v19, %v1488_v21  ;;  %v1440_v44 = vrot.slane %v4596_v49, 2  ;;  %2449 = vmatprep.subr.bf16.mxu1 %v3677_v17  ;;  %v3681_v16 = vld [vmem:[%s5091_s5 + $0x20] ss:$16 sps:$4 sm:$0xff]   ;;  %v3684_v57 = vld [vmem:[%s5091_s5 + $0x28] ss:$16 sps:$4 sm:$0xff]  }
 0x22f   : > { %v1596_v61 = vsel %vm1560_vm7, %v1591_v8, %v5107_v20  ;;  %v5109_v25 = vrot.slane %v4552_v51, 4  ;;  %v5110_v0 = vrot.slane %v4556_v63, 1  ;;  %v1518_v5 = vrot.slane %v4596_v49, 6  ;;  %v3689_v2 = vld [vmem:[%s5091_s5 + $0x44] ss:$16 sps:$4 sm:$0xff]  }
 0x230   : > { %v1546_v38 = vsel %vm753_vm1, %v1541_v33, %v5108_v55  ;;  %v1601_v62 = vpack.c.bf16 %v1596_v61, %v1561_v22  ;;  %v5111_v45 = vrot.slane %v4569_v42, 3  ;;  %v5112_v11 = vrot.slane %v4445_v18, 1  ;;  %v3692_v37 = vld [vmem:[%s5091_s5 + $0x4c] ss:$16 sps:$4 sm:$0xff]   ;;  %v3687_v6 = vld [vmem:[%s5091_s5 + $0x40] ss:$16 sps:$4 sm:$0xff]  }
 0x231   : > { %v1552_v32 = vsel %vm1548_vm5, %v1546_v38, %v5109_v25  ;;  %v1584_v26 = vsel %vm753_vm1, %v1579_v47, %v5110_v0  ;;  %v5113_v63 = vrot.slane %v4569_v42, 7  ;;  %v1411_v49 = vrot.slane %v4433_v14, 5  ;;  %v3690_v22 = vld [vmem:[%s5091_s5 + $0x48] ss:$16 sps:$4 sm:$0xff]   ;;  %v3695_v60 = vld [vmem:[%s5091_s5 + $0x64] ss:$16 sps:$4 sm:$0xff]  }
 0x232   : > { %v1558_v28 = vsel %vm1554_vm6, %v1552_v32, %v5111_v45  ;;  %v1589_v21 = vsel %vm1548_vm5, %v1584_v26, %v4552_v51  ;;  %v1580_v48 = vsel %vm1537_vm4, %v4477_v59, %v5112_v11  ;;  %1937 = vmatmul.mubr.bf16.vlgmr.msra.gmra.mrb[16].mxu0 %v1601_v62  ;;  %v1499_v27 = vrot.slane %v4433_v14, 1  ;;  %v3670_v51 = vld [vmem:[%s5089_s3 + $0x108] sm:$0xff]   ;;  %v3693_v19 = vld [vmem:[%s5091_s5 + $0x60] ss:$16 sps:$4 sm:$0xff]   ;;  %v3701_v31 = vld [vmem:[%s5091_s5 + $0x84] ss:$16 sps:$4 sm:$0xff]  }
 0x233   : > { %v1564_v54 = vsel %vm1560_vm7, %v1558_v28, %v1440_v44  ;;  %v1594_v39 = vsel %vm1554_vm6, %v1589_v21, %v5113_v63  ;;  %v1603_v34 = vpack.c.bf16 %v1598_v29, %v1563_v30  ;;  %3388 = vmatpush3.bf16.msra.mxu0 %v3667_v36  ;;  %v5114_v59 = vmov 0.0   ;;  %v3698_v7 = vld [vmem:[%s5091_s5 + $0x6c] ss:$16 sps:$4 sm:$0xff]   ;;  %v3696_v29 = vld [vmem:[%s5091_s5 + $0x68] ss:$16 sps:$4 sm:$0xff]  }
 0x234   : > { %v1599_v56 = vsel %vm1560_vm7, %v1594_v39, %v1518_v5  ;;  %3395 = vmatprep.mubr.msk.bf16.mxu0 %vm3869_vm8, %v5114_v59  ;;  %3389 = vmatprep.subr.bf16.mxu0 %v5114_v59  ;;  %v1547_v9 = vsel %vm753_vm1, %v4490_v3, %v1411_v49  ;;  %v1585_v41 = vsel %vm753_vm1, %v1580_v48, %v1499_v27  ;;  %v1421_v14 = vrot.slane %v4430_v13, 4  ;;  %v3704_v8 = vld [vmem:[%s5091_s5 + $0x8c] ss:$16 sps:$4 sm:$0xff]   ;;  %v3699_v33 = vld [vmem:[%s5091_s5 + $0x80] ss:$16 sps:$4 sm:$0xff]  }
 0x235   : > { %v1604_v42 = vpack.c.bf16 %v1599_v56, %v1564_v54  ;;  %v1590_v53 = vsel %vm1548_vm5, %v1585_v41, %v4430_v13  ;;  %v1431_v3 = vrot.slane %v4436_v15, 3  ;;  %v1509_v10 = vrot.slane %v4436_v15, 7  ;;  %v3702_v30 = vld [vmem:[%s5091_s5 + $0x88] ss:$16 sps:$4 sm:$0xff]   ;;  %v3707_v20 = vld [vmem:[%s5091_s5 + $0xa4] ss:$16 sps:$4 sm:$0xff]  }
 0x236   : > { %v1553_v4 = vsel %vm1548_vm5, %v1547_v9, %v1421_v14  ;;  %v1441_v1 = vrot.slane %v4445_v18, 2  ;;  %v1519_v24 = vrot.slane %v4445_v18, 6  ;;  %v3678_v18 = vld [vmem:[%s5091_s5 + $0x8] ss:$16 sps:$4 sm:$0xff]   ;;  %v3710_v61 = vld [vmem:[%s5091_s5 + $0xac] ss:$16 sps:$4 sm:$0xff]  }
 0x237   : > { %1977 = vmatprep.mubr.bf16.mxu1 %v1604_v42  ;;  %3390 = vmatpush3.bf16.msra.mxu0 %v3670_v51  ;;  %v1559_v58 = vsel %vm1554_vm6, %v1553_v4, %v1431_v3  ;;  %v1595_v40 = vsel %vm1554_vm6, %v1590_v53, %v1509_v10  ;;  %v3705_v36 = vld [vmem:[%s5091_s5 + $0xa0] ss:$16 sps:$4 sm:$0xff]   ;;  %v3708_v55 = vld [vmem:[%s5091_s5 + $0xa8] ss:$16 sps:$4 sm:$0xff]   ;;  %v3713_v38 = vld [vmem:[%s5091_s5 + $0xc4] ss:$16 sps:$4 sm:$0xff]  }
 0x238   : > { %1978 = vmatmul.mubr.bf16.vlgmr.msra.gmra.mrb[16].mxu1 %v1603_v34  ;;  %3391 = vmatprep.subr.bf16.mxu0 %v5114_v59  ;;  %v1565_v13 = vsel %vm1560_vm7, %v1559_v58, %v1441_v1  ;;  %v1600_v46 = vsel %vm1560_vm7, %v1595_v40, %v1519_v24  ;;  %v3716_v47 = vld [vmem:[%s5091_s5 + $0xcc] ss:$16 sps:$4 sm:$0xff]   ;;  %v3711_v62 = vld [vmem:[%s5091_s5 + $0xc0] ss:$16 sps:$4 sm:$0xff]   ;;  %v3714_v44 = vld [vmem:[%s5091_s5 + $0xc8] ss:$16 sps:$4 sm:$0xff]  }
 0x239   : > { %v1605_v15 = vpack.c.bf16 %v1600_v46, %v1565_v13  ;;  %2450 = vmatpush1.bf16.msra.mxu1 %v3675_v43  ;;  %v3719_v25 = vld [vmem:[%s5091_s5 + $0xe4] ss:$16 sps:$4 sm:$0xff]   ;;  %v3722_v32 = vld [vmem:[%s5091_s5 + $0xec] ss:$16 sps:$4 sm:$0xff]   ;;  %v3717_v0 = vld [vmem:[%s5091_s5 + $0xe0] ss:$16 sps:$4 sm:$0xff]  }
 0x23a   : > { %2451 = vmatprep.subr.bf16.mxu1 %v3683_v35  ;;  %v3720_v26 = vld [vmem:[%s5091_s5 + $0xe8] ss:$16 sps:$4 sm:$0xff]   ;;  %v3725_v5 = vld [vmem:[%s5091_s5 + $0x104] ss:$16 sps:$4 sm:$0xff]   ;;  %v3728_v45 = vld [vmem:[%s5091_s5 + $0x10c] ss:$16 sps:$4 sm:$0xff]  }
 0x23b   : > { %3392 = vmatpush3.bf16.msra.mxu0 %v3673_v50  ;;  %v3723_v28 = vld [vmem:[%s5091_s5 + $0x100] ss:$16 sps:$4 sm:$0xff]   ;;  %v3726_v21 = vld [vmem:[%s5091_s5 + $0x108] ss:$16 sps:$4 sm:$0xff]   ;;  %v3731_v11 = vld [vmem:[%s5091_s5 + $0x124] ss:$16 sps:$4 sm:$0xff]  }
 0x23c   : > { %3393 = vmatprep.subr.bf16.mxu0 %v5114_v59  ;;  %v3734_v48 = vld [vmem:[%s5091_s5 + $0x12c] ss:$16 sps:$4 sm:$0xff]   ;;  %v3729_v54 = vld [vmem:[%s5091_s5 + $0x120] ss:$16 sps:$4 sm:$0xff]   ;;  %v3732_v63 = vld [vmem:[%s5091_s5 + $0x128] ss:$16 sps:$4 sm:$0xff]  }
 0x23d   : > { %2452 = vmatpush1.bf16.msra.mxu1 %v3681_v16  ;;  %v3737_v39 = vld [vmem:[%s5091_s5 + $0x144] ss:$16 sps:$4 sm:$0xff]   ;;  %v3740_v49 = vld [vmem:[%s5091_s5 + $0x14c] ss:$16 sps:$4 sm:$0xff]   ;;  %v3735_v27 = vld [vmem:[%s5091_s5 + $0x140] ss:$16 sps:$4 sm:$0xff]  }
 0x23e   : > { %2453 = vmatprep.subr.bf16.mxu1 %v3689_v2  ;;  %v3738_v34 = vld [vmem:[%s5091_s5 + $0x148] ss:$16 sps:$4 sm:$0xff]   ;;  %v3743_v51 = vld [vmem:[%s5091_s5 + $0x164] ss:$16 sps:$4 sm:$0xff]   ;;  %v3746_v56 = vld [vmem:[%s5091_s5 + $0x16c] ss:$16 sps:$4 sm:$0xff]  }
 0x23f   : > { %3394 = vmatpush3.bf16.msra.mxu0 %v3674_v52  ;;  %v3741_v59 = vld [vmem:[%s5091_s5 + $0x160] ss:$16 sps:$4 sm:$0xff]   ;;  %v3744_v42 = vld [vmem:[%s5091_s5 + $0x168] ss:$16 sps:$4 sm:$0xff]   ;;  %v3749_v9 = vld [vmem:[%s5091_s5 + $0x184] ss:$16 sps:$4 sm:$0xff]  }
 0x240   : > { %2490 = vmatprep.subr.bf16.mxu0 %v3680_v23  ;;  %v3752_v41 = vld [vmem:[%s5091_s5 + $0x18c] ss:$16 sps:$4 sm:$0xff]   ;;  %v3747_v14 = vld [vmem:[%s5091_s5 + $0x180] ss:$16 sps:$4 sm:$0xff]   ;;  %v3750_v50 = vld [vmem:[%s5091_s5 + $0x188] ss:$16 sps:$4 sm:$0xff]  }
 0x241   : > { %2454 = vmatpush1.bf16.msra.mxu1 %v3687_v6  ;;  %v3755_v4 = vld [vmem:[%s5091_s5 + $0x1a4] ss:$16 sps:$4 sm:$0xff]   ;;  %v3758_v53 = vld [vmem:[%s5091_s5 + $0x1ac] ss:$16 sps:$4 sm:$0xff]   ;;  %v3753_v3 = vld [vmem:[%s5091_s5 + $0x1a0] ss:$16 sps:$4 sm:$0xff]  }
 0x242   : > { %3396 = vmatmul.mubr.msk.bf16.vlgmr.msra.gmra.mrb[20].mxu0 %vm364_vm0, %v1605_v15  ;;  %2455 = vmatprep.subr.bf16.mxu1 %v3695_v60  ;;  %v3756_v10 = vld [vmem:[%s5091_s5 + $0x1a8] ss:$16 sps:$4 sm:$0xff]   ;;  %v3761_v58 = vld [vmem:[%s5091_s5 + $0x1c4] ss:$16 sps:$4 sm:$0xff]   ;;  %v3764_v40 = vld [vmem:[%s5091_s5 + $0x1cc] ss:$16 sps:$4 sm:$0xff]  }
 0x243   : > { %2491 = vmatpush1.bf16.msra.mxu0 %v3678_v18  ;;  %v3759_v52 = vld [vmem:[%s5091_s5 + $0x1c0] ss:$16 sps:$4 sm:$0xff]   ;;  %v3762_v1 = vld [vmem:[%s5091_s5 + $0x1c8] ss:$16 sps:$4 sm:$0xff]  }
 0x244   : > { %2492 = vmatprep.subr.bf16.mxu0 %v3686_v12  ;;  %v3075_v17 = vld [vmem:[%s5090_s4] ss:$0 sm:$0xff] }
 0x245   : > { %2456 = vmatpush1.bf16.msra.mxu1 %v3693_v19  ;;  %v3770_v19 = vld [vmem:[%s5091_s5 + $0x1ec] ss:$16 sps:$4 sm:$0xff]  }
 0x246   : > { %2457 = vmatprep.subr.bf16.mxu1 %v3701_v31  ;;  %v3765_v31 = vld [vmem:[%s5091_s5 + $0x1e0] ss:$16 sps:$4 sm:$0xff]  }
 0x247   : > { %2493 = vmatpush1.bf16.msra.mxu0 %v3684_v57 }
 0x248   : > { %2494 = vmatprep.subr.bf16.mxu0 %v3692_v37 }
 0x249   : > { %2458 = vmatpush1.bf16.msra.mxu1 %v3699_v33 }
 0x24a   : > { %2459 = vmatprep.subr.bf16.mxu1 %v3707_v20 }
 0x24b   : > { %2495 = vmatpush1.bf16.msra.mxu0 %v3690_v22 }
 0x24c   : > { %2496 = vmatprep.subr.bf16.mxu0 %v3698_v7  ;;  %v3767_v7 = vld [vmem:[%s5091_s5 + $0x1e4] ss:$16 sps:$4 sm:$0xff]  }
 0x24d   : > { %2460 = vmatpush1.bf16.msra.mxu1 %v3705_v36 }
 0x24e   : > { %2461 = vmatprep.subr.bf16.mxu1 %v3713_v38  ;;  %v3771_v38 = vld [vmem:[%s5093_s7 + $0x40] sm:$0xff]  }
 0x24f   : > { %2497 = vmatpush1.bf16.msra.mxu0 %v3696_v29 }
 0x250   : > { %2498 = vmatprep.subr.bf16.mxu0 %v3704_v8  ;;  %v3768_v8 = vld [vmem:[%s5091_s5 + $0x1e8] ss:$16 sps:$4 sm:$0xff]  }
 0x251   : > { %2462 = vmatpush1.bf16.msra.mxu1 %v3711_v62 }
 0x252   : > { %2463 = vmatprep.subr.bf16.mxu1 %v3719_v25 }
 0x253   : > { %2499 = vmatpush1.bf16.msra.mxu0 %v3702_v30 }
 0x254   : > { %2500 = vmatprep.subr.bf16.mxu0 %v3710_v61 }
 0x255   : > { %2464 = vmatpush1.bf16.msra.mxu1 %v3717_v0 }
 0x256   : > { %2465 = vmatprep.subr.bf16.mxu1 %v3725_v5 }
 0x257   : > { %2501 = vmatpush1.bf16.msra.mxu0 %v3708_v55 }
 0x258   : > { %2502 = vmatprep.subr.bf16.mxu0 %v3716_v47  ;;  %v3772_v47 = vld [vmem:[%s5093_s7 + $0xc0] sm:$0xff]  }
 0x259   : > { %2466 = vmatpush1.bf16.msra.mxu1 %v3723_v28 }
 0x25a   : > { %2467 = vmatprep.subr.bf16.mxu1 %v3731_v11 }
 0x25b   : > { %2503 = vmatpush1.bf16.msra.mxu0 %v3714_v44 }
 0x25c   : > { %2504 = vmatprep.subr.bf16.mxu0 %v3722_v32 }
 0x25d   : > { %2468 = vmatpush1.bf16.msra.mxu1 %v3729_v54  ;;  %v3774_v54 = vld [vmem:[%s5093_s7 + $0x80] sm:$0xff]  }
 0x25e   : > { %2469 = vmatprep.subr.bf16.mxu1 %v3737_v39  ;;  %v3776_v39 = vld [vmem:[%s5093_s7 + $0xc8] sm:$0xff]  }
 0x25f   : > { %2505 = vmatpush1.bf16.msra.mxu0 %v3720_v26 }
 0x260   : > { %2506 = vmatprep.subr.bf16.mxu0 %v3728_v45 }
 0x261   : > { %2470 = vmatpush1.bf16.msra.mxu1 %v3735_v27  ;;  %v3778_v27 = vld [vmem:[%s5093_s7 + $0x88] sm:$0xff]  }
 0x262   : > { %2471 = vmatprep.subr.bf16.mxu1 %v3743_v51  ;;  %v3780_v51 = vld [vmem:[%s5093_s7 + $0xd0] sm:$0xff]  }
 0x263   : > { %2507 = vmatpush1.bf16.msra.mxu0 %v3726_v21 }
 0x264   : > { %2508 = vmatprep.subr.bf16.mxu0 %v3734_v48  ;;  %v3773_v48 = vld [vmem:[%s5093_s7] sm:$0xff]  }
 0x265   : > { %2472 = vmatpush1.bf16.msra.mxu1 %v3741_v59  ;;  %v3782_v59 = vld [vmem:[%s5093_s7 + $0x90] sm:$0xff]  }
 0x266   : > { %2473 = vmatprep.subr.bf16.mxu1 %v3749_v9  ;;  %v3784_v9 = vld [vmem:[%s5093_s7 + $0xd8] sm:$0xff]  }
 0x267   : > { %2509 = vmatpush1.bf16.msra.mxu0 %v3732_v63  ;;  %v3775_v63 = vld [vmem:[%s5093_s7 + $0x48] sm:$0xff]  }
 0x268   : > { %2510 = vmatprep.subr.bf16.mxu0 %v3740_v49  ;;  %v3777_v49 = vld [vmem:[%s5093_s7 + $0x8] sm:$0xff]  }
 0x269   : > { %2474 = vmatpush1.bf16.msra.mxu1 %v3747_v14  ;;  %v3786_v14 = vld [vmem:[%s5093_s7 + $0x98] sm:$0xff]  }
 0x26a   : > { %2475 = vmatprep.subr.bf16.mxu1 %v3755_v4  ;;  %v3788_v4 = vld [vmem:[%s5093_s7 + $0xe0] sm:$0xff]  }
 0x26b   : > { %2511 = vmatpush1.bf16.msra.mxu0 %v3738_v34  ;;  %v3779_v34 = vld [vmem:[%s5093_s7 + $0x50] sm:$0xff]  }
 0x26c   : > { %2512 = vmatprep.subr.bf16.mxu0 %v3746_v56  ;;  %v3781_v56 = vld [vmem:[%s5093_s7 + $0x10] sm:$0xff]  }
 0x26d   : > { %2476 = vmatpush1.bf16.msra.mxu1 %v3753_v3  ;;  %v3790_v3 = vld [vmem:[%s5093_s7 + $0xa0] sm:$0xff]  }
 0x26e   : > { %2477 = vmatprep.subr.bf16.mxu1 %v3761_v58  ;;  %v3792_v58 = vld [vmem:[%s5093_s7 + $0xe8] sm:$0xff]  }
 0x26f   : > { %2513 = vmatpush1.bf16.msra.mxu0 %v3744_v42  ;;  %v3783_v42 = vld [vmem:[%s5093_s7 + $0x58] sm:$0xff]  }
 0x270   : > { %2514 = vmatprep.subr.bf16.mxu0 %v3752_v41  ;;  %v3785_v41 = vld [vmem:[%s5093_s7 + $0x18] sm:$0xff]  }
 0x271   : > { %2478 = vmatpush1.bf16.msra.mxu1 %v3759_v52  ;;  %v3794_v52 = vld [vmem:[%s5093_s7 + $0xa8] sm:$0xff]  }
 0x272   : > { %2479 = vmatprep.subr.bf16.mxu1 %v3767_v7 }
 0x273   : > { %2515 = vmatpush1.bf16.msra.mxu0 %v3750_v50  ;;  %v3787_v50 = vld [vmem:[%s5093_s7 + $0x60] sm:$0xff]  }
 0x274   : > { %2516 = vmatprep.subr.bf16.mxu0 %v3758_v53  ;;  %v3789_v53 = vld [vmem:[%s5093_s7 + $0x20] sm:$0xff]  }
 0x275   : > { %2480 = vmatpush1.bf16.msra.mxu1 %v3765_v31 }
 0x276   : > { %3343 = vmatprep.subr.bf16.mxu1 %v3771_v38 }
 0x277   : > { %2517 = vmatpush1.bf16.msra.mxu0 %v3756_v10  ;;  %v3791_v10 = vld [vmem:[%s5093_s7 + $0x68] sm:$0xff]  }
 0x278   : > { %2518 = vmatprep.subr.bf16.mxu0 %v3764_v40  ;;  %v3793_v40 = vld [vmem:[%s5093_s7 + $0x28] sm:$0xff]  }
 0x27b   : > { %2519 = vmatpush1.bf16.msra.mxu0 %v3762_v1  ;;  %v3795_v1 = vld [vmem:[%s5093_s7 + $0x70] sm:$0xff]  }
 0x27c   : > { %2520 = vmatprep.subr.bf16.mxu0 %v3770_v19 }
 0x27f   : > { %2521 = vmatpush1.bf16.msra.mxu0 %v3768_v8 }
 0x280   : > { %3365 = vmatprep.subr.bf16.mxu0 %v3772_v47 }
 0x305   : > { %v3310_v24 = vpop.f32.mrb[16].mxu0 }
 0x306   : > { %v3311_v13 = vpop.f32.mrb[17].mxu0 }
 0x307   : > { %v3312_v46 = vadd.f32 %v3311_v13, %v3310_v24  ;;  %v3313_v15 = vpop.f32.mrb[18].mxu0  ;;  %v3796_v24 = vld [vmem:[%s5093_s7 + $0xf0] sm:$0xff]  }
 0x308   : > { %v3314_v43 = vpop.f32.mrb[19].mxu0  ;;  %v3797_v13 = vld [vmem:[%s5093_s7 + $0x30] sm:$0xff]  }
 0x309   : > { %v3315_v18 = vadd.f32 %v3314_v43, %v3313_v15  ;;  %v1939_v12 = vadd.f32 %v3312_v46, %v3075_v17  ;;  %v3798_v46 = vld [vmem:[%s5093_s7 + $0xb0] sm:$0xff]   ;;  %v3799_v15 = vld [vmem:[%s5093_s7 + $0x78] sm:$0xff]  }
 0x30a   : > { %v3800_v43 = vld [vmem:[%s5093_s7 + $0xf8] sm:$0xff]  }
 0x30b   : > { %v3332_v23 = vpop.f32.mrb[16].mxu1  ;;  %v1942_v37 = vadd.f32 %v3315_v18, %v3075_v17  ;;  %v3801_v17 = vld [vmem:[%s5093_s7 + $0x38] sm:$0xff]  }
 0x30c   : > { %v3333_v35 = vpop.f32.mrb[17].mxu1  ;;  %v3802_v18 = vld [vmem:[%s5093_s7 + $0xb8] sm:$0xff]  }
 0x30d   : > { %v3334_v16 = vadd.f32 %v3333_v35, %v3332_v23  ;;  %v3335_v57 = vpop.f32.mrb[18].mxu1  ;;  %v2109_v23 = vlaneseq }
 0x30e   : > { %v3336_v2 = vpop.f32.mrb[19].mxu1 }
 0x30f   : > { %v3337_v6 = vadd.f32 %v3336_v2, %v3335_v57  ;;  %v1980_v22 = vadd.f32 %v3334_v16, %v1939_v12  ;;  %v2110_v35 = vshrl.u32 %v2109_v23, 7  ;;  %v2107_v57 = vld [vmem:[%s5092_s6] sm:$0xf] }
 0x311   : > { %v1983_v60 = vadd.f32 %v3337_v6, %v1942_v37  ;;  %v2111_v12 = vsub.s32 0, %v2110_v35  ;;  %v2119_v16 = vsub.s32 2, %v2110_v35  ;;  %v2115_v2 = vsub.s32 1, %v2110_v35 }
 0x312   : > { %v2123_v37 = vsub.s32 3, %v2110_v35 }
 0x313   : > { %v2112_v6 = vrot.slane %v2107_v57, %v2111_v12 }
 0x314   : > { %v2124_v7 = vrot.slane %v2107_v57, %v2123_v37 }
 0x315   : > { %v2020_v29 = vpop.f32.mrb[20].mxu0 }
 0x316   : > { %v2021_v33 = vadd.f32 %v2020_v29, %v1980_v22  ;;  %v3397_v30 = vpop.f32.mrb[21].mxu0  ;;  %v2120_v22 = vrot.slane %v2107_v57, %v2119_v16 }
 0x317   : > { %v2023_v20 = vpop.f32.mrb[22].mxu0 }
 0x318   : > { %v2027_v61 = vmax.f32 %v2021_v33, 0.0  ;;  %v2024_v36 = vadd.f32 %v2023_v20, %v1983_v60  ;;  %v3398_v55 = vpop.f32.mrb[23].mxu0  ;;  %v2116_v60 = vrot.slane %v2107_v57, %v2115_v2 }
 0x31a   : > { %v2028_v62 = vmax.f32 %v2024_v36, 0.0  ;;  %v2030_v44 = vrot.slane %v2027_v61, 4 }
 0x31c   : > { %v2035_v25 = vrot.slane %v2028_v62, 4 }
 0x31e   : > { %v3602_v32 = vpack.i.bf16 %v2030_v44, %v2035_v25 }
 0x320   : > { %3603 = vrot.lane.b32.xlu0 %v3602_v32, %s3867_s28  ;;  %s3211_s28 = sshll.u32 %s3942_s13, 6  ;;  %s3870_s13 = smov [#allocation2]  }
 0x321   : > { %s5044_s21 = scalar_lea.hbm %s5095_s9, %s3211_s28  ;;  %s3807_s14 = sshll.u32 %s3870_s13, 4  ;;  %s3808_s14 = int_to_ptr.vmem [resolvable:$false] %s3807_s14 }
 0x322   : > { %s3809_s16 = scalar_lea.vmem %s3808_s14, 128  ;;  %p3810_p0 = scmp.lt.s32.totalorder %s5046_s23, %s3808_s14 }
 0x323   : > { %p3811_p1 = scmp.lt.s32.totalorder %s3809_s16, %s3803_s26 }
 0x325   : > { %p3812_p2 = por %p3811_p1, %p3810_p0 }
 0x327   : > { %p3813_p3 = pnand %p3812_p2, %p3806_p13 }
 0x392   : > { %v3604_v0 = vpop.permute.xlu0 %3603 }
 0x393   : > { %v3606_v26 = vunpack.i.h.bf16 %v3604_v0  ;;  %v3605_v5 = vunpack.i.l.bf16 %v3604_v0 }
 0x395   : > { %v2039_v45 = vsel %vm364_vm0, %v2027_v61, %v3606_v26  ;;  %v2040_v28 = vsel %vm364_vm0, %v2028_v62, %v3605_v5 }
 0x396   : > { %v2041_v21 = vpack.c.bf16 %v2039_v45, %v2039_v45  ;;  %v2042_v11 = vpack.c.bf16 %v2040_v28, %v2040_v28 }
 0x398   : > { %2481 = vmatprep.mubr.bf16.mxu1 %v2042_v11  ;;  %2522 = vmatprep.mubr.bf16.mxu0 %v2042_v11  ;;  %v3177_v11 = vld [vmem:[%s5094_s8] ss:$0 sm:$0xff] }
 0x399   : > { %2482 = vmatmul.mubr.bf16.vlgmr.msra.gmra.mrb[20].mxu1 %v2041_v21  ;;  %2523 = vmatmul.mubr.bf16.vlgmr.msra.gmra.mrb[24].mxu0 %v2041_v21 }
 0x39a   : > { %3344 = vmatpush3.bf16.msra.mxu1 %v3773_v48  ;;  %3366 = vmatpush3.bf16.msra.mxu0 %v3774_v54 }
 0x39b   : > { %3345 = vmatprep.subr.bf16.mxu1 %v3775_v63  ;;  %3367 = vmatprep.subr.bf16.mxu0 %v3776_v39 }
 0x39e   : > { %3346 = vmatpush3.bf16.msra.mxu1 %v3777_v49  ;;  %3368 = vmatpush3.bf16.msra.mxu0 %v3778_v27 }
 0x39f   : > { %3347 = vmatprep.subr.bf16.mxu1 %v3779_v34  ;;  %3369 = vmatprep.subr.bf16.mxu0 %v3780_v51 }
 0x3a2   : > { %3348 = vmatpush3.bf16.msra.mxu1 %v3781_v56  ;;  %3370 = vmatpush3.bf16.msra.mxu0 %v3782_v59 }
 0x3a3   : > { %3349 = vmatprep.subr.bf16.mxu1 %v3783_v42  ;;  %3371 = vmatprep.subr.bf16.mxu0 %v3784_v9 }
 0x3a6   : > { %3350 = vmatpush3.bf16.msra.mxu1 %v3785_v41  ;;  %3372 = vmatpush3.bf16.msra.mxu0 %v3786_v14 }
 0x3a7   : > { %3351 = vmatprep.subr.bf16.mxu1 %v3787_v50  ;;  %3373 = vmatprep.subr.bf16.mxu0 %v3788_v4 }
 0x3aa   : > { %3352 = vmatpush3.bf16.msra.mxu1 %v3789_v53  ;;  %3374 = vmatpush3.bf16.msra.mxu0 %v3790_v3 }
 0x3ab   : > { %3353 = vmatprep.subr.bf16.mxu1 %v3791_v10  ;;  %3375 = vmatprep.subr.bf16.mxu0 %v3792_v58 }
 0x3ae   : > { %3354 = vmatpush3.bf16.msra.mxu1 %v3793_v40  ;;  %3376 = vmatpush3.bf16.msra.mxu0 %v3794_v52 }
 0x3af   : > { %3355 = vmatprep.subr.bf16.mxu1 %v3795_v1  ;;  %3377 = vmatprep.subr.bf16.mxu0 %v3796_v24 }
 0x3b2   : > { %3356 = vmatpush3.bf16.msra.mxu1 %v3797_v13  ;;  %3378 = vmatpush3.bf16.msra.mxu0 %v3798_v46 }
 0x3b3   : > { %3357 = vmatprep.subr.bf16.mxu1 %v3799_v15  ;;  %3379 = vmatprep.subr.bf16.mxu0 %v3800_v43 }
 0x3b6   : > { %3358 = vmatpush3.bf16.msra.mxu1 %v3801_v17  ;;  %3380 = vmatpush3.bf16.msra.mxu0 %v3802_v18 }
 0x46c   : > { %v2483_v19 = vpop.f32.mrb[20].mxu1  ;;  %v2524_v29 = vpop.f32.mrb[24].mxu0 }
 0x46d   : > { %v2484_v31 = vadd.f32 %v2483_v19, %v2112_v6  ;;  %v2525_v8 = vadd.f32 %v2524_v29, %v2120_v22  ;;  %v2485_v33 = vpop.f32.mrb[21].mxu1  ;;  %v2526_v30 = vpop.f32.mrb[25].mxu0 }
 0x46e   : > { %v2486_v20 = vadd.f32 %v2485_v33, %v2116_v60  ;;  %v2527_v61 = vadd.f32 %v2526_v30, %v2124_v7  ;;  %v2487_v36 = vpop.f32.mrb[22].mxu1  ;;  %v2528_v55 = vpop.f32.mrb[26].mxu0 }
 0x46f   : > { %v2531_v38 = vmax.f32 %v2484_v31, 0.0  ;;  %v2533_v47 = vmax.f32 %v2525_v8, 0.0  ;;  %v2488_v62 = vpop.f32.mrb[23].mxu1  ;;  %v2529_v44 = vpop.f32.mrb[27].mxu0 }
 0x470   : > { %v2532_v25 = vmax.f32 %v2486_v20, 0.0  ;;  %v2534_v32 = vmax.f32 %v2527_v61, 0.0 }
 0x471   : > { %v2535_v5 = vpack.c.bf16 %v2531_v38, %v2531_v38  ;;  %v2537_v45 = vpack.c.bf16 %v2533_v47, %v2533_v47 }
 0x472   : > { %v2536_v0 = vpack.c.bf16 %v2532_v25, %v2532_v25  ;;  %v2538_v26 = vpack.c.bf16 %v2534_v32, %v2534_v32 }
 0x474   : > { %2834 = vmatprep.mubr.bf16.mxu1 %v2536_v0  ;;  %2874 = vmatprep.mubr.bf16.mxu0 %v2538_v26 }
 0x475   : > { %2835 = vmatmul.mubr.bf16.vlgmr.msra.gmra.mrb[24].mxu1 %v2535_v5  ;;  %2875 = vmatmul.mubr.bf16.vlgmr.msra.gmra.mrb[28].mxu0 %v2537_v45 }
 0x548   : > { %v3359_v28 = vpop.f32.mrb[24].mxu1  ;;  %v3381_v21 = vpop.f32.mrb[28].mxu0 }
 0x549   : > { %v3360_v48 = vpop.f32.mrb[25].mxu1  ;;  %v3382_v54 = vpop.f32.mrb[29].mxu0 }
 0x54a   : > { %v3361_v63 = vadd.f32 %v3360_v48, %v3359_v28  ;;  %v3383_v39 = vadd.f32 %v3382_v54, %v3381_v21  ;;  %v3362_v49 = vpop.f32.mrb[26].mxu1  ;;  %v3384_v27 = vpop.f32.mrb[30].mxu0 }
 0x54b   : > { %v3363_v34 = vpop.f32.mrb[27].mxu1  ;;  %v3385_v51 = vpop.f32.mrb[31].mxu0 }
 0x54c   : > { %v2837_v56 = vadd.f32 %v3361_v63, %v3177_v11 }
 0x54e   : > { %v2877_v59 = vadd.f32 %v3383_v39, %v2837_v56 }
 0x550   : > { %2883 = vst.msk [vmem:[%s328_s22] sm:$0xf] %vm2882_vm9, %v2877_v59 }
 0x551   : > { %3816 = shalt.err (!%p3813_p3)
}
 0x552   : > { %s3817_s29 = scalar_lea.hbm %s5044_s21, 64  ;;  %s3821_s22 = scalar_lea.hbm %s5095_s9, 128 }
 0x553   : > { %p3818_p4 = scmp.ne.s32.totalorder %s5044_s21, %s3817_s29  ;;  %p3822_p9 = scmp.lt.u32.totalorder %s5044_s21, %s5095_s9 }
 0x554   : > { %p3823_p10 = scmp.lt.u32.totalorder %s3821_s22, %s3817_s29  ;;  %p3825_p12 = scmp.lt.u32.totalorder %s3817_s29, %s5044_s21 }
 0x555   : > { %p3819_p7 = pnand %p3818_p4, %p3959_p5 }
 0x556   : > { %p3824_p11 = por %p3823_p10, %p3822_p9 }
 0x557   : > { %p3820_p8 = pneg %p3819_p7 }
 0x558   : > { %p3826_p13 = por %p3825_p12, %p3824_p11 }
 0x55a   : > { %p3827_p0 = pnand %p3826_p13, %p3820_p8 }
 0x55c   : > { %3830 = shalt.err (!%p3827_p0)
}
 0x55d   : > { %3400 = dma.vmem_to_hbm [thread:$0]  (%p3959_p5), %s5046_s23, 64, %s5044_s21, %s2885_s27  }
 0x55e PF: > { %p3406_p1 = scmp.ge.s32.totalorder %s3865_s12, 2  ;;  %s2910_s26 = sand.u32 1, %s3853_s30  }
 0x55f   : > { %s2911_s13 = scalar_lea.sflag [#allocation3], %s2910_s26 }
 0x560   : > { %p3403_p2 = pnand %p3406_p1, %p3963_p6 }
 0x562   : > { %3848 = dma.done.wait (!%p3403_p2), %s2911_s13, 64  }
 0x563   : > { %3850 = vsyncadd (!%p3403_p2), %s2911_s13, 4294967232  ;;  %p19_p3 = scmp.ge.s32.totalorder %s3946_s15, 4   ;;  %s5115_s30 = smov %s3857_s10 }
 0x564   : > { %s5116_s10 = smov %s3861_s11  ;;  %s5117_s11 = smov %s3957_s18 }
 0x565   : > { %s5118_s12 = smov %s3946_s15  ;;  %21 = sbr.rel (!%p19_p3) target bundleno = 3 (0x3), region = 130 }
 0x56c   :  { %2916 = vsyncpa [#allocation3], 1 }
 0x56d   :  { %2918 = vsyncpa [#allocation3 + $0x1], 1 }

</bundles_post_ra>
